<compile_context>
chip_gen: v5e
topology: v5e:2x2
jax: 0.10.0
libtpu: 0.0.40
codegen_flags: <defaults>
</compile_context>

<pallas_src>
import jax
import jax.numpy as jnp
from jax import lax
from jax.experimental import pallas as pl
from jax.experimental.pallas import tpu as pltpu


def make_mamba_block_fn(N, C, H, W, d_state=16, d_conv=4, expand=2):
    assert C % 4 == 0
    D = C // 4                       # per-chunk model dim (embed_dim = hidden_dim // 4)
    d_inner = expand * D
    dt_rank = max(1, -(-D // 16))
    Bp = 4 * N                       # 4 chunks folded into the batch (shared weights)
    L = H * W                        # flattened spatial sequence length
    assert L % 8 == 0

    # group sequences so that each grid step works on ~128 lanes of d_inner
    G = max(1, min(Bp, 128 // max(1, d_inner)))
    if Bp % G != 0:
        G = Bp
    Ng = Bp // G                     # "parallel" grid steps (one per group)
    GD = G * D                       # model-dim lanes per group
    GI = G * d_inner                 # inner-dim lanes per group
    GS = G * d_state                 # compact B/C lanes per group
    PAD = 8                          # aligned zero-pad rows for the causal conv
    UNROLL = 8                       # scan unroll factor / y store batch

    # ------------------------------------------------------------------ kernel
    def kernel(x_ref, mmean_ref, win_ref, bin_ref, cw_ref, cb_ref,
               wdt_ref, bdt_ref, wbc_ref, e_ref, abc_ref, dskip_ref, wout_ref,
               out_ref,
               xpad_ref, dA_ref, bF_ref, cF_ref, dtx_ref, y_ref):
        x_tm = x_ref[...]                                          # (L, GD)

        # ---- LayerNorm stats via block-diagonal averaging matmuls -----------
        # centered variance (no E[x^2]-mean^2 cancellation); affine folded into
        # the in_proj weights host-side.
        mean = jnp.dot(x_tm, mmean_ref[...], preferred_element_type=jnp.float32)
        cent = x_tm - mean
        var = jnp.dot(cent * cent, mmean_ref[...],
                      preferred_element_type=jnp.float32)
        xhat = cent * lax.rsqrt(var + 1e-6)

        # ---- in_proj (LN gamma/beta folded in; x-part / z-part separated) ---
        xz = (jnp.dot(xhat, win_ref[...], preferred_element_type=jnp.float32)
              + bin_ref[...])
        x_in = xz[:, :GI]                                          # (L, GI)
        z = xz[:, GI:]                                             # (L, GI)

        # ---- causal depthwise conv1d via aligned zero-padded scratch --------
        xpad_ref[pl.ds(0, PAD), :] = jnp.zeros((PAD, GI), jnp.float32)
        xpad_ref[pl.ds(PAD, L), :] = x_in
        acc = x_in * cw_ref[pl.ds(0, 1), :]
        for m in range(1, d_conv):
            acc = acc + xpad_ref[pl.ds(PAD - m, L), :] * cw_ref[pl.ds(m, 1), :]
        x_conv = acc + cb_ref[...]
        x_conv = x_conv * (1.0 / (1.0 + jnp.exp(-x_conv)))         # SiLU (exact)

        # ---- dt path (x_proj dt-rows folded with dt_proj host-side) ---------
        dt_raw = (jnp.dot(x_conv, wdt_ref[...],
                          preferred_element_type=jnp.float32) + bdt_ref[...])
        dt = jnp.maximum(dt_raw, 0.0) + jnp.log(1.0 + jnp.exp(-jnp.abs(dt_raw)))

        # ---- compact B/C projection, expanded with one shared 0/1 matrix ----
        bc = jnp.dot(x_conv, wbc_ref[...], preferred_element_type=jnp.float32)
        e32 = e_ref[...].astype(jnp.float32)                       # exact 0/1
        bF = jnp.dot(bc[:, :GS], e32, preferred_element_type=jnp.float32)
        cF = jnp.dot(bc[:, GS:], e32, preferred_element_type=jnp.float32)

        # ---- hoist dense scan inputs (dBx is NOT materialized) --------------
        dA_ref[...] = jnp.exp(dt[:, None, :] * abc_ref[...][None, :, :])
        bF_ref[...] = bF.reshape(L, d_state, GI)
        cF_ref[...] = cF.reshape(L, d_state, GI)
        dtx_ref[...] = dt * x_conv

        # ---- selective scan: unrolled by 8, y stored one full tile at a time
        def blk_body(blk, h):
            t0 = pl.multiple_of(blk * UNROLL, UNROLL)
            dA_blk = dA_ref[pl.ds(t0, UNROLL), :, :]
            bF_blk = bF_ref[pl.ds(t0, UNROLL), :, :]
            cF_blk = cF_ref[pl.ds(t0, UNROLL), :, :]
            dtx_blk = dtx_ref[pl.ds(t0, UNROLL), :]
            rows = []
            for j in range(UNROLL):
                h = dA_blk[j] * h + dtx_blk[j:j + 1, :] * bF_blk[j]
                rows.append(jnp.sum(h * cF_blk[j], axis=0, keepdims=True))
            y_ref[pl.ds(t0, UNROLL), :] = jnp.concatenate(rows, axis=0)
            return h

        _ = lax.fori_loop(0, L // UNROLL, blk_body,
                          jnp.zeros((d_state, GI), jnp.float32))

        # ---- skip, gate (EUP reciprocal), out_proj, pre-norm residual -------
        y = y_ref[...] + dskip_ref[...] * x_conv
        gate = z * pl.reciprocal(1.0 + jnp.exp(-z), approx=True)   # SiLU(z)
        out = jnp.dot(y * gate, wout_ref[...],
                      preferred_element_type=jnp.float32)
        out_ref[...] = out + x_tm

    # ------------------------------------------------------------- host folding
    def const_spec(shape):
        nd = len(shape)
        return pl.BlockSpec(shape, lambda g, nd=nd: (0,) * nd)

    def block_diag_g(M):
        # per-sequence map M (in_f, out_f) replicated G times on the diagonal
        in_f, out_f = M.shape
        eye = jnp.eye(G, dtype=M.dtype)
        return (eye[:, None, :, None] * M[None, :, None, :]).reshape(
            G * in_f, G * out_f)

    def compact_proj(Wr):
        # Wr (d_state, d_inner) -> (G*d_inner, d_state*G); output col = s*G + b
        eye = jnp.eye(G, dtype=Wr.dtype)
        t = jnp.einsum('si,bc->bisc', Wr, eye)
        return t.reshape(G * d_inner, d_state * G)

    @jax.jit
    def fn(x, params):
        (ln_g, ln_b, w_in, conv_w, conv_b, w_xproj, w_dtproj, b_dt,
         a_log, d_skip, w_out) = params

        # chunk(dim=1) + shared weights == fold the 4 chunks into the batch;
        # time-major lane-dense layout, split into Ng lane groups for the grid.
        x_tm = x.reshape(N, 4, D, L).transpose(3, 0, 1, 2).reshape(L, Bp * D)
        x_g = x_tm.reshape(L, Ng, GD).transpose(1, 0, 2)           # (Ng, L, GD)

        m_mean = block_diag_g(jnp.full((D, D), 1.0 / D, jnp.float32))
        # LayerNorm affine folded into in_proj
        wx = ln_g[:, None] * w_in[:d_inner].T                      # (D, d_inner)
        wz = ln_g[:, None] * w_in[d_inner:].T
        w_in_bd = jnp.concatenate([block_diag_g(wx), block_diag_g(wz)], axis=1)
        b_in = jnp.concatenate([jnp.tile(ln_b @ w_in[:d_inner].T, G),
                                jnp.tile(ln_b @ w_in[d_inner:].T, G)])[None, :]
        cw_t = jnp.stack([jnp.tile(conv_w[:, d_conv - 1 - m], G)
                          for m in range(d_conv)])
        cb_t = jnp.tile(conv_b, G)[None, :]
        w_dt_bd = block_diag_g((w_dtproj @ w_xproj[:dt_rank]).T)
        bdt_t = jnp.tile(b_dt, G)[None, :]
        wbc = jnp.concatenate(
            [compact_proj(w_xproj[dt_rank:dt_rank + d_state]),
             compact_proj(w_xproj[dt_rank + d_state:])], axis=1)   # (GI, 2*GS)
        # shared 0/1 expansion (s,b) -> (s,(b,i)); exact in bf16
        e_mat = (jnp.eye(d_state, dtype=jnp.float32)[:, None, :, None, None]
                 * jnp.eye(G, dtype=jnp.float32)[None, :, None, :, None]
                 * jnp.ones((1, 1, 1, 1, d_inner), jnp.float32))
        e_mat = e_mat.reshape(GS, d_state * GI).astype(jnp.bfloat16)
        a_bc = jnp.tile((-jnp.exp(a_log)).T, (1, G))               # (d_state, GI)
        dskip_t = jnp.tile(d_skip, G)[None, :]
        w_out_bd = block_diag_g(w_out.T)                           # (GI, GD)

        out_g = pl.pallas_call(
            kernel,
            out_shape=jax.ShapeDtypeStruct((Ng, L, GD), jnp.float32),
            grid_spec=pltpu.PrefetchScalarGridSpec(
                num_scalar_prefetch=0,
                grid=(Ng,),
                in_specs=[
                    pl.BlockSpec((None, L, GD), lambda g: (g, 0, 0)),
                    const_spec((GD, GD)),
                    const_spec((GD, 2 * GI)), const_spec((1, 2 * GI)),
                    const_spec((d_conv, GI)), const_spec((1, GI)),
                    const_spec((GI, GI)), const_spec((1, GI)),
                    const_spec((GI, 2 * GS)),
                    const_spec((GS, d_state * GI)),
                    const_spec((d_state, GI)),
                    const_spec((1, GI)),
                    const_spec((GI, GD)),
                ],
                out_specs=pl.BlockSpec((None, L, GD), lambda g: (g, 0, 0)),
                scratch_shapes=[
                    pltpu.VMEM((PAD + L, GI), jnp.float32),        # padded conv input
                    pltpu.VMEM((L, d_state, GI), jnp.float32),     # exp(dt*A)
                    pltpu.VMEM((L, d_state, GI), jnp.float32),     # B factors
                    pltpu.VMEM((L, d_state, GI), jnp.float32),     # C factors
                    pltpu.VMEM((L, GI), jnp.float32),              # dt * x_conv
                    pltpu.VMEM((L, GI), jnp.float32),              # scan outputs
                ],
            ),
            compiler_params=pltpu.CompilerParams(
                dimension_semantics=("parallel",),
                vmem_limit_bytes=32 * 1024 * 1024),
        )(x_g, m_mean, w_in_bd, b_in, cw_t, cb_t, w_dt_bd, bdt_t,
          wbc, e_mat, a_bc, dskip_t, w_out_bd)

        out_tm = out_g.transpose(1, 0, 2).reshape(L, Bp * D)
        return (out_tm.reshape(L, N, 4, D).transpose(1, 2, 3, 0)
                .reshape(N, C, H, W))

    return fn


def init_params(key, d_model, d_state=16, d_conv=4, expand=2):
    """Deterministic synthetic Mamba parameters (natural, unfolded form)."""
    d_inner = expand * d_model
    dt_rank = max(1, -(-d_model // 16))
    ks = jax.random.split(key, 10)
    ln_g = 1.0 + 0.1 * jax.random.normal(ks[0], (d_model,), jnp.float32)
    ln_b = 0.1 * jax.random.normal(ks[1], (d_model,), jnp.float32)
    w_in = 0.3 * jax.random.normal(ks[2], (2 * d_inner, d_model), jnp.float32)
    conv_w = 0.3 * jax.random.normal(ks[3], (d_inner, d_conv), jnp.float32)
    conv_b = 0.1 * jax.random.normal(ks[4], (d_inner,), jnp.float32)
    w_xproj = 0.3 * jax.random.normal(
        ks[5], (dt_rank + 2 * d_state, d_inner), jnp.float32)
    w_dtproj = 0.5 * jax.random.normal(ks[6], (d_inner, dt_rank), jnp.float32)
    b_dt = 0.5 + 0.1 * jax.random.normal(ks[7], (d_inner,), jnp.float32)
    a_log = jnp.log(jnp.broadcast_to(
        jnp.arange(1, d_state + 1, dtype=jnp.float32), (d_inner, d_state)))
    d_skip = 1.0 + 0.1 * jax.random.normal(ks[8], (d_inner,), jnp.float32)
    w_out = 0.3 * jax.random.normal(ks[9], (d_model, d_inner), jnp.float32)
    return (ln_g, ln_b, w_in, conv_w, conv_b, w_xproj, w_dtproj, b_dt,
            a_log, d_skip, w_out)


def reference(x, params, d_state=16, d_conv=4, expand=2):
    """Pure-JAX reference (chunk -> shared pre-norm Mamba layer -> concat)."""
    (ln_g, ln_b, w_in, conv_w, conv_b, w_xproj, w_dtproj, b_dt,
     a_log, d_skip, w_out) = params
    N, C, H, W = x.shape
    D = C // 4
    d_inner = expand * D
    dt_rank = max(1, -(-D // 16))
    L = H * W
    hp = jax.lax.Precision.HIGHEST

    xs = x.reshape(N, 4, D, L).transpose(0, 1, 3, 2).reshape(N * 4, L, D)

    mu = xs.mean(-1, keepdims=True)
    var = ((xs - mu) ** 2).mean(-1, keepdims=True)
    xn = (xs - mu) / jnp.sqrt(var + 1e-6) * ln_g + ln_b

    xz = jnp.einsum('bld,ed->ble', xn, w_in, precision=hp)
    x_in, z = xz[..., :d_inner], xz[..., d_inner:]

    xpad = jnp.pad(x_in, ((0, 0), (d_conv - 1, 0), (0, 0)))
    xc = sum(xpad[:, j:j + L, :] * conv_w[:, j][None, None, :]
             for j in range(d_conv)) + conv_b
    xc = xc * jax.nn.sigmoid(xc)

    xdbl = jnp.einsum('bli,ei->ble', xc, w_xproj, precision=hp)
    dtr = xdbl[..., :dt_rank]
    Bm = xdbl[..., dt_rank:dt_rank + d_state]
    Cm = xdbl[..., dt_rank + d_state:]
    dt = jax.nn.softplus(
        jnp.einsum('blr,ir->bli', dtr, w_dtproj, precision=hp) + b_dt)
    A = -jnp.exp(a_log)
    dA = jnp.exp(dt[..., None] * A[None, None, :, :])
    dBx = (dt * xc)[..., None] * Bm[..., None, :]

    def step(h, inp):
        dA_t, dBx_t, C_t = inp
        h = dA_t * h + dBx_t
        y = jnp.einsum('bis,bs->bi', h, C_t, precision=hp)
        return h, y

    h0 = jnp.zeros((N * 4, d_inner, d_state), jnp.float32)
    _, ys = lax.scan(step, h0, (dA.transpose(1, 0, 2, 3),
                                dBx.transpose(1, 0, 2, 3),
                                Cm.transpose(1, 0, 2)))
    y = ys.transpose(1, 0, 2) + d_skip * xc
    y = y * (z * jax.nn.sigmoid(z))
    out = jnp.einsum('bli,di->bld', y, w_out, precision=hp) + xs
    return out.reshape(N, 4, L, D).transpose(0, 1, 3, 2).reshape(N, C, H, W)


if __name__ == "__main__":
    # MambaBlock(hidden_dim=32) on a (N, C, H, W) feature map; embed_dim = 8.
    # N=4 chosen so each grid step is lane-dense (128 inner lanes) and the
    # "parallel" group axis has 2 steps (keeps both v7x TensorCores busy).
    N, C, H, W = 4, 32, 8, 8
    d_state, d_conv, expand = 16, 4, 2

    key = jax.random.PRNGKey(0)
    kx, kp = jax.random.split(key)
    x = jax.random.normal(kx, (N, C, H, W), jnp.float32)
    params = init_params(kp, C // 4, d_state, d_conv, expand)

    fn = make_mamba_block_fn(N, C, H, W, d_state, d_conv, expand)
    out = jax.block_until_ready(fn(x, params))
    ref = jax.block_until_ready(reference(x, params, d_state, d_conv, expand))

    assert out.shape == (N, C, H, W)
    max_err = float(jnp.max(jnp.abs(out - ref)))
    assert jnp.allclose(out, ref, atol=5e-3, rtol=5e-3), max_err
    print("KERNEL_OK")
</pallas_src>

<mosaic_0001>
module attributes {stable_mosaic.version = 11 : i64} {
  func.func @kernel(%arg0: i32, %arg1: memref<1x64x64xf32, #tpu.memory_space<vmem>>, %arg2: memref<64x64xf32, #tpu.memory_space<vmem>>, %arg3: memref<64x256xf32, #tpu.memory_space<vmem>>, %arg4: memref<1x256xf32, #tpu.memory_space<vmem>>, %arg5: memref<4x128xf32, #tpu.memory_space<vmem>>, %arg6: memref<1x128xf32, #tpu.memory_space<vmem>>, %arg7: memref<128x128xf32, #tpu.memory_space<vmem>>, %arg8: memref<1x128xf32, #tpu.memory_space<vmem>>, %arg9: memref<128x256xf32, #tpu.memory_space<vmem>>, %arg10: memref<128x2048xbf16, #tpu.memory_space<vmem>>, %arg11: memref<16x128xf32, #tpu.memory_space<vmem>>, %arg12: memref<1x128xf32, #tpu.memory_space<vmem>>, %arg13: memref<128x64xf32, #tpu.memory_space<vmem>>, %arg14: memref<1x64x64xf32, #tpu.memory_space<vmem>>, %arg15: memref<72x128xf32, #tpu.memory_space<vmem>>, %arg16: memref<64x16x128xf32, #tpu.memory_space<vmem>>, %arg17: memref<64x16x128xf32, #tpu.memory_space<vmem>>, %arg18: memref<64x16x128xf32, #tpu.memory_space<vmem>>, %arg19: memref<64x128xf32, #tpu.memory_space<vmem>>, %arg20: memref<64x128xf32, #tpu.memory_space<vmem>>) attributes {dimension_semantics = [#tpu.dimension_semantics<parallel>], iteration_bounds = array<i64: 2>, scalar_prefetch = 0 : i64, scratch_operands = 6 : i64, tpu.core_type = #tpu.core_type<tc>, window_params = [{transform_indices = @transform_0, window_bounds = array<i64: 1, 64, 64>}, {pipeline_mode = #tpu.pipeline_mode<synchronous>, transform_indices = @transform_1, window_bounds = array<i64: 64, 64>}, {pipeline_mode = #tpu.pipeline_mode<synchronous>, transform_indices = @transform_2, window_bounds = array<i64: 64, 256>}, {pipeline_mode = #tpu.pipeline_mode<synchronous>, transform_indices = @transform_3, window_bounds = array<i64: 1, 256>}, {pipeline_mode = #tpu.pipeline_mode<synchronous>, transform_indices = @transform_4, window_bounds = array<i64: 4, 128>}, {pipeline_mode = #tpu.pipeline_mode<synchronous>, transform_indices = @transform_5, window_bounds = array<i64: 1, 128>}, {pipeline_mode = #tpu.pipeline_mode<synchronous>, transform_indices = @transform_6, window_bounds = array<i64: 128, 128>}, {pipeline_mode = #tpu.pipeline_mode<synchronous>, transform_indices = @transform_7, window_bounds = array<i64: 1, 128>}, {pipeline_mode = #tpu.pipeline_mode<synchronous>, transform_indices = @transform_8, window_bounds = array<i64: 128, 256>}, {pipeline_mode = #tpu.pipeline_mode<synchronous>, transform_indices = @transform_9, window_bounds = array<i64: 128, 2048>}, {pipeline_mode = #tpu.pipeline_mode<synchronous>, transform_indices = @transform_10, window_bounds = array<i64: 16, 128>}, {pipeline_mode = #tpu.pipeline_mode<synchronous>, transform_indices = @transform_11, window_bounds = array<i64: 1, 128>}, {pipeline_mode = #tpu.pipeline_mode<synchronous>, transform_indices = @transform_12, window_bounds = array<i64: 128, 64>}, {transform_indices = @transform_13, window_bounds = array<i64: 1, 64, 64>}]} {
    %c0 = arith.constant 0 : index
    %c0_0 = arith.constant 0 : index
    %c0_1 = arith.constant 0 : index
    %0 = vector.load %arg1[%c0, %c0_0, %c0_1] : memref<1x64x64xf32, #tpu.memory_space<vmem>>, vector<1x64x64xf32>
    %1 = vector.shape_cast %0 : vector<1x64x64xf32> to vector<64x64xf32>
    %c0_2 = arith.constant 0 : index
    %c0_3 = arith.constant 0 : index
    %2 = vector.load %arg2[%c0_2, %c0_3] : memref<64x64xf32, #tpu.memory_space<vmem>>, vector<64x64xf32>
    %cst = arith.constant dense<0.000000e+00> : vector<64x64xf32>
    %3 = tpu.matmul %1, %2, %cst {dimension_numbers = #tpu.dot_dimension_numbers<[1], [0], [0], [1], [0, 0, 1, 1], [], []>} : vector<64x64xf32>, vector<64x64xf32>, vector<64x64xf32> -> vector<64x64xf32>
    %4 = arith.subf %1, %3 : vector<64x64xf32>
    %5 = arith.mulf %4, %4 : vector<64x64xf32>
    %c0_4 = arith.constant 0 : index
    %c0_5 = arith.constant 0 : index
    %6 = vector.load %arg2[%c0_4, %c0_5] : memref<64x64xf32, #tpu.memory_space<vmem>>, vector<64x64xf32>
    %cst_6 = arith.constant dense<0.000000e+00> : vector<64x64xf32>
    %7 = tpu.matmul %5, %6, %cst_6 {dimension_numbers = #tpu.dot_dimension_numbers<[1], [0], [0], [1], [0, 0, 1, 1], [], []>} : vector<64x64xf32>, vector<64x64xf32>, vector<64x64xf32> -> vector<64x64xf32>
    %cst_7 = arith.constant 9.99999997E-7 : f32
    %8 = vector.broadcast %cst_7 : f32 to vector<64x64xf32>
    %9 = arith.addf %7, %8 : vector<64x64xf32>
    %10 = math.rsqrt %9 : vector<64x64xf32>
    %11 = arith.mulf %4, %10 : vector<64x64xf32>
    %c0_8 = arith.constant 0 : index
    %c0_9 = arith.constant 0 : index
    %12 = vector.load %arg3[%c0_8, %c0_9] : memref<64x256xf32, #tpu.memory_space<vmem>>, vector<64x256xf32>
    %cst_10 = arith.constant dense<0.000000e+00> : vector<64x256xf32>
    %13 = tpu.matmul %11, %12, %cst_10 {dimension_numbers = #tpu.dot_dimension_numbers<[1], [0], [0], [1], [0, 0, 1, 1], [], []>} : vector<64x64xf32>, vector<64x256xf32>, vector<64x256xf32> -> vector<64x256xf32>
    %c0_11 = arith.constant 0 : index
    %c0_12 = arith.constant 0 : index
    %14 = vector.load %arg4[%c0_11, %c0_12] : memref<1x256xf32, #tpu.memory_space<vmem>>, vector<1x256xf32>
    %15 = vector.broadcast %14 : vector<1x256xf32> to vector<64x256xf32>
    %16 = arith.addf %13, %15 : vector<64x256xf32>
    %17 = vector.extract_strided_slice %16 {offsets = [0, 0], sizes = [64, 128], strides = [1, 1]} : vector<64x256xf32> to vector<64x128xf32>
    %18 = vector.extract_strided_slice %16 {offsets = [0, 128], sizes = [64, 128], strides = [1, 1]} : vector<64x256xf32> to vector<64x128xf32>
    %cst_13 = arith.constant 0.000000e+00 : f32
    %19 = vector.broadcast %cst_13 : f32 to vector<8x128xf32>
    %c0_14 = arith.constant 0 : index
    %c0_15 = arith.constant 0 : index
    %20 = vector.load %arg15[%c0_14, %c0_15] : memref<72x128xf32, #tpu.memory_space<vmem>>, vector<8x128xf32>
    tpu.vector_store %arg15[%c0_14, %c0_15], %19 {strides = array<i32>} : memref<72x128xf32, #tpu.memory_space<vmem>>, vector<8x128xf32>,
    %c8 = arith.constant 8 : index
    %c0_16 = arith.constant 0 : index
    %21 = vector.load %arg15[%c8, %c0_16] : memref<72x128xf32, #tpu.memory_space<vmem>>, vector<64x128xf32>
    tpu.vector_store %arg15[%c8, %c0_16], %17 {strides = array<i32>} : memref<72x128xf32, #tpu.memory_space<vmem>>, vector<64x128xf32>,
    %c0_17 = arith.constant 0 : index
    %c0_18 = arith.constant 0 : index
    %22 = vector.load %arg5[%c0_17, %c0_18] : memref<4x128xf32, #tpu.memory_space<vmem>>, vector<1x128xf32>
    %23 = vector.broadcast %22 : vector<1x128xf32> to vector<64x128xf32>
    %24 = arith.mulf %17, %23 : vector<64x128xf32>
    %c7 = arith.constant 7 : index
    %c0_19 = arith.constant 0 : index
    %25 = vector.load %arg15[%c7, %c0_19] : memref<72x128xf32, #tpu.memory_space<vmem>>, vector<64x128xf32>
    %c1 = arith.constant 1 : index
    %c0_20 = arith.constant 0 : index
    %26 = vector.load %arg5[%c1, %c0_20] : memref<4x128xf32, #tpu.memory_space<vmem>>, vector<1x128xf32>
    %27 = vector.broadcast %26 : vector<1x128xf32> to vector<64x128xf32>
    %28 = arith.mulf %25, %27 : vector<64x128xf32>
    %29 = arith.addf %24, %28 : vector<64x128xf32>
    %c6 = arith.constant 6 : index
    %c0_21 = arith.constant 0 : index
    %30 = vector.load %arg15[%c6, %c0_21] : memref<72x128xf32, #tpu.memory_space<vmem>>, vector<64x128xf32>
    %c2 = arith.constant 2 : index
    %c0_22 = arith.constant 0 : index
    %31 = vector.load %arg5[%c2, %c0_22] : memref<4x128xf32, #tpu.memory_space<vmem>>, vector<1x128xf32>
    %32 = vector.broadcast %31 : vector<1x128xf32> to vector<64x128xf32>
    %33 = arith.mulf %30, %32 : vector<64x128xf32>
    %34 = arith.addf %29, %33 : vector<64x128xf32>
    %c5 = arith.constant 5 : index
    %c0_23 = arith.constant 0 : index
    %35 = vector.load %arg15[%c5, %c0_23] : memref<72x128xf32, #tpu.memory_space<vmem>>, vector<64x128xf32>
    %c3 = arith.constant 3 : index
    %c0_24 = arith.constant 0 : index
    %36 = vector.load %arg5[%c3, %c0_24] : memref<4x128xf32, #tpu.memory_space<vmem>>, vector<1x128xf32>
    %37 = vector.broadcast %36 : vector<1x128xf32> to vector<64x128xf32>
    %38 = arith.mulf %35, %37 : vector<64x128xf32>
    %39 = arith.addf %34, %38 : vector<64x128xf32>
    %c0_25 = arith.constant 0 : index
    %c0_26 = arith.constant 0 : index
    %40 = vector.load %arg6[%c0_25, %c0_26] : memref<1x128xf32, #tpu.memory_space<vmem>>, vector<1x128xf32>
    %41 = vector.broadcast %40 : vector<1x128xf32> to vector<64x128xf32>
    %42 = arith.addf %39, %41 : vector<64x128xf32>
    %cst_27 = arith.constant 0.000000e+00 : f32
    %43 = vector.broadcast %cst_27 : f32 to vector<64x128xf32>
    %44 = arith.subf %43, %42 : vector<64x128xf32>
    %45 = math.exp %44 : vector<64x128xf32>
    %cst_28 = arith.constant 1.000000e+00 : f32
    %46 = vector.broadcast %cst_28 : f32 to vector<64x128xf32>
    %47 = arith.addf %46, %45 : vector<64x128xf32>
    %cst_29 = arith.constant 1.000000e+00 : f32
    %48 = vector.broadcast %cst_29 : f32 to vector<64x128xf32>
    %49 = arith.divf %48, %47 : vector<64x128xf32>
    %50 = arith.mulf %42, %49 : vector<64x128xf32>
    %c0_30 = arith.constant 0 : index
    %c0_31 = arith.constant 0 : index
    %51 = vector.load %arg7[%c0_30, %c0_31] : memref<128x128xf32, #tpu.memory_space<vmem>>, vector<128x128xf32>
    %cst_32 = arith.constant dense<0.000000e+00> : vector<64x128xf32>
    %52 = tpu.matmul %50, %51, %cst_32 {dimension_numbers = #tpu.dot_dimension_numbers<[1], [0], [0], [1], [0, 0, 1, 1], [], []>} : vector<64x128xf32>, vector<128x128xf32>, vector<64x128xf32> -> vector<64x128xf32>
    %c0_33 = arith.constant 0 : index
    %c0_34 = arith.constant 0 : index
    %53 = vector.load %arg8[%c0_33, %c0_34] : memref<1x128xf32, #tpu.memory_space<vmem>>, vector<1x128xf32>
    %54 = vector.broadcast %53 : vector<1x128xf32> to vector<64x128xf32>
    %55 = arith.addf %52, %54 : vector<64x128xf32>
    %cst_35 = arith.constant 0.000000e+00 : f32
    %56 = vector.broadcast %cst_35 : f32 to vector<64x128xf32>
    %57 = arith.maximumf %55, %56 : vector<64x128xf32>
    %58 = math.absf %55 : vector<64x128xf32>
    %cst_36 = arith.constant 0.000000e+00 : f32
    %59 = vector.broadcast %cst_36 : f32 to vector<64x128xf32>
    %60 = arith.subf %59, %58 : vector<64x128xf32>
    %61 = math.exp %60 : vector<64x128xf32>
    %cst_37 = arith.constant 1.000000e+00 : f32
    %62 = vector.broadcast %cst_37 : f32 to vector<64x128xf32>
    %63 = arith.addf %62, %61 : vector<64x128xf32>
    %64 = math.log %63 : vector<64x128xf32>
    %65 = arith.addf %57, %64 : vector<64x128xf32>
    %c0_38 = arith.constant 0 : index
    %c0_39 = arith.constant 0 : index
    %66 = vector.load %arg9[%c0_38, %c0_39] : memref<128x256xf32, #tpu.memory_space<vmem>>, vector<128x256xf32>
    %cst_40 = arith.constant dense<0.000000e+00> : vector<64x256xf32>
    %67 = tpu.matmul %50, %66, %cst_40 {dimension_numbers = #tpu.dot_dimension_numbers<[1], [0], [0], [1], [0, 0, 1, 1], [], []>} : vector<64x128xf32>, vector<128x256xf32>, vector<64x256xf32> -> vector<64x256xf32>
    %c0_41 = arith.constant 0 : index
    %c0_42 = arith.constant 0 : index
    %68 = vector.load %arg10[%c0_41, %c0_42] : memref<128x2048xbf16, #tpu.memory_space<vmem>>, vector<128x2048xbf16>
    %69 = arith.extf %68 : vector<128x2048xbf16> to vector<128x2048xf32>
    %70 = vector.extract_strided_slice %67 {offsets = [0, 0], sizes = [64, 128], strides = [1, 1]} : vector<64x256xf32> to vector<64x128xf32>
    %cst_43 = arith.constant dense<0.000000e+00> : vector<64x2048xf32>
    %71 = tpu.matmul %70, %69, %cst_43 {dimension_numbers = #tpu.dot_dimension_numbers<[1], [0], [0], [1], [0, 0, 1, 1], [], []>} : vector<64x128xf32>, vector<128x2048xf32>, vector<64x2048xf32> -> vector<64x2048xf32>
    %72 = vector.extract_strided_slice %67 {offsets = [0, 128], sizes = [64, 128], strides = [1, 1]} : vector<64x256xf32> to vector<64x128xf32>
    %cst_44 = arith.constant dense<0.000000e+00> : vector<64x2048xf32>
    %73 = tpu.matmul %72, %69, %cst_44 {dimension_numbers = #tpu.dot_dimension_numbers<[1], [0], [0], [1], [0, 0, 1, 1], [], []>} : vector<64x128xf32>, vector<128x2048xf32>, vector<64x2048xf32> -> vector<64x2048xf32>
    %74 = vector.shape_cast %65 : vector<64x128xf32> to vector<64x1x128xf32>
    %c0_45 = arith.constant 0 : index
    %c0_46 = arith.constant 0 : index
    %75 = vector.load %arg11[%c0_45, %c0_46] : memref<16x128xf32, #tpu.memory_space<vmem>>, vector<16x128xf32>
    %76 = vector.shape_cast %75 : vector<16x128xf32> to vector<1x16x128xf32>
    %77 = vector.broadcast %74 : vector<64x1x128xf32> to vector<64x16x128xf32>
    %78 = vector.broadcast %76 : vector<1x16x128xf32> to vector<64x16x128xf32>
    %79 = arith.mulf %77, %78 : vector<64x16x128xf32>
    %80 = math.exp %79 : vector<64x16x128xf32>
    %c0_47 = arith.constant 0 : index
    %c0_48 = arith.constant 0 : index
    %c0_49 = arith.constant 0 : index
    %81 = vector.load %arg16[%c0_47, %c0_48, %c0_49] : memref<64x16x128xf32, #tpu.memory_space<vmem>>, vector<64x16x128xf32>
    tpu.vector_store %arg16[%c0_47, %c0_48, %c0_49], %80 {strides = array<i32>} : memref<64x16x128xf32, #tpu.memory_space<vmem>>, vector<64x16x128xf32>,
    %82 = vector.shape_cast %71 : vector<64x2048xf32> to vector<64x16x128xf32>
    %c0_50 = arith.constant 0 : index
    %c0_51 = arith.constant 0 : index
    %c0_52 = arith.constant 0 : index
    %83 = vector.load %arg17[%c0_50, %c0_51, %c0_52] : memref<64x16x128xf32, #tpu.memory_space<vmem>>, vector<64x16x128xf32>
    tpu.vector_store %arg17[%c0_50, %c0_51, %c0_52], %82 {strides = array<i32>} : memref<64x16x128xf32, #tpu.memory_space<vmem>>, vector<64x16x128xf32>,
    %84 = vector.shape_cast %73 : vector<64x2048xf32> to vector<64x16x128xf32>
    %c0_53 = arith.constant 0 : index
    %c0_54 = arith.constant 0 : index
    %c0_55 = arith.constant 0 : index
    %85 = vector.load %arg18[%c0_53, %c0_54, %c0_55] : memref<64x16x128xf32, #tpu.memory_space<vmem>>, vector<64x16x128xf32>
    tpu.vector_store %arg18[%c0_53, %c0_54, %c0_55], %84 {strides = array<i32>} : memref<64x16x128xf32, #tpu.memory_space<vmem>>, vector<64x16x128xf32>,
    %86 = arith.mulf %65, %50 : vector<64x128xf32>
    %c0_56 = arith.constant 0 : index
    %c0_57 = arith.constant 0 : index
    %87 = vector.load %arg19[%c0_56, %c0_57] : memref<64x128xf32, #tpu.memory_space<vmem>>, vector<64x128xf32>
    tpu.vector_store %arg19[%c0_56, %c0_57], %86 {strides = array<i32>} : memref<64x128xf32, #tpu.memory_space<vmem>>, vector<64x128xf32>,
    %cst_58 = arith.constant 0.000000e+00 : f32
    %88 = vector.broadcast %cst_58 : f32 to vector<16x128xf32>
    %c0_i32 = arith.constant 0 : i32
    %c8_i32 = arith.constant 8 : i32
    %89 = arith.addi %c0_i32, %c8_i32 : i32
    %c1_i32 = arith.constant 1 : i32
    %90 = scf.for %arg21 = %c0_i32 to %89 step %c1_i32 iter_args(%arg22 = %88) -> (vector<16x128xf32>)  : i32 {
      %c8_i32_72 = arith.constant 8 : i32
      %110 = arith.muli %arg21, %c8_i32_72 : i32
      %111 = tpu.assume_multiple %110, 8 : i32
      %112 = arith.index_cast %111 : i32 to index
      %c0_73 = arith.constant 0 : index
      %c0_74 = arith.constant 0 : index
      %113 = vector.load %arg16[%112, %c0_73, %c0_74] : memref<64x16x128xf32, #tpu.memory_space<vmem>>, vector<8x16x128xf32>
      %114 = arith.index_cast %111 : i32 to index
      %c0_75 = arith.constant 0 : index
      %c0_76 = arith.constant 0 : index
      %115 = vector.load %arg17[%114, %c0_75, %c0_76] : memref<64x16x128xf32, #tpu.memory_space<vmem>>, vector<8x16x128xf32>
      %116 = arith.index_cast %111 : i32 to index
      %c0_77 = arith.constant 0 : index
      %c0_78 = arith.constant 0 : index
      %117 = vector.load %arg18[%116, %c0_77, %c0_78] : memref<64x16x128xf32, #tpu.memory_space<vmem>>, vector<8x16x128xf32>
      %118 = arith.index_cast %111 : i32 to index
      %c0_79 = arith.constant 0 : index
      %119 = vector.load %arg19[%118, %c0_79] : memref<64x128xf32, #tpu.memory_space<vmem>>, vector<8x128xf32>
      %120 = vector.extract_strided_slice %113 {offsets = [0, 0, 0], sizes = [1, 16, 128], strides = [1, 1, 1]} : vector<8x16x128xf32> to vector<1x16x128xf32>
      %121 = vector.shape_cast %120 : vector<1x16x128xf32> to vector<16x128xf32>
      %122 = arith.mulf %121, %arg22 : vector<16x128xf32>
      %123 = vector.extract_strided_slice %119 {offsets = [0, 0], sizes = [1, 128], strides = [1, 1]} : vector<8x128xf32> to vector<1x128xf32>
      %124 = vector.extract_strided_slice %115 {offsets = [0, 0, 0], sizes = [1, 16, 128], strides = [1, 1, 1]} : vector<8x16x128xf32> to vector<1x16x128xf32>
      %125 = vector.shape_cast %124 : vector<1x16x128xf32> to vector<16x128xf32>
      %126 = vector.broadcast %123 : vector<1x128xf32> to vector<16x128xf32>
      %127 = arith.mulf %126, %125 : vector<16x128xf32>
      %128 = arith.addf %122, %127 : vector<16x128xf32>
      %129 = vector.extract_strided_slice %117 {offsets = [0, 0, 0], sizes = [1, 16, 128], strides = [1, 1, 1]} : vector<8x16x128xf32> to vector<1x16x128xf32>
      %130 = vector.shape_cast %129 : vector<1x16x128xf32> to vector<16x128xf32>
      %131 = arith.mulf %128, %130 : vector<16x128xf32>
      %cst_80 = arith.constant dense<0.000000e+00> : vector<128xf32>
      %132 = vector.multi_reduction <add>, %131, %cst_80 [0] : vector<16x128xf32> to vector<128xf32>
      %133 = vector.shape_cast %132 : vector<128xf32> to vector<1x128xf32>
      %134 = vector.extract_strided_slice %113 {offsets = [1, 0, 0], sizes = [1, 16, 128], strides = [1, 1, 1]} : vector<8x16x128xf32> to vector<1x16x128xf32>
      %135 = vector.shape_cast %134 : vector<1x16x128xf32> to vector<16x128xf32>
      %136 = arith.mulf %135, %128 : vector<16x128xf32>
      %137 = vector.extract_strided_slice %119 {offsets = [1, 0], sizes = [1, 128], strides = [1, 1]} : vector<8x128xf32> to vector<1x128xf32>
      %138 = vector.extract_strided_slice %115 {offsets = [1, 0, 0], sizes = [1, 16, 128], strides = [1, 1, 1]} : vector<8x16x128xf32> to vector<1x16x128xf32>
      %139 = vector.shape_cast %138 : vector<1x16x128xf32> to vector<16x128xf32>
      %140 = vector.broadcast %137 : vector<1x128xf32> to vector<16x128xf32>
      %141 = arith.mulf %140, %139 : vector<16x128xf32>
      %142 = arith.addf %136, %141 : vector<16x128xf32>
      %143 = vector.extract_strided_slice %117 {offsets = [1, 0, 0], sizes = [1, 16, 128], strides = [1, 1, 1]} : vector<8x16x128xf32> to vector<1x16x128xf32>
      %144 = vector.shape_cast %143 : vector<1x16x128xf32> to vector<16x128xf32>
      %145 = arith.mulf %142, %144 : vector<16x128xf32>
      %cst_81 = arith.constant dense<0.000000e+00> : vector<128xf32>
      %146 = vector.multi_reduction <add>, %145, %cst_81 [0] : vector<16x128xf32> to vector<128xf32>
      %147 = vector.shape_cast %146 : vector<128xf32> to vector<1x128xf32>
      %148 = vector.extract_strided_slice %113 {offsets = [2, 0, 0], sizes = [1, 16, 128], strides = [1, 1, 1]} : vector<8x16x128xf32> to vector<1x16x128xf32>
      %149 = vector.shape_cast %148 : vector<1x16x128xf32> to vector<16x128xf32>
      %150 = arith.mulf %149, %142 : vector<16x128xf32>
      %151 = vector.extract_strided_slice %119 {offsets = [2, 0], sizes = [1, 128], strides = [1, 1]} : vector<8x128xf32> to vector<1x128xf32>
      %152 = vector.extract_strided_slice %115 {offsets = [2, 0, 0], sizes = [1, 16, 128], strides = [1, 1, 1]} : vector<8x16x128xf32> to vector<1x16x128xf32>
      %153 = vector.shape_cast %152 : vector<1x16x128xf32> to vector<16x128xf32>
      %154 = vector.broadcast %151 : vector<1x128xf32> to vector<16x128xf32>
      %155 = arith.mulf %154, %153 : vector<16x128xf32>
      %156 = arith.addf %150, %155 : vector<16x128xf32>
      %157 = vector.extract_strided_slice %117 {offsets = [2, 0, 0], sizes = [1, 16, 128], strides = [1, 1, 1]} : vector<8x16x128xf32> to vector<1x16x128xf32>
      %158 = vector.shape_cast %157 : vector<1x16x128xf32> to vector<16x128xf32>
      %159 = arith.mulf %156, %158 : vector<16x128xf32>
      %cst_82 = arith.constant dense<0.000000e+00> : vector<128xf32>
      %160 = vector.multi_reduction <add>, %159, %cst_82 [0] : vector<16x128xf32> to vector<128xf32>
      %161 = vector.shape_cast %160 : vector<128xf32> to vector<1x128xf32>
      %162 = vector.extract_strided_slice %113 {offsets = [3, 0, 0], sizes = [1, 16, 128], strides = [1, 1, 1]} : vector<8x16x128xf32> to vector<1x16x128xf32>
      %163 = vector.shape_cast %162 : vector<1x16x128xf32> to vector<16x128xf32>
      %164 = arith.mulf %163, %156 : vector<16x128xf32>
      %165 = vector.extract_strided_slice %119 {offsets = [3, 0], sizes = [1, 128], strides = [1, 1]} : vector<8x128xf32> to vector<1x128xf32>
      %166 = vector.extract_strided_slice %115 {offsets = [3, 0, 0], sizes = [1, 16, 128], strides = [1, 1, 1]} : vector<8x16x128xf32> to vector<1x16x128xf32>
      %167 = vector.shape_cast %166 : vector<1x16x128xf32> to vector<16x128xf32>
      %168 = vector.broadcast %165 : vector<1x128xf32> to vector<16x128xf32>
      %169 = arith.mulf %168, %167 : vector<16x128xf32>
      %170 = arith.addf %164, %169 : vector<16x128xf32>
      %171 = vector.extract_strided_slice %117 {offsets = [3, 0, 0], sizes = [1, 16, 128], strides = [1, 1, 1]} : vector<8x16x128xf32> to vector<1x16x128xf32>
      %172 = vector.shape_cast %171 : vector<1x16x128xf32> to vector<16x128xf32>
      %173 = arith.mulf %170, %172 : vector<16x128xf32>
      %cst_83 = arith.constant dense<0.000000e+00> : vector<128xf32>
      %174 = vector.multi_reduction <add>, %173, %cst_83 [0] : vector<16x128xf32> to vector<128xf32>
      %175 = vector.shape_cast %174 : vector<128xf32> to vector<1x128xf32>
      %176 = vector.extract_strided_slice %113 {offsets = [4, 0, 0], sizes = [1, 16, 128], strides = [1, 1, 1]} : vector<8x16x128xf32> to vector<1x16x128xf32>
      %177 = vector.shape_cast %176 : vector<1x16x128xf32> to vector<16x128xf32>
      %178 = arith.mulf %177, %170 : vector<16x128xf32>
      %179 = vector.extract_strided_slice %119 {offsets = [4, 0], sizes = [1, 128], strides = [1, 1]} : vector<8x128xf32> to vector<1x128xf32>
      %180 = vector.extract_strided_slice %115 {offsets = [4, 0, 0], sizes = [1, 16, 128], strides = [1, 1, 1]} : vector<8x16x128xf32> to vector<1x16x128xf32>
      %181 = vector.shape_cast %180 : vector<1x16x128xf32> to vector<16x128xf32>
      %182 = vector.broadcast %179 : vector<1x128xf32> to vector<16x128xf32>
      %183 = arith.mulf %182, %181 : vector<16x128xf32>
      %184 = arith.addf %178, %183 : vector<16x128xf32>
      %185 = vector.extract_strided_slice %117 {offsets = [4, 0, 0], sizes = [1, 16, 128], strides = [1, 1, 1]} : vector<8x16x128xf32> to vector<1x16x128xf32>
      %186 = vector.shape_cast %185 : vector<1x16x128xf32> to vector<16x128xf32>
      %187 = arith.mulf %184, %186 : vector<16x128xf32>
      %cst_84 = arith.constant dense<0.000000e+00> : vector<128xf32>
      %188 = vector.multi_reduction <add>, %187, %cst_84 [0] : vector<16x128xf32> to vector<128xf32>
      %189 = vector.shape_cast %188 : vector<128xf32> to vector<1x128xf32>
      %190 = vector.extract_strided_slice %113 {offsets = [5, 0, 0], sizes = [1, 16, 128], strides = [1, 1, 1]} : vector<8x16x128xf32> to vector<1x16x128xf32>
      %191 = vector.shape_cast %190 : vector<1x16x128xf32> to vector<16x128xf32>
      %192 = arith.mulf %191, %184 : vector<16x128xf32>
      %193 = vector.extract_strided_slice %119 {offsets = [5, 0], sizes = [1, 128], strides = [1, 1]} : vector<8x128xf32> to vector<1x128xf32>
      %194 = vector.extract_strided_slice %115 {offsets = [5, 0, 0], sizes = [1, 16, 128], strides = [1, 1, 1]} : vector<8x16x128xf32> to vector<1x16x128xf32>
      %195 = vector.shape_cast %194 : vector<1x16x128xf32> to vector<16x128xf32>
      %196 = vector.broadcast %193 : vector<1x128xf32> to vector<16x128xf32>
      %197 = arith.mulf %196, %195 : vector<16x128xf32>
      %198 = arith.addf %192, %197 : vector<16x128xf32>
      %199 = vector.extract_strided_slice %117 {offsets = [5, 0, 0], sizes = [1, 16, 128], strides = [1, 1, 1]} : vector<8x16x128xf32> to vector<1x16x128xf32>
      %200 = vector.shape_cast %199 : vector<1x16x128xf32> to vector<16x128xf32>
      %201 = arith.mulf %198, %200 : vector<16x128xf32>
      %cst_85 = arith.constant dense<0.000000e+00> : vector<128xf32>
      %202 = vector.multi_reduction <add>, %201, %cst_85 [0] : vector<16x128xf32> to vector<128xf32>
      %203 = vector.shape_cast %202 : vector<128xf32> to vector<1x128xf32>
      %204 = vector.extract_strided_slice %113 {offsets = [6, 0, 0], sizes = [1, 16, 128], strides = [1, 1, 1]} : vector<8x16x128xf32> to vector<1x16x128xf32>
      %205 = vector.shape_cast %204 : vector<1x16x128xf32> to vector<16x128xf32>
      %206 = arith.mulf %205, %198 : vector<16x128xf32>
      %207 = vector.extract_strided_slice %119 {offsets = [6, 0], sizes = [1, 128], strides = [1, 1]} : vector<8x128xf32> to vector<1x128xf32>
      %208 = vector.extract_strided_slice %115 {offsets = [6, 0, 0], sizes = [1, 16, 128], strides = [1, 1, 1]} : vector<8x16x128xf32> to vector<1x16x128xf32>
      %209 = vector.shape_cast %208 : vector<1x16x128xf32> to vector<16x128xf32>
      %210 = vector.broadcast %207 : vector<1x128xf32> to vector<16x128xf32>
      %211 = arith.mulf %210, %209 : vector<16x128xf32>
      %212 = arith.addf %206, %211 : vector<16x128xf32>
      %213 = vector.extract_strided_slice %117 {offsets = [6, 0, 0], sizes = [1, 16, 128], strides = [1, 1, 1]} : vector<8x16x128xf32> to vector<1x16x128xf32>
      %214 = vector.shape_cast %213 : vector<1x16x128xf32> to vector<16x128xf32>
      %215 = arith.mulf %212, %214 : vector<16x128xf32>
      %cst_86 = arith.constant dense<0.000000e+00> : vector<128xf32>
      %216 = vector.multi_reduction <add>, %215, %cst_86 [0] : vector<16x128xf32> to vector<128xf32>
      %217 = vector.shape_cast %216 : vector<128xf32> to vector<1x128xf32>
      %218 = vector.extract_strided_slice %113 {offsets = [7, 0, 0], sizes = [1, 16, 128], strides = [1, 1, 1]} : vector<8x16x128xf32> to vector<1x16x128xf32>
      %219 = vector.shape_cast %218 : vector<1x16x128xf32> to vector<16x128xf32>
      %220 = arith.mulf %219, %212 : vector<16x128xf32>
      %221 = vector.extract_strided_slice %119 {offsets = [7, 0], sizes = [1, 128], strides = [1, 1]} : vector<8x128xf32> to vector<1x128xf32>
      %222 = vector.extract_strided_slice %115 {offsets = [7, 0, 0], sizes = [1, 16, 128], strides = [1, 1, 1]} : vector<8x16x128xf32> to vector<1x16x128xf32>
      %223 = vector.shape_cast %222 : vector<1x16x128xf32> to vector<16x128xf32>
      %224 = vector.broadcast %221 : vector<1x128xf32> to vector<16x128xf32>
      %225 = arith.mulf %224, %223 : vector<16x128xf32>
      %226 = arith.addf %220, %225 : vector<16x128xf32>
      %227 = vector.extract_strided_slice %117 {offsets = [7, 0, 0], sizes = [1, 16, 128], strides = [1, 1, 1]} : vector<8x16x128xf32> to vector<1x16x128xf32>
      %228 = vector.shape_cast %227 : vector<1x16x128xf32> to vector<16x128xf32>
      %229 = arith.mulf %226, %228 : vector<16x128xf32>
      %cst_87 = arith.constant dense<0.000000e+00> : vector<128xf32>
      %230 = vector.multi_reduction <add>, %229, %cst_87 [0] : vector<16x128xf32> to vector<128xf32>
      %231 = vector.shape_cast %230 : vector<128xf32> to vector<1x128xf32>
      %232 = tpu.concatenate %133, %147, %161, %175, %189, %203, %217, %231 in 0 : vector<1x128xf32>, vector<1x128xf32>, vector<1x128xf32>, vector<1x128xf32>, vector<1x128xf32>, vector<1x128xf32>, vector<1x128xf32>, vector<1x128xf32> -> vector<8x128xf32>
      %233 = arith.index_cast %111 : i32 to index
      %c0_88 = arith.constant 0 : index
      %234 = vector.load %arg20[%233, %c0_88] : memref<64x128xf32, #tpu.memory_space<vmem>>, vector<8x128xf32>
      tpu.vector_store %arg20[%233, %c0_88], %232 {strides = array<i32>} : memref<64x128xf32, #tpu.memory_space<vmem>>, vector<8x128xf32>,
      scf.yield %226 : vector<16x128xf32>
    }
    %c8_i32_59 = arith.constant 8 : i32
    %c0_60 = arith.constant 0 : index
    %c0_61 = arith.constant 0 : index
    %91 = vector.load %arg20[%c0_60, %c0_61] : memref<64x128xf32, #tpu.memory_space<vmem>>, vector<64x128xf32>
    %c0_62 = arith.constant 0 : index
    %c0_63 = arith.constant 0 : index
    %92 = vector.load %arg12[%c0_62, %c0_63] : memref<1x128xf32, #tpu.memory_space<vmem>>, vector<1x128xf32>
    %93 = vector.broadcast %92 : vector<1x128xf32> to vector<64x128xf32>
    %94 = arith.mulf %93, %50 : vector<64x128xf32>
    %95 = arith.addf %91, %94 : vector<64x128xf32>
    %cst_64 = arith.constant 0.000000e+00 : f32
    %96 = vector.broadcast %cst_64 : f32 to vector<64x128xf32>
    %97 = arith.subf %96, %18 : vector<64x128xf32>
    %98 = math.exp %97 : vector<64x128xf32>
    %cst_65 = arith.constant 1.000000e+00 : f32
    %99 = vector.broadcast %cst_65 : f32 to vector<64x128xf32>
    %100 = arith.addf %99, %98 : vector<64x128xf32>
    %101 = tpu.reciprocal %100 {approx = true} : vector<64x128xf32> -> vector<64x128xf32>
    %102 = arith.mulf %18, %101 : vector<64x128xf32>
    %103 = arith.mulf %95, %102 : vector<64x128xf32>
    %c0_66 = arith.constant 0 : index
    %c0_67 = arith.constant 0 : index
    %104 = vector.load %arg13[%c0_66, %c0_67] : memref<128x64xf32, #tpu.memory_space<vmem>>, vector<128x64xf32>
    %cst_68 = arith.constant dense<0.000000e+00> : vector<64x64xf32>
    %105 = tpu.matmul %103, %104, %cst_68 {dimension_numbers = #tpu.dot_dimension_numbers<[1], [0], [0], [1], [0, 0, 1, 1], [], []>} : vector<64x128xf32>, vector<128x64xf32>, vector<64x64xf32> -> vector<64x64xf32>
    %106 = arith.addf %105, %1 : vector<64x64xf32>
    %c0_69 = arith.constant 0 : index
    %c0_70 = arith.constant 0 : index
    %c0_71 = arith.constant 0 : index
    %107 = vector.load %arg14[%c0_69, %c0_70, %c0_71] : memref<1x64x64xf32, #tpu.memory_space<vmem>>, vector<1x64x64xf32>
    %108 = vector.shape_cast %107 : vector<1x64x64xf32> to vector<64x64xf32>
    %109 = vector.shape_cast %106 : vector<64x64xf32> to vector<1x64x64xf32>
    tpu.vector_store %arg14[%c0_69, %c0_70, %c0_71], %109 {strides = array<i32>} : memref<1x64x64xf32, #tpu.memory_space<vmem>>, vector<1x64x64xf32>,
    return
  }
  func.func @transform_0(%arg0: i32) -> (i32, i32, i32) {
    %c0_i32 = arith.constant 0 : i32
    %c0_i32_0 = arith.constant 0 : i32
    %c0_i32_1 = arith.constant 0 : i32
    return %arg0, %c0_i32, %c0_i32_0 : i32, i32, i32
  }
  func.func @transform_1(%arg0: i32) -> (i32, i32) {
    %c0_i32 = arith.constant 0 : i32
    %c0_i32_0 = arith.constant 0 : i32
    %c0_i32_1 = arith.constant 0 : i32
    return %c0_i32, %c0_i32_0 : i32, i32
  }
  func.func @transform_2(%arg0: i32) -> (i32, i32) {
    %c0_i32 = arith.constant 0 : i32
    %c0_i32_0 = arith.constant 0 : i32
    %c0_i32_1 = arith.constant 0 : i32
    return %c0_i32, %c0_i32_0 : i32, i32
  }
  func.func @transform_3(%arg0: i32) -> (i32, i32) {
    %c0_i32 = arith.constant 0 : i32
    %c0_i32_0 = arith.constant 0 : i32
    %c0_i32_1 = arith.constant 0 : i32
    return %c0_i32, %c0_i32_0 : i32, i32
  }
  func.func @transform_4(%arg0: i32) -> (i32, i32) {
    %c0_i32 = arith.constant 0 : i32
    %c0_i32_0 = arith.constant 0 : i32
    %c0_i32_1 = arith.constant 0 : i32
    return %c0_i32, %c0_i32_0 : i32, i32
  }
  func.func @transform_5(%arg0: i32) -> (i32, i32) {
    %c0_i32 = arith.constant 0 : i32
    %c0_i32_0 = arith.constant 0 : i32
    %c0_i32_1 = arith.constant 0 : i32
    return %c0_i32, %c0_i32_0 : i32, i32
  }
  func.func @transform_6(%arg0: i32) -> (i32, i32) {
    %c0_i32 = arith.constant 0 : i32
    %c0_i32_0 = arith.constant 0 : i32
    %c0_i32_1 = arith.constant 0 : i32
    return %c0_i32, %c0_i32_0 : i32, i32
  }
  func.func @transform_7(%arg0: i32) -> (i32, i32) {
    %c0_i32 = arith.constant 0 : i32
    %c0_i32_0 = arith.constant 0 : i32
    %c0_i32_1 = arith.constant 0 : i32
    return %c0_i32, %c0_i32_0 : i32, i32
  }
  func.func @transform_8(%arg0: i32) -> (i32, i32) {
    %c0_i32 = arith.constant 0 : i32
    %c0_i32_0 = arith.constant 0 : i32
    %c0_i32_1 = arith.constant 0 : i32
    return %c0_i32, %c0_i32_0 : i32, i32
  }
  func.func @transform_9(%arg0: i32) -> (i32, i32) {
    %c0_i32 = arith.constant 0 : i32
    %c0_i32_0 = arith.constant 0 : i32
    %c0_i32_1 = arith.constant 0 : i32
    return %c0_i32, %c0_i32_0 : i32, i32
  }
  func.func @transform_10(%arg0: i32) -> (i32, i32) {
    %c0_i32 = arith.constant 0 : i32
    %c0_i32_0 = arith.constant 0 : i32
    %c0_i32_1 = arith.constant 0 : i32
    return %c0_i32, %c0_i32_0 : i32, i32
  }
  func.func @transform_11(%arg0: i32) -> (i32, i32) {
    %c0_i32 = arith.constant 0 : i32
    %c0_i32_0 = arith.constant 0 : i32
    %c0_i32_1 = arith.constant 0 : i32
    return %c0_i32, %c0_i32_0 : i32, i32
  }
  func.func @transform_12(%arg0: i32) -> (i32, i32) {
    %c0_i32 = arith.constant 0 : i32
    %c0_i32_0 = arith.constant 0 : i32
    %c0_i32_1 = arith.constant 0 : i32
    return %c0_i32, %c0_i32_0 : i32, i32
  }
  func.func @transform_13(%arg0: i32) -> (i32, i32, i32) {
    %c0_i32 = arith.constant 0 : i32
    %c0_i32_0 = arith.constant 0 : i32
    %c0_i32_1 = arith.constant 0 : i32
    return %arg0, %c0_i32, %c0_i32_0 : i32, i32, i32
  }
}

</mosaic_0001>

<bundles_post_ra>
// kernel: tile.58
= control target key start
LH: loop header
LB: loop body
LE: loop exit
PB: predicated region body
PF: predicated region fallthrough
CT: control target
= control target key end

     0   :  { %s22_s0 = inlined_call_operand.vmem [shape: f32[16], index: 0, kind: input, shape index: {}]   ;;  %s23_s1 = inlined_call_operand.vmem [shape: f32[8,16], index: 1, kind: output, shape index: {}]  }
   0x1   :  { %v4_v0 = vld [vmem:[%s22_s0] ss:$0 sm:$0xff] }
   0x2   :  { %5 = vst [vmem:[%s23_s1] sm:$0xff] %v4_v0 }

// kernel: tile.68
= control target key start
LH: loop header
LB: loop body
LE: loop exit
PB: predicated region body
PF: predicated region fallthrough
CT: control target
= control target key end

     0   :  { %s67_s10 = smov 112   ;;  %s68_s11 = smov 80   ;;  %vm3_vm0 = vcmask 130048   ;;  %vm9_vm1 = vcmask 1048448   ;;  %vm15_vm2 = vcmask 917248   ;;  %vm21_vm3 = vcmask 786048   ;;  %s111_s0 = inlined_call_operand.vmem [shape: f32[8,16], index: 0, kind: input, shape index: {}]   ;;  %s112_s1 = inlined_call_operand.vmem [shape: f32[1,128], index: 1, kind: output, shape index: {}]  }
   0x1   :  { %v53_v0 = vld [vmem:[%s111_s0 + $0x7] sm:$0x1]   ;;  %v55_v1 = vld [vmem:[%s111_s0 + $0x5] sm:$0x1]   ;;  %v57_v2 = vld [vmem:[%s111_s0 + $0x3] sm:$0x1]  }
   0x2   :  { %7 = vrot.lane.b32.xlu0 %v53_v0, %s67_s10  ;;  %19 = vrot.lane.b32.xlu1 %v55_v1, %s68_s11  ;;  %s69_s14 = smov 48   ;;  %v54_v3 = vld [vmem:[%s111_s0 + $0x6] sm:$0x1]   ;;  %v56_v4 = vld [vmem:[%s111_s0 + $0x4] sm:$0x1]   ;;  %s70_s21 = smov 96  }
   0x3   :  { %31 = vrot.lane.b32.xlu2 %v57_v2, %s69_s14  ;;  %v58_v5 = vld [vmem:[%s111_s0 + $0x2] sm:$0x1]   ;;  %s71_s22 = smov 64   ;;  %s72_s23 = smov 32   ;;  %v59_v6 = vld [vmem:[%s111_s0 + $0x1] sm:$0x1]  }
   0x4   :  { %s73_s26 = smov 16   ;;  %v2_v7 = vld [vmem:[%s111_s0] sm:$0x1]   ;;  %vm27_vm4 = vcmask 654848   ;;  %vm33_vm5 = vcmask 523648   ;;  %vm39_vm6 = vcmask 392448  }
   0x5   :  { %4 = vst.msk [vmem:[#allocation0] sm:$0x1] %vm3_vm0, %v2_v7   ;;  %vm45_vm7 = vcmask 261248  }
   0xa   :  { %13 = vrot.lane.b32.xlu0 %v54_v3, %s70_s21  ;;  %25 = vrot.lane.b32.xlu1 %v56_v4, %s71_s22 }
   0xb   :  { %37 = vrot.lane.b32.xlu2 %v58_v5, %s72_s23 }
  0x12   :  { %43 = vrot.lane.b32.xlu0 %v59_v6, %s73_s26 }
  0x5d   :  { %v32_v8 = vpop.permute.xlu2 %31  }
  0x65   :  { %v38_v9 = vpop.permute.xlu2 %37  }
  0x74   :  { %v8_v10 = vpop.permute.xlu0 %7   ;;  %v20_v11 = vpop.permute.xlu1 %19  }
  0x75   :  { %10 = vst.msk [vmem:[#allocation0] sm:$0x1] %vm9_vm1, %v8_v10  }
  0x7c   :  { %v14_v12 = vpop.permute.xlu0 %13   ;;  %v26_v13 = vpop.permute.xlu1 %25  }
  0x7d   :  { %16 = vst.msk [vmem:[#allocation0] sm:$0x1] %vm15_vm2, %v14_v12  }
  0x7e   :  { %22 = vst.msk [vmem:[#allocation0] sm:$0x1] %vm21_vm3, %v20_v11  }
  0x7f   :  { %28 = vst.msk [vmem:[#allocation0] sm:$0x1] %vm27_vm4, %v26_v13  }
  0x80   :  { %34 = vst.msk [vmem:[#allocation0] sm:$0x1] %vm33_vm5, %v32_v8  }
  0x81   :  { %40 = vst.msk [vmem:[#allocation0] sm:$0x1] %vm39_vm6, %v38_v9  }
  0x84   :  { %v44_v14 = vpop.permute.xlu0 %43  }
  0x85   :  { %46 = vst.msk [vmem:[#allocation0] sm:$0x1] %vm45_vm7, %v44_v14  }
  0x8c   :  { %v49_v15 = vld [vmem:[#allocation0] sm:$0x1] }
  0x8d   :  { %52 = vst [vmem:[%s112_s1] sm:$0x1] %v49_v15 }

// kernel: tile.50
= control target key start
LH: loop header
LB: loop body
LE: loop exit
PB: predicated region body
PF: predicated region fallthrough
CT: control target
= control target key end

     0   :  { %s67_s10 = smov 112   ;;  %s68_s11 = smov 80   ;;  %vm3_vm0 = vcmask 130048   ;;  %vm9_vm1 = vcmask 1048448   ;;  %vm15_vm2 = vcmask 917248   ;;  %vm21_vm3 = vcmask 786048   ;;  %s111_s0 = inlined_call_operand.vmem [shape: f32[8,16], index: 0, kind: input, shape index: {}]   ;;  %s112_s1 = inlined_call_operand.vmem [shape: f32[128], index: 1, kind: output, shape index: {}]  }
   0x1   :  { %v53_v0 = vld [vmem:[%s111_s0 + $0x7] sm:$0x1]   ;;  %v55_v1 = vld [vmem:[%s111_s0 + $0x5] sm:$0x1]   ;;  %v57_v2 = vld [vmem:[%s111_s0 + $0x3] sm:$0x1]  }
   0x2   :  { %7 = vrot.lane.b32.xlu0 %v53_v0, %s67_s10  ;;  %19 = vrot.lane.b32.xlu1 %v55_v1, %s68_s11  ;;  %s69_s14 = smov 48   ;;  %v54_v3 = vld [vmem:[%s111_s0 + $0x6] sm:$0x1]   ;;  %v56_v4 = vld [vmem:[%s111_s0 + $0x4] sm:$0x1]   ;;  %s70_s21 = smov 96  }
   0x3   :  { %31 = vrot.lane.b32.xlu2 %v57_v2, %s69_s14  ;;  %v58_v5 = vld [vmem:[%s111_s0 + $0x2] sm:$0x1]   ;;  %s71_s22 = smov 64   ;;  %s72_s23 = smov 32   ;;  %v59_v6 = vld [vmem:[%s111_s0 + $0x1] sm:$0x1]  }
   0x4   :  { %s73_s26 = smov 16   ;;  %v2_v7 = vld [vmem:[%s111_s0] sm:$0x1]   ;;  %vm27_vm4 = vcmask 654848   ;;  %vm33_vm5 = vcmask 523648   ;;  %vm39_vm6 = vcmask 392448  }
   0x5   :  { %4 = vst.msk [vmem:[#allocation0] sm:$0x1] %vm3_vm0, %v2_v7   ;;  %vm45_vm7 = vcmask 261248  }
   0xa   :  { %13 = vrot.lane.b32.xlu0 %v54_v3, %s70_s21  ;;  %25 = vrot.lane.b32.xlu1 %v56_v4, %s71_s22 }
   0xb   :  { %37 = vrot.lane.b32.xlu2 %v58_v5, %s72_s23 }
  0x12   :  { %43 = vrot.lane.b32.xlu0 %v59_v6, %s73_s26 }
  0x5d   :  { %v32_v8 = vpop.permute.xlu2 %31  }
  0x65   :  { %v38_v9 = vpop.permute.xlu2 %37  }
  0x74   :  { %v8_v10 = vpop.permute.xlu0 %7   ;;  %v20_v11 = vpop.permute.xlu1 %19  }
  0x75   :  { %10 = vst.msk [vmem:[#allocation0] sm:$0x1] %vm9_vm1, %v8_v10  }
  0x7c   :  { %v14_v12 = vpop.permute.xlu0 %13   ;;  %v26_v13 = vpop.permute.xlu1 %25  }
  0x7d   :  { %16 = vst.msk [vmem:[#allocation0] sm:$0x1] %vm15_vm2, %v14_v12  }
  0x7e   :  { %22 = vst.msk [vmem:[#allocation0] sm:$0x1] %vm21_vm3, %v20_v11  }
  0x7f   :  { %28 = vst.msk [vmem:[#allocation0] sm:$0x1] %vm27_vm4, %v26_v13  }
  0x80   :  { %34 = vst.msk [vmem:[#allocation0] sm:$0x1] %vm33_vm5, %v32_v8  }
  0x81   :  { %40 = vst.msk [vmem:[#allocation0] sm:$0x1] %vm39_vm6, %v38_v9  }
  0x84   :  { %v44_v14 = vpop.permute.xlu0 %43  }
  0x85   :  { %46 = vst.msk [vmem:[#allocation0] sm:$0x1] %vm45_vm7, %v44_v14  }
  0x8c   :  { %v49_v15 = vld [vmem:[#allocation0] sm:$0x1] }
  0x8d   :  { %52 = vst [vmem:[%s112_s1] sm:$0x1] %v49_v15 }

// kernel: tile.86
= control target key start
LH: loop header
LB: loop body
LE: loop exit
PB: predicated region body
PF: predicated region fallthrough
CT: control target
= control target key end

     0   :  { %vm4_vm0 = vcmask 1047556   ;;  %s209_s14 = smov 96   ;;  %s210_s15 = smov 112   ;;  %vm6_vm1 = vcmask 130048   ;;  %vm25_vm2 = vcmask 1048448   ;;  %vm46_vm3 = vcmask 917248   ;;  %s386_s0 = inlined_call_operand.vmem [shape: f32[16,8,16], index: 0, kind: input, shape index: {}]   ;;  %s387_s1 = inlined_call_operand.vmem [shape: f32[16,128], index: 1, kind: output, shape index: {}]  }
   0x1   :  { %v172_v0 = vld [vmem:[%s386_s0 + $0x6] ss:$8 sm:$0xf]   ;;  %v167_v3 = vld [vmem:[%s386_s0 + $0x7] ss:$8 sm:$0xf]  }
   0x2   :  { %v173_v1 = vld [vmem:[%s386_s0 + $0x6] ss:$8 sm:$0xf0]   ;;  %v168_v4 = vld [vmem:[%s386_s0 + $0x7] ss:$8 sm:$0xf0]  }
   0x3   :  { %v43_v2 = vsel %vm4_vm0, %v173_v1, %v172_v0  ;;  %v22_v5 = vsel %vm4_vm0, %v168_v4, %v167_v3  ;;  %v174_v6 = vld [vmem:[%s386_s0 + $0x46] ss:$8 sm:$0xf]   ;;  %v169_v8 = vld [vmem:[%s386_s0 + $0x47] ss:$8 sm:$0xf]  }
   0x4   :  { %44 = vrot.lane.b32.xlu1 %v43_v2, %s209_s14  ;;  %23 = vrot.lane.b32.xlu0 %v22_v5, %s210_s15  ;;  %v175_v7 = vld [vmem:[%s386_s0 + $0x46] ss:$8 sm:$0xf0]   ;;  %v170_v9 = vld [vmem:[%s386_s0 + $0x47] ss:$8 sm:$0xf0]  }
   0x5   :  { %v53_v10 = vsel %vm4_vm0, %v175_v7, %v174_v6  ;;  %v32_v11 = vsel %vm4_vm0, %v170_v9, %v169_v8  ;;  %v177_v12 = vld [vmem:[%s386_s0 + $0x5] ss:$8 sm:$0xf]   ;;  %v184_v15 = vld [vmem:[%s386_s0 + $0x44] ss:$8 sm:$0xf]  }
   0x6   :  { %v178_v13 = vld [vmem:[%s386_s0 + $0x5] ss:$8 sm:$0xf0]   ;;  %v185_v16 = vld [vmem:[%s386_s0 + $0x44] ss:$8 sm:$0xf0]  }
   0x7   :  { %v64_v14 = vsel %vm4_vm0, %v178_v13, %v177_v12  ;;  %s211_s3 = smov 80   ;;  %v182_v17 = vld [vmem:[%s386_s0 + $0x4] ss:$8 sm:$0xf]   ;;  %v95_v21 = vsel %vm4_vm0, %v185_v16, %v184_v15  ;;  %s212_s12 = smov 64   ;;  %vm67_vm4 = vcmask 786048  }
   0x8   :  { %65 = vrot.lane.b32.xlu2 %v64_v14, %s211_s3  ;;  %v183_v18 = vld [vmem:[%s386_s0 + $0x4] ss:$8 sm:$0xf0]   ;;  %v179_v19 = vld [vmem:[%s386_s0 + $0x45] ss:$8 sm:$0xf]  }
   0x9   :  { %v180_v20 = vld [vmem:[%s386_s0 + $0x45] ss:$8 sm:$0xf0]   ;;  %v85_v22 = vsel %vm4_vm0, %v183_v18, %v182_v17  ;;  %v192_v24 = vld [vmem:[%s386_s0 + $0x2] ss:$8 sm:$0xf]  }
   0xa   :  { %v74_v23 = vsel %vm4_vm0, %v180_v20, %v179_v19  ;;  %v193_v25 = vld [vmem:[%s386_s0 + $0x2] ss:$8 sm:$0xf0]   ;;  %v189_v26 = vld [vmem:[%s386_s0 + $0x43] ss:$8 sm:$0xf]  }
   0xb   :  { %v190_v27 = vld [vmem:[%s386_s0 + $0x43] ss:$8 sm:$0xf0]   ;;  %v127_v30 = vsel %vm4_vm0, %v193_v25, %v192_v24  ;;  %s213_s25 = smov 32   ;;  %s214_s26 = smov 48   ;;  %vm88_vm5 = vcmask 654848  }
   0xc   :  { %54 = vrot.lane.b32.xlu1 %v53_v10, %s209_s14  ;;  %33 = vrot.lane.b32.xlu0 %v32_v11, %s210_s15  ;;  %v187_v28 = vld [vmem:[%s386_s0 + $0x3] ss:$8 sm:$0xf]   ;;  %v116_v31 = vsel %vm4_vm0, %v190_v27, %v189_v26  ;;  %v199_v33 = vld [vmem:[%s386_s0 + $0x41] ss:$8 sm:$0xf]  }
   0xd   :  { %v188_v29 = vld [vmem:[%s386_s0 + $0x3] ss:$8 sm:$0xf0]   ;;  %v200_v34 = vld [vmem:[%s386_s0 + $0x41] ss:$8 sm:$0xf0]  }
   0xe   :  { %v106_v32 = vsel %vm4_vm0, %v188_v29, %v187_v28  ;;  %v197_v35 = vld [vmem:[%s386_s0 + $0x1] ss:$8 sm:$0xf]   ;;  %v194_v37 = vld [vmem:[%s386_s0 + $0x42] ss:$8 sm:$0xf]   ;;  %v158_v39 = vsel %vm4_vm0, %v200_v34, %v199_v33 }
   0xf   :  { %v198_v36 = vld [vmem:[%s386_s0 + $0x1] ss:$8 sm:$0xf0]   ;;  %v195_v38 = vld [vmem:[%s386_s0 + $0x42] ss:$8 sm:$0xf0]  }
  0x10   :  { %75 = vrot.lane.b32.xlu2 %v74_v23, %s211_s3  ;;  %v148_v40 = vsel %vm4_vm0, %v198_v36, %v197_v35  ;;  %v137_v41 = vsel %vm4_vm0, %v195_v38, %v194_v37  ;;  %s215_s10 = smov 16   ;;  %v2_v42 = vld [vmem:[%s386_s0] ss:$8 sm:$0xf]   ;;  %vm109_vm6 = vcmask 523648   ;;  %vm130_vm7 = vcmask 392448  }
  0x11   :  { %v3_v43 = vld [vmem:[%s386_s0] ss:$8 sm:$0xf0]   ;;  %vm151_vm8 = vcmask 261248  }
  0x12   :  { %v5_v44 = vsel %vm4_vm0, %v3_v43, %v2_v42  ;;  %v164_v45 = vld [vmem:[%s386_s0 + $0x40] ss:$8 sm:$0xf]  }
  0x13   :  { %7 = vst.msk [vmem:[%s387_s1] sm:$0xff] %vm6_vm1, %v5_v44   ;;  %v165_v46 = vld [vmem:[%s386_s0 + $0x40] ss:$8 sm:$0xf0]  }
  0x14   :  { %96 = vrot.lane.b32.xlu1 %v95_v21, %s212_s12  ;;  %86 = vrot.lane.b32.xlu0 %v85_v22, %s212_s12  ;;  %v13_v47 = vsel %vm4_vm0, %v165_v46, %v164_v45 }
  0x15   :  { %166 = vst.msk [vmem:[%s387_s1 + $0x8] sm:$0xff] %vm6_vm1, %v13_v47  }
  0x18   :  { %107 = vrot.lane.b32.xlu2 %v106_v32, %s214_s26 }
  0x1c   :  { %128 = vrot.lane.b32.xlu1 %v127_v30, %s213_s25  ;;  %117 = vrot.lane.b32.xlu0 %v116_v31, %s214_s26 }
  0x20   :  { %138 = vrot.lane.b32.xlu2 %v137_v41, %s213_s25 }
  0x24   :  { %159 = vrot.lane.b32.xlu1 %v158_v39, %s215_s10  ;;  %149 = vrot.lane.b32.xlu0 %v148_v40, %s215_s10 }
  0x62   :  { %v66_v48 = vpop.permute.xlu2 %65  }
  0x6a   :  { %v76_v49 = vpop.permute.xlu2 %75  }
  0x72   :  { %v108_v52 = vpop.permute.xlu2 %107  }
  0x76   :  { %v45_v50 = vpop.permute.xlu1 %44   ;;  %v24_v51 = vpop.permute.xlu0 %23  }
  0x77   :  { %26 = vst.msk [vmem:[%s387_s1] sm:$0xff] %vm25_vm2, %v24_v51  }
  0x78   :  { %47 = vst.msk [vmem:[%s387_s1] sm:$0xff] %vm46_vm3, %v45_v50  }
  0x79   :  { %68 = vst.msk [vmem:[%s387_s1] sm:$0xff] %vm67_vm4, %v66_v48  }
  0x7a   :  { %v139_v55 = vpop.permute.xlu2 %138  }
  0x7e   :  { %v55_v53 = vpop.permute.xlu1 %54   ;;  %v34_v54 = vpop.permute.xlu0 %33  }
  0x7f   :  { %171 = vst.msk [vmem:[%s387_s1 + $0x8] sm:$0xff] %vm25_vm2, %v34_v54  }
  0x80   :  { %176 = vst.msk [vmem:[%s387_s1 + $0x8] sm:$0xff] %vm46_vm3, %v55_v53  }
  0x81   :  { %181 = vst.msk [vmem:[%s387_s1 + $0x8] sm:$0xff] %vm67_vm4, %v76_v49  }
  0x86   :  { %v97_v56 = vpop.permute.xlu1 %96   ;;  %v87_v57 = vpop.permute.xlu0 %86  }
  0x87   :  { %186 = vst.msk [vmem:[%s387_s1 + $0x8] sm:$0xff] %vm88_vm5, %v97_v56  }
  0x88   :  { %89 = vst.msk [vmem:[%s387_s1] sm:$0xff] %vm88_vm5, %v87_v57  }
  0x89   :  { %110 = vst.msk [vmem:[%s387_s1] sm:$0xff] %vm109_vm6, %v108_v52  }
  0x8e   :  { %v129_v58 = vpop.permute.xlu1 %128   ;;  %v118_v59 = vpop.permute.xlu0 %117  }
  0x8f   :  { %131 = vst.msk [vmem:[%s387_s1] sm:$0xff] %vm130_vm7, %v129_v58  }
  0x90   :  { %191 = vst.msk [vmem:[%s387_s1 + $0x8] sm:$0xff] %vm109_vm6, %v118_v59  }
  0x91   :  { %196 = vst.msk [vmem:[%s387_s1 + $0x8] sm:$0xff] %vm130_vm7, %v139_v55  }
  0x96   :  { %v160_v60 = vpop.permute.xlu1 %159   ;;  %v150_v61 = vpop.permute.xlu0 %149  }
  0x97   :  { %201 = vst.msk [vmem:[%s387_s1 + $0x8] sm:$0xff] %vm151_vm8, %v160_v60  }
  0x98   :  { %152 = vst.msk [vmem:[%s387_s1] sm:$0xff] %vm151_vm8, %v150_v61  }

// kernel: fn.1
= control target key start
LH: loop header
LB: loop body
LE: loop exit
PB: predicated region body
PF: predicated region fallthrough
CT: control target
= control target key end

     0   :  { %s6282_s25 = smov 0   ;;  %s9676_s0 = inlined_call_operand.vmem [shape: f32[2,64,64], index: 0, kind: input, shape index: {}]   ;;  %s9677_s1 = inlined_call_operand.vmem [shape: f32[64,64], index: 1, kind: input, shape index: {}]   ;;  %s9678_s2 = inlined_call_operand.vmem [shape: f32[64,256], index: 2, kind: input, shape index: {}]   ;;  %s9679_s3 = inlined_call_operand.vmem [shape: f32[1,256], index: 3, kind: input, shape index: {}]   ;;  %s9680_s4 = inlined_call_operand.vmem [shape: f32[4,128], index: 4, kind: input, shape index: {}]   ;;  %s9681_s5 = inlined_call_operand.vmem [shape: f32[1,128], index: 5, kind: input, shape index: {}]   ;;  %s9682_s6 = inlined_call_operand.vmem [shape: f32[128,128], index: 6, kind: input, shape index: {}]   ;;  %s9683_s7 = inlined_call_operand.vmem [shape: f32[1,128], index: 7, kind: input, shape index: {}]   ;;  %s9684_s8 = inlined_call_operand.vmem [shape: f32[128,256], index: 8, kind: input, shape index: {}]   ;;  %s9685_s9 = inlined_call_operand.vmem [shape: bf16[128,2048], index: 9, kind: input, shape index: {}]   ;;  %s9686_s10 = inlined_call_operand.vmem [shape: f32[16,128], index: 10, kind: input, shape index: {}]   ;;  %s9687_s11 = inlined_call_operand.vmem [shape: f32[1,128], index: 11, kind: input, shape index: {}]   ;;  %s9688_s12 = inlined_call_operand.vmem [shape: f32[128,64], index: 12, kind: input, shape index: {}]   ;;  %s9689_s13 = inlined_call_operand.vmem [shape: f32[2,64,64], index: 13, kind: output, shape index: {}]  }
   0x1 LB: > { %s5720_s26 = sadd.s32 4294967295, %s6197_s25   ;;  %p5724_p0 = scmp.ge.s32.totalorder %s6197_s25, 1  ;;  %s6197_s25 = sphi %s6282_s25, %s23_s25  }
   0x2   : > { %p387_p1 = scmp.lt.s32.totalorder %s6197_s25, 3 }
   0x4   : > { %p388_p2 = pnand %p5724_p0, %p387_p1 }
   0x6   : > { %391 = sbr.rel (%p388_p2) target bundleno = 2205 (0x89d), region = 72 }
   0xb   : > { %v456_v0 = vld [vmem:[%s9677_s1 + $0x38] sm:$0xff]  ;;  %v455_v1 = vld [vmem:[%s9677_s1 + $0x30] sm:$0xff]  ;;  %p431_p3 = scmp.lt.s32.totalorder %s5720_s26, 1  ;;  %v454_v2 = vld [vmem:[%s9677_s1 + $0x28] sm:$0xff]  ;;  %vm457_vm0 = vcmask 523264   ;;  %s9480_s20 = smov 0  }
   0xc   : > { %490 = vmatpush.msra.mxu0 %v456_v0  ;;  %571 = vmatpush.msra.mxu1 %v456_v0  ;;  %v453_v3 = vld [vmem:[%s9677_s1 + $0x20] sm:$0xff]  ;;  %v452_v4 = vld [vmem:[%s9677_s1 + $0x18] sm:$0xff]  ;;  %v451_v5 = vld [vmem:[%s9677_s1 + $0x10] sm:$0xff] }
   0xd   : > { %s10625_s26 = smov (!%p431_p3, %s5720_s26), 1  ;;  %v450_v6 = vld [vmem:[%s9677_s1 + $0x8] sm:$0xff]  ;;  %v449_v7 = vld [vmem:[%s9677_s1] sm:$0xff]  ;;  %v706_v40 = vld [vmem:[%s9678_s2 + $0x70] sm:$0xff] }
   0xe   : > { %491 = vmatpush.msra.mxu0 %v455_v1  ;;  %572 = vmatpush.msra.mxu1 %v455_v1  ;;  %s5765_s18 = sshll.u32 %s10625_s26, 6  ;;  %v707_v41 = vld [vmem:[%s9678_s2 + $0x78] sm:$0xff]  ;;  %v704_v42 = vld [vmem:[%s9678_s2 + $0x60] sm:$0xff]  ;;  %v705_v43 = vld [vmem:[%s9678_s2 + $0x68] sm:$0xff] }
   0xf   : > { %s6305_s21 = scalar_lea.vmem %s9689_s13, %s5765_s18  ;;  %s435_s14 = scalar_lea.vmem %s9676_s0, %s5765_s18  ;;  %746 = vmatpush.msra.mxu2 %v706_v40  ;;  %787 = vmatpush.msra.mxu3 %v707_v41  ;;  %v702_v44 = vld [vmem:[%s9678_s2 + $0x50] sm:$0xff]  ;;  %v703_v45 = vld [vmem:[%s9678_s2 + $0x58] sm:$0xff]  ;;  %v700_v46 = vld [vmem:[%s9678_s2 + $0x40] sm:$0xff] }
  0x10   : > { %492 = vmatpush.msra.mxu0 %v454_v2  ;;  %573 = vmatpush.msra.mxu1 %v454_v2  ;;  %v6322_v8 = vld [vmem:[%s435_s14] sm:$0xff]  ;;  %v6326_v9 = vld [vmem:[%s435_s14 + $0x8] sm:$0xff]  ;;  %v6330_v10 = vld [vmem:[%s435_s14 + $0x10] sm:$0xff] }
  0x11   : > { %10057 = vst [vmem:[#allocation8_spill] sm:$0xff] %v6322_v8  ;;  %v6334_v11 = vld [vmem:[%s435_s14 + $0x18] sm:$0xff]  ;;  %v6338_v12 = vld [vmem:[%s435_s14 + $0x20] sm:$0xff]  ;;  %v6342_v13 = vld [vmem:[%s435_s14 + $0x28] sm:$0xff]  ;;  %747 = vmatpush.msra.mxu2 %v704_v42  ;;  %788 = vmatpush.msra.mxu3 %v705_v43 }
  0x12   : > { %493 = vmatpush.msra.mxu0 %v453_v3  ;;  %574 = vmatpush.msra.mxu1 %v453_v3  ;;  %10058 = vst [vmem:[#allocation9_spill] sm:$0xff] %v6326_v9  ;;  %v6346_v14 = vld [vmem:[%s435_s14 + $0x30] sm:$0xff]  ;;  %v6350_v15 = vld [vmem:[%s435_s14 + $0x38] sm:$0xff]  ;;  %v701_v47 = vld [vmem:[%s9678_s2 + $0x48] sm:$0xff] }
  0x13   : > { %10059 = vst [vmem:[#allocation10_spill] sm:$0xff] %v6330_v10  ;;  %748 = vmatpush.msra.mxu2 %v702_v44  ;;  %789 = vmatpush.msra.mxu3 %v703_v45  ;;  %v698_v48 = vld [vmem:[%s9678_s2 + $0x30] sm:$0xff]  ;;  %v699_v49 = vld [vmem:[%s9678_s2 + $0x38] sm:$0xff]  ;;  %v696_v50 = vld [vmem:[%s9678_s2 + $0x20] sm:$0xff] }
  0x14   : > { %494 = vmatpush.msra.mxu0 %v452_v4  ;;  %575 = vmatpush.msra.mxu1 %v452_v4  ;;  %10060 = vst [vmem:[#allocation11_spill] sm:$0xff] %v6334_v11  ;;  %v697_v51 = vld [vmem:[%s9678_s2 + $0x28] sm:$0xff]  ;;  %v694_v52 = vld [vmem:[%s9678_s2 + $0x10] sm:$0xff]  ;;  %v695_v53 = vld [vmem:[%s9678_s2 + $0x18] sm:$0xff] }
  0x15   : > { %10061 = vst [vmem:[#allocation12_spill] sm:$0xff] %v6338_v12  ;;  %749 = vmatpush.msra.mxu2 %v700_v46  ;;  %790 = vmatpush.msra.mxu3 %v701_v47  ;;  %v692_v54 = vld [vmem:[%s9678_s2] sm:$0xff]  ;;  %v693_v55 = vld [vmem:[%s9678_s2 + $0x8] sm:$0xff] }
  0x16   : > { %495 = vmatpush.msra.mxu0 %v451_v5  ;;  %576 = vmatpush.msra.mxu1 %v451_v5  ;;  %10062 = vst [vmem:[#allocation13_spill] sm:$0xff] %v6342_v13 }
  0x17   : > { %10063 = vst [vmem:[#allocation14_spill] sm:$0xff] %v6346_v14  ;;  %750 = vmatpush.msra.mxu2 %v698_v48  ;;  %791 = vmatpush.msra.mxu3 %v699_v49 }
  0x18   : > { %496 = vmatpush.msra.mxu0 %v450_v6  ;;  %577 = vmatpush.msra.mxu1 %v450_v6  ;;  %10064 = vst [vmem:[#allocation15_spill] sm:$0xff] %v6350_v15 }
  0x19   : > { %751 = vmatpush.msra.mxu2 %v696_v50  ;;  %792 = vmatpush.msra.mxu3 %v697_v51 }
  0x1a   : > { %497 = vmatpush.msra.mxu0 %v449_v7  ;;  %578 = vmatpush.msra.mxu1 %v449_v7 }
  0x1b   : > { %5729 = vmatmul.msk.f32.vlgmr.msra.gmra.mxu0 %vm457_vm0, %v6322_v8  ;;  %752 = vmatpush.msra.mxu2 %v694_v52 }
  0x1c   : > { %793 = vmatpush.msra.mxu3 %v695_v53  ;;  %v1252_v53 = vld [vmem:[%s9684_s8 + $0xf0] sm:$0xff] }
  0x1d   : > { %753 = vmatpush.msra.mxu2 %v692_v54  ;;  %v1250_v54 = vld [vmem:[%s9684_s8 + $0xe0] sm:$0xff]  ;;  %1254 = vmatpush.msrb.mxu1 %v1252_v53 }
  0x1e   : > { %794 = vmatpush.msra.mxu3 %v693_v55 }
  0x1f   : > { %1255 = vmatpush.msrb.mxu1 %v1250_v54 }
  0x23   : > { %5730 = vmatmul.msk.f32.gmra.mxu0 %vm457_vm0, %v6326_v9 }
  0x2b   : > { %5731 = vmatmul.msk.f32.gmra.mxu0 %vm457_vm0, %v6330_v10 }
  0x33   : > { %5732 = vmatmul.msk.f32.gmra.mxu0 %vm457_vm0, %v6334_v11 }
  0x3b   : > { %5733 = vmatmul.msk.f32.gmra.mxu0 %vm457_vm0, %v6338_v12 }
  0x43   : > { %5734 = vmatmul.msk.f32.gmra.mxu0 %vm457_vm0, %v6342_v13 }
  0x4b   : > { %5735 = vmatmul.msk.f32.gmra.mxu0 %vm457_vm0, %v6346_v14 }
  0x53   : > { %5736 = vmatmul.msk.f32.gmra.mxu0 %vm457_vm0, %v6350_v15 }
  0x98   : > { %v499_v16 = vpop.f32.mrf.mxu0 }
  0x99   : > { %v6355_v17 = vsub.f32 %v6322_v8, %v499_v16  ;;  %v7278_v8 = vld [vmem:[%s9685_s9 + $0x398] sm:$0xff] }
  0x9a   : > { %10111 = vst [vmem:[#allocation49_spill] sm:$0xff] %v7278_v8 }
  0x9b   : > { %v531_v18 = vmul.f32 %v6355_v17, %v6355_v17 }
  0x9d   : > { %5737 = vmatmul.msk.f32.vlgmr.msra.gmra.mxu1 %vm457_vm0, %v531_v18 }
  0xa0   : > { %v502_v19 = vpop.f32.mrf.mxu0 }
  0xa1   : > { %v6361_v20 = vsub.f32 %v6326_v9, %v502_v19  ;;  %v9761_v9 = vunpack.c.h.bf16 %v7278_v8 }
  0xa3   : > { %v532_v21 = vmul.f32 %v6361_v20, %v6361_v20 }
  0xa5   : > { %5738 = vmatmul.msk.f32.gmra.mxu1 %vm457_vm0, %v532_v21 }
  0xa8   : > { %v505_v22 = vpop.f32.mrf.mxu0 }
  0xa9   : > { %v6367_v23 = vsub.f32 %v6330_v10, %v505_v22 }
  0xab   : > { %v533_v24 = vmul.f32 %v6367_v23, %v6367_v23 }
  0xad   : > { %5739 = vmatmul.msk.f32.gmra.mxu1 %vm457_vm0, %v533_v24 }
  0xb0   : > { %v508_v25 = vpop.f32.mrf.mxu0 }
  0xb1   : > { %v6373_v26 = vsub.f32 %v6334_v11, %v508_v25 }
  0xb3   : > { %v534_v27 = vmul.f32 %v6373_v26, %v6373_v26 }
  0xb5   : > { %5740 = vmatmul.msk.f32.gmra.mxu1 %vm457_vm0, %v534_v27 }
  0xb8   : > { %v511_v28 = vpop.f32.mrf.mxu0 }
  0xb9   : > { %v6379_v29 = vsub.f32 %v6338_v12, %v511_v28 }
  0xbb   : > { %v535_v30 = vmul.f32 %v6379_v29, %v6379_v29 }
  0xbd   : > { %5741 = vmatmul.msk.f32.gmra.mxu1 %vm457_vm0, %v535_v30 }
  0xc0   : > { %v514_v31 = vpop.f32.mrf.mxu0 }
  0xc1   : > { %v6385_v32 = vsub.f32 %v6342_v13, %v514_v31 }
  0xc3   : > { %v536_v33 = vmul.f32 %v6385_v32, %v6385_v32 }
  0xc5   : > { %5742 = vmatmul.msk.f32.gmra.mxu1 %vm457_vm0, %v536_v33 }
  0xc8   : > { %v517_v34 = vpop.f32.mrf.mxu0 }
  0xc9   : > { %v6391_v35 = vsub.f32 %v6346_v14, %v517_v34 }
  0xcb   : > { %v537_v36 = vmul.f32 %v6391_v35, %v6391_v35 }
  0xcd   : > { %5743 = vmatmul.msk.f32.gmra.mxu1 %vm457_vm0, %v537_v36 }
  0xd0   : > { %v520_v37 = vpop.f32.mrf.mxu0 }
  0xd1   : > { %v6397_v38 = vsub.f32 %v6350_v15, %v520_v37 }
  0xd3   : > { %v538_v39 = vmul.f32 %v6397_v38, %v6397_v38 }
  0xd5   : > { %5744 = vmatmul.msk.f32.gmra.mxu1 %vm457_vm0, %v538_v39 }
 0x11a   : > { %v580_v56 = vpop.f32.mrf.mxu1 }
 0x11b   : > { %v581_v57 = vadd.f32 1e-06, %v580_v56 }
 0x11d   : > { %5807 = vrsqrt.f32 %v581_v57  ;;  %vm610_vm2 = vweird.f32 %v581_v57 }
 0x122   : > { %v583_v58 = vpop.f32.mrf.mxu1 }
 0x123   : > { %v5808_v59 = vpop.eup %5807  ;;  %v584_v60 = vadd.f32 1e-06, %v583_v58 }
 0x124   : > { %v605_v61 = vmul.f32 %v5808_v59, %v581_v57  ;;  %vm611_vm1 = vweird.f32 %v5808_v59 }
 0x125   : > { %5809 = vrsqrt.f32 %v584_v60  ;;  %vm612_vm3 = vmor %vm610_vm2, %vm611_vm1  ;;  %vm620_vm5 = vweird.f32 %v584_v60 }
 0x126   : > { %v606_v62 = vmul.f32 %v5808_v59, %v605_v61 }
 0x128   : > { %v607_v63 = vmul.f32 0.5, %v606_v62 }
 0x12a   : > { %v608_v0 = vsub.f32 1.5, %v607_v63  ;;  %v586_v1 = vpop.f32.mrf.mxu1 }
 0x12b   : > { %v5810_v2 = vpop.eup %5809  ;;  %v587_v3 = vadd.f32 1e-06, %v586_v1 }
 0x12c   : > { %v615_v4 = vmul.f32 %v5810_v2, %v584_v60  ;;  %v609_v5 = vmul.f32 %v5808_v59, %v608_v0  ;;  %vm621_vm4 = vweird.f32 %v5810_v2 }
 0x12d   : > { %5811 = vrsqrt.f32 %v587_v3  ;;  %vm622_vm6 = vmor %vm620_vm5, %vm621_vm4  ;;  %vm630_vm8 = vweird.f32 %v587_v3 }
 0x12e   : > { %v616_v6 = vmul.f32 %v5810_v2, %v615_v4  ;;  %v613_v7 = vsel %vm612_vm3, %v5808_v59, %v609_v5 }
 0x12f   : > { %v684_v16 = vmul.f32 %v613_v7, %v6355_v17 }
 0x130   : > { %v617_v18 = vmul.f32 0.5, %v616_v6 }
 0x131   : > { %5745 = vmatmul.msk.f32.vlgmr.msra.gmra.mxu2 %vm457_vm0, %v684_v16  ;;  %5753 = vmatmul.msk.f32.vlgmr.msra.gmra.mxu3 %vm457_vm0, %v684_v16 }
 0x132   : > { %v618_v19 = vsub.f32 1.5, %v617_v18  ;;  %v589_v21 = vpop.f32.mrf.mxu1 }
 0x133   : > { %v5812_v22 = vpop.eup %5811  ;;  %v590_v24 = vadd.f32 1e-06, %v589_v21 }
 0x134   : > { %v625_v25 = vmul.f32 %v5812_v22, %v587_v3  ;;  %v619_v27 = vmul.f32 %v5810_v2, %v618_v19  ;;  %vm631_vm7 = vweird.f32 %v5812_v22 }
 0x135   : > { %5813 = vrsqrt.f32 %v590_v24  ;;  %vm632_vm9 = vmor %vm630_vm8, %vm631_vm7  ;;  %vm640_vm11 = vweird.f32 %v590_v24 }
 0x136   : > { %v626_v28 = vmul.f32 %v5812_v22, %v625_v25  ;;  %v623_v30 = vsel %vm622_vm6, %v5810_v2, %v619_v27 }
 0x137   : > { %v685_v31 = vmul.f32 %v623_v30, %v6361_v20 }
 0x138   : > { %v627_v17 = vmul.f32 0.5, %v626_v28 }
 0x139   : > { %5746 = vmatmul.msk.f32.gmra.mxu2 %vm457_vm0, %v685_v31  ;;  %5754 = vmatmul.msk.f32.gmra.mxu3 %vm457_vm0, %v685_v31 }
 0x13a   : > { %v628_v33 = vsub.f32 1.5, %v627_v17  ;;  %v592_v34 = vpop.f32.mrf.mxu1 }
 0x13b   : > { %v5814_v36 = vpop.eup %5813  ;;  %v593_v37 = vadd.f32 1e-06, %v592_v34  ;;  %v6211_v34 = vmov 0.0  }
 0x13c   : > { %v635_v39 = vmul.f32 %v5814_v36, %v590_v24  ;;  %v629_v40 = vmul.f32 %v5812_v22, %v628_v33  ;;  %vm641_vm10 = vweird.f32 %v5814_v36  ;;  %820 = vst [vmem:[#allocation2] sm:$0xff] %v6211_v34  ;;  %v1228_v34 = vld [vmem:[%s9684_s8 + $0x30] sm:$0xff] }
 0x13d   : > { %5815 = vrsqrt.f32 %v593_v37  ;;  %vm642_vm12 = vmor %vm640_vm11, %vm641_vm10  ;;  %vm650_vm14 = vweird.f32 %v593_v37 }
 0x13e   : > { %v636_v41 = vmul.f32 %v5814_v36, %v635_v39  ;;  %v633_v42 = vsel %vm632_vm9, %v5812_v22, %v629_v40  ;;  %v1103_v39 = vld [vmem:[%s9682_s6 + $0x70] sm:$0xff]  ;;  %v1251_v40 = vld [vmem:[%s9684_s8 + $0xe8] sm:$0xff] }
 0x13f   : > { %v686_v43 = vmul.f32 %v633_v42, %v6367_v23  ;;  %v1240_v42 = vld [vmem:[%s9684_s8 + $0x90] sm:$0xff] }
 0x140   : > { %v637_v20 = vmul.f32 0.5, %v636_v41  ;;  %v1242_v41 = vld [vmem:[%s9684_s8 + $0xa0] sm:$0xff] }
 0x141   : > { %5747 = vmatmul.msk.f32.gmra.mxu2 %vm457_vm0, %v686_v43  ;;  %5755 = vmatmul.msk.f32.gmra.mxu3 %vm457_vm0, %v686_v43  ;;  %v1102_v43 = vld [vmem:[%s9682_s6 + $0x68] sm:$0xff] }
 0x142   : > { %v638_v44 = vsub.f32 1.5, %v637_v20  ;;  %v595_v45 = vpop.f32.mrf.mxu1  ;;  %v708_v20 = vld [vmem:[%s9679_s3] sm:$0x3] }
 0x143   : > { %v5816_v46 = vpop.eup %5815  ;;  %v596_v47 = vadd.f32 1e-06, %v595_v45  ;;  %v1101_v45 = vld [vmem:[%s9682_s6 + $0x60] sm:$0xff] }
 0x144   : > { %v645_v48 = vmul.f32 %v5816_v46, %v593_v37  ;;  %v639_v49 = vmul.f32 %v5814_v36, %v638_v44  ;;  %vm651_vm13 = vweird.f32 %v5816_v46  ;;  %v1253_v37 = vld [vmem:[%s9684_s8 + $0xf8] sm:$0xff] }
 0x145   : > { %5817 = vrsqrt.f32 %v596_v47  ;;  %vm652_vm15 = vmor %vm650_vm14, %vm651_vm13  ;;  %vm660_vm2 = vweird.f32 %v596_v47  ;;  %1295 = vmatpush.msrb.mxu2 %v1253_v37  ;;  %v1249_v44 = vld [vmem:[%s9684_s8 + $0xd8] sm:$0xff] }
 0x146   : > { %v646_v50 = vmul.f32 %v5816_v46, %v645_v48  ;;  %v643_v51 = vsel %vm642_vm12, %v5814_v36, %v639_v49  ;;  %v1244_v36 = vld [vmem:[%s9684_s8 + $0xb0] sm:$0xff]  ;;  %v6524_v48 = vperm.slane %v708_v20, 1  ;;  %v1100_v49 = vld [vmem:[%s9682_s6 + $0x58] sm:$0xff] }
 0x147   : > { %v687_v52 = vmul.f32 %v643_v51, %v6373_v26  ;;  %v1248_v26 = vld [vmem:[%s9684_s8 + $0xd0] sm:$0xff]  ;;  %1296 = vmatpush.msrb.mxu2 %v1251_v40 }
 0x148   : > { %v647_v23 = vmul.f32 0.5, %v646_v50  ;;  %1256 = vmatpush.msrb.mxu1 %v1248_v26  ;;  %v1245_v50 = vld [vmem:[%s9684_s8 + $0xb8] sm:$0xff]  ;;  %v1099_v51 = vld [vmem:[%s9682_s6 + $0x50] sm:$0xff] }
 0x149   : > { %5748 = vmatmul.msk.f32.gmra.mxu2 %vm457_vm0, %v687_v52  ;;  %5756 = vmatmul.msk.f32.gmra.mxu3 %vm457_vm0, %v687_v52  ;;  %v1243_v52 = vld [vmem:[%s9684_s8 + $0xa8] sm:$0xff]  ;;  %v1241_v26 = vld [vmem:[%s9684_s8 + $0x98] sm:$0xff]  ;;  %v1091_v40 = vld [vmem:[%s9682_s6 + $0x10] sm:$0xff] }
 0x14a   : > { %v648_v55 = vsub.f32 1.5, %v647_v23  ;;  %v598_v56 = vpop.f32.mrf.mxu1  ;;  %1297 = vmatpush.msrb.mxu2 %v1249_v44 }
 0x14b   : > { %v5818_v57 = vpop.eup %5817  ;;  %v599_v58 = vadd.f32 1e-06, %v598_v56  ;;  %v1238_v56 = vld [vmem:[%s9684_s8 + $0x80] sm:$0xff] }
 0x14c   : > { %v655_v59 = vmul.f32 %v5818_v57, %v596_v47  ;;  %v649_v60 = vmul.f32 %v5816_v46, %v648_v55  ;;  %vm661_vm1 = vweird.f32 %v5818_v57  ;;  %v6522_v47 = vperm.slane %v708_v20, 0  ;;  %v6642_v20 = vld [vmem:[%s9681_s5] ss:$0 sm:$0xff] }
 0x14d   : > { %5819 = vrsqrt.f32 %v599_v58  ;;  %vm662_vm3 = vmor %vm660_vm2, %vm661_vm1  ;;  %vm670_vm5 = vweird.f32 %v599_v58 }
 0x14e   : > { %v656_v61 = vmul.f32 %v5818_v57, %v655_v59  ;;  %v653_v62 = vsel %vm652_vm15, %v5816_v46, %v649_v60  ;;  %v1247_v46 = vld [vmem:[%s9684_s8 + $0xc8] sm:$0xff]  ;;  %v1097_v59 = vld [vmem:[%s9682_s6 + $0x40] sm:$0xff] }
 0x14f   : > { %v688_v63 = vmul.f32 %v653_v62, %v6379_v29  ;;  %1298 = vmatpush.msrb.mxu2 %v1247_v46  ;;  %v1239_v60 = vld [vmem:[%s9684_s8 + $0x88] sm:$0xff]  ;;  %v1237_v62 = vld [vmem:[%s9684_s8 + $0x78] sm:$0xff] }
 0x150   : > { %v657_v0 = vmul.f32 0.5, %v656_v61  ;;  %v1096_v61 = vld [vmem:[%s9682_s6 + $0x38] sm:$0xff] }
 0x151   : > { %5749 = vmatmul.msk.f32.gmra.mxu2 %vm457_vm0, %v688_v63  ;;  %5757 = vmatmul.msk.f32.gmra.mxu3 %vm457_vm0, %v688_v63  ;;  %v6569_v63 = vld [vmem:[%s9680_s4] ss:$0 sm:$0xff] }
 0x152   : > { %v658_v1 = vsub.f32 1.5, %v657_v0  ;;  %v601_v2 = vpop.f32.mrf.mxu1  ;;  %1299 = vmatpush.msrb.mxu2 %v1245_v50  ;;  %v6574_v0 = vld [vmem:[%s9680_s4 + $0x1] ss:$0 sm:$0xff]  ;;  %v1090_v50 = vld [vmem:[%s9682_s6 + $0x8] sm:$0xff] }
 0x153   : > { %v5820_v3 = vpop.eup %5819  ;;  %v602_v4 = vadd.f32 1e-06, %v601_v2  ;;  %v1095_v2 = vld [vmem:[%s9682_s6 + $0x30] sm:$0xff] }
 0x154   : > { %v665_v5 = vmul.f32 %v5820_v3, %v599_v58  ;;  %v659_v6 = vmul.f32 %v5818_v57, %v658_v1  ;;  %vm671_vm4 = vweird.f32 %v5820_v3  ;;  %1300 = vmatpush.msrb.mxu2 %v1243_v52  ;;  %v1098_v58 = vld [vmem:[%s9682_s6 + $0x48] sm:$0xff]  ;;  %v1234_v1 = vld [vmem:[%s9684_s8 + $0x60] sm:$0xff] }
 0x155   : > { %5821 = vrsqrt.f32 %v602_v4  ;;  %vm672_vm6 = vmor %vm670_vm5, %vm671_vm4  ;;  %vm680_vm8 = vweird.f32 %v602_v4 }
 0x156   : > { %v666_v7 = vmul.f32 %v5820_v3, %v665_v5  ;;  %v663_v16 = vsel %vm662_vm3, %v5818_v57, %v659_v6  ;;  %v1236_v57 = vld [vmem:[%s9684_s8 + $0x70] sm:$0xff]  ;;  %1301 = vmatpush.msrb.mxu2 %v1241_v26  ;;  %v1223_v26 = vld [vmem:[%s9684_s8 + $0x8] sm:$0xff] }
 0x157   : > { %v689_v18 = vmul.f32 %v663_v16, %v6385_v32 }
 0x158   : > { %v667_v29 = vmul.f32 0.5, %v666_v7  ;;  %1302 = vmatpush.msrb.mxu2 %v1239_v60 }
 0x159   : > { %5750 = vmatmul.msk.f32.gmra.mxu2 %vm457_vm0, %v689_v18  ;;  %5758 = vmatmul.msk.f32.gmra.mxu3 %vm457_vm0, %v689_v18  ;;  %v1232_v18 = vld [vmem:[%s9684_s8 + $0x50] sm:$0xff] }
 0x15a   : > { %v668_v19 = vsub.f32 1.5, %v667_v29  ;;  %1303 = vmatpush.msrb.mxu2 %v1237_v62  ;;  %v1094_v29 = vld [vmem:[%s9682_s6 + $0x28] sm:$0xff] }
 0x15b   : > { %v5822_v21 = vpop.eup %5821 }
 0x15c   : > { %v675_v22 = vmul.f32 %v5822_v21, %v602_v4  ;;  %v669_v24 = vmul.f32 %v5820_v3, %v668_v19  ;;  %vm681_vm7 = vweird.f32 %v5822_v21  ;;  %v6588_v4 = vld [vmem:[%s9680_s4 + $0x2] ss:$0 sm:$0xff]  ;;  %v1233_v19 = vld [vmem:[%s9684_s8 + $0x58] sm:$0xff] }
 0x15d   : > { %vm682_vm9 = vmor %vm680_vm8, %vm681_vm7 }
 0x15e   : > { %v676_v25 = vmul.f32 %v5822_v21, %v675_v22  ;;  %v673_v27 = vsel %vm672_vm6, %v5820_v3, %v669_v24  ;;  %v1235_v3 = vld [vmem:[%s9684_s8 + $0x68] sm:$0xff]  ;;  %v6606_v24 = vld [vmem:[%s9680_s4 + $0x3] ss:$0 sm:$0xff] }
 0x15f   : > { %v690_v28 = vmul.f32 %v673_v27, %v6391_v35  ;;  %v1246_v35 = vld [vmem:[%s9684_s8 + $0xc0] sm:$0xff]  ;;  %1304 = vmatpush.msrb.mxu2 %v1235_v3 }
 0x160   : > { %v677_v30 = vmul.f32 0.5, %v676_v25  ;;  %1257 = vmatpush.msrb.mxu1 %v1246_v35  ;;  %v1092_v35 = vld [vmem:[%s9682_s6 + $0x18] sm:$0xff] }
 0x161   : > { %5751 = vmatmul.msk.f32.gmra.mxu2 %vm457_vm0, %v690_v28  ;;  %5759 = vmatmul.msk.f32.gmra.mxu3 %vm457_vm0, %v690_v28  ;;  %v1230_v28 = vld [vmem:[%s9684_s8 + $0x40] sm:$0xff] }
 0x162   : > { %v678_v32 = vsub.f32 1.5, %v677_v30  ;;  %1258 = vmatpush.msrb.mxu1 %v1244_v36  ;;  %v1093_v30 = vld [vmem:[%s9682_s6 + $0x20] sm:$0xff]  ;;  %1305 = vmatpush.msrb.mxu2 %v1233_v19  ;;  %v1229_v36 = vld [vmem:[%s9684_s8 + $0x38] sm:$0xff] }
 0x164   : > { %v679_v31 = vmul.f32 %v5822_v21, %v678_v32  ;;  %1259 = vmatpush.msrb.mxu1 %v1242_v41  ;;  %v1231_v32 = vld [vmem:[%s9684_s8 + $0x48] sm:$0xff] }
 0x165   : > { %1306 = vmatpush.msrb.mxu2 %v1231_v32  ;;  %v1227_v41 = vld [vmem:[%s9684_s8 + $0x28] sm:$0xff] }
 0x166   : > { %v683_v17 = vsel %vm682_vm9, %v5822_v21, %v679_v31  ;;  %1260 = vmatpush.msrb.mxu1 %v1240_v42 }
 0x167   : > { %v691_v33 = vmul.f32 %v683_v17, %v6397_v38  ;;  %v1104_v38 = vld [vmem:[%s9682_s6 + $0x78] sm:$0xff]  ;;  %1307 = vmatpush.msrb.mxu2 %v1229_v36 }
 0x168   : > { %1109 = vmatpush.msrb.mxu0 %v1104_v38  ;;  %1261 = vmatpush.msrb.mxu1 %v1238_v56  ;;  %v1222_v56 = vld [vmem:[%s9684_s8] sm:$0xff] }
 0x169   : > { %5752 = vmatmul.msk.f32.gmra.mxu2 %vm457_vm0, %v691_v33  ;;  %5760 = vmatmul.msk.f32.gmra.mxu3 %vm457_vm0, %v691_v33 }
 0x16a   : > { %1110 = vmatpush.msrb.mxu0 %v1103_v39  ;;  %1262 = vmatpush.msrb.mxu1 %v1236_v57  ;;  %v1226_v39 = vld [vmem:[%s9684_s8 + $0x20] sm:$0xff] }
 0x16b   : > { %1308 = vmatpush.msrb.mxu2 %v1227_v41  ;;  %v1089_v57 = vld [vmem:[%s9682_s6] sm:$0xff] }
 0x16c   : > { %1111 = vmatpush.msrb.mxu0 %v1102_v43  ;;  %1263 = vmatpush.msrb.mxu1 %v1234_v1 }
 0x16e   : > { %1112 = vmatpush.msrb.mxu0 %v1101_v45  ;;  %1264 = vmatpush.msrb.mxu1 %v1232_v18 }
 0x170   : > { %1113 = vmatpush.msrb.mxu0 %v1100_v49  ;;  %1265 = vmatpush.msrb.mxu1 %v1230_v28  ;;  %v1224_v49 = vld [vmem:[%s9684_s8 + $0x10] sm:$0xff] }
 0x172   : > { %1114 = vmatpush.msrb.mxu0 %v1099_v51  ;;  %1266 = vmatpush.msrb.mxu1 %v1228_v34 }
 0x174   : > { %1115 = vmatpush.msrb.mxu0 %v1098_v58  ;;  %1267 = vmatpush.msrb.mxu1 %v1226_v39 }
 0x176   : > { %1116 = vmatpush.msrb.mxu0 %v1097_v59  ;;  %1268 = vmatpush.msrb.mxu1 %v1224_v49 }
 0x178   : > { %1117 = vmatpush.msrb.mxu0 %v1096_v61  ;;  %1269 = vmatpush.msrb.mxu1 %v1222_v56 }
 0x17a   : > { %1118 = vmatpush.msrb.mxu0 %v1095_v2 }
 0x17c   : > { %1119 = vmatpush.msrb.mxu0 %v1094_v29 }
 0x17e   : > { %1120 = vmatpush.msrb.mxu0 %v1093_v30 }
 0x180   : > { %1121 = vmatpush.msrb.mxu0 %v1092_v35 }
 0x182   : > { %1122 = vmatpush.msrb.mxu0 %v1091_v40 }
 0x184   : > { %1123 = vmatpush.msrb.mxu0 %v1090_v50 }
 0x186   : > { %1124 = vmatpush.msrb.mxu0 %v1089_v57 }
 0x1b4   : > { %v755_v23 = vpop.f32.mrf.mxu2  ;;  %v796_v53 = vpop.f32.mrf.mxu3 }
 0x1b5   : > { %v756_v54 = vadd.f32 %v755_v23, %v6522_v47  ;;  %v6540_v55 = vadd.f32 %v796_v53, %v6524_v48  ;;  %v1225_v23 = vld [vmem:[%s9684_s8 + $0x18] sm:$0xff] }
 0x1b6   : > { %1309 = vmatpush.msrb.mxu2 %v1225_v23 }
 0x1b7   : > { %10065 = vst [vmem:[#allocation16_spill] sm:$0xff] %v6540_v55  ;;  %v831_v25 = vmul.f32 %v6569_v63, %v756_v54 }
 0x1b8   : > { %821 = vst [vmem:[#allocation2 + $0x8] sm:$0xff] %v756_v54  ;;  %1310 = vmatpush.msrb.mxu2 %v1223_v26 }
 0x1bc   : > { %v758_v5 = vpop.f32.mrf.mxu2  ;;  %v799_v6 = vpop.f32.mrf.mxu3 }
 0x1bd   : > { %v759_v7 = vadd.f32 %v758_v5, %v6522_v47  ;;  %v6592_v16 = vadd.f32 %v799_v6, %v6524_v48 }
 0x1bf   : > { %10066 = vst [vmem:[#allocation17_spill] sm:$0xff] %v6592_v16  ;;  %v839_v21 = vld [vmem:[#allocation2 + $0x7] sm:$0xff]  ;;  %v832_v53 = vmul.f32 %v6569_v63, %v759_v7 }
 0x1c0   : > { %v865_v22 = vld [vmem:[#allocation2 + $0x6] sm:$0xff]  ;;  %v849_v27 = vmul.f32 %v6574_v0, %v839_v21  ;;  %822 = vst [vmem:[#allocation2 + $0x10] sm:$0xff] %v759_v7 }
 0x1c1   : > { %v891_v31 = vld [vmem:[#allocation2 + $0x5] sm:$0xff]  ;;  %v875_v33 = vmul.f32 %v6588_v4, %v865_v22 }
 0x1c2   : > { %v857_v17 = vadd.f32 %v849_v27, %v831_v25  ;;  %v901_v37 = vmul.f32 %v6606_v24, %v891_v31 }
 0x1c4   : > { %v883_v38 = vadd.f32 %v875_v33, %v857_v17  ;;  %v761_v42 = vpop.f32.mrf.mxu2  ;;  %v802_v43 = vpop.f32.mrf.mxu3 }
 0x1c5   : > { %v762_v45 = vadd.f32 %v761_v42, %v6522_v47  ;;  %v6646_v46 = vadd.f32 %v802_v43, %v6524_v48 }
 0x1c6   : > { %v909_v44 = vadd.f32 %v901_v37, %v883_v38 }
 0x1c7   : > { %10067 = vst [vmem:[#allocation18_spill] sm:$0xff] %v6646_v46  ;;  %v840_v51 = vld [vmem:[#allocation2 + $0xf] sm:$0xff]  ;;  %v833_v22 = vmul.f32 %v6569_v63, %v762_v45 }
 0x1c8   : > { %v866_v52 = vld [vmem:[#allocation2 + $0xe] sm:$0xff]  ;;  %v850_v54 = vmul.f32 %v6574_v0, %v840_v51  ;;  %823 = vst [vmem:[#allocation2 + $0x18] sm:$0xff] %v762_v45  ;;  %v6669_v59 = vadd.f32 %v6642_v20, %v909_v44 }
 0x1c9   : > { %v892_v58 = vld [vmem:[#allocation2 + $0xd] sm:$0xff]  ;;  %v876_v61 = vmul.f32 %v6588_v4, %v866_v52 }
 0x1ca   : > { %v858_v60 = vadd.f32 %v850_v54, %v832_v53  ;;  %v929_v62 = vsub.f32 0.0, %v6669_v59  ;;  %v902_v2 = vmul.f32 %v6606_v24, %v892_v58 }
 0x1cc   : > { %v884_v1 = vadd.f32 %v876_v61, %v858_v60  ;;  %v764_v3 = vpop.f32.mrf.mxu2  ;;  %v805_v5 = vpop.f32.mrf.mxu3  ;;  %v937_v6 = vmul.f32 1.442695, %v929_v62 }
 0x1cd   : > { %v765_v18 = vadd.f32 %v764_v3, %v6522_v47  ;;  %v6676_v29 = vadd.f32 %v805_v5, %v6524_v48 }
 0x1ce   : > { %v910_v7 = vadd.f32 %v902_v2, %v884_v1  ;;  %5823 = vpow2.f32 %v937_v6 }
 0x1cf   : > { %10068 = vst [vmem:[#allocation19_spill] sm:$0xff] %v6676_v29  ;;  %v841_v19 = vld [vmem:[#allocation2 + $0x17] sm:$0xff]  ;;  %v834_v44 = vmul.f32 %v6569_v63, %v765_v18 }
 0x1d0   : > { %v867_v21 = vld [vmem:[#allocation2 + $0x16] sm:$0xff]  ;;  %v851_v25 = vmul.f32 %v6574_v0, %v841_v19  ;;  %824 = vst [vmem:[#allocation2 + $0x20] sm:$0xff] %v765_v18  ;;  %v6681_v28 = vadd.f32 %v6642_v20, %v910_v7 }
 0x1d1   : > { %v893_v27 = vld [vmem:[#allocation2 + $0x15] sm:$0xff]  ;;  %v877_v32 = vmul.f32 %v6588_v4, %v867_v21 }
 0x1d2   : > { %v859_v30 = vadd.f32 %v851_v25, %v833_v22  ;;  %v930_v31 = vsub.f32 0.0, %v6681_v28  ;;  %v903_v33 = vmul.f32 %v6606_v24, %v893_v27 }
 0x1d4   : > { %v885_v17 = vadd.f32 %v877_v32, %v859_v30  ;;  %v5824_v34 = vpop.eup %5823  ;;  %v767_v35 = vpop.f32.mrf.mxu2  ;;  %v939_v38 = vmul.f32 1.442695, %v930_v31 }
 0x1d5   : > { %v808_v36 = vpop.f32.mrf.mxu3  ;;  %v768_v39 = vadd.f32 %v767_v35, %v6522_v47  ;;  %v953_v41 = vadd.f32 1.0, %v5824_v34 }
 0x1d6   : > { %v911_v37 = vadd.f32 %v903_v33, %v885_v17  ;;  %v6688_v40 = vadd.f32 %v808_v36, %v6524_v48  ;;  %5825 = vpow2.f32 %v939_v38 }
 0x1d7   : > { %v842_v42 = vld [vmem:[#allocation2 + $0x1f] sm:$0xff]  ;;  %825 = vst [vmem:[#allocation2 + $0x28] sm:$0xff] %v768_v39  ;;  %5827 = vrcp.f32 %v953_v41  ;;  %v835_v6 = vmul.f32 %v6569_v63, %v768_v39  ;;  %v970_v31 = vand.u32 2147483647, %v953_v41  ;;  %v972_v17 = vand.u32 2147483648, %v953_v41 }
 0x1d8   : > { %10069 = vst [vmem:[#allocation20_spill] sm:$0xff] %v6688_v40  ;;  %v868_v43 = vld [vmem:[#allocation2 + $0x1e] sm:$0xff]  ;;  %v852_v45 = vmul.f32 %v6574_v0, %v842_v42  ;;  %v6694_v52 = vadd.f32 %v6642_v20, %v911_v37  ;;  %vm966_vm11 = vweird.f32 %v953_v41 }
 0x1d9   : > { %v878_v50 = vmul.f32 %v6588_v4, %v868_v43  ;;  %v894_v51 = vld [vmem:[#allocation2 + $0x1d] sm:$0xff]  ;;  %vm971_vm13 = vcmp.eq.f32.partialorder %v970_v31, 8.507059e+37 }
 0x1da   : > { %v860_v49 = vadd.f32 %v852_v45, %v834_v44  ;;  %v931_v53 = vsub.f32 0.0, %v6694_v52  ;;  %v904_v56 = vmul.f32 %v6606_v24, %v894_v51 }
 0x1dc   : > { %v886_v23 = vadd.f32 %v878_v50, %v860_v49  ;;  %v5826_v54 = vpop.eup %5825  ;;  %v770_v57 = vpop.f32.mrf.mxu2  ;;  %v941_v5 = vmul.f32 1.442695, %v931_v53  ;;  %v973_v53 = vor.u32 1.1754944e-38, %v972_v17 }
 0x1dd   : > { %v811_v58 = vpop.f32.mrf.mxu3  ;;  %v771_v26 = vadd.f32 %v770_v57, %v6522_v47  ;;  %v6702_v61 = vadd.f32 1.0, %v5826_v54  ;;  %v5828_v62 = vpop.eup %5827 }
 0x1de   : > { %v6700_v60 = vadd.f32 %v811_v58, %v6524_v48  ;;  %v912_v1 = vadd.f32 %v904_v56, %v886_v23  ;;  %v843_v2 = vld [vmem:[#allocation2 + $0x27] sm:$0xff]  ;;  %v962_v19 = vmul.f32 %v5828_v62, %v953_v41  ;;  %vm967_vm10 = vweird.f32 %v5828_v62 }
 0x1df   : > { %v869_v3 = vld [vmem:[#allocation2 + $0x26] sm:$0xff]  ;;  %v853_v7 = vmul.f32 %v6574_v0, %v843_v2  ;;  %826 = vst [vmem:[#allocation2 + $0x30] sm:$0xff] %v771_v26  ;;  %5829 = vrcp.f32 %v6702_v61  ;;  %v836_v51 = vmul.f32 %v6569_v63, %v771_v26  ;;  %vm968_vm12 = vmor %vm966_vm11, %vm967_vm10  ;;  %vm981_vm15 = vweird.f32 %v6702_v61 }
 0x1e0   : > { %10070 = vst [vmem:[#allocation21_spill] sm:$0xff] %v6700_v60  ;;  %v895_v18 = vld [vmem:[#allocation2 + $0x25] sm:$0xff]  ;;  %v879_v22 = vmul.f32 %v6588_v4, %v869_v3  ;;  %5831 = vpow2.f32 %v941_v5  ;;  %v963_v25 = vsub.f32 1.0, %v962_v19  ;;  %v6709_v27 = vadd.f32 %v6642_v20, %v912_v1 }
 0x1e1   : > { %v861_v21 = vadd.f32 %v853_v7, %v835_v6  ;;  %v905_v32 = vmul.f32 %v6606_v24, %v895_v18  ;;  %v985_v6 = vand.u32 2147483647, %v6702_v61  ;;  %v987_v18 = vand.u32 2147483648, %v6702_v61 }
 0x1e2   : > { %v964_v35 = vmul.f32 %v5828_v62, %v963_v25  ;;  %v932_v36 = vsub.f32 0.0, %v6709_v27 }
 0x1e3   : > { %v887_v30 = vadd.f32 %v879_v22, %v861_v21  ;;  %vm986_vm2 = vcmp.eq.f32.partialorder %v985_v6, 8.507059e+37 }
 0x1e4   : > { %v773_v33 = vpop.f32.mrf.mxu2  ;;  %v965_v45 = vadd.f32 %v5828_v62, %v964_v35  ;;  %v943_v49 = vmul.f32 1.442695, %v932_v36 }
 0x1e5   : > { %v814_v34 = vpop.f32.mrf.mxu3  ;;  %v913_v38 = vadd.f32 %v905_v32, %v887_v30  ;;  %v774_v37 = vadd.f32 %v773_v33, %v6522_v47  ;;  %v5830_v42 = vpop.eup %5829 }
 0x1e6   : > { %v6715_v39 = vadd.f32 %v814_v34, %v6524_v48  ;;  %v844_v43 = vld [vmem:[#allocation2 + $0x2f] sm:$0xff]  ;;  %v5832_v50 = vpop.eup %5831  ;;  %v969_v57 = vsel %vm968_vm12, %v5828_v62, %v965_v45  ;;  %v977_v58 = vmul.f32 %v5830_v42, %v6702_v61  ;;  %5833 = vpow2.f32 %v943_v49 }
 0x1e7   : > { %v870_v44 = vld [vmem:[#allocation2 + $0x2e] sm:$0xff]  ;;  %v854_v23 = vmul.f32 %v6574_v0, %v844_v43  ;;  %827 = vst [vmem:[#allocation2 + $0x38] sm:$0xff] %v774_v37  ;;  %v6722_v1 = vadd.f32 1.0, %v5832_v50  ;;  %v974_v2 = vsel %vm971_vm13, %v973_v53, %v969_v57  ;;  %v6725_v26 = vadd.f32 %v6642_v20, %v913_v38 }
 0x1e8   : > { %10071 = vst [vmem:[#allocation22_spill] sm:$0xff] %v6715_v39  ;;  %v880_v54 = vmul.f32 %v6588_v4, %v870_v44  ;;  %v896_v56 = vld [vmem:[#allocation2 + $0x2d] sm:$0xff]  ;;  %v6728_v3 = vmul.f32 %v974_v2, %v6669_v59  ;;  %v978_v5 = vsub.f32 1.0, %v977_v58  ;;  %vm982_vm14 = vweird.f32 %v5830_v42 }
 0x1e9   : > { %v862_v41 = vadd.f32 %v854_v23, %v836_v51  ;;  %5835 = vrcp.f32 %v6722_v1  ;;  %v906_v62 = vmul.f32 %v6606_v24, %v896_v56  ;;  %v933_v19 = vsub.f32 0.0, %v6725_v26  ;;  %vm983_vm1 = vmor %vm981_vm15, %vm982_vm14 }
 0x1ea   : > { %10072 = vst [vmem:[#allocation23_spill] sm:$0xff] %v6728_v3  ;;  %1125 = vmatmul.f32.vlgmr.msrb.gmra.mxu0 %v6728_v3  ;;  %1270 = vmatmul.f32.vlgmr.msrb.gmra.mxu1 %v6728_v3  ;;  %v979_v59 = vmul.f32 %v5830_v42, %v978_v5  ;;  %v837_v36 = vmul.f32 %v6569_v63, %v774_v37  ;;  %v988_v43 = vor.u32 1.1754944e-38, %v987_v18  ;;  %v1000_v53 = vand.u32 2147483647, %v6722_v1 }
 0x1eb   : > { %v888_v7 = vadd.f32 %v880_v54, %v862_v41  ;;  %1311 = vmatmul.f32.vlgmr.msrb.gmra.mxu2 %v6728_v3  ;;  %v945_v34 = vmul.f32 1.442695, %v933_v19  ;;  %v1002_v58 = vand.u32 2147483648, %v6722_v1  ;;  %vm996_vm4 = vweird.f32 %v6722_v1 }
 0x1ec   : > { %v776_v21 = vpop.f32.mrf.mxu2  ;;  %v980_v33 = vadd.f32 %v5830_v42, %v979_v59  ;;  %v5834_v35 = vpop.eup %5833  ;;  %vm1001_vm5 = vcmp.eq.f32.partialorder %v1000_v53, 8.507059e+37 }
 0x1ed   : > { %v817_v22 = vpop.f32.mrf.mxu3  ;;  %v914_v25 = vadd.f32 %v906_v62, %v888_v7  ;;  %v777_v30 = vadd.f32 %v776_v21, %v6522_v47  ;;  %5837 = vpow2.f32 %v945_v34  ;;  %v1003_v59 = vor.u32 1.1754944e-38, %v1002_v58 }
 0x1ee   : > { %v6740_v32 = vadd.f32 %v817_v22, %v6524_v48  ;;  %v845_v31 = vld [vmem:[#allocation2 + $0x37] sm:$0xff]  ;;  %v984_v45 = vsel %vm983_vm1, %v5830_v42, %v980_v33  ;;  %v6745_v48 = vadd.f32 1.0, %v5834_v35 }
 0x1ef   : > { %v871_v17 = vld [vmem:[#allocation2 + $0x36] sm:$0xff]  ;;  %v855_v38 = vmul.f32 %v6574_v0, %v845_v31  ;;  %828 = vst [vmem:[#allocation2 + $0x40] sm:$0xff] %v777_v30  ;;  %v5836_v44 = vpop.eup %5835  ;;  %v6748_v49 = vadd.f32 %v6642_v20, %v914_v25  ;;  %v989_v51 = vsel %vm986_vm2, %v988_v43, %v984_v45  ;;  %v838_v62 = vmul.f32 %v6569_v63, %v777_v30 }
 0x1f0   : > { %10073 = vst [vmem:[#allocation24_spill] sm:$0xff] %v6740_v32  ;;  %v897_v47 = vld [vmem:[#allocation2 + $0x35] sm:$0xff]  ;;  %v881_v50 = vmul.f32 %v6588_v4, %v871_v17  ;;  %v992_v37 = vmul.f32 %v5836_v44, %v6722_v1  ;;  %v6753_v23 = vmul.f32 %v989_v51, %v6681_v28  ;;  %5839 = vrcp.f32 %v6745_v48 }
 0x1f1   : > { %v863_v61 = vadd.f32 %v855_v38, %v837_v36  ;;  %v907_v54 = vmul.f32 %v6606_v24, %v897_v47  ;;  %v934_v57 = vsub.f32 0.0, %v6748_v49  ;;  %vm997_vm3 = vweird.f32 %v5836_v44 }
 0x1f2   : > { %10074 = vst [vmem:[#allocation25_spill] sm:$0xff] %v6753_v23  ;;  %v993_v56 = vsub.f32 1.0, %v992_v37  ;;  %1128 = vmatmul.f32.gmra.mxu0 %v6753_v23  ;;  %1273 = vmatmul.f32.gmra.mxu1 %v6753_v23  ;;  %vm998_vm6 = vmor %vm996_vm4, %vm997_vm3  ;;  %v1017_v38 = vand.u32 2147483648, %v6745_v48  ;;  %vm1011_vm8 = vweird.f32 %v6745_v48 }
 0x1f3   : > { %v889_v42 = vadd.f32 %v881_v50, %v863_v61  ;;  %1314 = vmatmul.f32.gmra.mxu2 %v6753_v23  ;;  %v947_v2 = vmul.f32 1.442695, %v934_v57  ;;  %v5838_v5 = vpop.eup %5837 }
 0x1f4   : > { %v994_v28 = vmul.f32 %v5836_v44, %v993_v56  ;;  %v6766_v25 = vadd.f32 1.0, %v5838_v5  ;;  %v1018_v37 = vor.u32 1.1754944e-38, %v1017_v38  ;;  %v6810_v5 = vld [vmem:[%s9685_s9 + $0x3c8] sm:$0xff]  ;;  %v6853_v38 = vld [vmem:[%s9685_s9 + $0x300] sm:$0xff] }
 0x1f5   : > { %v915_v41 = vadd.f32 %v907_v54, %v889_v42  ;;  %5841 = vpow2.f32 %v947_v2 }
 0x1f6   : > { %v846_v6 = vld [vmem:[#allocation2 + $0x3f] sm:$0xff]  ;;  %v995_v19 = vadd.f32 %v5836_v44, %v994_v28  ;;  %v5840_v21 = vpop.eup %5839  ;;  %5843 = vrcp.f32 %v6766_v25  ;;  %vm1026_vm12 = vweird.f32 %v6766_v25 }
 0x1f7   : > { %v872_v7 = vld [vmem:[#allocation2 + $0x3e] sm:$0xff]  ;;  %v856_v18 = vmul.f32 %v6574_v0, %v846_v6  ;;  %v6769_v31 = vadd.f32 %v6642_v20, %v915_v41  ;;  %v1007_v63 = vmul.f32 %v5840_v21, %v6745_v48  ;;  %vm1012_vm7 = vweird.f32 %v5840_v21 }
 0x1f8   : > { %v898_v22 = vld [vmem:[#allocation2 + $0x3d] sm:$0xff]  ;;  %v882_v33 = vmul.f32 %v6588_v4, %v872_v7  ;;  %v999_v1 = vsel %vm998_vm6, %v5836_v44, %v995_v19  ;;  %v1015_v44 = vand.u32 2147483647, %v6745_v48  ;;  %vm1013_vm9 = vmor %vm1011_vm8, %vm1012_vm7  ;;  %v1030_v41 = vand.u32 2147483647, %v6766_v25 }
 0x1f9   : > { %v864_v17 = vadd.f32 %v856_v18, %v838_v62  ;;  %v1004_v30 = vsel %vm1001_vm5, %v1003_v59, %v999_v1  ;;  %v908_v34 = vmul.f32 %v6606_v24, %v898_v22  ;;  %v1008_v36 = vsub.f32 1.0, %v1007_v63  ;;  %v6820_v19 = vld [vmem:[%s9685_s9 + $0x380] sm:$0xff] }
 0x1fa   : > { %v6776_v35 = vmul.f32 %v1004_v30, %v6694_v52  ;;  %v935_v43 = vsub.f32 0.0, %v6769_v31  ;;  %vm1016_vm10 = vcmp.eq.f32.partialorder %v1015_v44, 8.507059e+37  ;;  %vm1031_vm14 = vcmp.eq.f32.partialorder %v1030_v41, 8.507059e+37  ;;  %v6837_v1 = vld [vmem:[%s9685_s9 + $0x340] sm:$0xff]  ;;  %v6953_v41 = vld [vmem:[%s9685_s9 + $0x288] sm:$0xff] }
 0x1fb   : > { %v890_v0 = vadd.f32 %v882_v33, %v864_v17  ;;  %v1009_v4 = vmul.f32 %v5840_v21, %v1008_v36  ;;  %v5842_v45 = vpop.eup %5841  ;;  %v6829_v17 = vld [vmem:[%s9685_s9 + $0x388] sm:$0xff] }
 0x1fc   : > { %10075 = vst [vmem:[#allocation26_spill] sm:$0xff] %v6776_v35  ;;  %1131 = vmatmul.f32.gmra.mxu0 %v6776_v35  ;;  %1276 = vmatmul.f32.gmra.mxu1 %v6776_v35  ;;  %v949_v24 = vmul.f32 1.442695, %v935_v43  ;;  %v6785_v61 = vadd.f32 1.0, %v5842_v45  ;;  %v5844_v51 = vpop.eup %5843  ;;  %v6848_v36 = vld [vmem:[%s9685_s9 + $0x348] sm:$0xff]  ;;  %v9698_v45 = vunpack.c.h.bf16 %v6820_v19 }
 0x1fd   : > { %v916_v47 = vadd.f32 %v908_v34, %v890_v0  ;;  %1317 = vmatmul.f32.gmra.mxu2 %v6776_v35  ;;  %v1010_v52 = vadd.f32 %v5840_v21, %v1009_v4  ;;  %v1022_v42 = vmul.f32 %v5844_v51, %v6766_v25  ;;  %vm1027_vm11 = vweird.f32 %v5844_v51 }
 0x1fe   : > { %5845 = vpow2.f32 %v949_v24  ;;  %vm1028_vm13 = vmor %vm1026_vm12, %vm1027_vm11  ;;  %v1045_v0 = vand.u32 2147483647, %v6785_v61  ;;  %v9717_v34 = vunpack.c.l.bf16 %v6820_v19  ;;  %v9706_v4 = vunpack.c.h.bf16 %v6829_v17 }
 0x1ff   : > { %v6788_v50 = vadd.f32 %v6642_v20, %v916_v47  ;;  %v1014_v53 = vsel %vm1013_vm9, %v5840_v21, %v1010_v52  ;;  %5847 = vrcp.f32 %v6785_v61  ;;  %v1023_v48 = vsub.f32 1.0, %v1022_v42 }
 0x200   : > { %v1019_v54 = vsel %vm1016_vm10, %v1018_v37, %v1014_v53  ;;  %v1032_v20 = vand.u32 2147483648, %v6766_v25  ;;  %v9719_v25 = vunpack.c.h.bf16 %v6810_v5  ;;  %v1047_v47 = vand.u32 2147483648, %v6785_v61 }
 0x201   : > { %v6793_v56 = vmul.f32 %v1019_v54, %v6709_v27  ;;  %v936_v57 = vsub.f32 0.0, %v6788_v50  ;;  %v1024_v58 = vmul.f32 %v5844_v51, %v1023_v48  ;;  %v6805_v27 = vld [vmem:[%s9685_s9 + $0x3c0] sm:$0xff]  ;;  %v9701_v24 = vunpack.c.l.bf16 %v6810_v5 }
 0x202   : > { %v9732_v18 = vunpack.c.l.bf16 %v6805_v27  ;;  %v1033_v21 = vor.u32 1.1754944e-38, %v1032_v20  ;;  %v9705_v59 = vunpack.c.h.bf16 %v6805_v27  ;;  %1843 = vmatpush.msra.mxu2 %v9719_v25  ;;  %v9700_v52 = vunpack.c.l.bf16 %v6837_v1 }
 0x203   : > { %10076 = vst [vmem:[#allocation27_spill] sm:$0xff] %v6793_v56  ;;  %v951_v28 = vmul.f32 1.442695, %v936_v57  ;;  %v1025_v7 = vadd.f32 %v5844_v51, %v1024_v58  ;;  %vm1041_vm1 = vweird.f32 %v6785_v61  ;;  %v9699_v53 = vunpack.c.h.bf16 %v6848_v36  ;;  %1802 = vmatpush.msra.mxu1 %v9701_v24 }
 0x204   : > { %1134 = vmatmul.f32.gmra.mxu0 %v6793_v56  ;;  %1279 = vmatmul.f32.gmra.mxu1 %v6793_v56  ;;  %v5846_v2 = vpop.eup %5845  ;;  %v9697_v42 = vunpack.c.l.bf16 %v6829_v17  ;;  %v9696_v54 = vunpack.c.l.bf16 %v6853_v38  ;;  %vm6885_vm2 = vcmp.eq.f32.partialorder %v1045_v0, 8.507059e+37  ;;  %v6928_v0 = vld [vmem:[%s9685_s9 + $0x2c8] sm:$0xff] }
 0x205   : > { %1320 = vmatmul.f32.gmra.mxu2 %v6793_v56  ;;  %v6812_v6 = vpop.eup %5847  ;;  %v6814_v62 = vadd.f32 1.0, %v5846_v2  ;;  %5849 = vpow2.f32 %v951_v28  ;;  %v1029_v33 = vsel %vm1028_vm13, %v5844_v51, %v1025_v7  ;;  %1720 = vmatpush.msrb.mxu3 %v9732_v18  ;;  %v6875_v51 = vld [vmem:[%s9685_s9 + $0x2c0] sm:$0xff]  ;;  %v1048_v28 = vor.u32 1.1754944e-38, %v1047_v47 }
 0x206   : > { %v1037_v22 = vmul.f32 %v6812_v6, %v6785_v61  ;;  %v1034_v63 = vsel %vm1031_vm14, %v1033_v21, %v1029_v33  ;;  %1761 = vmatpush.msra.mxu0 %v9705_v59  ;;  %vm1042_vm15 = vweird.f32 %v6812_v6  ;;  %v9691_v61 = vunpack.c.h.bf16 %v6837_v1  ;;  %1844 = vmatpush.msra.mxu2 %v9706_v4  ;;  %v6939_v47 = vld [vmem:[%s9685_s9 + $0x240] sm:$0xff] }
 0x207   : > { %5851 = vrcp.f32 %v6814_v62  ;;  %v6856_v43 = vmul.f32 %v1034_v63, %v6725_v26  ;;  %1721 = vmatpush.msrb.mxu3 %v9717_v34  ;;  %v6870_v26 = vld [vmem:[%s9685_s9 + $0x308] sm:$0xff]  ;;  %vm6898_vm3 = vmor %vm1041_vm1, %vm1042_vm15  ;;  %v9690_v7 = vunpack.c.l.bf16 %v6848_v36  ;;  %v9692_v21 = vunpack.c.l.bf16 %v6875_v51  ;;  %1803 = vmatpush.msra.mxu1 %v9697_v42 }
 0x208   : > { %v1038_v30 = vsub.f32 1.0, %v1037_v22  ;;  %v9693_v2 = vunpack.c.h.bf16 %v6870_v26  ;;  %v6912_v22 = vld [vmem:[%s9685_s9 + $0x280] sm:$0xff]  ;;  %1762 = vmatpush.msra.mxu0 %v9698_v45  ;;  %1845 = vmatpush.msra.mxu2 %v9699_v53  ;;  %vm1056_vm5 = vweird.f32 %v6814_v62  ;;  %v9709_v45 = vunpack.c.l.bf16 %v6953_v41 }
 0x209   : > { %10077 = vst [vmem:[#allocation28_spill] sm:$0xff] %v6856_v43  ;;  %1722 = vmatpush.msrb.mxu3 %v9700_v52  ;;  %1804 = vmatpush.msra.mxu1 %v9690_v7  ;;  %v9702_v57 = vunpack.c.l.bf16 %v6912_v22 }
 0x20a   : > { %v1039_v44 = vmul.f32 %v6812_v6, %v1038_v30  ;;  %v9694_v30 = vunpack.c.h.bf16 %v6853_v38  ;;  %1763 = vmatpush.msra.mxu0 %v9691_v61  ;;  %1846 = vmatpush.msra.mxu2 %v9693_v2  ;;  %v9715_v61 = vunpack.c.l.bf16 %v6928_v0  ;;  %v6979_v2 = vld [vmem:[%s9685_s9 + $0x248] sm:$0xff] }
 0x20b   : > { %v5850_v37 = vpop.eup %5849  ;;  %1723 = vmatpush.msrb.mxu3 %v9696_v54 }
 0x20c   : > { %1137 = vmatmul.f32.gmra.mxu0 %v6856_v43  ;;  %1282 = vmatmul.f32.gmra.mxu1 %v6856_v43  ;;  %v1040_v48 = vadd.f32 %v6812_v6, %v1039_v44  ;;  %v6889_v20 = vadd.f32 1.0, %v5850_v37 }
 0x20d   : > { %1323 = vmatmul.f32.gmra.mxu2 %v6856_v43  ;;  %v6894_v58 = vpop.eup %5851  ;;  %1724 = vmatpush.msrb.mxu3 %v9692_v21  ;;  %v9707_v21 = vunpack.c.l.bf16 %v6939_v47 }
 0x20e   : > { %v1044_v33 = vsel %vm6898_vm3, %v6812_v6, %v1040_v48  ;;  %v1052_v63 = vmul.f32 %v6894_v58, %v6814_v62  ;;  %5853 = vrcp.f32 %v6889_v20  ;;  %v9695_v48 = vunpack.c.l.bf16 %v6870_v26  ;;  %1764 = vmatpush.msra.mxu0 %v9694_v30 }
 0x20f   : > { %v1049_v6 = vsel %vm6885_vm2, %v1048_v28, %v1044_v33  ;;  %v1060_v28 = vand.u32 2147483647, %v6814_v62  ;;  %v9703_v33 = vunpack.c.h.bf16 %v6875_v51  ;;  %vm1057_vm4 = vweird.f32 %v6894_v58  ;;  %1725 = vmatpush.msrb.mxu3 %v9702_v57 }
 0x210   : > { %v6942_v44 = vmul.f32 %v1049_v6, %v6748_v49  ;;  %v1053_v37 = vsub.f32 1.0, %v1052_v63  ;;  %v1062_v49 = vand.u32 2147483648, %v6814_v62  ;;  %v9704_v63 = vunpack.c.h.bf16 %v6928_v0  ;;  %v6966_v6 = vld [vmem:[%s9685_s9 + $0x200] sm:$0xff]  ;;  %1805 = vmatpush.msra.mxu1 %v9695_v48  ;;  %vm1058_vm6 = vmor %vm1056_vm5, %vm1057_vm4 }
 0x211   : > { %v9716_v30 = vunpack.c.h.bf16 %v6953_v41  ;;  %v6988_v48 = vld [vmem:[%s9685_s9 + $0x1c0] sm:$0xff]  ;;  %v9708_v53 = vunpack.c.l.bf16 %v6966_v6  ;;  %1765 = vmatpush.msra.mxu0 %v9703_v33  ;;  %v9710_v62 = vunpack.c.h.bf16 %v6939_v47  ;;  %vm1061_vm7 = vcmp.eq.f32.partialorder %v1060_v28, 8.507059e+37  ;;  %1726 = vmatpush.msrb.mxu3 %v9707_v21 }
 0x212   : > { %10082 = vst [vmem:[#allocation29_spill] sm:$0xff] %v6942_v44  ;;  %v1054_v7 = vmul.f32 %v6894_v58, %v1053_v37  ;;  %v9711_v37 = vunpack.c.h.bf16 %v6912_v22  ;;  %v1063_v52 = vor.u32 1.1754944e-38, %v1062_v49  ;;  %1847 = vmatpush.msra.mxu2 %v9704_v63  ;;  %1806 = vmatpush.msra.mxu1 %v9715_v61  ;;  %v7017_v49 = vld [vmem:[%s9685_s9 + $0x208] sm:$0xff]  ;;  %v9712_v33 = vunpack.c.l.bf16 %v6979_v2 }
 0x213   : > { %v9714_v63 = vunpack.c.l.bf16 %v6988_v48  ;;  %v1075_v28 = vand.u32 2147483647, %v6889_v20  ;;  %v1077_v21 = vand.u32 2147483648, %v6889_v20  ;;  %1727 = vmatpush.msrb.mxu3 %v9708_v53  ;;  %v7056_v53 = vld [vmem:[%s9685_s9 + $0x140] sm:$0xff]  ;;  %vm1071_vm9 = vweird.f32 %v6889_v20 }
 0x214   : > { %1140 = vmatmul.f32.gmra.mxu0 %v6942_v44  ;;  %1285 = vmatmul.f32.gmra.mxu1 %v6942_v44  ;;  %v6990_v54 = vpop.eup %5853  ;;  %v1055_v42 = vadd.f32 %v6894_v58, %v1054_v7  ;;  %v9713_v7 = vunpack.c.h.bf16 %v6979_v2  ;;  %10086 = vst [vmem:[#allocation33_spill] sm:$0xff] %v7056_v53 }
 0x215   : > { %1326 = vmatmul.f32.gmra.mxu2 %v6942_v44  ;;  %v1067_v24 = vmul.f32 %v6990_v54, %v6889_v20  ;;  %1766 = vmatpush.msra.mxu0 %v9711_v37  ;;  %vm1072_vm8 = vweird.f32 %v6990_v54  ;;  %v1078_v61 = vor.u32 1.1754944e-38, %v1077_v21  ;;  %vm1076_vm11 = vcmp.eq.f32.partialorder %v1075_v28, 8.507059e+37  ;;  %v7096_v21 = vld [vmem:[%s9685_s9 + $0x148] sm:$0xff]  ;;  %v7108_v28 = vld [vmem:[%s9685_s9 + $0xc0] sm:$0xff] }
 0x216   : > { %v1059_v57 = vsel %vm1058_vm6, %v6894_v58, %v1055_v42  ;;  %1848 = vmatpush.msra.mxu2 %v9716_v30  ;;  %v7028_v42 = vld [vmem:[%s9685_s9 + $0x180] sm:$0xff]  ;;  %1807 = vmatpush.msra.mxu1 %v9709_v45  ;;  %vm1073_vm10 = vmor %vm1071_vm9, %vm1072_vm8  ;;  %10089 = vst [vmem:[#allocation36_spill] sm:$0xff] %v7096_v21 }
 0x217   : > { %v1064_v59 = vsel %vm1061_vm7, %v1063_v52, %v1059_v57  ;;  %v1068_v4 = vsub.f32 1.0, %v1067_v24  ;;  %10083 = vst [vmem:[#allocation30_spill] sm:$0xff] %v7028_v42  ;;  %v9718_v24 = vunpack.c.h.bf16 %v6966_v6  ;;  %v7043_v52 = vld [vmem:[%s9685_s9 + $0x1c8] sm:$0xff]  ;;  %1767 = vmatpush.msra.mxu0 %v9710_v62  ;;  %v9720_v57 = vunpack.c.l.bf16 %v7017_v49  ;;  %1728 = vmatpush.msrb.mxu3 %v9714_v63  ;;  %v7078_v63 = vld [vmem:[%s9685_s9 + $0x100] sm:$0xff] }
 0x218   : > { %v7031_v58 = vmul.f32 %v1064_v59, %v6769_v31  ;;  %10085 = vst [vmem:[#allocation32_spill] sm:$0xff] %v7043_v52  ;;  %1849 = vmatpush.msra.mxu2 %v9713_v7  ;;  %v9731_v59 = vunpack.c.h.bf16 %v7017_v49  ;;  %1808 = vmatpush.msra.mxu1 %v9712_v33  ;;  %v9727_v45 = vunpack.c.l.bf16 %v7028_v42  ;;  %v7067_v62 = vld [vmem:[%s9685_s9 + $0x188] sm:$0xff]  ;;  %v9730_v33 = vunpack.c.h.bf16 %v7043_v52 }
 0x219   : > { %v1069_v31 = vmul.f32 %v6990_v54, %v1068_v4  ;;  %v9724_v4 = vunpack.c.h.bf16 %v6988_v48  ;;  %10087 = vst [vmem:[#allocation34_spill] sm:$0xff] %v7067_v62  ;;  %v9723_v7 = vunpack.c.l.bf16 %v7043_v52  ;;  %1768 = vmatpush.msra.mxu0 %v9718_v24  ;;  %v9722_v20 = vunpack.c.h.bf16 %v7028_v42 }
 0x21a   : > { %10084 = vst [vmem:[#allocation31_spill] sm:$0xff] %v7031_v58  ;;  %1850 = vmatpush.msra.mxu2 %v9731_v59  ;;  %1809 = vmatpush.msra.mxu1 %v9720_v57  ;;  %v9726_v34 = vunpack.c.h.bf16 %v7067_v62  ;;  %v9725_v24 = vunpack.c.l.bf16 %v7067_v62  ;;  %v7171_v59 = vld [vmem:[%s9685_s9] sm:$0xff] }
 0x21b   : > { %v1070_v37 = vadd.f32 %v6990_v54, %v1069_v31  ;;  %10088 = vst [vmem:[#allocation35_spill] sm:$0xff] %v7078_v63  ;;  %v9721_v31 = vunpack.c.l.bf16 %v7056_v53  ;;  %1729 = vmatpush.msrb.mxu3 %v9727_v45  ;;  %1769 = vmatpush.msra.mxu0 %v9724_v4 }
 0x21c   : > { %1143 = vmatmul.f32.gmra.mxu0 %v7031_v58  ;;  %1288 = vmatmul.f32.gmra.mxu1 %v7031_v58  ;;  %10090 = vst [vmem:[#allocation37_spill] sm:$0xff] %v7108_v28 }
 0x21d   : > { %1329 = vmatmul.f32.gmra.mxu2 %v7031_v58  ;;  %v1074_v30 = vsel %vm1073_vm10, %v6990_v54, %v1070_v37  ;;  %v9729_v54 = vunpack.c.h.bf16 %v7056_v53  ;;  %v9728_v37 = vunpack.c.l.bf16 %v7078_v63  ;;  %1810 = vmatpush.msra.mxu1 %v9723_v7  ;;  %v9736_v7 = vunpack.c.h.bf16 %v7078_v63  ;;  %10097 = vst [vmem:[#allocation44_spill] sm:$0xff] %v7171_v59 }
 0x21e   : > { %v1079_v25 = vsel %vm1076_vm11, %v1078_v61, %v1074_v30  ;;  %1851 = vmatpush.msra.mxu2 %v9730_v33  ;;  %v7120_v61 = vld [vmem:[%s9685_s9 + $0x108] sm:$0xff]  ;;  %1730 = vmatpush.msrb.mxu3 %v9721_v31  ;;  %v9734_v30 = vunpack.c.h.bf16 %v7096_v21  ;;  %v9735_v31 = vunpack.c.l.bf16 %v7108_v28 }
 0x21f   : > { %v7111_v57 = vmul.f32 %v1079_v25, %v6788_v50  ;;  %10092 = vst [vmem:[#allocation39_spill] sm:$0xff] %v7120_v61  ;;  %1770 = vmatpush.msra.mxu0 %v9722_v20  ;;  %v9733_v50 = vunpack.c.l.bf16 %v7096_v21  ;;  %v7130_v25 = vld [vmem:[%s9685_s9 + $0x80] sm:$0xff]  ;;  %1811 = vmatpush.msra.mxu1 %v9725_v24  ;;  %v7141_v20 = vld [vmem:[%s9685_s9 + $0xc8] sm:$0xff]  ;;  %v9737_v4 = vunpack.c.l.bf16 %v7120_v61 }
 0x220   : > { %10093 = vst [vmem:[#allocation40_spill] sm:$0xff] %v7130_v25  ;;  %1852 = vmatpush.msra.mxu2 %v9726_v34  ;;  %1731 = vmatpush.msrb.mxu3 %v9728_v37  ;;  %v7152_v24 = vld [vmem:[%s9685_s9 + $0x40] sm:$0xff]  ;;  %v9738_v34 = vunpack.c.h.bf16 %v7120_v61  ;;  %v7161_v37 = vld [vmem:[%s9685_s9 + $0x88] sm:$0xff] }
 0x221   : > { %10091 = vst [vmem:[#allocation38_spill] sm:$0xff] %v7111_v57  ;;  %1771 = vmatpush.msra.mxu0 %v9729_v54  ;;  %1812 = vmatpush.msra.mxu1 %v9733_v50  ;;  %v9739_v54 = vunpack.c.h.bf16 %v7108_v28  ;;  %v7182_v50 = vld [vmem:[%s9685_s9 + $0x48] sm:$0xff]  ;;  %v9744_v45 = vunpack.c.h.bf16 %v7161_v37  ;;  %v10103_v18 = vunpack.c.l.bf16 %v7152_v24 }
 0x222   : > { %10094 = vst [vmem:[#allocation41_spill] sm:$0xff] %v7141_v20  ;;  %1853 = vmatpush.msra.mxu2 %v9734_v30  ;;  %1732 = vmatpush.msrb.mxu3 %v9735_v31  ;;  %v9740_v30 = vunpack.c.h.bf16 %v7130_v25  ;;  %v10099_v31 = vunpack.c.l.bf16 %v7130_v25  ;;  %v7204_v33 = vld [vmem:[%s9685_s9 + $0x8] sm:$0xff] }
 0x223   : > { %10095 = vst [vmem:[#allocation42_spill] sm:$0xff] %v7152_v24  ;;  %1772 = vmatpush.msra.mxu0 %v9736_v7  ;;  %1813 = vmatpush.msra.mxu1 %v9737_v4  ;;  %v10100_v7 = vunpack.c.l.bf16 %v7141_v20  ;;  %v9741_v4 = vunpack.c.h.bf16 %v7171_v59 }
 0x224   : > { %1146 = vmatmul.f32.gmra.mxu0 %v7111_v57  ;;  %1291 = vmatmul.f32.gmra.mxu1 %v7111_v57  ;;  %10096 = vst [vmem:[#allocation43_spill] sm:$0xff] %v7161_v37 }
 0x225   : > { %1332 = vmatmul.f32.gmra.mxu2 %v7111_v57  ;;  %10098 = vst [vmem:[#allocation45_spill] sm:$0xff] %v7182_v50  ;;  %1733 = vmatpush.msrb.mxu3 %v10099_v31  ;;  %v10102_v31 = vunpack.c.h.bf16 %v7141_v20 }
 0x226   : > { %1854 = vmatpush.msra.mxu2 %v9738_v34  ;;  %1773 = vmatpush.msra.mxu0 %v9739_v54  ;;  %10101 = vst [vmem:[#allocation46_spill] sm:$0xff] %v7204_v33  ;;  %v10105_v34 = vunpack.c.l.bf16 %v7171_v59  ;;  %v10107_v54 = vunpack.c.l.bf16 %v7182_v50 }
 0x227   : > { %1814 = vmatpush.msra.mxu1 %v10100_v7  ;;  %1734 = vmatpush.msrb.mxu3 %v10103_v18  ;;  %v10104_v7 = vunpack.c.l.bf16 %v7161_v37  ;;  %v10106_v18 = vunpack.c.h.bf16 %v7152_v24 }
 0x228   : > { %1855 = vmatpush.msra.mxu2 %v10102_v31  ;;  %1774 = vmatpush.msra.mxu0 %v9740_v30  ;;  %v9743_v31 = vunpack.c.h.bf16 %v7204_v33  ;;  %v10108_v30 = vunpack.c.h.bf16 %v7182_v50 }
 0x229   : > { %1815 = vmatpush.msra.mxu1 %v10104_v7  ;;  %1735 = vmatpush.msrb.mxu3 %v10105_v34  ;;  %v9742_v7 = vunpack.c.l.bf16 %v7204_v33  ;;  %v7238_v34 = vld [vmem:[%s9683_s7] ss:$0 sm:$0xff] }
 0x22a   : > { %1856 = vmatpush.msra.mxu2 %v9744_v45  ;;  %1775 = vmatpush.msra.mxu0 %v10106_v18 }
 0x22b   : > { %1816 = vmatpush.msra.mxu1 %v10107_v54 }
 0x22c   : > { %1857 = vmatpush.msra.mxu2 %v10108_v30  ;;  %1776 = vmatpush.msra.mxu0 %v9741_v4 }
 0x22d   : > { %1817 = vmatpush.msra.mxu1 %v9742_v7 }
 0x22e   : > { %1858 = vmatpush.msra.mxu2 %v9743_v31 }
 0x267   : > { %v1126_v54 = vpop.f32.mrf.mxu0  ;;  %v7240_v18 = vpop.f32.mrf.mxu1 }
 0x268   : > { %v1127_v30 = vadd.f32 %v7238_v34, %v1126_v54  ;;  %1736 = vmatmul.f32.vlgmr.msrb.gmra.mxu3 %v7240_v18  ;;  %1777 = vmatmul.f32.vlgmr.msra.gmra.mxu0 %v7240_v18 }
 0x269   : > { %1818 = vmatmul.f32.vlgmr.msra.gmra.mxu1 %v7240_v18  ;;  %1859 = vmatmul.f32.vlgmr.msra.gmra.mxu2 %v7240_v18 }
 0x26a   : > { %v1158_v4 = vand.u32 2147483647, %v1127_v30  ;;  %v1150_v40 = vmax.f32 %v1127_v30, 0.0  ;;  %v7308_v30 = vld [vmem:[%s9686_s10] sm:$0xff] }
 0x26c   : > { %v1166_v7 = vsub.f32 0.0, %v1158_v4 }
 0x26e   : > { %v1174_v31 = vmul.f32 1.442695, %v1166_v7  ;;  %v7260_v7 = vld [vmem:[%s9685_s9 + $0x3d0] sm:$0xff] }
 0x26f   : > { %v1129_v45 = vpop.f32.mrf.mxu0  ;;  %v7247_v15 = vpop.f32.mrf.mxu1  ;;  %10109 = vst [vmem:[#allocation47_spill] sm:$0xff] %v7260_v7  ;;  %v9757_v11 = vunpack.c.l.bf16 %v7260_v7  ;;  %v10112_v60 = vunpack.c.h.bf16 %v7260_v7 }
 0x270   : > { %5855 = vpow2.f32 %v1174_v31  ;;  %v7250_v14 = vadd.f32 %v7238_v34, %v1129_v45  ;;  %1739 = vmatmul.f32.gmra.mxu3 %v7247_v15  ;;  %1780 = vmatmul.f32.gmra.mxu0 %v7247_v15  ;;  %v7265_v45 = vld [vmem:[%s9685_s9 + $0x3d8] sm:$0xff] }
 0x271   : > { %1821 = vmatmul.f32.gmra.mxu1 %v7247_v15  ;;  %1862 = vmatmul.f32.gmra.mxu2 %v7247_v15  ;;  %10110 = vst [vmem:[#allocation48_spill] sm:$0xff] %v7265_v45  ;;  %v9756_v10 = vunpack.c.h.bf16 %v7265_v45  ;;  %v9760_v32 = vunpack.c.l.bf16 %v7265_v45 }
 0x272   : > { %v1159_v54 = vand.u32 2147483647, %v7250_v14  ;;  %1884 = vmatpush.msra.mxu3 %v9757_v11  ;;  %1925 = vmatpush.msrb.mxu0 %v10112_v60 }
 0x273   : > { %2007 = vmatpush.msrb.mxu2 %v9756_v10  ;;  %1966 = vmatpush.msrb.mxu1 %v9760_v32 }
 0x274   : > { %v1167_v13 = vsub.f32 0.0, %v1159_v54  ;;  %v7273_v54 = vld [vmem:[%s9685_s9 + $0x390] sm:$0xff] }
 0x275   : > { %2008 = vmatpush.msrb.mxu2 %v9761_v9 }
 0x276   : > { %v5856_v4 = vpop.eup %5855  ;;  %v1176_v31 = vmul.f32 1.442695, %v1167_v13 }
 0x277   : > { %v1190_v12 = vadd.f32 1.0, %v5856_v4  ;;  %v9762_v4 = vunpack.c.l.bf16 %v7273_v54 }
 0x279   : > { %v1132_v13 = vpop.f32.mrf.mxu0  ;;  %5857 = vlog2.f32 %v1190_v12  ;;  %1885 = vmatpush.msra.mxu3 %v9762_v4  ;;  %v7299_v11 = vpop.f32.mrf.mxu1 }
 0x27a   : > { %v7288_v39 = vadd.f32 %v7238_v34, %v1132_v13  ;;  %5859 = vpow2.f32 %v1176_v31  ;;  %1742 = vmatmul.f32.gmra.mxu3 %v7299_v11  ;;  %1783 = vmatmul.f32.gmra.mxu0 %v7299_v11 }
 0x27b   : > { %1824 = vmatmul.f32.gmra.mxu1 %v7299_v11  ;;  %1865 = vmatmul.f32.gmra.mxu2 %v7299_v11 }
 0x27c   : > { %v1160_v12 = vand.u32 2147483647, %v7288_v39 }
 0x27e   : > { %v1168_v60 = vsub.f32 0.0, %v1160_v12  ;;  %v7313_v12 = vld [vmem:[%s9686_s10 + $0x8] sm:$0xff] }
 0x27f   : > { %v5858_v10 = vpop.eup %5857 }
 0x280   : > { %v5860_v13 = vpop.eup %5859  ;;  %v1199_v29 = vmul.f32 0.6931472, %v5858_v10  ;;  %v1178_v7 = vmul.f32 1.442695, %v1168_v60  ;;  %v1151_v60 = vmax.f32 %v7250_v14, 0.0 }
 0x281   : > { %v1191_v32 = vadd.f32 1.0, %v5860_v13 }
 0x282   : > { %v1214_v31 = vadd.f32 %v1199_v29, %v1150_v40 }
 0x283   : > { %5861 = vlog2.f32 %v1191_v32 }
 0x284   : > { %v3040_v9 = vrot.slane %v1214_v31, 1  ;;  %v3041_v4 = vrot.slane %v1214_v31, 2  ;;  %v3042_v46 = vrot.slane %v1214_v31, 3  ;;  %v3043_v16 = vrot.slane %v1214_v31, 4 }
 0x285   : > { %v3044_v10 = vrot.slane %v1214_v31, 5  ;;  %v3045_v55 = vrot.slane %v1214_v31, 6  ;;  %v3098_v45 = vperm.slane %v1214_v31, 0  ;;  %v3046_v29 = vrot.slane %v1214_v31, 7 }
 0x286   : > { %v3099_v40 = vperm.slane %v3040_v9, 0  ;;  %v3100_v13 = vperm.slane %v3041_v4, 0  ;;  %v3101_v33 = vperm.slane %v3042_v46, 0  ;;  %v3102_v59 = vperm.slane %v3043_v16, 0 }
 0x287   : > { %v3103_v50 = vperm.slane %v3044_v10, 0  ;;  %v3226_v24 = vmul.f32 %v3098_v45, %v7308_v30  ;;  %v3227_v37 = vmul.f32 %v3098_v45, %v7313_v12  ;;  %v3104_v28 = vperm.slane %v3045_v55, 0 }
 0x288   : > { %v3228_v25 = vmul.f32 %v3099_v40, %v7308_v30  ;;  %v3229_v20 = vmul.f32 %v3099_v40, %v7313_v12  ;;  %v3230_v61 = vmul.f32 %v3100_v13, %v7308_v30  ;;  %5863 = vpow2.f32 %v1178_v7 }
 0x289   : > { %v3105_v9 = vperm.slane %v3046_v29, 0  ;;  %v3231_v46 = vmul.f32 %v3100_v13, %v7313_v12  ;;  %v3232_v16 = vmul.f32 %v3101_v33, %v7308_v30  ;;  %v3233_v4 = vmul.f32 %v3101_v33, %v7313_v12  ;;  %v5862_v53 = vpop.eup %5861 }
 0x28a   : > { %v3234_v45 = vmul.f32 %v3102_v59, %v7308_v30  ;;  %v3235_v10 = vmul.f32 %v3102_v59, %v7313_v12  ;;  %v3236_v40 = vmul.f32 %v3103_v50, %v7308_v30  ;;  %v3354_v32 = vmul.f32 1.442695, %v3226_v24  ;;  %v7335_v24 = vld [vmem:[%s9685_s9 + $0x350] sm:$0xff] }
 0x28b   : > { %v3237_v55 = vmul.f32 %v3103_v50, %v7313_v12  ;;  %v3356_v63 = vmul.f32 1.442695, %v3227_v37  ;;  %v3358_v21 = vmul.f32 1.442695, %v3228_v25  ;;  %v3360_v14 = vmul.f32 1.442695, %v3229_v20 }
 0x28c   : > { %v3238_v7 = vmul.f32 %v3104_v28, %v7308_v30  ;;  %5865 = vpow2.f32 %v3354_v32  ;;  %v3362_v29 = vmul.f32 1.442695, %v3230_v61  ;;  %v5272_v13 = vmul.f32 %v1214_v31, %v6728_v3  ;;  %10113 = vst [vmem:[#allocation50_spill] sm:$0xff] %v7335_v24  ;;  %v7340_v20 = vld [vmem:[%s9685_s9 + $0x358] sm:$0xff] }
 0x28d   : > { %v3239_v33 = vmul.f32 %v3104_v28, %v7313_v12  ;;  %v3240_v62 = vmul.f32 %v3105_v9, %v7308_v30  ;;  %5867 = vpow2.f32 %v3356_v63  ;;  %v3364_v59 = vmul.f32 1.442695, %v3231_v46  ;;  %10114 = vst [vmem:[#allocation51_spill] sm:$0xff] %v7340_v20  ;;  %v7348_v63 = vld [vmem:[%s9685_s9 + $0x310] sm:$0xff]  ;;  %v7353_v25 = vld [vmem:[%s9685_s9 + $0x318] sm:$0xff] }
 0x28e   : > { %v7342_v37 = vpop.eup %5863  ;;  %v3241_v61 = vmul.f32 %v3105_v9, %v7313_v12  ;;  %5869 = vpow2.f32 %v3358_v21  ;;  %v3366_v28 = vmul.f32 1.442695, %v3232_v16  ;;  %v3368_v50 = vmul.f32 1.442695, %v3233_v4  ;;  %5280 = vst [vmem:[#allocation6] sm:$0xff] %v5272_v13 }
 0x28f   : > { %5871 = vpow2.f32 %v3360_v14  ;;  %v3370_v31 = vmul.f32 1.442695, %v3234_v45  ;;  %v3372_v46 = vmul.f32 1.442695, %v3235_v10  ;;  %v3374_v32 = vmul.f32 1.442695, %v3236_v40 }
 0x290   : > { %5873 = vpow2.f32 %v3362_v29  ;;  %v1201_v9 = vmul.f32 0.6931472, %v5862_v53  ;;  %v9808_v21 = vunpack.c.l.bf16 %v7335_v24  ;;  %v9807_v16 = vunpack.c.h.bf16 %v7340_v20 }
 0x291   : > { %5875 = vpow2.f32 %v3364_v59  ;;  %v9806_v4 = vunpack.c.h.bf16 %v7273_v54  ;;  %v9805_v3 = vunpack.c.l.bf16 %v7278_v8  ;;  %v9802_v42 = vunpack.c.l.bf16 %v7348_v63 }
 0x292   : > { %v5866_v52 = vpop.eup %5865  ;;  %5877 = vpow2.f32 %v3366_v28  ;;  %v7360_v14 = vadd.f32 %v1201_v9, %v1151_v60  ;;  %1886 = vmatpush.msra.mxu3 %v9808_v21  ;;  %2009 = vmatpush.msrb.mxu2 %v9807_v16  ;;  %v9801_v53 = vunpack.c.h.bf16 %v7353_v25  ;;  %v9803_v45 = vunpack.c.h.bf16 %v7335_v24 }
 0x293   : > { %v5868_v10 = vpop.eup %5867  ;;  %5879 = vpow2.f32 %v3368_v50  ;;  %v3376_v40 = vmul.f32 1.442695, %v3237_v55  ;;  %v3378_v29 = vmul.f32 1.442695, %v3238_v7  ;;  %3610 = vst [vmem:[#allocation3] sm:$0xff] %v5866_v52  ;;  %1926 = vmatpush.msrb.mxu0 %v9806_v4  ;;  %1967 = vmatpush.msrb.mxu1 %v9805_v3  ;;  %v9804_v60 = vunpack.c.l.bf16 %v7340_v20 }
 0x294   : > { %v5870_v13 = vpop.eup %5869  ;;  %5881 = vpow2.f32 %v3370_v31  ;;  %3611 = vst [vmem:[#allocation3 + $0x8] sm:$0xff] %v5868_v10  ;;  %v3047_v59 = vrot.slane %v7360_v14, 1  ;;  %v3048_v28 = vrot.slane %v7360_v14, 2  ;;  %v3049_v50 = vrot.slane %v7360_v14, 3  ;;  %1887 = vmatpush.msra.mxu3 %v9802_v42  ;;  %2010 = vmatpush.msrb.mxu2 %v9801_v53 }
 0x295   : > { %v5872_v52 = vpop.eup %5871  ;;  %5883 = vpow2.f32 %v3372_v46  ;;  %v3380_v55 = vmul.f32 1.442695, %v3239_v33  ;;  %v3382_v7 = vmul.f32 1.442695, %v3240_v62  ;;  %3612 = vst [vmem:[#allocation3 + $0x10] sm:$0xff] %v5870_v13  ;;  %v3050_v31 = vrot.slane %v7360_v14, 4  ;;  %1927 = vmatpush.msrb.mxu0 %v9803_v45  ;;  %1968 = vmatpush.msrb.mxu1 %v9804_v60 }
 0x296   : > { %v5874_v9 = vpop.eup %5873  ;;  %5885 = vpow2.f32 %v3374_v32  ;;  %3613 = vst [vmem:[#allocation3 + $0x18] sm:$0xff] %v5872_v52  ;;  %v3051_v10 = vrot.slane %v7360_v14, 5  ;;  %v3106_v53 = vperm.slane %v7360_v14, 0  ;;  %v3107_v42 = vperm.slane %v3047_v59, 0 }
 0x297   : > { %v5876_v46 = vpop.eup %5875  ;;  %5887 = vpow2.f32 %v3376_v40  ;;  %v3384_v62 = vmul.f32 1.442695, %v3241_v61  ;;  %3614 = vst [vmem:[#allocation3 + $0x20] sm:$0xff] %v5874_v9  ;;  %v3108_v33 = vperm.slane %v3048_v28, 0  ;;  %v3052_v45 = vrot.slane %v7360_v14, 6 }
 0x298   : > { %v5878_v13 = vpop.eup %5877  ;;  %5889 = vpow2.f32 %v3378_v29  ;;  %3615 = vst [vmem:[#allocation3 + $0x28] sm:$0xff] %v5876_v46  ;;  %v3053_v60 = vrot.slane %v7360_v14, 7  ;;  %v3109_v3 = vperm.slane %v3049_v50, 0  ;;  %v3110_v52 = vperm.slane %v3050_v31, 0 }
 0x299   : > { %v5880_v32 = vpop.eup %5879  ;;  %5891 = vpow2.f32 %v3380_v55  ;;  %3616 = vst [vmem:[#allocation3 + $0x30] sm:$0xff] %v5878_v13  ;;  %v3242_v4 = vmul.f32 %v3106_v53, %v7308_v30  ;;  %v1192_v59 = vadd.f32 1.0, %v7342_v37  ;;  %v3111_v61 = vperm.slane %v3051_v10, 0 }
 0x29a   : > { %v5882_v40 = vpop.eup %5881  ;;  %5893 = vpow2.f32 %v3382_v7  ;;  %3617 = vst [vmem:[#allocation3 + $0x38] sm:$0xff] %v5880_v32  ;;  %v3243_v29 = vmul.f32 %v3106_v53, %v7313_v12  ;;  %v3244_v28 = vmul.f32 %v3107_v42, %v7308_v30  ;;  %v3245_v50 = vmul.f32 %v3107_v42, %v7313_v12  ;;  %v7401_v53 = vld [vmem:[%s9685_s9 + $0x2d0] sm:$0xff] }
 0x29b   : > { %v5884_v9 = vpop.eup %5883  ;;  %5895 = vpow2.f32 %v3384_v62  ;;  %3618 = vst [vmem:[#allocation3 + $0x40] sm:$0xff] %v5882_v40  ;;  %v3246_v55 = vmul.f32 %v3108_v33, %v7308_v30  ;;  %v3112_v37 = vperm.slane %v3052_v45, 0  ;;  %v3113_v13 = vperm.slane %v3053_v60, 0  ;;  %v7409_v45 = vld [vmem:[%s9685_s9 + $0x2d8] sm:$0xff] }
 0x29c   : > { %v5886_v46 = vpop.eup %5885  ;;  %3619 = vst [vmem:[#allocation3 + $0x48] sm:$0xff] %v5884_v9  ;;  %v3247_v7 = vmul.f32 %v3108_v33, %v7313_v12  ;;  %v3248_v10 = vmul.f32 %v3109_v3, %v7308_v30  ;;  %v3249_v42 = vmul.f32 %v3109_v3, %v7313_v12  ;;  %v3250_v32 = vmul.f32 %v3110_v52, %v7308_v30 }
 0x29d   : > { %10115 = vst [vmem:[#allocation52_spill] sm:$0xff] %v7401_v53  ;;  %v5888_v62 = vpop.eup %5887  ;;  %v3251_v40 = vmul.f32 %v3110_v52, %v7313_v12  ;;  %v3386_v9 = vmul.f32 1.442695, %v3242_v4  ;;  %v3252_v33 = vmul.f32 %v3111_v61, %v7308_v30  ;;  %v3388_v16 = vmul.f32 1.442695, %v3243_v29 }
 0x29e   : > { %3620 = vst [vmem:[#allocation3 + $0x50] sm:$0xff] %v5886_v46  ;;  %v5890_v60 = vpop.eup %5889  ;;  %v3390_v21 = vmul.f32 1.442695, %v3244_v28  ;;  %5897 = vlog2.f32 %v1192_v59  ;;  %v3392_v3 = vmul.f32 1.442695, %v3245_v50  ;;  %v9822_v52 = vunpack.c.l.bf16 %v7401_v53 }
 0x29f   : > { %10116 = vst [vmem:[#allocation53_spill] sm:$0xff] %v7409_v45  ;;  %v5892_v46 = vpop.eup %5891  ;;  %5899 = vpow2.f32 %v3386_v9  ;;  %v3394_v31 = vmul.f32 1.442695, %v3246_v55  ;;  %v3396_v20 = vmul.f32 1.442695, %v3247_v7  ;;  %v5273_v24 = vmul.f32 %v7360_v14, %v6753_v23 }
 0x2a0   : > { %3621 = vst [vmem:[#allocation3 + $0x58] sm:$0xff] %v5888_v62  ;;  %v5894_v4 = vpop.eup %5893  ;;  %5901 = vpow2.f32 %v3388_v16  ;;  %v9821_v62 = vunpack.c.h.bf16 %v7409_v45  ;;  %v3253_v59 = vmul.f32 %v3111_v61, %v7313_v12  ;;  %v3398_v29 = vmul.f32 1.442695, %v3248_v10  ;;  %1888 = vmatpush.msra.mxu3 %v9822_v52  ;;  %v7423_v16 = vld [vmem:[%s9685_s9 + $0x290] sm:$0xff]  ;;  %v7432_v61 = vld [vmem:[%s9685_s9 + $0x298] sm:$0xff] }
 0x2a1   : > { %3622 = vst [vmem:[#allocation3 + $0x60] sm:$0xff] %v5890_v60  ;;  %v5896_v8 = vpop.eup %5895  ;;  %5903 = vpow2.f32 %v3390_v21  ;;  %v9820_v28 = vunpack.c.h.bf16 %v7348_v63  ;;  %v3254_v14 = vmul.f32 %v3112_v37, %v7308_v30  ;;  %v3400_v50 = vmul.f32 1.442695, %v3249_v42 }
 0x2a2   : > { %3623 = vst [vmem:[#allocation3 + $0x68] sm:$0xff] %v5892_v46  ;;  %5905 = vpow2.f32 %v3392_v3  ;;  %2011 = vmatpush.msrb.mxu2 %v9821_v62  ;;  %v9819_v21 = vunpack.c.l.bf16 %v7353_v25  ;;  %v3255_v55 = vmul.f32 %v3112_v37, %v7313_v12  ;;  %v3256_v7 = vmul.f32 %v3113_v13, %v7308_v30 }
 0x2a3   : > { %3624 = vst [vmem:[#allocation3 + $0x70] sm:$0xff] %v5894_v4  ;;  %5907 = vpow2.f32 %v3394_v31  ;;  %1928 = vmatpush.msrb.mxu0 %v9820_v28  ;;  %v3404_v42 = vmul.f32 1.442695, %v3251_v40  ;;  %v3406_v9 = vmul.f32 1.442695, %v3252_v33  ;;  %v9818_v60 = vunpack.c.l.bf16 %v7423_v16 }
 0x2a4   : > { %10117 = vst [vmem:[#allocation54_spill] sm:$0xff] %v7423_v16  ;;  %v5898_v10 = vpop.eup %5897  ;;  %5909 = vpow2.f32 %v3396_v20  ;;  %1969 = vmatpush.msrb.mxu1 %v9819_v21  ;;  %v9817_v3 = vunpack.c.h.bf16 %v7432_v61  ;;  %v9816_v31 = vunpack.c.h.bf16 %v7401_v53  ;;  %v3257_v4 = vmul.f32 %v3113_v13, %v7313_v12 }
 0x2a5   : > { %3625 = vst [vmem:[#allocation3 + $0x78] sm:$0xff] %v5896_v8  ;;  %v3402_v8 = vmul.f32 1.442695, %v3250_v32  ;;  %v5900_v46 = vpop.eup %5899  ;;  %5911 = vpow2.f32 %v3398_v29  ;;  %v1203_v37 = vmul.f32 0.6931472, %v5898_v10  ;;  %1889 = vmatpush.msra.mxu3 %v9818_v60  ;;  %v10119_v29 = vmax.f32 %v7288_v39, 0.0 }
 0x2a6   : > { %10118 = vst [vmem:[#allocation55_spill] sm:$0xff] %v7432_v61  ;;  %v5902_v32 = vpop.eup %5901  ;;  %5913 = vpow2.f32 %v3400_v50  ;;  %v3408_v20 = vmul.f32 1.442695, %v3253_v59  ;;  %v3410_v33 = vmul.f32 1.442695, %v3254_v14  ;;  %2012 = vmatpush.msrb.mxu2 %v9817_v3  ;;  %1929 = vmatpush.msrb.mxu0 %v9816_v31 }
 0x2a7   : > { %5281 = vst [vmem:[#allocation6 + $0x8] sm:$0xff] %v5273_v24  ;;  %v9815_v24 = vunpack.c.l.bf16 %v7409_v45  ;;  %v5904_v40 = vpop.eup %5903  ;;  %5915 = vpow2.f32 %v3402_v8  ;;  %v7449_v10 = vadd.f32 %v1203_v37, %v10119_v29  ;;  %v3412_v59 = vmul.f32 1.442695, %v3255_v55 }
 0x2a8   : > { %3626 = vst [vmem:[#allocation3 + $0x80] sm:$0xff] %v5900_v46  ;;  %v5906_v13 = vpop.eup %5905  ;;  %5917 = vpow2.f32 %v3404_v42  ;;  %v3414_v14 = vmul.f32 1.442695, %v3256_v7  ;;  %v1135_v46 = vpop.f32.mrf.mxu0 }
 0x2a9   : > { %3627 = vst [vmem:[#allocation3 + $0x88] sm:$0xff] %v5902_v32  ;;  %1970 = vmatpush.msrb.mxu1 %v9815_v24  ;;  %v5908_v50 = vpop.eup %5907  ;;  %5919 = vpow2.f32 %v3406_v9  ;;  %v3054_v39 = vrot.slane %v7449_v10, 1  ;;  %v3055_v8 = vrot.slane %v7449_v10, 2  ;;  %v3416_v32 = vmul.f32 1.442695, %v3257_v4  ;;  %v7461_v9 = vpop.f32.mrf.mxu1 }
 0x2aa   : > { %3628 = vst [vmem:[#allocation3 + $0x90] sm:$0xff] %v5904_v40  ;;  %v5910_v37 = vpop.eup %5909  ;;  %5921 = vpow2.f32 %v3408_v20  ;;  %v3056_v42 = vrot.slane %v7449_v10, 3  ;;  %v3114_v40 = vperm.slane %v7449_v10, 0  ;;  %1745 = vmatmul.f32.gmra.mxu3 %v7461_v9  ;;  %1786 = vmatmul.f32.gmra.mxu0 %v7461_v9  ;;  %v3058_v20 = vrot.slane %v7449_v10, 5 }
 0x2ab   : > { %3629 = vst [vmem:[#allocation3 + $0x98] sm:$0xff] %v5906_v13  ;;  %v5912_v55 = vpop.eup %5911  ;;  %5923 = vpow2.f32 %v3410_v33  ;;  %v3115_v29 = vperm.slane %v3054_v39, 0  ;;  %v3057_v13 = vrot.slane %v7449_v10, 4  ;;  %v3116_v24 = vperm.slane %v3055_v8, 0  ;;  %1827 = vmatmul.f32.gmra.mxu1 %v7461_v9  ;;  %1868 = vmatmul.f32.gmra.mxu2 %v7461_v9 }
 0x2ac   : > { %3630 = vst [vmem:[#allocation3 + $0xa0] sm:$0xff] %v5908_v50  ;;  %v5914_v7 = vpop.eup %5913  ;;  %5925 = vpow2.f32 %v3412_v59  ;;  %v3059_v33 = vrot.slane %v7449_v10, 6  ;;  %v3117_v50 = vperm.slane %v3056_v42, 0  ;;  %v3258_v39 = vmul.f32 %v3114_v40, %v7308_v30 }
 0x2ad   : > { %3631 = vst [vmem:[#allocation3 + $0xa8] sm:$0xff] %v5910_v37  ;;  %v5916_v4 = vpop.eup %5915  ;;  %5927 = vpow2.f32 %v3414_v14  ;;  %v3259_v8 = vmul.f32 %v3114_v40, %v7313_v12  ;;  %v3060_v14 = vrot.slane %v7449_v10, 7  ;;  %v3118_v3 = vperm.slane %v3057_v13, 0 }
 0x2ae   : > { %3632 = vst [vmem:[#allocation3 + $0xb0] sm:$0xff] %v5912_v55  ;;  %v5918_v59 = vpop.eup %5917  ;;  %5929 = vpow2.f32 %v3416_v32  ;;  %v3260_v55 = vmul.f32 %v3115_v29, %v7308_v30  ;;  %v3262_v60 = vmul.f32 %v3116_v24, %v7308_v30  ;;  %v3119_v42 = vperm.slane %v3058_v20, 0 }
 0x2af   : > { %3633 = vst [vmem:[#allocation3 + $0xb8] sm:$0xff] %v5914_v7  ;;  %v5920_v37 = vpop.eup %5919  ;;  %v3261_v7 = vmul.f32 %v3115_v29, %v7313_v12  ;;  %v7478_v40 = vadd.f32 %v7238_v34, %v1135_v46  ;;  %v3120_v21 = vperm.slane %v3059_v33, 0  ;;  %v3264_v28 = vmul.f32 %v3117_v50, %v7308_v30 }
 0x2b0   : > { %3634 = vst [vmem:[#allocation3 + $0xc0] sm:$0xff] %v5916_v4  ;;  %v5922_v31 = vpop.eup %5921  ;;  %v3263_v4 = vmul.f32 %v3116_v24, %v7313_v12  ;;  %v3418_v62 = vmul.f32 1.442695, %v3258_v39  ;;  %v3420_v29 = vmul.f32 1.442695, %v3259_v8  ;;  %v3121_v13 = vperm.slane %v3060_v14, 0  ;;  %v1138_v20 = vpop.f32.mrf.mxu0 }
 0x2b1   : > { %3635 = vst [vmem:[#allocation3 + $0xc8] sm:$0xff] %v5918_v59  ;;  %v5924_v32 = vpop.eup %5923  ;;  %v3422_v23 = vmul.f32 1.442695, %v3260_v55  ;;  %v3266_v24 = vmul.f32 %v3118_v3, %v7308_v30  ;;  %v3426_v46 = vmul.f32 1.442695, %v3262_v60  ;;  %v5274_v33 = vmul.f32 %v7449_v10, %v6776_v35 }
 0x2b2   : > { %3636 = vst [vmem:[#allocation3 + $0xd0] sm:$0xff] %v5920_v37  ;;  %v5926_v59 = vpop.eup %5925  ;;  %v3265_v37 = vmul.f32 %v3117_v50, %v7313_v12  ;;  %5931 = vpow2.f32 %v3418_v62  ;;  %v3267_v39 = vmul.f32 %v3118_v3, %v7313_v12  ;;  %v3428_v8 = vmul.f32 1.442695, %v3263_v4 }
 0x2b3   : > { %3637 = vst [vmem:[#allocation3 + $0xd8] sm:$0xff] %v5922_v31  ;;  %v5928_v52 = vpop.eup %5927  ;;  %v3424_v31 = vmul.f32 1.442695, %v3261_v7  ;;  %5933 = vpow2.f32 %v3420_v29  ;;  %v7487_v14 = vadd.f32 %v7238_v34, %v1138_v20  ;;  %v3268_v50 = vmul.f32 %v3119_v42, %v7308_v30 }
 0x2b4   : > { %3638 = vst [vmem:[#allocation3 + $0xe0] sm:$0xff] %v5924_v32  ;;  %v5930_v45 = vpop.eup %5929  ;;  %5935 = vpow2.f32 %v3422_v23  ;;  %v3430_v55 = vmul.f32 1.442695, %v3264_v28  ;;  %v3269_v62 = vmul.f32 %v3119_v42, %v7313_v12  ;;  %v3270_v60 = vmul.f32 %v3120_v21, %v7308_v30 }
 0x2b5   : > { %3639 = vst [vmem:[#allocation3 + $0xe8] sm:$0xff] %v5926_v59  ;;  %5937 = vpow2.f32 %v3424_v31  ;;  %v3432_v10 = vmul.f32 1.442695, %v3265_v37  ;;  %v3272_v3 = vmul.f32 %v3121_v13, %v7308_v30  ;;  %v3434_v7 = vmul.f32 1.442695, %v3266_v24 }
 0x2b6   : > { %3640 = vst [vmem:[#allocation3 + $0xf0] sm:$0xff] %v5928_v52  ;;  %v1161_v52 = vand.u32 2147483647, %v7478_v40  ;;  %5939 = vpow2.f32 %v3426_v46  ;;  %v3436_v32 = vmul.f32 1.442695, %v3267_v39  ;;  %v3273_v4 = vmul.f32 %v3121_v13, %v7313_v12 }
 0x2b7   : > { %3641 = vst [vmem:[#allocation3 + $0xf8] sm:$0xff] %v5930_v45  ;;  %v3271_v45 = vmul.f32 %v3120_v21, %v7313_v12  ;;  %5941 = vpow2.f32 %v3428_v8  ;;  %v1162_v23 = vand.u32 2147483647, %v7487_v14  ;;  %v3438_v42 = vmul.f32 1.442695, %v3268_v50 }
 0x2b8   : > { %5282 = vst [vmem:[#allocation6 + $0x10] sm:$0xff] %v5274_v33  ;;  %v5932_v28 = vpop.eup %5931  ;;  %5943 = vpow2.f32 %v3430_v55  ;;  %v3440_v29 = vmul.f32 1.442695, %v3269_v62  ;;  %v3442_v37 = vmul.f32 1.442695, %v3270_v60  ;;  %v1169_v24 = vsub.f32 0.0, %v1161_v52 }
 0x2b9   : > { %v5934_v59 = vpop.eup %5933  ;;  %5945 = vpow2.f32 %v3432_v10  ;;  %3642 = vst [vmem:[#allocation3 + $0x100] sm:$0xff] %v5932_v28  ;;  %v3444_v31 = vmul.f32 1.442695, %v3271_v45  ;;  %v3446_v20 = vmul.f32 1.442695, %v3272_v3  ;;  %v9831_v33 = vunpack.c.h.bf16 %v7423_v16  ;;  %v7502_v55 = vld [vmem:[%s9685_s9 + $0x250] sm:$0xff] }
 0x2ba   : > { %v5936_v21 = vpop.eup %5935  ;;  %5947 = vpow2.f32 %v3434_v7  ;;  %3643 = vst [vmem:[#allocation3 + $0x108] sm:$0xff] %v5934_v59  ;;  %v9830_v13 = vunpack.c.l.bf16 %v7432_v61  ;;  %v1170_v39 = vsub.f32 0.0, %v1162_v23  ;;  %v3448_v50 = vmul.f32 1.442695, %v3273_v4  ;;  %v7507_v52 = vld [vmem:[%s9685_s9 + $0x258] sm:$0xff] }
 0x2bb   : > { %v5938_v46 = vpop.eup %5937  ;;  %5949 = vpow2.f32 %v3436_v32  ;;  %3644 = vst [vmem:[#allocation3 + $0x110] sm:$0xff] %v5936_v21  ;;  %v9833_v60 = vunpack.c.l.bf16 %v7502_v55  ;;  %v9832_v10 = vunpack.c.h.bf16 %v7507_v52  ;;  %1930 = vmatpush.msrb.mxu0 %v9831_v33  ;;  %v9827_v45 = vunpack.c.h.bf16 %v7502_v55  ;;  %v7519_v32 = vld [vmem:[%s9685_s9 + $0x210] sm:$0xff]  ;;  %v7524_v23 = vld [vmem:[%s9685_s9 + $0x218] sm:$0xff] }
 0x2bc   : > { %v5940_v8 = vpop.eup %5939  ;;  %5951 = vpow2.f32 %v3438_v42  ;;  %3645 = vst [vmem:[#allocation3 + $0x118] sm:$0xff] %v5938_v46  ;;  %1971 = vmatpush.msrb.mxu1 %v9830_v13  ;;  %v1180_v7 = vmul.f32 1.442695, %v1169_v24  ;;  %v9826_v28 = vunpack.c.l.bf16 %v7507_v52  ;;  %v9829_v42 = vunpack.c.l.bf16 %v7519_v32 }
 0x2bd   : > { %10120 = vst [vmem:[#allocation56_spill] sm:$0xff] %v7502_v55  ;;  %v5942_v62 = vpop.eup %5941  ;;  %5953 = vpow2.f32 %v3440_v29  ;;  %1890 = vmatpush.msra.mxu3 %v9833_v60  ;;  %2013 = vmatpush.msrb.mxu2 %v9832_v10  ;;  %v9828_v59 = vunpack.c.h.bf16 %v7524_v23  ;;  %v1182_v29 = vmul.f32 1.442695, %v1170_v39  ;;  %v1154_v10 = vmax.f32 %v7487_v14, 0.0 }
 0x2be   : > { %10121 = vst [vmem:[#allocation57_spill] sm:$0xff] %v7507_v52  ;;  %v5944_v3 = vpop.eup %5943  ;;  %5955 = vpow2.f32 %v3442_v37  ;;  %1931 = vmatpush.msrb.mxu0 %v9827_v45  ;;  %1972 = vmatpush.msrb.mxu1 %v9826_v28 }
 0x2bf   : > { %3646 = vst [vmem:[#allocation3 + $0x120] sm:$0xff] %v5940_v8  ;;  %v5946_v4 = vpop.eup %5945  ;;  %5957 = vpow2.f32 %v3444_v31  ;;  %1891 = vmatpush.msra.mxu3 %v9829_v42  ;;  %2014 = vmatpush.msrb.mxu2 %v9828_v59 }
 0x2c0   : > { %3647 = vst [vmem:[#allocation3 + $0x128] sm:$0xff] %v5942_v62  ;;  %v5948_v37 = vpop.eup %5947  ;;  %5959 = vpow2.f32 %v3446_v20 }
 0x2c1   : > { %10122 = vst [vmem:[#allocation58_spill] sm:$0xff] %v7519_v32  ;;  %v5950_v21 = vpop.eup %5949  ;;  %5961 = vpow2.f32 %v3448_v50  ;;  %v7541_v50 = vpop.f32.mrf.mxu1 }
 0x2c2   : > { %10123 = vst [vmem:[#allocation59_spill] sm:$0xff] %v7524_v23  ;;  %v5952_v31 = vpop.eup %5951  ;;  %5963 = vpow2.f32 %v1180_v7  ;;  %1748 = vmatmul.f32.gmra.mxu3 %v7541_v50  ;;  %1789 = vmatmul.f32.gmra.mxu0 %v7541_v50 }
 0x2c3   : > { %3648 = vst [vmem:[#allocation3 + $0x130] sm:$0xff] %v5944_v3  ;;  %v5954_v20 = vpop.eup %5953  ;;  %5965 = vpow2.f32 %v1182_v29  ;;  %1830 = vmatmul.f32.gmra.mxu1 %v7541_v50  ;;  %1871 = vmatmul.f32.gmra.mxu2 %v7541_v50  ;;  %v1141_v29 = vpop.f32.mrf.mxu0 }
 0x2c4   : > { %3649 = vst [vmem:[#allocation3 + $0x138] sm:$0xff] %v5946_v4  ;;  %v5956_v24 = vpop.eup %5955 }
 0x2c5   : > { %3650 = vst [vmem:[#allocation3 + $0x140] sm:$0xff] %v5948_v37  ;;  %v5958_v46 = vpop.eup %5957 }
 0x2c6   : > { %3651 = vst [vmem:[#allocation3 + $0x148] sm:$0xff] %v5950_v21  ;;  %v5960_v39 = vpop.eup %5959  ;;  %v7548_v21 = vadd.f32 %v7238_v34, %v1141_v29 }
 0x2c7   : > { %3652 = vst [vmem:[#allocation3 + $0x150] sm:$0xff] %v5952_v31  ;;  %v5962_v8 = vpop.eup %5961  ;;  %v1153_v31 = vmax.f32 %v7478_v40, 0.0 }
 0x2c8   : > { %3653 = vst [vmem:[#allocation3 + $0x158] sm:$0xff] %v5954_v20  ;;  %v5964_v62 = vpop.eup %5963 }
 0x2c9   : > { %3654 = vst [vmem:[#allocation3 + $0x160] sm:$0xff] %v5956_v24  ;;  %v5966_v3 = vpop.eup %5965  ;;  %v1193_v7 = vadd.f32 1.0, %v5964_v62  ;;  %v1163_v62 = vand.u32 2147483647, %v7548_v21 }
 0x2ca   : > { %3655 = vst [vmem:[#allocation3 + $0x168] sm:$0xff] %v5958_v46  ;;  %v1194_v4 = vadd.f32 1.0, %v5966_v3 }
 0x2cb   : > { %3656 = vst [vmem:[#allocation3 + $0x170] sm:$0xff] %v5960_v39  ;;  %5967 = vlog2.f32 %v1193_v7  ;;  %v9835_v39 = vunpack.c.h.bf16 %v7519_v32 }
 0x2cc   : > { %3657 = vst [vmem:[#allocation3 + $0x178] sm:$0xff] %v5962_v8  ;;  %5969 = vlog2.f32 %v1194_v4  ;;  %v9838_v8 = vunpack.c.l.bf16 %v7524_v23 }
 0x2cd   : > { %1932 = vmatpush.msrb.mxu0 %v9835_v39 }
 0x2ce   : > { %1973 = vmatpush.msrb.mxu1 %v9838_v8 }
 0x2d1   : > { %v5968_v37 = vpop.eup %5967 }
 0x2d2   : > { %v1205_v20 = vmul.f32 0.6931472, %v5968_v37  ;;  %v5970_v24 = vpop.eup %5969 }
 0x2d3   : > { %v1207_v34 = vmul.f32 0.6931472, %v5970_v24 }
 0x2d4   : > { %v1217_v46 = vadd.f32 %v1205_v20, %v1153_v31 }
 0x2d5   : > { %v7564_v8 = vadd.f32 %v1207_v34, %v1154_v10 }
 0x2d6   : > { %v3061_v28 = vrot.slane %v1217_v46, 1  ;;  %v3062_v3 = vrot.slane %v1217_v46, 2  ;;  %v3063_v7 = vrot.slane %v1217_v46, 3  ;;  %v3064_v4 = vrot.slane %v1217_v46, 4 }
 0x2d7   : > { %v3065_v45 = vrot.slane %v1217_v46, 5  ;;  %v3066_v59 = vrot.slane %v1217_v46, 6  ;;  %v3122_v42 = vperm.slane %v1217_v46, 0  ;;  %v3067_v40 = vrot.slane %v1217_v46, 7 }
 0x2d8   : > { %v3123_v29 = vperm.slane %v3061_v28, 0  ;;  %v3124_v37 = vperm.slane %v3062_v3, 0  ;;  %v3125_v31 = vperm.slane %v3063_v7, 0  ;;  %v3126_v20 = vperm.slane %v3064_v4, 0 }
 0x2d9   : > { %v3127_v13 = vperm.slane %v3065_v45, 0  ;;  %v3274_v33 = vmul.f32 %v3122_v42, %v7308_v30  ;;  %v3275_v60 = vmul.f32 %v3122_v42, %v7313_v12  ;;  %v3128_v39 = vperm.slane %v3066_v59, 0 }
 0x2da   : > { %v3276_v24 = vmul.f32 %v3123_v29, %v7308_v30  ;;  %v3277_v35 = vmul.f32 %v3123_v29, %v7313_v12  ;;  %v3278_v23 = vmul.f32 %v3124_v37, %v7308_v30  ;;  %v7566_v28 = vsub.f32 0.0, %v1163_v62 }
 0x2db   : > { %v3129_v3 = vperm.slane %v3067_v40, 0  ;;  %v3279_v45 = vmul.f32 %v3124_v37, %v7313_v12  ;;  %v3280_v7 = vmul.f32 %v3125_v31, %v7308_v30  ;;  %v3281_v14 = vmul.f32 %v3125_v31, %v7313_v12 }
 0x2dc   : > { %v3282_v42 = vmul.f32 %v3126_v20, %v7308_v30  ;;  %v3283_v4 = vmul.f32 %v3126_v20, %v7313_v12  ;;  %v3284_v29 = vmul.f32 %v3127_v13, %v7308_v30  ;;  %v3450_v59 = vmul.f32 1.442695, %v3274_v33 }
 0x2dd   : > { %v3285_v32 = vmul.f32 %v3127_v13, %v7313_v12  ;;  %v3452_v10 = vmul.f32 1.442695, %v3275_v60  ;;  %v3454_v34 = vmul.f32 1.442695, %v3276_v24  ;;  %v3456_v62 = vmul.f32 1.442695, %v3277_v35 }
 0x2de   : > { %v3286_v40 = vmul.f32 %v3128_v39, %v7308_v30  ;;  %5971 = vpow2.f32 %v3450_v59  ;;  %v3458_v37 = vmul.f32 1.442695, %v3278_v23  ;;  %v5275_v52 = vmul.f32 %v1217_v46, %v6793_v56 }
 0x2df   : > { %v3287_v31 = vmul.f32 %v3128_v39, %v7313_v12  ;;  %v3288_v55 = vmul.f32 %v3129_v3, %v7308_v30  ;;  %5973 = vpow2.f32 %v3452_v10  ;;  %v3460_v20 = vmul.f32 1.442695, %v3279_v45 }
 0x2e0   : > { %v3289_v61 = vmul.f32 %v3129_v3, %v7313_v12  ;;  %5975 = vpow2.f32 %v3454_v34  ;;  %v3462_v33 = vmul.f32 1.442695, %v3280_v7  ;;  %v3464_v13 = vmul.f32 1.442695, %v3281_v14  ;;  %5283 = vst [vmem:[#allocation6 + $0x18] sm:$0xff] %v5275_v52 }
 0x2e1   : > { %5977 = vpow2.f32 %v3456_v62  ;;  %v3466_v60 = vmul.f32 1.442695, %v3282_v42  ;;  %v3468_v35 = vmul.f32 1.442695, %v3283_v4  ;;  %v3470_v24 = vmul.f32 1.442695, %v3284_v29  ;;  %v7588_v62 = vpop.f32.mrf.mxu1 }
 0x2e2   : > { %5979 = vpow2.f32 %v3458_v37  ;;  %v3068_v23 = vrot.slane %v7564_v8, 1  ;;  %v3069_v46 = vrot.slane %v7564_v8, 2  ;;  %v3070_v39 = vrot.slane %v7564_v8, 3  ;;  %1751 = vmatmul.f32.gmra.mxu3 %v7588_v62  ;;  %1792 = vmatmul.f32.gmra.mxu0 %v7588_v62 }
 0x2e3   : > { %5981 = vpow2.f32 %v3460_v20  ;;  %v3472_v59 = vmul.f32 1.442695, %v3285_v32  ;;  %v3071_v45 = vrot.slane %v7564_v8, 4  ;;  %v3072_v3 = vrot.slane %v7564_v8, 5  ;;  %1833 = vmatmul.f32.gmra.mxu1 %v7588_v62  ;;  %1874 = vmatmul.f32.gmra.mxu2 %v7588_v62 }
 0x2e4   : > { %v5972_v7 = vpop.eup %5971  ;;  %5983 = vpow2.f32 %v3462_v33  ;;  %v3474_v14 = vmul.f32 1.442695, %v3286_v40  ;;  %v3073_v42 = vrot.slane %v7564_v8, 6  ;;  %v3130_v4 = vperm.slane %v7564_v8, 0 }
 0x2e5   : > { %v5974_v52 = vpop.eup %5973  ;;  %5985 = vpow2.f32 %v3464_v13  ;;  %v3476_v29 = vmul.f32 1.442695, %v3287_v31  ;;  %3658 = vst [vmem:[#allocation3 + $0x180] sm:$0xff] %v5972_v7  ;;  %v3074_v10 = vrot.slane %v7564_v8, 7  ;;  %v3131_v34 = vperm.slane %v3068_v23, 0 }
 0x2e6   : > { %v5976_v32 = vpop.eup %5975  ;;  %5987 = vpow2.f32 %v3466_v60  ;;  %v3478_v37 = vmul.f32 1.442695, %v3288_v55  ;;  %3659 = vst [vmem:[#allocation3 + $0x188] sm:$0xff] %v5974_v52  ;;  %v3132_v20 = vperm.slane %v3069_v46, 0  ;;  %v3133_v33 = vperm.slane %v3070_v39, 0 }
 0x2e7   : > { %v5978_v40 = vpop.eup %5977  ;;  %5989 = vpow2.f32 %v3468_v35  ;;  %v3480_v13 = vmul.f32 1.442695, %v3289_v61  ;;  %3660 = vst [vmem:[#allocation3 + $0x190] sm:$0xff] %v5976_v32  ;;  %v3134_v31 = vperm.slane %v3071_v45, 0  ;;  %v3135_v7 = vperm.slane %v3072_v3, 0  ;;  %v7612_v32 = vld [vmem:[%s9685_s9 + $0x1d0] sm:$0xff] }
 0x2e8   : > { %v5980_v23 = vpop.eup %5979  ;;  %5991 = vpow2.f32 %v3470_v24  ;;  %3661 = vst [vmem:[#allocation3 + $0x198] sm:$0xff] %v5978_v40  ;;  %v3136_v60 = vperm.slane %v3073_v42, 0  ;;  %v3290_v55 = vmul.f32 %v3130_v4, %v7308_v30  ;;  %v3291_v46 = vmul.f32 %v3130_v4, %v7313_v12  ;;  %v7618_v40 = vld [vmem:[%s9685_s9 + $0x1d8] sm:$0xff] }
 0x2e9   : > { %v5982_v39 = vpop.eup %5981  ;;  %5993 = vpow2.f32 %v3472_v59  ;;  %3662 = vst [vmem:[#allocation3 + $0x1a0] sm:$0xff] %v5980_v23  ;;  %v3137_v35 = vperm.slane %v3074_v10, 0  ;;  %v3292_v61 = vmul.f32 %v3131_v34, %v7308_v30  ;;  %v3293_v45 = vmul.f32 %v3131_v34, %v7313_v12  ;;  %v7605_v10 = vld [vmem:[%s9686_s10] sm:$0xff] }
 0x2ea   : > { %v5984_v3 = vpop.eup %5983  ;;  %5995 = vpow2.f32 %v3474_v14  ;;  %3663 = vst [vmem:[#allocation3 + $0x1a8] sm:$0xff] %v5982_v39  ;;  %v3294_v24 = vmul.f32 %v3132_v20, %v7308_v30  ;;  %v3295_v42 = vmul.f32 %v3132_v20, %v7313_v12  ;;  %v3296_v52 = vmul.f32 %v3133_v33, %v7308_v30 }
 0x2eb   : > { %v5986_v4 = vpop.eup %5985  ;;  %5997 = vpow2.f32 %v3476_v29  ;;  %3664 = vst [vmem:[#allocation3 + $0x1b0] sm:$0xff] %v5984_v3  ;;  %v3297_v59 = vmul.f32 %v3133_v33, %v7313_v12  ;;  %v3298_v34 = vmul.f32 %v7605_v10, %v3134_v31  ;;  %v3299_v14 = vmul.f32 %v3134_v31, %v7313_v12  ;;  %v7623_v12 = vld [vmem:[%s9686_s10 + $0x8] sm:$0xff] }
 0x2ec   : > { %10124 = vst [vmem:[#allocation60_spill] sm:$0xff] %v7612_v32  ;;  %v5988_v30 = vpop.eup %5987  ;;  %5999 = vpow2.f32 %v3478_v37  ;;  %v3300_v29 = vmul.f32 %v7605_v10, %v3135_v7  ;;  %v3482_v20 = vmul.f32 1.442695, %v3290_v55  ;;  %v3484_v33 = vmul.f32 1.442695, %v3291_v46  ;;  %v7629_v55 = vld [vmem:[%s9685_s9 + $0x190] sm:$0xff] }
 0x2ed   : > { %3665 = vst [vmem:[#allocation3 + $0x1b8] sm:$0xff] %v5986_v4  ;;  %v5990_v23 = vpop.eup %5989  ;;  %6001 = vpow2.f32 %v3480_v13  ;;  %v3301_v37 = vmul.f32 %v7623_v12, %v3135_v7  ;;  %v3486_v31 = vmul.f32 1.442695, %v3292_v61  ;;  %v3488_v39 = vmul.f32 1.442695, %v3293_v45 }
 0x2ee   : > { %10125 = vst [vmem:[#allocation61_spill] sm:$0xff] %v7618_v40  ;;  %v5992_v46 = vpop.eup %5991  ;;  %v3302_v3 = vmul.f32 %v7605_v10, %v3136_v60  ;;  %6003 = vpow2.f32 %v3482_v20  ;;  %v3490_v13 = vmul.f32 1.442695, %v3294_v24  ;;  %v9853_v4 = vunpack.c.l.bf16 %v7612_v32 }
 0x2ef   : > { %3666 = vst [vmem:[#allocation3 + $0x1c0] sm:$0xff] %v5988_v30  ;;  %v7636_v30 = vld [vmem:[%s9685_s9 + $0x198] sm:$0xff]  ;;  %v5994_v7 = vpop.eup %5993  ;;  %v3303_v61 = vmul.f32 %v7623_v12, %v3136_v60  ;;  %6005 = vpow2.f32 %v3484_v33  ;;  %v3492_v45 = vmul.f32 1.442695, %v3295_v42  ;;  %v9852_v56 = vunpack.c.h.bf16 %v7618_v40 }
 0x2f0   : > { %10126 = vst [vmem:[#allocation62_spill] sm:$0xff] %v7629_v55  ;;  %v3304_v20 = vmul.f32 %v7605_v10, %v3137_v35  ;;  %6007 = vpow2.f32 %v3486_v31  ;;  %v3494_v24 = vmul.f32 1.442695, %v3296_v52  ;;  %1892 = vmatpush.msra.mxu3 %v9853_v4  ;;  %v9857_v16 = vunpack.c.l.bf16 %v7629_v55  ;;  %v7651_v52 = vld [vmem:[%s9685_s9 + $0x150] sm:$0xff]  ;;  %v7656_v33 = vld [vmem:[%s9685_s9 + $0x158] sm:$0xff] }
 0x2f1   : > { %3667 = vst [vmem:[#allocation3 + $0x1c8] sm:$0xff] %v5990_v23  ;;  %v5996_v23 = vpop.eup %5995  ;;  %6009 = vpow2.f32 %v3488_v39  ;;  %v3496_v60 = vmul.f32 1.442695, %v3297_v59  ;;  %2015 = vmatpush.msrb.mxu2 %v9852_v56  ;;  %v9854_v42 = vunpack.c.h.bf16 %v7636_v30  ;;  %v3500_v59 = vmul.f32 1.442695, %v3299_v14 }
 0x2f2   : > { %10127 = vst [vmem:[#allocation63_spill] sm:$0xff] %v7636_v30  ;;  %v5998_v53 = vpop.eup %5997  ;;  %6011 = vpow2.f32 %v3490_v13  ;;  %1893 = vmatpush.msra.mxu3 %v9857_v16  ;;  %v9856_v39 = vunpack.c.h.bf16 %v7612_v32  ;;  %v3502_v56 = vmul.f32 1.442695, %v3300_v29  ;;  %v3504_v4 = vmul.f32 1.442695, %v3301_v37 }
 0x2f3   : > { %3668 = vst [vmem:[#allocation3 + $0x1d0] sm:$0xff] %v5992_v46  ;;  %v3305_v46 = vmul.f32 %v7623_v12, %v3137_v35  ;;  %v6000_v31 = vpop.eup %5999  ;;  %v3498_v35 = vmul.f32 1.442695, %v3298_v34  ;;  %6013 = vpow2.f32 %v3492_v45  ;;  %2016 = vmatpush.msrb.mxu2 %v9854_v42  ;;  %v7672_v34 = vld [vmem:[%s9685_s9 + $0x118] sm:$0xff]  ;;  %v3506_v13 = vmul.f32 1.442695, %v3302_v3  ;;  %v1144_v45 = vpop.f32.mrf.mxu0 }
 0x2f4   : > { %3669 = vst [vmem:[#allocation3 + $0x1d8] sm:$0xff] %v5994_v7  ;;  %v7664_v7 = vld [vmem:[%s9685_s9 + $0x110] sm:$0xff]  ;;  %6015 = vpow2.f32 %v3494_v24  ;;  %1933 = vmatpush.msrb.mxu0 %v9856_v39  ;;  %v9859_v29 = vunpack.c.l.bf16 %v7651_v52  ;;  %v9858_v37 = vunpack.c.h.bf16 %v7656_v33  ;;  %v9871_v42 = vunpack.c.h.bf16 %v7629_v55 }
 0x2f5   : > { %3670 = vst [vmem:[#allocation3 + $0x1e0] sm:$0xff] %v5996_v23  ;;  %v6002_v23 = vpop.eup %6001  ;;  %6017 = vpow2.f32 %v3496_v60  ;;  %v9867_v3 = vunpack.c.l.bf16 %v7664_v7  ;;  %v9866_v60 = vunpack.c.h.bf16 %v7672_v34  ;;  %v3508_v16 = vmul.f32 1.442695, %v3303_v61 }
 0x2f6   : > { %10128 = vst [vmem:[#allocation64_spill] sm:$0xff] %v7651_v52  ;;  %v6004_v14 = vpop.eup %6003  ;;  %6019 = vpow2.f32 %v3498_v35  ;;  %1894 = vmatpush.msra.mxu3 %v9859_v29  ;;  %2017 = vmatpush.msrb.mxu2 %v9858_v37  ;;  %v7697_v35 = vld [vmem:[%s9683_s7] ss:$0 sm:$0xff]  ;;  %v3510_v29 = vmul.f32 1.442695, %v3304_v20 }
 0x2f7   : > { %10129 = vst [vmem:[#allocation65_spill] sm:$0xff] %v7656_v33  ;;  %6021 = vpow2.f32 %v3500_v59  ;;  %1934 = vmatpush.msrb.mxu0 %v9871_v42  ;;  %v3512_v59 = vmul.f32 1.442695, %v3305_v46 }
 0x2f8   : > { %3671 = vst [vmem:[#allocation3 + $0x1e8] sm:$0xff] %v5998_v53  ;;  %v9855_v53 = vunpack.c.l.bf16 %v7618_v40  ;;  %6023 = vpow2.f32 %v3502_v56  ;;  %1895 = vmatpush.msra.mxu3 %v9867_v3  ;;  %2018 = vmatpush.msrb.mxu2 %v9866_v60 }
 0x2f9   : > { %10130 = vst [vmem:[#allocation66_spill] sm:$0xff] %v7664_v7  ;;  %6025 = vpow2.f32 %v3504_v4 }
 0x2fa   : > { %3672 = vst [vmem:[#allocation3 + $0x1f0] sm:$0xff] %v6000_v31  ;;  %v6006_v31 = vpop.eup %6005  ;;  %1974 = vmatpush.msrb.mxu1 %v9855_v53  ;;  %v9861_v53 = vunpack.c.l.bf16 %v7656_v33  ;;  %6027 = vpow2.f32 %v3506_v13 }
 0x2fb   : > { %10131 = vst [vmem:[#allocation67_spill] sm:$0xff] %v7672_v34  ;;  %v6008_v24 = vpop.eup %6007  ;;  %6029 = vpow2.f32 %v3508_v16  ;;  %v5276_v16 = vmul.f32 %v7564_v8, %v6856_v43 }
 0x2fc   : > { %3673 = vst [vmem:[#allocation3 + $0x1f8] sm:$0xff] %v6002_v23  ;;  %v9868_v23 = vunpack.c.l.bf16 %v7636_v30  ;;  %v6010_v39 = vpop.eup %6009  ;;  %6031 = vpow2.f32 %v3510_v29 }
 0x2fd   : > { %3674 = vst [vmem:[#allocation3 + $0x200] sm:$0xff] %v6004_v14  ;;  %v9860_v14 = vunpack.c.h.bf16 %v7651_v52  ;;  %v6012_v37 = vpop.eup %6011  ;;  %6033 = vpow2.f32 %v3512_v59  ;;  %v7714_v59 = vpop.f32.mrf.mxu1 }
 0x2fe   : > { %3675 = vst [vmem:[#allocation3 + $0x208] sm:$0xff] %v6006_v31  ;;  %1975 = vmatpush.msrb.mxu1 %v9868_v23  ;;  %v7700_v31 = vadd.f32 %v7697_v35, %v1144_v45  ;;  %v6014_v61 = vpop.eup %6013  ;;  %1754 = vmatmul.f32.gmra.mxu3 %v7714_v59 }
 0x2ff   : > { %3676 = vst [vmem:[#allocation3 + $0x210] sm:$0xff] %v6008_v24  ;;  %1935 = vmatpush.msrb.mxu0 %v9860_v14  ;;  %v6016_v20 = vpop.eup %6015  ;;  %1836 = vmatmul.f32.gmra.mxu1 %v7714_v59 }
 0x300   : > { %3677 = vst [vmem:[#allocation3 + $0x218] sm:$0xff] %v6010_v39  ;;  %1976 = vmatpush.msrb.mxu1 %v9861_v53  ;;  %v1164_v56 = vand.u32 2147483647, %v7700_v31  ;;  %v1184_v39 = vmul.f32 1.442695, %v7566_v28  ;;  %v6018_v45 = vpop.eup %6017  ;;  %1795 = vmatmul.f32.gmra.mxu0 %v7714_v59 }
 0x301   : > { %3678 = vst [vmem:[#allocation3 + $0x220] sm:$0xff] %v6012_v37  ;;  %v6020_v4 = vpop.eup %6019  ;;  %1877 = vmatmul.f32.gmra.mxu2 %v7714_v59 }
 0x302   : > { %3679 = vst [vmem:[#allocation3 + $0x228] sm:$0xff] %v6014_v61  ;;  %v1172_v24 = vsub.f32 0.0, %v1164_v56  ;;  %v6022_v46 = vpop.eup %6021  ;;  %6035 = vpow2.f32 %v1184_v39  ;;  %v9862_v39 = vunpack.c.l.bf16 %v7672_v34 }
 0x303   : > { %3680 = vst [vmem:[#allocation3 + $0x230] sm:$0xff] %v6016_v20  ;;  %v6024_v14 = vpop.eup %6023  ;;  %v9863_v20 = vunpack.c.h.bf16 %v7664_v7  ;;  %v1156_v7 = vmax.f32 %v7700_v31, 0.0 }
 0x304   : > { %3681 = vst [vmem:[#allocation3 + $0x238] sm:$0xff] %v6018_v45  ;;  %v1186_v37 = vmul.f32 1.442695, %v1172_v24  ;;  %v6026_v53 = vpop.eup %6025  ;;  %v7725_v45 = vld [vmem:[%s9685_s9 + $0xd0] sm:$0xff]  ;;  %v7730_v24 = vld [vmem:[%s9685_s9 + $0xd8] sm:$0xff]  ;;  %1977 = vmatpush.msrb.mxu1 %v9862_v39 }
 0x305   : > { %3682 = vst [vmem:[#allocation3 + $0x240] sm:$0xff] %v6020_v4  ;;  %v6028_v13 = vpop.eup %6027  ;;  %v9865_v4 = vunpack.c.l.bf16 %v7725_v45  ;;  %1936 = vmatpush.msrb.mxu0 %v9863_v20  ;;  %v1147_v20 = vpop.f32.mrf.mxu0 }
 0x306   : > { %3683 = vst [vmem:[#allocation3 + $0x248] sm:$0xff] %v6022_v46  ;;  %6037 = vpow2.f32 %v1186_v37  ;;  %v6030_v28 = vpop.eup %6029  ;;  %v9864_v46 = vunpack.c.h.bf16 %v7730_v24  ;;  %v9869_v37 = vunpack.c.h.bf16 %v7725_v45 }
 0x307   : > { %3684 = vst [vmem:[#allocation3 + $0x250] sm:$0xff] %v6024_v14  ;;  %v6032_v61 = vpop.eup %6031  ;;  %1896 = vmatpush.msra.mxu3 %v9865_v4 }
 0x308   : > { %3685 = vst [vmem:[#allocation3 + $0x258] sm:$0xff] %v6026_v53  ;;  %v6034_v29 = vpop.eup %6033  ;;  %2019 = vmatpush.msrb.mxu2 %v9864_v46  ;;  %1937 = vmatpush.msrb.mxu0 %v9869_v37  ;;  %v7766_v37 = vadd.f32 %v7697_v35, %v1147_v20 }
 0x309   : > { %3686 = vst [vmem:[#allocation3 + $0x260] sm:$0xff] %v6028_v13  ;;  %v6036_v56 = vpop.eup %6035  ;;  %v9870_v13 = vunpack.c.l.bf16 %v7730_v24 }
 0x30a   : > { %3687 = vst [vmem:[#allocation3 + $0x268] sm:$0xff] %v6030_v28  ;;  %v1195_v53 = vadd.f32 1.0, %v6036_v56  ;;  %v7743_v28 = vld [vmem:[%s9685_s9 + $0x90] sm:$0xff] }
 0x30b   : > { %3688 = vst [vmem:[#allocation3 + $0x270] sm:$0xff] %v6032_v61  ;;  %1978 = vmatpush.msrb.mxu1 %v9870_v13 }
 0x30c   : > { %3689 = vst [vmem:[#allocation3 + $0x278] sm:$0xff] %v6034_v29  ;;  %v6038_v14 = vpop.eup %6037  ;;  %6039 = vlog2.f32 %v1195_v53  ;;  %v9873_v29 = vunpack.c.l.bf16 %v7743_v28 }
 0x30d   : > { %5284 = vst [vmem:[#allocation6 + $0x20] sm:$0xff] %v5276_v16  ;;  %v1196_v8 = vadd.f32 1.0, %v6038_v14  ;;  %v7748_v16 = vld [vmem:[%s9685_s9 + $0x98] sm:$0xff]  ;;  %v1155_v14 = vmax.f32 %v7548_v21, 0.0 }
 0x30e   : > { %10132 = vst [vmem:[#allocation68_spill] sm:$0xff] %v7725_v45  ;;  %v9878_v56 = vunpack.c.h.bf16 %v7748_v16  ;;  %1897 = vmatpush.msra.mxu3 %v9873_v29 }
 0x30f   : > { %6041 = vlog2.f32 %v1196_v8  ;;  %10133 = vst [vmem:[#allocation69_spill] sm:$0xff] %v7730_v24 }
 0x310   : > { %2020 = vmatpush.msrb.mxu2 %v9878_v56 }
 0x312   : > { %v6040_v61 = vpop.eup %6039 }
 0x313   : > { %v1209_v53 = vmul.f32 0.6931472, %v6040_v61 }
 0x315   : > { %v6042_v8 = vpop.eup %6041  ;;  %v1219_v39 = vadd.f32 %v1209_v53, %v1155_v14 }
 0x316   : > { %v1211_v23 = vmul.f32 0.6931472, %v6042_v8 }
 0x317   : > { %v3075_v46 = vrot.slane %v1219_v39, 1  ;;  %v3076_v4 = vrot.slane %v1219_v39, 2  ;;  %v3077_v60 = vrot.slane %v1219_v39, 3  ;;  %v3078_v21 = vrot.slane %v1219_v39, 4 }
 0x318   : > { %v3079_v61 = vrot.slane %v1219_v39, 5  ;;  %v3138_v3 = vperm.slane %v1219_v39, 0  ;;  %v3080_v13 = vrot.slane %v1219_v39, 6  ;;  %v3081_v42 = vrot.slane %v1219_v39, 7 }
 0x319   : > { %v3139_v43 = vperm.slane %v3075_v46, 0  ;;  %v3140_v29 = vperm.slane %v3076_v4, 0  ;;  %v3141_v24 = vperm.slane %v3077_v60, 0  ;;  %v3142_v45 = vperm.slane %v3078_v21, 0 }
 0x31a   : > { %v3306_v56 = vmul.f32 %v7605_v10, %v3138_v3  ;;  %v3307_v14 = vmul.f32 %v7623_v12, %v3138_v3  ;;  %v3143_v8 = vperm.slane %v3079_v61, 0  ;;  %v3144_v33 = vperm.slane %v3080_v13, 0 }
 0x31b   : > { %v3308_v53 = vmul.f32 %v7605_v10, %v3139_v43  ;;  %v3309_v34 = vmul.f32 %v7623_v12, %v3139_v43  ;;  %v3310_v35 = vmul.f32 %v7605_v10, %v3140_v29  ;;  %v3145_v46 = vperm.slane %v3081_v42, 0 }
 0x31c   : > { %v3311_v60 = vmul.f32 %v7623_v12, %v3140_v29  ;;  %v7776_v4 = vadd.f32 %v1211_v23, %v1156_v7  ;;  %v3312_v21 = vmul.f32 %v7605_v10, %v3141_v24  ;;  %v3313_v3 = vmul.f32 %v7623_v12, %v3141_v24 }
 0x31d   : > { %v3314_v52 = vmul.f32 %v7605_v10, %v3142_v45  ;;  %v3514_v43 = vmul.f32 1.442695, %v3306_v56  ;;  %v3315_v31 = vmul.f32 %v7623_v12, %v3142_v45  ;;  %v3516_v61 = vmul.f32 1.442695, %v3307_v14 }
 0x31e   : > { %v3518_v30 = vmul.f32 1.442695, %v3308_v53  ;;  %v3520_v55 = vmul.f32 1.442695, %v3309_v34  ;;  %v3316_v20 = vmul.f32 %v7605_v10, %v3143_v8  ;;  %v3522_v42 = vmul.f32 1.442695, %v3310_v35 }
 0x31f   : > { %6043 = vpow2.f32 %v3514_v43  ;;  %v5277_v13 = vmul.f32 %v1219_v39, %v6942_v44  ;;  %v3317_v7 = vmul.f32 %v7623_v12, %v3143_v8  ;;  %v3318_v23 = vmul.f32 %v7605_v10, %v3144_v33  ;;  %v7808_v44 = vpop.f32.mrf.mxu2 }
 0x320   : > { %6045 = vpow2.f32 %v3516_v61  ;;  %v3524_v24 = vmul.f32 1.442695, %v3311_v60  ;;  %v3319_v29 = vmul.f32 %v7623_v12, %v3144_v33  ;;  %v3320_v56 = vmul.f32 %v7605_v10, %v3145_v46  ;;  %10134 = vst [vmem:[#allocation70_spill] sm:$0xff] %v7808_v44 }
 0x321   : > { %6047 = vpow2.f32 %v3518_v30  ;;  %v3526_v45 = vmul.f32 1.442695, %v3312_v21  ;;  %v3321_v34 = vmul.f32 %v7623_v12, %v3145_v46  ;;  %v3528_v14 = vmul.f32 1.442695, %v3313_v3  ;;  %5285 = vst [vmem:[#allocation6 + $0x28] sm:$0xff] %v5277_v13 }
 0x322   : > { %6049 = vpow2.f32 %v3520_v55  ;;  %v3530_v53 = vmul.f32 1.442695, %v3314_v52  ;;  %v3532_v35 = vmul.f32 1.442695, %v3315_v31  ;;  %v3082_v39 = vrot.slane %v7776_v4, 1 }
 0x323   : > { %6051 = vpow2.f32 %v3522_v42  ;;  %v3083_v8 = vrot.slane %v7776_v4, 2  ;;  %v3534_v60 = vmul.f32 1.442695, %v3316_v20  ;;  %v3536_v43 = vmul.f32 1.442695, %v3317_v7  ;;  %v7795_v42 = vpop.f32.mrf.mxu1 }
 0x324   : > { %6053 = vpow2.f32 %v3524_v24  ;;  %v3084_v33 = vrot.slane %v7776_v4, 3  ;;  %v3538_v30 = vmul.f32 1.442695, %v3318_v23  ;;  %v3085_v46 = vrot.slane %v7776_v4, 4  ;;  %1757 = vmatmul.f32.gmra.mxu3 %v7795_v42  ;;  %1798 = vmatmul.f32.gmra.mxu0 %v7795_v42 }
 0x325   : > { %v6044_v61 = vpop.eup %6043  ;;  %6055 = vpow2.f32 %v3526_v45  ;;  %v3146_v55 = vperm.slane %v7776_v4, 0  ;;  %v3540_v21 = vmul.f32 1.442695, %v3319_v29  ;;  %v3086_v3 = vrot.slane %v7776_v4, 5  ;;  %1839 = vmatmul.f32.gmra.mxu1 %v7795_v42  ;;  %1880 = vmatmul.f32.gmra.mxu2 %v7795_v42 }
 0x326   : > { %v6046_v52 = vpop.eup %6045  ;;  %6057 = vpow2.f32 %v3528_v14  ;;  %3690 = vst [vmem:[#allocation3 + $0x280] sm:$0xff] %v6044_v61  ;;  %v3147_v31 = vperm.slane %v3082_v39, 0  ;;  %v3087_v13 = vrot.slane %v7776_v4, 6  ;;  %v3088_v7 = vrot.slane %v7776_v4, 7 }
 0x327   : > { %v6048_v20 = vpop.eup %6047  ;;  %6059 = vpow2.f32 %v3530_v53  ;;  %3691 = vst [vmem:[#allocation3 + $0x288] sm:$0xff] %v6046_v52  ;;  %v3148_v23 = vperm.slane %v3083_v8, 0  ;;  %v3542_v29 = vmul.f32 1.442695, %v3320_v56  ;;  %v3544_v45 = vmul.f32 1.442695, %v3321_v34 }
 0x328   : > { %v6050_v24 = vpop.eup %6049  ;;  %6061 = vpow2.f32 %v3532_v35  ;;  %3692 = vst [vmem:[#allocation3 + $0x290] sm:$0xff] %v6048_v20  ;;  %v3149_v14 = vperm.slane %v3084_v33, 0  ;;  %v3150_v53 = vperm.slane %v3085_v46, 0  ;;  %v3322_v61 = vmul.f32 %v7605_v10, %v3146_v55 }
 0x329   : > { %v6052_v39 = vpop.eup %6051  ;;  %6063 = vpow2.f32 %v3534_v60  ;;  %3693 = vst [vmem:[#allocation3 + $0x298] sm:$0xff] %v6050_v24  ;;  %v3323_v8 = vmul.f32 %v7623_v12, %v3146_v55  ;;  %v3151_v35 = vperm.slane %v3086_v3, 0  ;;  %v3324_v56 = vmul.f32 %v7605_v10, %v3147_v31 }
 0x32a   : > { %v6054_v52 = vpop.eup %6053  ;;  %6065 = vpow2.f32 %v3536_v43  ;;  %3694 = vst [vmem:[#allocation3 + $0x2a0] sm:$0xff] %v6052_v39  ;;  %v3325_v34 = vmul.f32 %v7623_v12, %v3147_v31  ;;  %v3152_v60 = vperm.slane %v3087_v13, 0  ;;  %v3153_v20 = vperm.slane %v3088_v7, 0 }
 0x32b   : > { %v6056_v33 = vpop.eup %6055  ;;  %6067 = vpow2.f32 %v3538_v30  ;;  %3695 = vst [vmem:[#allocation3 + $0x2a8] sm:$0xff] %v6054_v52  ;;  %v3326_v46 = vmul.f32 %v7605_v10, %v3148_v23  ;;  %v3327_v43 = vmul.f32 %v7623_v12, %v3148_v23  ;;  %v3328_v55 = vmul.f32 %v7605_v10, %v3149_v14  ;;  %v7816_v30 = vld [vmem:[%s9685_s9 + $0x50] sm:$0xff] }
 0x32c   : > { %v6058_v24 = vpop.eup %6057  ;;  %6069 = vpow2.f32 %v3540_v21  ;;  %3696 = vst [vmem:[#allocation3 + $0x2b0] sm:$0xff] %v6056_v33  ;;  %v3329_v3 = vmul.f32 %v7623_v12, %v3149_v14  ;;  %v3330_v13 = vmul.f32 %v7605_v10, %v3150_v53  ;;  %v3546_v7 = vmul.f32 1.442695, %v3322_v61  ;;  %v7822_v21 = vld [vmem:[%s9685_s9 + $0x58] sm:$0xff] }
 0x32d   : > { %v6060_v31 = vpop.eup %6059  ;;  %6071 = vpow2.f32 %v3542_v29  ;;  %3697 = vst [vmem:[#allocation3 + $0x2b8] sm:$0xff] %v6058_v24  ;;  %v3548_v39 = vmul.f32 1.442695, %v3323_v8  ;;  %v3331_v14 = vmul.f32 %v7623_v12, %v3150_v53  ;;  %v3550_v52 = vmul.f32 1.442695, %v3324_v56  ;;  %v7832_v53 = vld [vmem:[%s9685_s9 + $0x10] sm:$0xff] }
 0x32e   : > { %v6062_v23 = vpop.eup %6061  ;;  %6073 = vpow2.f32 %v3544_v45  ;;  %3698 = vst [vmem:[#allocation3 + $0x2c0] sm:$0xff] %v6060_v31  ;;  %v3552_v33 = vmul.f32 1.442695, %v3325_v34  ;;  %v3332_v29 = vmul.f32 %v7605_v10, %v3151_v35  ;;  %v3554_v24 = vmul.f32 1.442695, %v3326_v46 }
 0x32f   : > { %v6064_v40 = vpop.eup %6063  ;;  %3699 = vst [vmem:[#allocation3 + $0x2c8] sm:$0xff] %v6062_v23  ;;  %6075 = vpow2.f32 %v3546_v7  ;;  %v9912_v61 = vunpack.c.l.bf16 %v7816_v30  ;;  %v3333_v32 = vmul.f32 %v7623_v12, %v3151_v35  ;;  %v3556_v44 = vmul.f32 1.442695, %v3327_v43  ;;  %v7841_v35 = vld [vmem:[%s9685_s9 + $0x18] sm:$0xff] }
 0x330   : > { %v6066_v8 = vpop.eup %6065  ;;  %3700 = vst [vmem:[#allocation3 + $0x2d0] sm:$0xff] %v6064_v40  ;;  %6077 = vpow2.f32 %v3548_v39  ;;  %v9911_v45 = vunpack.c.h.bf16 %v7822_v21  ;;  %v3334_v34 = vmul.f32 %v7605_v10, %v3152_v60  ;;  %v3558_v46 = vmul.f32 1.442695, %v3328_v55 }
 0x331   : > { %v6068_v56 = vpop.eup %6067  ;;  %3701 = vst [vmem:[#allocation3 + $0x2d8] sm:$0xff] %v6066_v8  ;;  %6079 = vpow2.f32 %v3550_v52  ;;  %1898 = vmatpush.msra.mxu3 %v9912_v61  ;;  %v9897_v40 = vunpack.c.h.bf16 %v7743_v28  ;;  %v3335_v31 = vmul.f32 %v7623_v12, %v3152_v60  ;;  %v3560_v7 = vmul.f32 1.442695, %v3329_v3 }
 0x332   : > { %10135 = vst [vmem:[#allocation71_spill] sm:$0xff] %v7841_v35  ;;  %v6070_v43 = vpop.eup %6069  ;;  %6081 = vpow2.f32 %v3552_v33  ;;  %2021 = vmatpush.msrb.mxu2 %v9911_v45  ;;  %v9899_v55 = vunpack.c.l.bf16 %v7748_v16  ;;  %v3336_v23 = vmul.f32 %v7605_v10, %v3153_v20  ;;  %v3562_v52 = vmul.f32 1.442695, %v3330_v13 }
 0x333   : > { %3702 = vst [vmem:[#allocation3 + $0x2e0] sm:$0xff] %v6068_v56  ;;  %v6072_v39 = vpop.eup %6071  ;;  %6083 = vpow2.f32 %v3554_v24  ;;  %1938 = vmatpush.msrb.mxu0 %v9897_v40  ;;  %v9898_v8 = vunpack.c.l.bf16 %v7832_v53  ;;  %v3337_v60 = vmul.f32 %v7623_v12, %v3153_v20  ;;  %v3564_v3 = vmul.f32 1.442695, %v3331_v14  ;;  %v7859_v20 = vpop.f32.mrf.mxu2 }
 0x334   : > { %3703 = vst [vmem:[#allocation3 + $0x2e8] sm:$0xff] %v6070_v43  ;;  %v6074_v56 = vpop.eup %6073  ;;  %6085 = vpow2.f32 %v3556_v44  ;;  %1979 = vmatpush.msrb.mxu1 %v9899_v55  ;;  %v9910_v33 = vunpack.c.h.bf16 %v7841_v35  ;;  %v3566_v13 = vmul.f32 1.442695, %v3332_v29  ;;  %v9909_v24 = vunpack.c.h.bf16 %v7816_v30 }
 0x335   : > { %3704 = vst [vmem:[#allocation3 + $0x2f0] sm:$0xff] %v6072_v39  ;;  %v6076_v43 = vpop.eup %6075  ;;  %6087 = vpow2.f32 %v3558_v46  ;;  %1899 = vmatpush.msra.mxu3 %v9898_v8  ;;  %v9906_v39 = vunpack.c.l.bf16 %v7822_v21  ;;  %v3568_v44 = vmul.f32 1.442695, %v3333_v32  ;;  %v9905_v14 = vunpack.c.h.bf16 %v7832_v53 }
 0x336   : > { %3705 = vst [vmem:[#allocation3 + $0x2f8] sm:$0xff] %v6074_v56  ;;  %v6078_v40 = vpop.eup %6077  ;;  %6089 = vpow2.f32 %v3560_v7  ;;  %2022 = vmatpush.msrb.mxu2 %v9910_v33  ;;  %v9904_v29 = vunpack.c.l.bf16 %v7841_v35  ;;  %1900 = vmatmul.f32.vlgmr.msra.gmra.mxu3 %v7240_v18  ;;  %v3570_v56 = vmul.f32 1.442695, %v3334_v34  ;;  %v10136_v8 = vand.u32 2147483647, %v7766_v37 }
 0x337   : > { %3706 = vst [vmem:[#allocation3 + $0x300] sm:$0xff] %v6076_v43  ;;  %v6080_v46 = vpop.eup %6079  ;;  %6091 = vpow2.f32 %v3562_v52  ;;  %1939 = vmatpush.msrb.mxu0 %v9909_v24  ;;  %1980 = vmatpush.msrb.mxu1 %v9906_v39  ;;  %v3572_v7 = vmul.f32 1.442695, %v3335_v31  ;;  %v3574_v52 = vmul.f32 1.442695, %v3336_v23 }
 0x338   : > { %3707 = vst [vmem:[#allocation3 + $0x308] sm:$0xff] %v6078_v40  ;;  %v1173_v55 = vsub.f32 0.0, %v10136_v8  ;;  %v6082_v32 = vpop.eup %6081  ;;  %6093 = vpow2.f32 %v3564_v3  ;;  %2023 = vmatmul.f32.vlgmr.msrb.gmra.mxu2 %v7240_v18  ;;  %v3576_v40 = vmul.f32 1.442695, %v3337_v60 }
 0x339   : > { %3708 = vst [vmem:[#allocation3 + $0x310] sm:$0xff] %v6080_v46  ;;  %v6084_v43 = vpop.eup %6083  ;;  %6095 = vpow2.f32 %v3566_v13  ;;  %1940 = vmatpush.msrb.mxu0 %v9905_v14  ;;  %1981 = vmatpush.msrb.mxu1 %v9904_v29 }
 0x33a   : > { %3709 = vst [vmem:[#allocation3 + $0x318] sm:$0xff] %v6082_v32  ;;  %v6086_v34 = vpop.eup %6085  ;;  %6097 = vpow2.f32 %v3568_v44  ;;  %1941 = vmatmul.f32.vlgmr.msrb.gmra.mxu0 %v7240_v18  ;;  %1982 = vmatmul.f32.vlgmr.msrb.gmra.mxu1 %v7240_v18  ;;  %v1188_v8 = vmul.f32 1.442695, %v1173_v55  ;;  %v5278_v32 = vmul.f32 %v7776_v4, %v7031_v58  ;;  %v7896_v4 = vld [vmem:[%s9685_s9 + $0x3e0] sm:$0xff] }
 0x33b   : > { %3710 = vst [vmem:[#allocation3 + $0x320] sm:$0xff] %v6084_v43  ;;  %v6088_v31 = vpop.eup %6087  ;;  %6099 = vpow2.f32 %v3570_v56  ;;  %v7880_v46 = vpop.f32.mrf.mxu2 }
 0x33c   : > { %3711 = vst [vmem:[#allocation3 + $0x328] sm:$0xff] %v6086_v34  ;;  %v6090_v23 = vpop.eup %6089  ;;  %6101 = vpow2.f32 %v3572_v7 }
 0x33d   : > { %3712 = vst [vmem:[#allocation3 + $0x330] sm:$0xff] %v6088_v31  ;;  %v6092_v3 = vpop.eup %6091  ;;  %6103 = vpow2.f32 %v3574_v52  ;;  %v7901_v31 = vld [vmem:[%s9685_s9 + $0x3e8] sm:$0xff] }
 0x33e   : > { %3713 = vst [vmem:[#allocation3 + $0x338] sm:$0xff] %v6090_v23  ;;  %v6094_v13 = vpop.eup %6093  ;;  %6105 = vpow2.f32 %v3576_v40  ;;  %1903 = vmatmul.f32.gmra.mxu3 %v7247_v15  ;;  %v9903_v23 = vunpack.c.l.bf16 %v7896_v4 }
 0x33f   : > { %3714 = vst [vmem:[#allocation3 + $0x340] sm:$0xff] %v6092_v3  ;;  %v6096_v60 = vpop.eup %6095  ;;  %6107 = vpow2.f32 %v1188_v8  ;;  %v9900_v3 = vunpack.c.h.bf16 %v7901_v31 }
 0x340   : > { %3715 = vst [vmem:[#allocation3 + $0x348] sm:$0xff] %v6094_v13  ;;  %v6098_v44 = vpop.eup %6097  ;;  %2026 = vmatmul.f32.gmra.mxu2 %v7247_v15  ;;  %v9902_v13 = vunpack.c.h.bf16 %v7896_v4  ;;  %2048 = vmatpush.msrb.mxu3 %v9903_v23 }
 0x341   : > { %3716 = vst [vmem:[#allocation3 + $0x350] sm:$0xff] %v6096_v60  ;;  %v6100_v55 = vpop.eup %6099  ;;  %v9901_v60 = vunpack.c.l.bf16 %v7901_v31  ;;  %2171 = vmatpush.msra.mxu2 %v9900_v3  ;;  %v7939_v3 = vld [vmem:[%s9685_s9 + $0x368] sm:$0xff] }
 0x342   : > { %3717 = vst [vmem:[#allocation3 + $0x358] sm:$0xff] %v6098_v44  ;;  %v6102_v56 = vpop.eup %6101  ;;  %1944 = vmatmul.f32.gmra.mxu0 %v7247_v15  ;;  %1985 = vmatmul.f32.gmra.mxu1 %v7247_v15  ;;  %v1157_v44 = vmax.f32 %v7766_v37, 0.0 }
 0x343   : > { %3718 = vst [vmem:[#allocation3 + $0x360] sm:$0xff] %v6100_v55  ;;  %v6104_v7 = vpop.eup %6103  ;;  %v7889_v40 = vpop.f32.mrf.mxu2  ;;  %2089 = vmatpush.msra.mxu0 %v9902_v13  ;;  %2130 = vmatpush.msra.mxu1 %v9901_v60 }
 0x344   : > { %3719 = vst [vmem:[#allocation3 + $0x368] sm:$0xff] %v6102_v56  ;;  %v6106_v43 = vpop.eup %6105  ;;  %v7912_v56 = vld [vmem:[%s9685_s9 + $0x3a0] sm:$0xff] }
 0x345   : > { %3720 = vst [vmem:[#allocation3 + $0x370] sm:$0xff] %v6104_v7  ;;  %v6108_v52 = vpop.eup %6107  ;;  %v9907_v7 = vunpack.c.l.bf16 %v7912_v56 }
 0x346   : > { %3721 = vst [vmem:[#allocation3 + $0x378] sm:$0xff] %v6106_v43  ;;  %v1197_v34 = vadd.f32 1.0, %v6108_v52  ;;  %1906 = vmatmul.f32.gmra.mxu3 %v7299_v11  ;;  %v9914_v43 = vunpack.c.h.bf16 %v7912_v56 }
 0x347   : > { %5286 = vst [vmem:[#allocation6 + $0x30] sm:$0xff] %v5278_v32  ;;  %v7917_v32 = vld [vmem:[%s9685_s9 + $0x3a8] sm:$0xff]  ;;  %2049 = vmatpush.msrb.mxu3 %v9907_v7 }
 0x348   : > { %6109 = vlog2.f32 %v1197_v34  ;;  %2029 = vmatmul.f32.gmra.mxu2 %v7299_v11  ;;  %10137 = vst [vmem:[#allocation72_spill] sm:$0xff] %v7889_v40  ;;  %v9908_v37 = vunpack.c.h.bf16 %v7917_v32  ;;  %v9915_v52 = vunpack.c.l.bf16 %v7917_v32  ;;  %2090 = vmatpush.msra.mxu0 %v9914_v43 }
 0x349   : > { %10138 = vst [vmem:[#allocation73_spill] sm:$0xff] %v7896_v4 }
 0x34a   : > { %1947 = vmatmul.f32.gmra.mxu0 %v7299_v11  ;;  %1988 = vmatmul.f32.gmra.mxu1 %v7299_v11  ;;  %10139 = vst [vmem:[#allocation74_spill] sm:$0xff] %v7901_v31 }
 0x34b   : > { %10140 = vst [vmem:[#allocation75_spill] sm:$0xff] %v7912_v56  ;;  %2172 = vmatpush.msra.mxu2 %v9908_v37  ;;  %2131 = vmatpush.msra.mxu1 %v9915_v52  ;;  %v7953_v7 = vpop.f32.mrf.mxu2  ;;  %v10146_v52 = vunpack.c.l.bf16 %v7939_v3 }
 0x34c   : > { %10141 = vst [vmem:[#allocation76_spill] sm:$0xff] %v7917_v32 }
 0x34d   : > { %10143 = vst [vmem:[#allocation78_spill] sm:$0xff] %v7939_v3  ;;  %2132 = vmatpush.msra.mxu1 %v10146_v52 }
 0x34e   : > { %v6110_v8 = vpop.eup %6109  ;;  %1909 = vmatmul.f32.gmra.mxu3 %v7461_v9  ;;  %10144 = vst [vmem:[#allocation79_spill] sm:$0xff] %v7953_v7 }
 0x34f   : > { %v1213_v55 = vmul.f32 0.6931472, %v6110_v8  ;;  %v7934_v8 = vld [vmem:[%s9685_s9 + $0x360] sm:$0xff] }
 0x350   : > { %10142 = vst [vmem:[#allocation77_spill] sm:$0xff] %v7934_v8  ;;  %v10145_v43 = vunpack.c.h.bf16 %v7934_v8  ;;  %2032 = vmatmul.f32.gmra.mxu2 %v7461_v9 }
 0x351   : > { %v1221_v34 = vadd.f32 %v1213_v55, %v1157_v44  ;;  %v9919_v44 = vunpack.c.l.bf16 %v7934_v8  ;;  %v9920_v55 = vunpack.c.h.bf16 %v7939_v3 }
 0x352   : > { %2091 = vmatpush.msra.mxu0 %v10145_v43  ;;  %1991 = vmatmul.f32.gmra.mxu1 %v7461_v9 }
 0x353   : > { %v3089_v23 = vrot.slane %v1221_v34, 1  ;;  %v3090_v29 = vrot.slane %v1221_v34, 2  ;;  %v3091_v14 = vrot.slane %v1221_v34, 3  ;;  %v3092_v39 = vrot.slane %v1221_v34, 4  ;;  %2050 = vmatpush.msrb.mxu3 %v9919_v44  ;;  %2173 = vmatpush.msra.mxu2 %v9920_v55 }
 0x354   : > { %v3093_v37 = vrot.slane %v1221_v34, 5  ;;  %v3094_v24 = vrot.slane %v1221_v34, 6  ;;  %v3095_v33 = vrot.slane %v1221_v34, 7  ;;  %v3154_v45 = vperm.slane %v1221_v34, 0  ;;  %1950 = vmatmul.f32.gmra.mxu0 %v7461_v9 }
 0x355   : > { %v3155_v61 = vperm.slane %v3089_v23, 0  ;;  %v3156_v13 = vperm.slane %v3090_v29, 0  ;;  %v3157_v60 = vperm.slane %v3091_v14, 0  ;;  %v3158_v58 = vperm.slane %v3092_v39, 0 }
 0x356   : > { %v3159_v7 = vperm.slane %v3093_v37, 0  ;;  %v3338_v32 = vmul.f32 %v7605_v10, %v3154_v45  ;;  %v3160_v44 = vperm.slane %v3094_v24, 0  ;;  %v3339_v55 = vmul.f32 %v7623_v12, %v3154_v45  ;;  %1912 = vmatmul.f32.gmra.mxu3 %v7541_v50 }
 0x357   : > { %v3340_v29 = vmul.f32 %v7605_v10, %v3155_v61  ;;  %v3341_v39 = vmul.f32 %v7623_v12, %v3155_v61  ;;  %v3161_v14 = vperm.slane %v3095_v33, 0  ;;  %v3342_v23 = vmul.f32 %v7605_v10, %v3156_v13 }
 0x358   : > { %v3343_v37 = vmul.f32 %v7623_v12, %v3156_v13  ;;  %v3344_v43 = vmul.f32 %v7605_v10, %v3157_v60  ;;  %v3345_v52 = vmul.f32 %v7623_v12, %v3157_v60  ;;  %v3346_v24 = vmul.f32 %v7605_v10, %v3158_v58  ;;  %2035 = vmatmul.f32.gmra.mxu2 %v7541_v50 }
 0x359   : > { %v3347_v45 = vmul.f32 %v7623_v12, %v3158_v58  ;;  %v3348_v3 = vmul.f32 %v7605_v10, %v3159_v7  ;;  %v3349_v61 = vmul.f32 %v7623_v12, %v3159_v7  ;;  %v3578_v8 = vmul.f32 1.442695, %v3338_v32  ;;  %v7987_v58 = vld [vmem:[%s9685_s9 + $0x320] sm:$0xff]  ;;  %v7992_v32 = vld [vmem:[%s9685_s9 + $0x328] sm:$0xff] }
 0x35a   : > { %v3350_v33 = vmul.f32 %v7605_v10, %v3160_v44  ;;  %v3580_v56 = vmul.f32 1.442695, %v3339_v55  ;;  %v3582_v31 = vmul.f32 1.442695, %v3340_v29  ;;  %v3584_v4 = vmul.f32 1.442695, %v3341_v39  ;;  %v8020_v39 = vpop.f32.mrf.mxu2  ;;  %1994 = vmatmul.f32.gmra.mxu1 %v7541_v50 }
 0x35b   : > { %v7981_v13 = vmul.f32 %v7623_v12, %v3160_v44  ;;  %6111 = vpow2.f32 %v3578_v8  ;;  %v3586_v40 = vmul.f32 1.442695, %v3342_v23  ;;  %v5279_v60 = vmul.f32 %v1221_v34, %v7111_v57  ;;  %v7997_v7 = vld [vmem:[%s9685_s9 + $0x2e0] sm:$0xff]  ;;  %v8008_v55 = vld [vmem:[%s9685_s9 + $0x2e8] sm:$0xff]  ;;  %10147 = vst [vmem:[#allocation80_spill] sm:$0xff] %v8020_v39 }
 0x35c   : > { %v8000_v8 = vmul.f32 %v7605_v10, %v3161_v14  ;;  %v8003_v34 = vmul.f32 %v7623_v12, %v3161_v14  ;;  %6113 = vpow2.f32 %v3580_v56  ;;  %v3588_v44 = vmul.f32 1.442695, %v3343_v37  ;;  %v8013_v29 = vld [vmem:[%s9685_s9 + $0x2a0] sm:$0xff]  ;;  %v8018_v10 = vld [vmem:[%s9685_s9 + $0x2a8] sm:$0xff]  ;;  %1953 = vmatmul.f32.gmra.mxu0 %v7541_v50 }
 0x35d   : > { %6115 = vpow2.f32 %v3582_v31  ;;  %v3590_v12 = vmul.f32 1.442695, %v3344_v43  ;;  %v3592_v56 = vmul.f32 1.442695, %v3345_v52  ;;  %v3594_v14 = vmul.f32 1.442695, %v3346_v24 }
 0x35e   : > { %6117 = vpow2.f32 %v3584_v4  ;;  %v3596_v23 = vmul.f32 1.442695, %v3347_v45  ;;  %v3598_v37 = vmul.f32 1.442695, %v3348_v3  ;;  %v3600_v57 = vmul.f32 1.442695, %v3349_v61  ;;  %1915 = vmatmul.f32.gmra.mxu3 %v7588_v62  ;;  %v8034_v4 = vpop.f32.mrf.mxu0 }
 0x35f   : > { %6119 = vpow2.f32 %v3586_v40  ;;  %5287 = vst [vmem:[#allocation6 + $0x38] sm:$0xff] %v5279_v60  ;;  %v9937_v35 = vunpack.c.l.bf16 %v7987_v58  ;;  %v9936_v39 = vunpack.c.h.bf16 %v7992_v32  ;;  %v8031_v43 = vld [vmem:[%s9685_s9 + $0x260] sm:$0xff]  ;;  %v9939_v40 = vunpack.c.h.bf16 %v7987_v58  ;;  %v8042_v24 = vld [vmem:[%s9685_s9 + $0x268] sm:$0xff] }
 0x360   : > { %6121 = vpow2.f32 %v3588_v44  ;;  %v9938_v52 = vunpack.c.l.bf16 %v7992_v32  ;;  %3794 = vst [vmem:[#allocation4 + $0x1] ss:$16 sm:$0x3] %v8034_v4  ;;  %v9940_v44 = vunpack.c.h.bf16 %v7997_v7  ;;  %v3602_v31 = vmul.f32 1.442695, %v3350_v33  ;;  %v8067_v33 = vld [vmem:[%s9685_s9 + $0x228] sm:$0xff]  ;;  %2038 = vmatmul.f32.gmra.mxu2 %v7588_v62 }
 0x361   : > { %v6112_v45 = vpop.eup %6111  ;;  %6123 = vpow2.f32 %v3590_v12  ;;  %2051 = vmatpush.msrb.mxu3 %v9937_v35  ;;  %2174 = vmatpush.msra.mxu2 %v9936_v39  ;;  %3795 = vst [vmem:[#allocation4 + $0x1] ss:$16 sm:$0xc] %v8034_v4  ;;  %v8062_v35 = vld [vmem:[%s9685_s9 + $0x220] sm:$0xff]  ;;  %v9941_v39 = vunpack.c.h.bf16 %v8013_v29  ;;  %v3604_v12 = vmul.f32 1.442695, %v7981_v13 }
 0x362   : > { %v6114_v3 = vpop.eup %6113  ;;  %6125 = vpow2.f32 %v3592_v56  ;;  %3722 = vst [vmem:[#allocation3 + $0x380] sm:$0xff] %v6112_v45  ;;  %2092 = vmatpush.msra.mxu0 %v9939_v40  ;;  %2133 = vmatpush.msra.mxu1 %v9938_v52  ;;  %v10148_v45 = vunpack.c.l.bf16 %v7997_v7  ;;  %v10149_v52 = vunpack.c.h.bf16 %v8008_v55  ;;  %v8091_v13 = vld [vmem:[%s9685_s9 + $0x1e8] sm:$0xff]  ;;  %v3608_v60 = vmul.f32 1.442695, %v8003_v34 }
 0x363   : > { %v6116_v56 = vpop.eup %6115  ;;  %6127 = vpow2.f32 %v3594_v14  ;;  %3723 = vst [vmem:[#allocation3 + $0x388] sm:$0xff] %v6114_v3  ;;  %v10150_v14 = vunpack.c.l.bf16 %v8008_v55  ;;  %v10160_v3 = vunpack.c.h.bf16 %v8031_v43  ;;  %1997 = vmatmul.f32.gmra.mxu1 %v7588_v62 }
 0x364   : > { %2052 = vmatpush.msrb.mxu3 %v10148_v45  ;;  %2175 = vmatpush.msra.mxu2 %v10149_v52  ;;  %v6118_v61 = vpop.eup %6117  ;;  %6129 = vpow2.f32 %v3596_v23  ;;  %3724 = vst [vmem:[#allocation3 + $0x390] sm:$0xff] %v6116_v56  ;;  %v8086_v45 = vld [vmem:[%s9685_s9 + $0x1e0] sm:$0xff]  ;;  %v3606_v56 = vmul.f32 1.442695, %v8000_v8  ;;  %v10154_v8 = vunpack.c.l.bf16 %v8018_v10  ;;  %v10161_v52 = vunpack.c.l.bf16 %v8042_v24 }
 0x365   : > { %2093 = vmatpush.msra.mxu0 %v9940_v44  ;;  %2134 = vmatpush.msra.mxu1 %v10150_v14  ;;  %10151 = vst [vmem:[#allocation81_spill] sm:$0xff] %v8091_v13  ;;  %v6120_v23 = vpop.eup %6119  ;;  %6131 = vpow2.f32 %v3598_v37  ;;  %v10152_v14 = vunpack.c.l.bf16 %v8013_v29  ;;  %v10153_v44 = vunpack.c.h.bf16 %v8018_v10 }
 0x366   : > { %3725 = vst [vmem:[#allocation3 + $0x398] sm:$0xff] %v6118_v61  ;;  %v6122_v40 = vpop.eup %6121  ;;  %6133 = vpow2.f32 %v3600_v57  ;;  %v8115_v57 = vld [vmem:[%s9685_s9 + $0x1a8] sm:$0xff]  ;;  %v9943_v61 = vunpack.c.h.bf16 %v8091_v13  ;;  %1956 = vmatmul.f32.gmra.mxu0 %v7588_v62  ;;  %1918 = vmatmul.f32.gmra.mxu3 %v7714_v59 }
 0x367   : > { %2053 = vmatpush.msrb.mxu3 %v10152_v14  ;;  %2176 = vmatpush.msra.mxu2 %v10153_v44  ;;  %3726 = vst [vmem:[#allocation3 + $0x3a0] sm:$0xff] %v6120_v23  ;;  %v8110_v44 = vld [vmem:[%s9685_s9 + $0x1a0] sm:$0xff]  ;;  %v6124_v34 = vpop.eup %6123  ;;  %v8117_v23 = vpop.f32.mrf.mxu2  ;;  %6135 = vpow2.f32 %v3602_v31  ;;  %v10158_v14 = vunpack.c.l.bf16 %v8031_v43 }
 0x368   : > { %2094 = vmatpush.msra.mxu0 %v9941_v39  ;;  %2135 = vmatpush.msra.mxu1 %v10154_v8  ;;  %10155 = vst [vmem:[#allocation82_spill] sm:$0xff] %v8110_v44  ;;  %v10159_v8 = vunpack.c.h.bf16 %v8042_v24  ;;  %v9942_v39 = vunpack.c.l.bf16 %v8086_v45  ;;  %v6126_v37 = vpop.eup %6125  ;;  %6137 = vpow2.f32 %v3604_v12  ;;  %v10163_v12 = vunpack.c.l.bf16 %v8062_v35 }
 0x369   : > { %10156 = vst [vmem:[#allocation83_spill] sm:$0xff] %v8115_v57  ;;  %2054 = vmatpush.msrb.mxu3 %v10158_v14  ;;  %v8134_v14 = vld [vmem:[%s9685_s9 + $0x160] sm:$0xff]  ;;  %6139 = vpow2.f32 %v3606_v56  ;;  %v10166_v56 = vunpack.c.h.bf16 %v8062_v35  ;;  %2041 = vmatmul.f32.gmra.mxu2 %v7714_v59 }
 0x36a   : > { %10157 = vst [vmem:[#allocation84_spill] sm:$0xff] %v8117_v23  ;;  %2177 = vmatpush.msra.mxu2 %v10159_v8  ;;  %2095 = vmatpush.msra.mxu0 %v10160_v3  ;;  %v6128_v8 = vpop.eup %6127  ;;  %v10164_v3 = vunpack.c.h.bf16 %v8067_v33  ;;  %6141 = vpow2.f32 %v3608_v60  ;;  %v10172_v60 = vunpack.c.h.bf16 %v8115_v57 }
 0x36b   : > { %3727 = vst [vmem:[#allocation3 + $0x3a8] sm:$0xff] %v6122_v40  ;;  %2136 = vmatpush.msra.mxu1 %v10161_v52  ;;  %2055 = vmatpush.msrb.mxu3 %v10163_v12  ;;  %v9945_v52 = vunpack.c.l.bf16 %v8110_v44  ;;  %v8145_v40 = vld [vmem:[%s9685_s9 + $0x168] sm:$0xff]  ;;  %v6130_v31 = vpop.eup %6129  ;;  %v8154_v12 = vld [vmem:[%s9685_s9 + $0x120] sm:$0xff] }
 0x36c   : > { %3728 = vst [vmem:[#allocation3 + $0x3b0] sm:$0xff] %v6124_v34  ;;  %2178 = vmatpush.msra.mxu2 %v10164_v3  ;;  %2096 = vmatpush.msra.mxu0 %v10166_v56  ;;  %v6132_v3 = vpop.eup %6131  ;;  %v1819_v34 = vpop.f32.mrf.mxu1 }
 0x36d   : > { %10162 = vst [vmem:[#allocation85_spill] sm:$0xff] %v8134_v14  ;;  %2056 = vmatpush.msrb.mxu3 %v9942_v39  ;;  %v6134_v56 = vpop.eup %6133  ;;  %2000 = vmatmul.f32.gmra.mxu1 %v7714_v59 }
 0x36e   : > { %3729 = vst [vmem:[#allocation3 + $0x3b8] sm:$0xff] %v6126_v37  ;;  %v10167_v37 = vunpack.c.l.bf16 %v8067_v33  ;;  %2179 = vmatpush.msra.mxu2 %v9943_v61  ;;  %v6136_v61 = vpop.eup %6135  ;;  %1959 = vmatmul.f32.gmra.mxu0 %v7714_v59 }
 0x36f   : > { %10165 = vst [vmem:[#allocation86_spill] sm:$0xff] %v8145_v40  ;;  %2057 = vmatpush.msrb.mxu3 %v9945_v52  ;;  %v8218_v52 = vld [vmem:[%s9685_s9 + $0xa8] sm:$0xff] }
 0x370   : > { %3730 = vst [vmem:[#allocation3 + $0x3c0] sm:$0xff] %v6128_v8  ;;  %2137 = vmatpush.msra.mxu1 %v10167_v37  ;;  %v8164_v8 = vld [vmem:[%s9685_s9 + $0x128] sm:$0xff]  ;;  %v10170_v37 = vunpack.c.h.bf16 %v8086_v45  ;;  %2180 = vmatpush.msra.mxu2 %v10172_v60  ;;  %v10190_v60 = vunpack.c.h.bf16 %v8154_v12 }
 0x371   : > { %10168 = vst [vmem:[#allocation87_spill] sm:$0xff] %v8154_v12  ;;  %1921 = vmatmul.f32.gmra.mxu3 %v7795_v42  ;;  %2044 = vmatmul.f32.gmra.mxu2 %v7795_v42 }
 0x372   : > { %3731 = vst [vmem:[#allocation3 + $0x3c8] sm:$0xff] %v6130_v31  ;;  %2097 = vmatpush.msra.mxu0 %v10170_v37  ;;  %v10171_v31 = vunpack.c.l.bf16 %v8091_v13  ;;  %v8181_v37 = vld [vmem:[%s9685_s9 + $0xe0] sm:$0xff]  ;;  %v10177_v13 = vunpack.c.h.bf16 %v8110_v44 }
 0x373   : > { %10169 = vst [vmem:[#allocation88_spill] sm:$0xff] %v8164_v8 }
 0x374   : > { %3732 = vst [vmem:[#allocation3 + $0x3d0] sm:$0xff] %v6132_v3  ;;  %2138 = vmatpush.msra.mxu1 %v10171_v31  ;;  %v8186_v31 = vld [vmem:[%s9685_s9 + $0xe8] sm:$0xff]  ;;  %v10175_v3 = vunpack.c.l.bf16 %v8134_v14  ;;  %2098 = vmatpush.msra.mxu0 %v10177_v13 }
 0x375   : > { %3733 = vst [vmem:[#allocation3 + $0x3d8] sm:$0xff] %v6134_v56  ;;  %v6138_v56 = vpop.eup %6137  ;;  %v10189_v13 = vunpack.c.h.bf16 %v8186_v31  ;;  %2003 = vmatmul.f32.gmra.mxu1 %v7795_v42 }
 0x376   : > { %10173 = vst [vmem:[#allocation89_spill] sm:$0xff] %v8181_v37  ;;  %v6140_v23 = vpop.eup %6139  ;;  %2058 = vmatpush.msrb.mxu3 %v10175_v3  ;;  %v8207_v3 = vpop.f32.mrf.mxu2  ;;  %1962 = vmatmul.f32.gmra.mxu0 %v7795_v42 }
 0x377   : > { %10174 = vst [vmem:[#allocation90_spill] sm:$0xff] %v8186_v31  ;;  %v6142_v39 = vpop.eup %6141 }
 0x378   : > { %3734 = vst [vmem:[#allocation3 + $0x3e0] sm:$0xff] %v6136_v61  ;;  %v10176_v61 = vunpack.c.h.bf16 %v8145_v40 }
 0x379   : > { %3735 = vst [vmem:[#allocation3 + $0x3e8] sm:$0xff] %v6138_v56  ;;  %v8205_v56 = vld [vmem:[%s9685_s9 + $0xa0] sm:$0xff] }
 0x37a   : > { %3736 = vst [vmem:[#allocation3 + $0x3f0] sm:$0xff] %v6140_v23  ;;  %2181 = vmatpush.msra.mxu2 %v10176_v61  ;;  %v10180_v23 = vunpack.c.l.bf16 %v8115_v57  ;;  %v10181_v61 = vunpack.c.l.bf16 %v8154_v12  ;;  %v9964_v57 = vunpack.c.l.bf16 %v8218_v52  ;;  %v10200_v12 = vunpack.c.h.bf16 %v8205_v56 }
 0x37b   : > { %10178 = vst [vmem:[#allocation91_spill] sm:$0xff] %v8205_v56 }
 0x37c   : > { %3737 = vst [vmem:[#allocation3 + $0x3f8] sm:$0xff] %v6142_v39  ;;  %2139 = vmatpush.msra.mxu1 %v10180_v23  ;;  %2059 = vmatpush.msrb.mxu3 %v10181_v61  ;;  %v10183_v39 = vunpack.c.h.bf16 %v8164_v8  ;;  %v8227_v23 = vld [vmem:[%s9685_s9 + $0x60] sm:$0xff]  ;;  %v10186_v61 = vunpack.c.l.bf16 %v8145_v40  ;;  %v9961_v40 = vunpack.c.h.bf16 %v8218_v52 }
 0x37d   : > { %10179 = vst [vmem:[#allocation92_spill] sm:$0xff] %v8207_v3  ;;  %v10184_v3 = vunpack.c.h.bf16 %v8134_v14  ;;  %v10191_v14 = vunpack.c.l.bf16 %v8164_v8  ;;  %v10195_v8 = vunpack.c.h.bf16 %v8181_v37  ;;  %v10197_v44 = vunpack.c.l.bf16 %v8227_v23 }
 0x37e   : > { %10182 = vst [vmem:[#allocation93_spill] sm:$0xff] %v8218_v52  ;;  %2182 = vmatpush.msra.mxu2 %v10183_v39  ;;  %2140 = vmatpush.msra.mxu1 %v10186_v61  ;;  %v8237_v39 = vld [vmem:[%s9685_s9 + $0x68] sm:$0xff]  ;;  %v1737_v61 = vpop.f32.mrf.mxu3  ;;  %v8360_v52 = vld [vmem:[%s9685_s9 + $0x338] sm:$0xff] }
 0x37f   : > { %2099 = vmatpush.msra.mxu0 %v10184_v3  ;;  %10185 = vst [vmem:[#allocation94_spill] sm:$0xff] %v8227_v23  ;;  %v10188_v3 = vunpack.c.l.bf16 %v8181_v37 }
 0x380   : > { %3796 = vst [vmem:[#allocation4 + $0x1] ss:$16 sm:$0x30] %v8034_v4  ;;  %2183 = vmatpush.msra.mxu2 %v10189_v13  ;;  %2141 = vmatpush.msra.mxu1 %v10191_v14  ;;  %v8260_v13 = vld [vmem:[%s9685_s9 + $0x28] sm:$0xff]  ;;  %v10199_v14 = vunpack.c.h.bf16 %v8237_v39 }
 0x381   : > { %10187 = vst [vmem:[#allocation95_spill] sm:$0xff] %v8237_v39  ;;  %2060 = vmatpush.msrb.mxu3 %v10188_v3  ;;  %2100 = vmatpush.msra.mxu0 %v10190_v60  ;;  %v8255_v3 = vld [vmem:[%s9685_s9 + $0x20] sm:$0xff]  ;;  %v10196_v60 = vunpack.c.l.bf16 %v8186_v31  ;;  %v8349_v31 = vld [vmem:[%s9685_s9 + $0x330] sm:$0xff] }
 0x382   : > { %3797 = vst [vmem:[#allocation4 + $0x1] ss:$16 sm:$0xc0] %v8034_v4  ;;  %v10194_v4 = vunpack.c.l.bf16 %v8205_v56  ;;  %2184 = vmatpush.msra.mxu2 %v9961_v40  ;;  %v8285_v40 = vld [vmem:[%s9685_s9 + $0x3f0] sm:$0xff]  ;;  %v10224_v37 = vunpack.c.l.bf16 %v8349_v31 }
 0x383   : > { %3842 = vst [vmem:[#allocation4 + $0x2] ss:$16 sm:$0x3] %v1819_v34  ;;  %2101 = vmatpush.msra.mxu0 %v10195_v8  ;;  %2142 = vmatpush.msra.mxu1 %v10196_v60  ;;  %v1860_v8 = vpop.f32.mrf.mxu2  ;;  %v10206_v60 = vunpack.c.l.bf16 %v8237_v39  ;;  %v8325_v56 = vld [vmem:[%s9685_s9 + $0x370] sm:$0xff] }
 0x384   : > { %10192 = vst [vmem:[#allocation96_spill] sm:$0xff] %v8255_v3  ;;  %2061 = vmatpush.msrb.mxu3 %v10194_v4  ;;  %2185 = vmatpush.msra.mxu2 %v10199_v14  ;;  %v8303_v14 = vld [vmem:[%s9685_s9 + $0x3b0] sm:$0xff]  ;;  %v10209_v4 = vunpack.c.h.bf16 %v8255_v3 }
 0x385   : > { %10193 = vst [vmem:[#allocation97_spill] sm:$0xff] %v8260_v13  ;;  %2102 = vmatpush.msra.mxu0 %v10200_v12  ;;  %2143 = vmatpush.msra.mxu1 %v9964_v57  ;;  %v10202_v12 = vunpack.c.l.bf16 %v8255_v3  ;;  %v10205_v57 = vunpack.c.h.bf16 %v8227_v23  ;;  %v10210_v23 = vunpack.c.l.bf16 %v8260_v13 }
 0x386   : > { %3843 = vst [vmem:[#allocation4 + $0x2] ss:$16 sm:$0xc] %v1819_v34  ;;  %2062 = vmatpush.msrb.mxu3 %v10197_v44  ;;  %v8294_v44 = vld [vmem:[%s9685_s9 + $0x3f8] sm:$0xff] }
 0x387   : > { %3844 = vst [vmem:[#allocation4 + $0x2] ss:$16 sm:$0x30] %v1819_v34  ;;  %2103 = vmatpush.msra.mxu0 %v10205_v57  ;;  %2144 = vmatpush.msra.mxu1 %v10206_v60  ;;  %v10211_v57 = vunpack.c.l.bf16 %v8285_v40  ;;  %v10214_v60 = vunpack.c.l.bf16 %v8303_v14 }
 0x388   : > { %3845 = vst [vmem:[#allocation4 + $0x2] ss:$16 sm:$0xc0] %v1819_v34  ;;  %2063 = vmatpush.msrb.mxu3 %v10202_v12  ;;  %v10203_v34 = vunpack.c.h.bf16 %v8260_v13  ;;  %v8334_v12 = vld [vmem:[%s9685_s9 + $0x378] sm:$0xff]  ;;  %v9986_v13 = vunpack.c.h.bf16 %v8325_v56 }
 0x389   : > { %3746 = vst [vmem:[#allocation4] ss:$16 sm:$0x3] %v1737_v61  ;;  %2104 = vmatpush.msra.mxu0 %v10209_v4  ;;  %2145 = vmatpush.msra.mxu1 %v10210_v23  ;;  %v10212_v4 = vunpack.c.h.bf16 %v8294_v44  ;;  %v10213_v23 = vunpack.c.h.bf16 %v8285_v40  ;;  %v10226_v3 = vunpack.c.l.bf16 %v8334_v12 }
 0x38a   : > { %10198 = vst [vmem:[#allocation98_spill] sm:$0xff] %v8285_v40  ;;  %2186 = vmatpush.msra.mxu2 %v10203_v34  ;;  %v1781_v34 = vpop.f32.mrf.mxu0  ;;  %2212 = vmatpush.msra.mxu3 %v10211_v57  ;;  %v9985_v40 = vunpack.c.h.bf16 %v8360_v52  ;;  %v1740_v57 = vpop.f32.mrf.mxu3 }
 0x38b   : > { %3747 = vst [vmem:[#allocation4] ss:$16 sm:$0xc] %v1737_v61  ;;  %2253 = vmatpush.msrb.mxu0 %v10213_v23  ;;  %v8369_v23 = vld [vmem:[%s9685_s9 + $0x2f0] sm:$0xff]  ;;  %2064 = vmatmul.f32.vlgmr.msrb.gmra.mxu3 %v7240_v18 }
 0x38c   : > { %10201 = vst [vmem:[#allocation99_spill] sm:$0xff] %v8294_v44  ;;  %2335 = vmatpush.msrb.mxu2 %v10212_v4  ;;  %2213 = vmatpush.msra.mxu3 %v10214_v60  ;;  %v10215_v4 = vunpack.c.l.bf16 %v8294_v44  ;;  %v8378_v60 = vld [vmem:[%s9685_s9 + $0x2f8] sm:$0xff]  ;;  %v10219_v44 = vunpack.c.h.bf16 %v8303_v14 }
 0x38d   : > { %3748 = vst [vmem:[#allocation4] ss:$16 sm:$0x30] %v1737_v61  ;;  %2105 = vmatmul.f32.vlgmr.msra.gmra.mxu0 %v7240_v18  ;;  %2146 = vmatmul.f32.vlgmr.msra.gmra.mxu1 %v7240_v18 }
 0x38e   : > { %3749 = vst [vmem:[#allocation4] ss:$16 sm:$0xc0] %v1737_v61  ;;  %v8314_v61 = vld [vmem:[%s9685_s9 + $0x3b8] sm:$0xff]  ;;  %2294 = vmatpush.msrb.mxu1 %v10215_v4  ;;  %v10218_v4 = vunpack.c.l.bf16 %v8325_v56  ;;  %2254 = vmatpush.msrb.mxu0 %v10219_v44  ;;  %v8395_v44 = vld [vmem:[%s9685_s9 + $0x2b0] sm:$0xff] }
 0x38f   : > { %3890 = vst [vmem:[#allocation4 + $0x3] ss:$16 sm:$0x3] %v1860_v8  ;;  %v10216_v39 = vunpack.c.h.bf16 %v8314_v61  ;;  %2187 = vmatmul.f32.vlgmr.msra.gmra.mxu2 %v7240_v18 }
 0x390   : > { %10204 = vst [vmem:[#allocation100_spill] sm:$0xff] %v8314_v61  ;;  %2214 = vmatpush.msra.mxu3 %v10218_v4  ;;  %v8400_v4 = vld [vmem:[%s9685_s9 + $0x2b8] sm:$0xff]  ;;  %2255 = vmatpush.msrb.mxu0 %v9986_v13  ;;  %v10232_v13 = vunpack.c.l.bf16 %v8395_v44 }
 0x391   : > { %3891 = vst [vmem:[#allocation4 + $0x3] ss:$16 sm:$0xc] %v1860_v8  ;;  %2336 = vmatpush.msrb.mxu2 %v10216_v39  ;;  %v10220_v39 = vunpack.c.h.bf16 %v8334_v12 }
 0x392   : > { %10207 = vst [vmem:[#allocation101_spill] sm:$0xff] %v8325_v56  ;;  %2215 = vmatpush.msra.mxu3 %v10224_v37  ;;  %v1863_v37 = vpop.f32.mrf.mxu2  ;;  %v10230_v56 = vunpack.c.h.bf16 %v8349_v31 }
 0x393   : > { %3892 = vst [vmem:[#allocation4 + $0x3] ss:$16 sm:$0x30] %v1860_v8  ;;  %2337 = vmatpush.msrb.mxu2 %v10220_v39  ;;  %v8430_v39 = vld [vmem:[%s9685_s9 + $0x278] sm:$0xff]  ;;  %2067 = vmatmul.f32.gmra.mxu3 %v7247_v15 }
 0x394   : > { %10208 = vst [vmem:[#allocation102_spill] sm:$0xff] %v8334_v12  ;;  %2256 = vmatpush.msrb.mxu0 %v10230_v56  ;;  %v9992_v12 = vunpack.c.h.bf16 %v8395_v44  ;;  %v1784_v56 = vpop.f32.mrf.mxu0 }
 0x395   : > { %3893 = vst [vmem:[#allocation4 + $0x3] ss:$16 sm:$0xc0] %v1860_v8  ;;  %v1822_v8 = vpop.f32.mrf.mxu1  ;;  %2338 = vmatpush.msrb.mxu2 %v9985_v40  ;;  %v10233_v40 = vunpack.c.h.bf16 %v8400_v4  ;;  %2108 = vmatmul.f32.gmra.mxu0 %v7247_v15 }
 0x396   : > { %3799 = vst [vmem:[#allocation4 + $0x81] ss:$16 sm:$0x3] %v1781_v34  ;;  %2149 = vmatmul.f32.gmra.mxu1 %v7247_v15 }
 0x397   : > { %3800 = vst [vmem:[#allocation4 + $0x81] ss:$16 sm:$0xc] %v1781_v34  ;;  %2190 = vmatmul.f32.gmra.mxu2 %v7247_v15 }
 0x398   : > { %3801 = vst [vmem:[#allocation4 + $0x81] ss:$16 sm:$0x30] %v1781_v34 }
 0x399   : > { %3802 = vst [vmem:[#allocation4 + $0x81] ss:$16 sm:$0xc0] %v1781_v34  ;;  %v10221_v34 = vunpack.c.l.bf16 %v8314_v61  ;;  %v10229_v61 = vunpack.c.h.bf16 %v8378_v60 }
 0x39a   : > { %10217 = vst [vmem:[#allocation103_spill] sm:$0xff] %v8378_v60 }
 0x39b   : > { %3847 = vst [vmem:[#allocation4 + $0x82] ss:$16 sm:$0x3] %v1822_v8  ;;  %2295 = vmatpush.msrb.mxu1 %v10221_v34  ;;  %v10227_v34 = vunpack.c.l.bf16 %v8369_v23  ;;  %2339 = vmatpush.msrb.mxu2 %v10229_v61  ;;  %v9991_v61 = vunpack.c.h.bf16 %v8430_v39 }
 0x39c   : > { %3848 = vst [vmem:[#allocation4 + $0x82] ss:$16 sm:$0xc] %v1822_v8  ;;  %2070 = vmatmul.f32.gmra.mxu3 %v7299_v11 }
 0x39d   : > { %10222 = vst [vmem:[#allocation104_spill] sm:$0xff] %v8395_v44  ;;  %2296 = vmatpush.msrb.mxu1 %v10226_v3  ;;  %2216 = vmatpush.msra.mxu3 %v10227_v34  ;;  %v10231_v3 = vunpack.c.l.bf16 %v8360_v52  ;;  %v9995_v34 = vunpack.c.l.bf16 %v8400_v4  ;;  %v10242_v44 = vunpack.c.l.bf16 %v8430_v39 }
 0x39e   : > { %10223 = vst [vmem:[#allocation105_spill] sm:$0xff] %v8400_v4  ;;  %2340 = vmatpush.msrb.mxu2 %v10233_v40  ;;  %2111 = vmatmul.f32.gmra.mxu0 %v7299_v11 }
 0x39f   : > { %3849 = vst [vmem:[#allocation4 + $0x82] ss:$16 sm:$0x30] %v1822_v8  ;;  %2297 = vmatpush.msrb.mxu1 %v10231_v3  ;;  %2217 = vmatpush.msra.mxu3 %v10232_v13  ;;  %v10235_v3 = vunpack.c.l.bf16 %v8378_v60  ;;  %v8459_v13 = vld [vmem:[%s9685_s9 + $0x230] sm:$0xff] }
 0x3a0   : > { %3850 = vst [vmem:[#allocation4 + $0x82] ss:$16 sm:$0xc0] %v1822_v8  ;;  %v8419_v8 = vld [vmem:[%s9685_s9 + $0x270] sm:$0xff]  ;;  %2341 = vmatpush.msrb.mxu2 %v9991_v61  ;;  %v1743_v61 = vpop.f32.mrf.mxu3  ;;  %2152 = vmatmul.f32.gmra.mxu1 %v7299_v11 }
 0x3a1   : > { %3751 = vst [vmem:[#allocation4 + $0x80] ss:$16 sm:$0x3] %v1740_v57  ;;  %2298 = vmatpush.msrb.mxu1 %v10235_v3  ;;  %v10236_v40 = vunpack.c.l.bf16 %v8419_v8  ;;  %2193 = vmatmul.f32.gmra.mxu2 %v7299_v11  ;;  %v10241_v60 = vunpack.c.h.bf16 %v8419_v8 }
 0x3a2   : > { %10225 = vst [vmem:[#allocation106_spill] sm:$0xff] %v8419_v8 }
 0x3a3   : > { %3752 = vst [vmem:[#allocation4 + $0x80] ss:$16 sm:$0xc] %v1740_v57  ;;  %2218 = vmatpush.msra.mxu3 %v10236_v40  ;;  %v1825_v40 = vpop.f32.mrf.mxu1  ;;  %2299 = vmatpush.msrb.mxu1 %v9995_v34  ;;  %v10004_v34 = vunpack.c.h.bf16 %v8459_v13 }
 0x3a4   : > { %10228 = vst [vmem:[#allocation107_spill] sm:$0xff] %v8430_v39  ;;  %2073 = vmatmul.f32.gmra.mxu3 %v7461_v9 }
 0x3a5   : > { %3753 = vst [vmem:[#allocation4 + $0x80] ss:$16 sm:$0x30] %v1740_v57  ;;  %2300 = vmatpush.msrb.mxu1 %v10242_v44  ;;  %v8517_v44 = vld [vmem:[%s9685_s9 + $0x1b0] sm:$0xff] }
 0x3a6   : > { %3754 = vst [vmem:[#allocation4 + $0x80] ss:$16 sm:$0xc0] %v1740_v57  ;;  %v10234_v57 = vunpack.c.h.bf16 %v8369_v23  ;;  %2114 = vmatmul.f32.gmra.mxu0 %v7461_v9 }
 0x3a7   : > { %3895 = vst [vmem:[#allocation4 + $0x83] ss:$16 sm:$0x3] %v1863_v37 }
 0x3a8   : > { %3896 = vst [vmem:[#allocation4 + $0x83] ss:$16 sm:$0xc] %v1863_v37  ;;  %2257 = vmatpush.msrb.mxu0 %v10234_v57  ;;  %v8464_v57 = vld [vmem:[%s9685_s9 + $0x238] sm:$0xff]  ;;  %2155 = vmatmul.f32.gmra.mxu1 %v7461_v9 }
 0x3a9   : > { %3897 = vst [vmem:[#allocation4 + $0x83] ss:$16 sm:$0x30] %v1863_v37  ;;  %v9994_v3 = vunpack.c.h.bf16 %v8464_v57  ;;  %2196 = vmatmul.f32.gmra.mxu2 %v7461_v9 }
 0x3aa   : > { %3898 = vst [vmem:[#allocation4 + $0x83] ss:$16 sm:$0xc0] %v1863_v37  ;;  %2258 = vmatpush.msrb.mxu0 %v9992_v12  ;;  %v9993_v37 = vunpack.c.l.bf16 %v8459_v13  ;;  %v10002_v12 = vunpack.c.l.bf16 %v8464_v57 }
 0x3ab   : > { %10237 = vst [vmem:[#allocation108_spill] sm:$0xff] %v8459_v13  ;;  %2342 = vmatpush.msrb.mxu2 %v9994_v3  ;;  %v8492_v3 = vld [vmem:[%s9685_s9 + $0x1f8] sm:$0xff] }
 0x3ac   : > { %10238 = vst [vmem:[#allocation109_spill] sm:$0xff] %v8464_v57  ;;  %2219 = vmatpush.msra.mxu3 %v9993_v37  ;;  %v10003_v4 = vunpack.c.h.bf16 %v8492_v3  ;;  %v1866_v37 = vpop.f32.mrf.mxu2  ;;  %2259 = vmatpush.msrb.mxu0 %v10241_v60  ;;  %v1787_v60 = vpop.f32.mrf.mxu0  ;;  %v10017_v57 = vunpack.c.h.bf16 %v8517_v44  ;;  %v10248_v8 = vunpack.c.l.bf16 %v8492_v3 }
 0x3ad   : > { %3804 = vst [vmem:[#allocation4 + $0x101] ss:$16 sm:$0x3] %v1784_v56  ;;  %2301 = vmatpush.msrb.mxu1 %v10002_v12  ;;  %v10006_v12 = vunpack.c.l.bf16 %v8517_v44  ;;  %2076 = vmatmul.f32.gmra.mxu3 %v7541_v50 }
 0x3ae   : > { %3805 = vst [vmem:[#allocation4 + $0x101] ss:$16 sm:$0xc] %v1784_v56  ;;  %2343 = vmatpush.msrb.mxu2 %v10003_v4  ;;  %2260 = vmatpush.msrb.mxu0 %v10004_v34  ;;  %v1828_v34 = vpop.f32.mrf.mxu1 }
 0x3af   : > { %3806 = vst [vmem:[#allocation4 + $0x101] ss:$16 sm:$0x30] %v1784_v56  ;;  %2117 = vmatmul.f32.gmra.mxu0 %v7541_v50  ;;  %2302 = vmatpush.msrb.mxu1 %v10248_v8  ;;  %v8569_v8 = vld [vmem:[%s9685_s9 + $0x130] sm:$0xff] }
 0x3b0   : > { %3807 = vst [vmem:[#allocation4 + $0x101] ss:$16 sm:$0xc0] %v1784_v56  ;;  %v8487_v56 = vld [vmem:[%s9685_s9 + $0x1f0] sm:$0xff]  ;;  %2158 = vmatmul.f32.gmra.mxu1 %v7541_v50 }
 0x3b1   : > { %3852 = vst [vmem:[#allocation4 + $0x102] ss:$16 sm:$0x3] %v1825_v40  ;;  %2199 = vmatmul.f32.gmra.mxu2 %v7541_v50  ;;  %v10247_v39 = vunpack.c.h.bf16 %v8487_v56 }
 0x3b2   : > { %3853 = vst [vmem:[#allocation4 + $0x102] ss:$16 sm:$0xc] %v1825_v40 }
 0x3b3   : > { %3854 = vst [vmem:[#allocation4 + $0x102] ss:$16 sm:$0x30] %v1825_v40  ;;  %2261 = vmatpush.msrb.mxu0 %v10247_v39 }
 0x3b4   : > { %3855 = vst [vmem:[#allocation4 + $0x102] ss:$16 sm:$0xc0] %v1825_v40  ;;  %v10005_v40 = vunpack.c.l.bf16 %v8487_v56  ;;  %v1790_v39 = vpop.f32.mrf.mxu0 }
 0x3b5   : > { %10239 = vst [vmem:[#allocation110_spill] sm:$0xff] %v8487_v56  ;;  %2079 = vmatmul.f32.gmra.mxu3 %v7588_v62  ;;  %2262 = vmatpush.msrb.mxu0 %v10017_v57 }
 0x3b6   : > { %10240 = vst [vmem:[#allocation111_spill] sm:$0xff] %v8492_v3  ;;  %2220 = vmatpush.msra.mxu3 %v10005_v40 }
 0x3b7   : > { %3756 = vst [vmem:[#allocation4 + $0x100] ss:$16 sm:$0x3] %v1743_v61  ;;  %2120 = vmatmul.f32.gmra.mxu0 %v7588_v62 }
 0x3b8   : > { %3757 = vst [vmem:[#allocation4 + $0x100] ss:$16 sm:$0xc] %v1743_v61  ;;  %2221 = vmatpush.msra.mxu3 %v10006_v12  ;;  %v1869_v12 = vpop.f32.mrf.mxu2  ;;  %2161 = vmatmul.f32.gmra.mxu1 %v7588_v62 }
 0x3b9   : > { %3758 = vst [vmem:[#allocation4 + $0x100] ss:$16 sm:$0x30] %v1743_v61  ;;  %2202 = vmatmul.f32.gmra.mxu2 %v7588_v62 }
 0x3ba   : > { %3759 = vst [vmem:[#allocation4 + $0x100] ss:$16 sm:$0xc0] %v1743_v61  ;;  %v8522_v61 = vld [vmem:[%s9685_s9 + $0x1b8] sm:$0xff] }
 0x3bb   : > { %3900 = vst [vmem:[#allocation4 + $0x103] ss:$16 sm:$0x3] %v1866_v37  ;;  %v10007_v4 = vunpack.c.h.bf16 %v8522_v61  ;;  %v10016_v40 = vunpack.c.l.bf16 %v8522_v61 }
 0x3bc   : > { %3901 = vst [vmem:[#allocation4 + $0x103] ss:$16 sm:$0xc] %v1866_v37 }
 0x3bd   : > { %3902 = vst [vmem:[#allocation4 + $0x103] ss:$16 sm:$0x30] %v1866_v37  ;;  %2344 = vmatpush.msrb.mxu2 %v10007_v4  ;;  %v8544_v4 = vld [vmem:[%s9685_s9 + $0x178] sm:$0xff]  ;;  %2303 = vmatpush.msrb.mxu1 %v10016_v40  ;;  %v10023_v40 = vunpack.c.l.bf16 %v8569_v8 }
 0x3be   : > { %3903 = vst [vmem:[#allocation4 + $0x103] ss:$16 sm:$0xc0] %v1866_v37  ;;  %v1746_v37 = vpop.f32.mrf.mxu3  ;;  %v10018_v13 = vunpack.c.h.bf16 %v8544_v4  ;;  %2082 = vmatmul.f32.gmra.mxu3 %v7714_v59  ;;  %v10253_v56 = vunpack.c.l.bf16 %v8544_v4 }
 0x3bf   : > { %10243 = vst [vmem:[#allocation112_spill] sm:$0xff] %v8517_v44  ;;  %2123 = vmatmul.f32.gmra.mxu0 %v7714_v59 }
 0x3c0   : > { %10244 = vst [vmem:[#allocation113_spill] sm:$0xff] %v8522_v61  ;;  %2345 = vmatpush.msrb.mxu2 %v10018_v13  ;;  %v1831_v13 = vpop.f32.mrf.mxu1  ;;  %2164 = vmatmul.f32.gmra.mxu1 %v7714_v59  ;;  %v1872_v44 = vpop.f32.mrf.mxu2 }
 0x3c1   : > { %3809 = vst [vmem:[#allocation4 + $0x181] ss:$16 sm:$0x3] %v1787_v60  ;;  %2205 = vmatmul.f32.gmra.mxu2 %v7714_v59  ;;  %2304 = vmatpush.msrb.mxu1 %v10253_v56  ;;  %v8620_v56 = vld [vmem:[%s9685_s9 + $0xb0] sm:$0xff] }
 0x3c2   : > { %3810 = vst [vmem:[#allocation4 + $0x181] ss:$16 sm:$0xc] %v1787_v60 }
 0x3c3   : > { %3811 = vst [vmem:[#allocation4 + $0x181] ss:$16 sm:$0x30] %v1787_v60 }
 0x3c4   : > { %3812 = vst [vmem:[#allocation4 + $0x181] ss:$16 sm:$0xc0] %v1787_v60  ;;  %v8539_v60 = vld [vmem:[%s9685_s9 + $0x170] sm:$0xff] }
 0x3c5   : > { %3857 = vst [vmem:[#allocation4 + $0x182] ss:$16 sm:$0x3] %v1828_v34  ;;  %v10252_v3 = vunpack.c.h.bf16 %v8539_v60 }
 0x3c6   : > { %3858 = vst [vmem:[#allocation4 + $0x182] ss:$16 sm:$0xc] %v1828_v34  ;;  %2085 = vmatmul.f32.gmra.mxu3 %v7795_v42 }
 0x3c7   : > { %3859 = vst [vmem:[#allocation4 + $0x182] ss:$16 sm:$0x30] %v1828_v34  ;;  %2263 = vmatpush.msrb.mxu0 %v10252_v3  ;;  %v1793_v3 = vpop.f32.mrf.mxu0 }
 0x3c8   : > { %3860 = vst [vmem:[#allocation4 + $0x182] ss:$16 sm:$0xc0] %v1828_v34  ;;  %v10019_v34 = vunpack.c.l.bf16 %v8539_v60  ;;  %2126 = vmatmul.f32.gmra.mxu0 %v7795_v42  ;;  %2167 = vmatmul.f32.gmra.mxu1 %v7795_v42 }
 0x3c9   : > { %10245 = vst [vmem:[#allocation114_spill] sm:$0xff] %v8539_v60  ;;  %2208 = vmatmul.f32.gmra.mxu2 %v7795_v42 }
 0x3ca   : > { %10246 = vst [vmem:[#allocation115_spill] sm:$0xff] %v8544_v4  ;;  %2222 = vmatpush.msra.mxu3 %v10019_v34 }
 0x3cb   : > { %3761 = vst [vmem:[#allocation4 + $0x180] ss:$16 sm:$0x3] %v1746_v37 }
 0x3cc   : > { %3762 = vst [vmem:[#allocation4 + $0x180] ss:$16 sm:$0xc] %v1746_v37  ;;  %2223 = vmatpush.msra.mxu3 %v10023_v40  ;;  %v10031_v40 = vunpack.c.h.bf16 %v8569_v8 }
 0x3cd   : > { %3763 = vst [vmem:[#allocation4 + $0x180] ss:$16 sm:$0x30] %v1746_v37 }
 0x3ce   : > { %3764 = vst [vmem:[#allocation4 + $0x180] ss:$16 sm:$0xc0] %v1746_v37  ;;  %v8574_v37 = vld [vmem:[%s9685_s9 + $0x138] sm:$0xff]  ;;  %2264 = vmatpush.msrb.mxu0 %v10031_v40 }
 0x3cf   : > { %3905 = vst [vmem:[#allocation4 + $0x183] ss:$16 sm:$0x3] %v1869_v12  ;;  %v10022_v57 = vunpack.c.h.bf16 %v8574_v37 }
 0x3d0   : > { %3906 = vst [vmem:[#allocation4 + $0x183] ss:$16 sm:$0xc] %v1869_v12 }
 0x3d1   : > { %3907 = vst [vmem:[#allocation4 + $0x183] ss:$16 sm:$0x30] %v1869_v12  ;;  %2346 = vmatpush.msrb.mxu2 %v10022_v57  ;;  %v8596_v57 = vld [vmem:[%s9685_s9 + $0xf8] sm:$0xff] }
 0x3d2   : > { %3908 = vst [vmem:[#allocation4 + $0x183] ss:$16 sm:$0xc0] %v1869_v12  ;;  %v1749_v12 = vpop.f32.mrf.mxu3  ;;  %v10032_v61 = vunpack.c.h.bf16 %v8596_v57  ;;  %v10257_v60 = vunpack.c.l.bf16 %v8596_v57 }
 0x3d3   : > { %10249 = vst [vmem:[#allocation116_spill] sm:$0xff] %v8569_v8  ;;  %v8639_v8 = vld [vmem:[%s9685_s9 + $0x70] sm:$0xff] }
 0x3d4   : > { %10250 = vst [vmem:[#allocation117_spill] sm:$0xff] %v8574_v37  ;;  %2347 = vmatpush.msrb.mxu2 %v10032_v61  ;;  %v1834_v61 = vpop.f32.mrf.mxu1 }
 0x3d5   : > { %3814 = vst [vmem:[#allocation4 + $0x201] ss:$16 sm:$0x3] %v1790_v39 }
 0x3d6   : > { %3815 = vst [vmem:[#allocation4 + $0x201] ss:$16 sm:$0xc] %v1790_v39 }
 0x3d7   : > { %3816 = vst [vmem:[#allocation4 + $0x201] ss:$16 sm:$0x30] %v1790_v39 }
 0x3d8   : > { %3817 = vst [vmem:[#allocation4 + $0x201] ss:$16 sm:$0xc0] %v1790_v39  ;;  %v8591_v39 = vld [vmem:[%s9685_s9 + $0xf0] sm:$0xff] }
 0x3d9   : > { %3862 = vst [vmem:[#allocation4 + $0x202] ss:$16 sm:$0x3] %v1831_v13  ;;  %v10033_v34 = vunpack.c.l.bf16 %v8591_v39  ;;  %v10256_v4 = vunpack.c.h.bf16 %v8591_v39 }
 0x3da   : > { %3863 = vst [vmem:[#allocation4 + $0x202] ss:$16 sm:$0xc] %v1831_v13 }
 0x3db   : > { %3864 = vst [vmem:[#allocation4 + $0x202] ss:$16 sm:$0x30] %v1831_v13  ;;  %2224 = vmatpush.msra.mxu3 %v10033_v34  ;;  %2265 = vmatpush.msrb.mxu0 %v10256_v4  ;;  %v1796_v4 = vpop.f32.mrf.mxu0 }
 0x3dc   : > { %3865 = vst [vmem:[#allocation4 + $0x202] ss:$16 sm:$0xc0] %v1831_v13  ;;  %v10030_v13 = vunpack.c.l.bf16 %v8574_v37  ;;  %v1875_v37 = vpop.f32.mrf.mxu2 }
 0x3dd   : > { %10251 = vst [vmem:[#allocation118_spill] sm:$0xff] %v8596_v57  ;;  %v10260_v57 = vunpack.c.l.bf16 %v6820_v19 }
 0x3de   : > { %3766 = vst [vmem:[#allocation4 + $0x200] ss:$16 sm:$0x3] %v1749_v12  ;;  %2305 = vmatpush.msrb.mxu1 %v10030_v13  ;;  %v10038_v13 = vunpack.c.l.bf16 %v8620_v56 }
 0x3df   : > { %3767 = vst [vmem:[#allocation4 + $0x200] ss:$16 sm:$0xc] %v1749_v12 }
 0x3e0   : > { %3768 = vst [vmem:[#allocation4 + $0x200] ss:$16 sm:$0x30] %v1749_v12  ;;  %2225 = vmatpush.msra.mxu3 %v10038_v13  ;;  %v8644_v13 = vld [vmem:[%s9685_s9 + $0x78] sm:$0xff]  ;;  %2306 = vmatpush.msrb.mxu1 %v10257_v60  ;;  %v8665_v60 = vld [vmem:[%s9685_s9 + $0x30] sm:$0xff] }
 0x3e1   : > { %3769 = vst [vmem:[#allocation4 + $0x200] ss:$16 sm:$0xc0] %v1749_v12  ;;  %v8625_v12 = vld [vmem:[%s9685_s9 + $0xb8] sm:$0xff]  ;;  %v10046_v34 = vunpack.c.h.bf16 %v8644_v13 }
 0x3e2   : > { %3910 = vst [vmem:[#allocation4 + $0x203] ss:$16 sm:$0x3] %v1872_v44  ;;  %v10039_v40 = vunpack.c.h.bf16 %v8625_v12 }
 0x3e3   : > { %3911 = vst [vmem:[#allocation4 + $0x203] ss:$16 sm:$0xc] %v1872_v44 }
 0x3e4   : > { %3912 = vst [vmem:[#allocation4 + $0x203] ss:$16 sm:$0x30] %v1872_v44  ;;  %2348 = vmatpush.msrb.mxu2 %v10039_v40  ;;  %v10045_v40 = vunpack.c.l.bf16 %v8625_v12 }
 0x3e5   : > { %3913 = vst [vmem:[#allocation4 + $0x203] ss:$16 sm:$0xc0] %v1872_v44  ;;  %v1752_v44 = vpop.f32.mrf.mxu3 }
 0x3e6   : > { %10254 = vst [vmem:[#allocation119_spill] sm:$0xff] %v8620_v56  ;;  %2349 = vmatpush.msrb.mxu2 %v10046_v34  ;;  %2307 = vmatpush.msrb.mxu1 %v10045_v40  ;;  %v1837_v34 = vpop.f32.mrf.mxu1 }
 0x3e7   : > { %10255 = vst [vmem:[#allocation120_spill] sm:$0xff] %v8625_v12  ;;  %v10258_v12 = vunpack.c.l.bf16 %v6805_v27 }
 0x3e8   : > { %3819 = vst [vmem:[#allocation4 + $0x281] ss:$16 sm:$0x3] %v1793_v3 }
 0x3e9   : > { %3820 = vst [vmem:[#allocation4 + $0x281] ss:$16 sm:$0xc] %v1793_v3 }
 0x3ea   : > { %3821 = vst [vmem:[#allocation4 + $0x281] ss:$16 sm:$0x30] %v1793_v3 }
 0x3eb   : > { %3822 = vst [vmem:[#allocation4 + $0x281] ss:$16 sm:$0xc0] %v1793_v3  ;;  %v10044_v3 = vunpack.c.h.bf16 %v8620_v56  ;;  %v10259_v56 = vunpack.c.h.bf16 %v6810_v5 }
 0x3ec   : > { %3867 = vst [vmem:[#allocation4 + $0x282] ss:$16 sm:$0x3] %v1834_v61 }
 0x3ed   : > { %3868 = vst [vmem:[#allocation4 + $0x282] ss:$16 sm:$0xc] %v1834_v61  ;;  %2266 = vmatpush.msrb.mxu0 %v10044_v3  ;;  %v10052_v3 = vunpack.c.l.bf16 %v8665_v60 }
 0x3ee   : > { %3869 = vst [vmem:[#allocation4 + $0x282] ss:$16 sm:$0x30] %v1834_v61 }
 0x3ef   : > { %3870 = vst [vmem:[#allocation4 + $0x282] ss:$16 sm:$0xc0] %v1834_v61  ;;  %v10047_v61 = vunpack.c.l.bf16 %v8639_v8 }
 0x3f0   : > { %3771 = vst [vmem:[#allocation4 + $0x280] ss:$16 sm:$0x3] %v1752_v44 }
 0x3f1   : > { %3772 = vst [vmem:[#allocation4 + $0x280] ss:$16 sm:$0xc] %v1752_v44  ;;  %2226 = vmatpush.msra.mxu3 %v10047_v61  ;;  %v1494_v61 = vunpack.c.l.bf16 %v8644_v13 }
 0x3f2   : > { %3773 = vst [vmem:[#allocation4 + $0x280] ss:$16 sm:$0x30] %v1752_v44 }
 0x3f3   : > { %3774 = vst [vmem:[#allocation4 + $0x280] ss:$16 sm:$0xc0] %v1752_v44  ;;  %v8670_v44 = vld [vmem:[%s9685_s9 + $0x38] sm:$0xff]  ;;  %2227 = vmatpush.msra.mxu3 %v10052_v3  ;;  %v1755_v3 = vpop.f32.mrf.mxu3  ;;  %2308 = vmatpush.msrb.mxu1 %v1494_v61 }
 0x3f4   : > { %3915 = vst [vmem:[#allocation4 + $0x283] ss:$16 sm:$0x3] %v1875_v37  ;;  %v10053_v40 = vunpack.c.h.bf16 %v8670_v44  ;;  %2228 = vmatmul.f32.vlgmr.msra.gmra.mxu3 %v7240_v18 }
 0x3f5   : > { %3916 = vst [vmem:[#allocation4 + $0x283] ss:$16 sm:$0xc] %v1875_v37  ;;  %2376 = vmatpush.msrb.mxu3 %v10258_v12  ;;  %v10261_v12 = vunpack.c.h.bf16 %v6829_v17 }
 0x3f6   : > { %3917 = vst [vmem:[#allocation4 + $0x283] ss:$16 sm:$0x30] %v1875_v37  ;;  %2350 = vmatpush.msrb.mxu2 %v10053_v40  ;;  %v10056_v40 = vunpack.c.l.bf16 %v8670_v44 }
 0x3f7   : > { %3918 = vst [vmem:[#allocation4 + $0x283] ss:$16 sm:$0xc0] %v1875_v37  ;;  %2351 = vmatmul.f32.vlgmr.msrb.gmra.mxu2 %v7240_v18  ;;  %v1493_v37 = vunpack.c.h.bf16 %v8639_v8  ;;  %2377 = vmatpush.msrb.mxu3 %v10260_v57  ;;  %v10263_v57 = vunpack.c.l.bf16 %v6810_v5  ;;  %v10267_v5 = vunpack.c.l.bf16 %v6829_v17  ;;  %v10273_v17 = vunpack.c.h.bf16 %v6928_v0 }
 0x3f8   : > { %3824 = vst [vmem:[#allocation4 + $0x301] ss:$16 sm:$0x3] %v1796_v4  ;;  %2499 = vmatpush.msra.mxu2 %v10259_v56  ;;  %2309 = vmatpush.msrb.mxu1 %v10056_v40  ;;  %v1878_v56 = vpop.f32.mrf.mxu2  ;;  %v10265_v40 = vunpack.c.h.bf16 %v6848_v36 }
 0x3f9   : > { %3825 = vst [vmem:[#allocation4 + $0x301] ss:$16 sm:$0xc] %v1796_v4  ;;  %2267 = vmatpush.msrb.mxu0 %v1493_v37  ;;  %2310 = vmatmul.f32.vlgmr.msrb.gmra.mxu1 %v7240_v18 }
 0x3fa   : > { %3826 = vst [vmem:[#allocation4 + $0x301] ss:$16 sm:$0x30] %v1796_v4  ;;  %2500 = vmatpush.msra.mxu2 %v10261_v12  ;;  %2458 = vmatpush.msra.mxu1 %v10263_v57  ;;  %v10264_v12 = vunpack.c.l.bf16 %v6837_v1  ;;  %v10270_v57 = vunpack.c.h.bf16 %v6837_v1  ;;  %v10274_v1 = vunpack.c.h.bf16 %v6853_v38 }
 0x3fb   : > { %3827 = vst [vmem:[#allocation4 + $0x301] ss:$16 sm:$0xc0] %v1796_v4  ;;  %v1477_v4 = vunpack.c.h.bf16 %v8665_v60 }
 0x3fc   : > { %3872 = vst [vmem:[#allocation4 + $0x302] ss:$16 sm:$0x3] %v1837_v34  ;;  %2231 = vmatmul.f32.gmra.mxu3 %v7247_v15  ;;  %2501 = vmatpush.msra.mxu2 %v10265_v40  ;;  %v10271_v40 = vunpack.c.l.bf16 %v6848_v36  ;;  %v10275_v36 = vunpack.c.l.bf16 %v6870_v26 }
 0x3fd   : > { %3873 = vst [vmem:[#allocation4 + $0x302] ss:$16 sm:$0xc] %v1837_v34  ;;  %2268 = vmatpush.msrb.mxu0 %v1477_v4  ;;  %2378 = vmatpush.msrb.mxu3 %v10264_v12  ;;  %v1840_v12 = vpop.f32.mrf.mxu1 }
 0x3fe   : > { %3874 = vst [vmem:[#allocation4 + $0x302] ss:$16 sm:$0x30] %v1837_v34  ;;  %2269 = vmatmul.f32.vlgmr.msrb.gmra.mxu0 %v7240_v18  ;;  %v1799_v18 = vpop.f32.mrf.mxu0  ;;  %2459 = vmatpush.msra.mxu1 %v10267_v5  ;;  %v10281_v5 = vunpack.c.h.bf16 %v6979_v2 }
 0x3ff   : > { %3875 = vst [vmem:[#allocation4 + $0x302] ss:$16 sm:$0xc0] %v1837_v34  ;;  %v10262_v34 = vunpack.c.h.bf16 %v6805_v27  ;;  %2354 = vmatmul.f32.gmra.mxu2 %v7247_v15  ;;  %v10266_v27 = vunpack.c.h.bf16 %v6820_v19  ;;  %v10272_v19 = vunpack.c.l.bf16 %v6875_v51 }
 0x400   : > { %3776 = vst [vmem:[#allocation4 + $0x300] ss:$16 sm:$0x3] %v1755_v3  ;;  %2460 = vmatpush.msra.mxu1 %v10271_v40  ;;  %v10288_v40 = vunpack.c.l.bf16 %v6988_v48 }
 0x401   : > { %3777 = vst [vmem:[#allocation4 + $0x300] ss:$16 sm:$0xc] %v1755_v3  ;;  %2417 = vmatpush.msra.mxu0 %v10262_v34  ;;  %v10269_v34 = vunpack.c.h.bf16 %v6870_v26  ;;  %2313 = vmatmul.f32.gmra.mxu1 %v7247_v15  ;;  %v10279_v26 = vunpack.c.l.bf16 %v6928_v0  ;;  %v10285_v0 = vunpack.c.h.bf16 %v7017_v49 }
 0x402   : > { %3778 = vst [vmem:[#allocation4 + $0x300] ss:$16 sm:$0x30] %v1755_v3  ;;  %2461 = vmatpush.msra.mxu1 %v10275_v36  ;;  %v10295_v36 = vld [vmem:[#allocation34_spill] sm:$0xff] }
 0x403   : > { %3779 = vst [vmem:[#allocation4 + $0x300] ss:$16 sm:$0xc0] %v1755_v3  ;;  %2418 = vmatpush.msra.mxu0 %v10266_v27  ;;  %v10268_v3 = vunpack.c.l.bf16 %v6853_v38  ;;  %2502 = vmatpush.msra.mxu2 %v10269_v34  ;;  %v10277_v27 = vunpack.c.h.bf16 %v6953_v41  ;;  %v10278_v38 = vunpack.c.h.bf16 %v6875_v51  ;;  %v10283_v34 = vunpack.c.l.bf16 %v6953_v41 }
 0x404   : > { %3920 = vst [vmem:[#allocation4 + $0x303] ss:$16 sm:$0x3] %v1878_v56  ;;  %2234 = vmatmul.f32.gmra.mxu3 %v7299_v11  ;;  %2462 = vmatpush.msra.mxu1 %v10279_v26  ;;  %v10284_v51 = vunpack.c.l.bf16 %v6966_v6  ;;  %v10287_v41 = vunpack.c.l.bf16 %v6979_v2  ;;  %v10292_v2 = vunpack.c.l.bf16 %v7017_v49  ;;  %v10301_v49 = vld [vmem:[#allocation36_spill] sm:$0xff] }
 0x405   : > { %3921 = vst [vmem:[#allocation4 + $0x303] ss:$16 sm:$0xc] %v1878_v56  ;;  %2379 = vmatpush.msrb.mxu3 %v10268_v3  ;;  %2419 = vmatpush.msra.mxu0 %v10270_v57  ;;  %v10282_v3 = vunpack.c.h.bf16 %v6912_v22  ;;  %v1881_v57 = vpop.f32.mrf.mxu2  ;;  %v10302_v26 = vunpack.c.h.bf16 %v10301_v49 }
 0x406   : > { %3922 = vst [vmem:[#allocation4 + $0x303] ss:$16 sm:$0x30] %v1878_v56  ;;  %2503 = vmatpush.msra.mxu2 %v10273_v17  ;;  %2272 = vmatmul.f32.gmra.mxu0 %v7247_v15  ;;  %v1758_v15 = vpop.f32.mrf.mxu3 }
 0x407   : > { %3923 = vst [vmem:[#allocation4 + $0x303] ss:$16 sm:$0xc0] %v1878_v56  ;;  %2380 = vmatpush.msrb.mxu3 %v10272_v19  ;;  %2420 = vmatpush.msra.mxu0 %v10274_v1  ;;  %v10276_v56 = vunpack.c.l.bf16 %v6912_v22  ;;  %v10286_v22 = vunpack.c.h.bf16 %v6939_v47  ;;  %v10289_v19 = vld [vmem:[#allocation32_spill] sm:$0xff] }
 0x408   : > { %3829 = vst [vmem:[#allocation4 + $0x381] ss:$16 sm:$0x3] %v1799_v18  ;;  %2357 = vmatmul.f32.gmra.mxu2 %v7299_v11  ;;  %2463 = vmatpush.msra.mxu1 %v10283_v34  ;;  %v10290_v17 = vunpack.c.h.bf16 %v10289_v19 }
 0x409   : > { %3830 = vst [vmem:[#allocation4 + $0x381] ss:$16 sm:$0xc] %v1799_v18  ;;  %2381 = vmatpush.msrb.mxu3 %v10276_v56  ;;  %2504 = vmatpush.msra.mxu2 %v10277_v27  ;;  %v10296_v56 = vunpack.c.h.bf16 %v10295_v36  ;;  %v10297_v27 = vunpack.c.h.bf16 %v6988_v48 }
 0x40a   : > { %3831 = vst [vmem:[#allocation4 + $0x381] ss:$16 sm:$0x30] %v1799_v18  ;;  %2421 = vmatpush.msra.mxu0 %v10278_v38  ;;  %2316 = vmatmul.f32.gmra.mxu1 %v7299_v11 }
 0x40b   : > { %3832 = vst [vmem:[#allocation4 + $0x381] ss:$16 sm:$0xc0] %v1799_v18  ;;  %v10280_v18 = vunpack.c.l.bf16 %v6939_v47  ;;  %2505 = vmatpush.msra.mxu2 %v10281_v5  ;;  %2464 = vmatpush.msra.mxu1 %v10287_v41  ;;  %v10291_v47 = vunpack.c.h.bf16 %v6966_v6  ;;  %v10299_v6 = vld [vmem:[#allocation33_spill] sm:$0xff]  ;;  %v10304_v5 = vunpack.c.l.bf16 %v10295_v36 }
 0x40c   : > { %3877 = vst [vmem:[#allocation4 + $0x382] ss:$16 sm:$0x3] %v1840_v12  ;;  %2422 = vmatpush.msra.mxu0 %v10282_v3  ;;  %2237 = vmatmul.f32.gmra.mxu3 %v7461_v9  ;;  %v10300_v38 = vunpack.c.l.bf16 %v10299_v6  ;;  %v10305_v3 = vld [vmem:[#allocation35_spill] sm:$0xff]  ;;  %v10311_v41 = vld [vmem:[#allocation37_spill] sm:$0xff] }
 0x40d   : > { %3878 = vst [vmem:[#allocation4 + $0x382] ss:$16 sm:$0xc] %v1840_v12  ;;  %2382 = vmatpush.msrb.mxu3 %v10280_v18  ;;  %2506 = vmatpush.msra.mxu2 %v10285_v0  ;;  %v1983_v18 = vpop.f32.mrf.mxu1  ;;  %v10306_v34 = vunpack.c.l.bf16 %v10305_v3 }
 0x40e   : > { %3879 = vst [vmem:[#allocation4 + $0x382] ss:$16 sm:$0x30] %v1840_v12  ;;  %2275 = vmatmul.f32.gmra.mxu0 %v7299_v11  ;;  %v1942_v11 = vpop.f32.mrf.mxu0  ;;  %2465 = vmatpush.msra.mxu1 %v10292_v2  ;;  %v10317_v2 = vld [vmem:[#allocation40_spill] sm:$0xff] }
 0x40f   : > { %3880 = vst [vmem:[#allocation4 + $0x382] ss:$16 sm:$0xc0] %v1840_v12  ;;  %2383 = vmatpush.msrb.mxu3 %v10284_v51  ;;  %2423 = vmatpush.msra.mxu0 %v10286_v22  ;;  %v10293_v12 = vld [vmem:[#allocation30_spill] sm:$0xff]  ;;  %v10307_v51 = vld [vmem:[#allocation39_spill] sm:$0xff]  ;;  %v10310_v22 = vunpack.c.l.bf16 %v10301_v49  ;;  %v10325_v49 = vld [vmem:[#allocation45_spill] sm:$0xff] }
 0x410   : > { %3781 = vst [vmem:[#allocation4 + $0x380] ss:$16 sm:$0x3] %v1758_v15  ;;  %2360 = vmatmul.f32.gmra.mxu2 %v7461_v9  ;;  %v10294_v1 = vunpack.c.l.bf16 %v10293_v12  ;;  %v10303_v48 = vunpack.c.h.bf16 %v10293_v12  ;;  %v10308_v0 = vunpack.c.h.bf16 %v10307_v51  ;;  %v10318_v12 = vunpack.c.l.bf16 %v10317_v2 }
 0x411   : > { %3782 = vst [vmem:[#allocation4 + $0x380] ss:$16 sm:$0xc] %v1758_v15  ;;  %2384 = vmatpush.msrb.mxu3 %v10288_v40  ;;  %2507 = vmatpush.msra.mxu2 %v10290_v17  ;;  %v10312_v40 = vunpack.c.l.bf16 %v10311_v41 }
 0x412   : > { %3783 = vst [vmem:[#allocation4 + $0x380] ss:$16 sm:$0x30] %v1758_v15  ;;  %2424 = vmatpush.msra.mxu0 %v10291_v47  ;;  %2319 = vmatmul.f32.gmra.mxu1 %v7461_v9  ;;  %v10316_v47 = vunpack.c.l.bf16 %v10307_v51 }
 0x413   : > { %3784 = vst [vmem:[#allocation4 + $0x380] ss:$16 sm:$0xc0] %v1758_v15  ;;  %2385 = vmatpush.msrb.mxu3 %v10294_v1  ;;  %2508 = vmatpush.msra.mxu2 %v10296_v56  ;;  %v10298_v15 = vunpack.c.l.bf16 %v10289_v19  ;;  %v10313_v19 = vld [vmem:[#allocation41_spill] sm:$0xff]  ;;  %v10319_v1 = vld [vmem:[#allocation43_spill] sm:$0xff]  ;;  %v2024_v56 = vpop.f32.mrf.mxu2 }
 0x414   : > { %3925 = vst [vmem:[#allocation4 + $0x383] ss:$16 sm:$0x3] %v1881_v57  ;;  %2425 = vmatpush.msra.mxu0 %v10297_v27  ;;  %2240 = vmatmul.f32.gmra.mxu3 %v7541_v50  ;;  %v10314_v17 = vunpack.c.h.bf16 %v10313_v19  ;;  %v10320_v36 = vunpack.c.h.bf16 %v10319_v1  ;;  %v10321_v27 = vunpack.c.h.bf16 %v10311_v41  ;;  %v10337_v41 = vld [vmem:[#allocation48_spill] sm:$0xff] }
 0x415   : > { %3926 = vst [vmem:[#allocation4 + $0x383] ss:$16 sm:$0xc] %v1881_v57  ;;  %2466 = vmatpush.msra.mxu1 %v10298_v15  ;;  %2386 = vmatpush.msrb.mxu3 %v10300_v38  ;;  %v10322_v15 = vunpack.c.l.bf16 %v10313_v19  ;;  %v1986_v19 = vpop.f32.mrf.mxu1 }
 0x416   : > { %3927 = vst [vmem:[#allocation4 + $0x383] ss:$16 sm:$0x30] %v1881_v57  ;;  %2509 = vmatpush.msra.mxu2 %v10302_v26  ;;  %2278 = vmatmul.f32.gmra.mxu0 %v7461_v9  ;;  %v1901_v9 = vpop.f32.mrf.mxu3  ;;  %v10326_v26 = vunpack.c.h.bf16 %v10325_v49 }
 0x417   : > { %3928 = vst [vmem:[#allocation4 + $0x383] ss:$16 sm:$0xc0] %v1881_v57  ;;  %2426 = vmatpush.msra.mxu0 %v10303_v48  ;;  %2467 = vmatpush.msra.mxu1 %v10304_v5  ;;  %v10309_v57 = vunpack.c.h.bf16 %v10299_v6  ;;  %v10323_v6 = vld [vmem:[#allocation42_spill] sm:$0xff]  ;;  %v10328_v48 = vunpack.c.l.bf16 %v10319_v1  ;;  %v10329_v5 = vld [vmem:[#allocation44_spill] sm:$0xff] }
 0x418   : > { %3986 = vst [vmem:[#allocation4 + $0x5] ss:$16 sm:$0x3] %v1942_v11  ;;  %2363 = vmatmul.f32.gmra.mxu2 %v7541_v50  ;;  %2387 = vmatpush.msrb.mxu3 %v10306_v34  ;;  %v10324_v38 = vunpack.c.l.bf16 %v10323_v6  ;;  %v10331_v34 = vld [vmem:[#allocation46_spill] sm:$0xff] }
 0x419   : > { %3987 = vst [vmem:[#allocation4 + $0x5] ss:$16 sm:$0xc] %v1942_v11  ;;  %2510 = vmatpush.msra.mxu2 %v10308_v0  ;;  %2427 = vmatpush.msra.mxu0 %v10309_v57  ;;  %v10332_v51 = vunpack.c.h.bf16 %v10331_v34  ;;  %v10333_v0 = vunpack.c.h.bf16 %v10323_v6  ;;  %v10335_v57 = vld [vmem:[#allocation47_spill] sm:$0xff] }
 0x41a   : > { %3988 = vst [vmem:[#allocation4 + $0x5] ss:$16 sm:$0x30] %v1942_v11  ;;  %2468 = vmatpush.msra.mxu1 %v10310_v22  ;;  %2388 = vmatpush.msrb.mxu3 %v10312_v40  ;;  %v10336_v22 = vunpack.c.l.bf16 %v10335_v57  ;;  %v10338_v40 = vunpack.c.h.bf16 %v10337_v41  ;;  %v10344_v1 = vunpack.c.h.bf16 %v10335_v57  ;;  %v10362_v57 = vld [vmem:[#allocation54_spill] sm:$0xff] }
 0x41b   : > { %3989 = vst [vmem:[#allocation4 + $0x5] ss:$16 sm:$0xc0] %v1942_v11  ;;  %2511 = vmatpush.msra.mxu2 %v10314_v17  ;;  %v10315_v11 = vunpack.c.h.bf16 %v10305_v3  ;;  %2322 = vmatmul.f32.gmra.mxu1 %v7541_v50  ;;  %v10330_v3 = vunpack.c.l.bf16 %v10329_v5  ;;  %v10339_v17 = vunpack.c.h.bf16 %v10329_v5  ;;  %v10356_v5 = vld [vmem:[#allocation52_spill] sm:$0xff] }
 0x41c   : > { %4034 = vst [vmem:[#allocation4 + $0x6] ss:$16 sm:$0x3] %v1983_v18  ;;  %2469 = vmatpush.msra.mxu1 %v10316_v47  ;;  %2389 = vmatpush.msrb.mxu3 %v10318_v12  ;;  %v10341_v47 = vunpack.c.l.bf16 %v7273_v54 }
 0x41d   : > { %4035 = vst [vmem:[#allocation4 + $0x6] ss:$16 sm:$0xc] %v1983_v18  ;;  %2428 = vmatpush.msra.mxu0 %v10315_v11  ;;  %2512 = vmatpush.msra.mxu2 %v10320_v36  ;;  %v10340_v11 = vunpack.c.l.bf16 %v10331_v34  ;;  %v10345_v36 = vunpack.c.l.bf16 %v10337_v41  ;;  %v10358_v34 = vld [vmem:[#allocation53_spill] sm:$0xff]  ;;  %v10364_v41 = vld [vmem:[#allocation55_spill] sm:$0xff] }
 0x41e   : > { %4036 = vst [vmem:[#allocation4 + $0x6] ss:$16 sm:$0x30] %v1983_v18  ;;  %2281 = vmatmul.f32.gmra.mxu0 %v7541_v50  ;;  %2470 = vmatpush.msra.mxu1 %v10322_v15  ;;  %v1945_v50 = vpop.f32.mrf.mxu0  ;;  %v10348_v15 = vld [vmem:[#allocation51_spill] sm:$0xff] }
 0x41f   : > { %4037 = vst [vmem:[#allocation4 + $0x6] ss:$16 sm:$0xc0] %v1983_v18  ;;  %2429 = vmatpush.msra.mxu0 %v10321_v27  ;;  %2243 = vmatmul.f32.gmra.mxu3 %v7588_v62  ;;  %v10327_v18 = vunpack.c.h.bf16 %v10317_v2  ;;  %v10342_v2 = vld [vmem:[#allocation49_spill] sm:$0xff]  ;;  %v10349_v6 = vunpack.c.h.bf16 %v10348_v15 }
 0x420   : > { %3938 = vst [vmem:[#allocation4 + $0x4] ss:$16 sm:$0x3] %v1901_v9  ;;  %2366 = vmatmul.f32.gmra.mxu2 %v7588_v62  ;;  %2390 = vmatpush.msrb.mxu3 %v10324_v38  ;;  %v10343_v12 = vunpack.c.h.bf16 %v10342_v2  ;;  %v10350_v38 = vunpack.c.h.bf16 %v7273_v54 }
 0x421   : > { %3939 = vst [vmem:[#allocation4 + $0x4] ss:$16 sm:$0xc] %v1901_v9  ;;  %2513 = vmatpush.msra.mxu2 %v10326_v26  ;;  %2430 = vmatpush.msra.mxu0 %v10327_v18  ;;  %v10352_v26 = vunpack.c.l.bf16 %v7348_v63  ;;  %v2027_v18 = vpop.f32.mrf.mxu2 }
 0x422   : > { %3940 = vst [vmem:[#allocation4 + $0x4] ss:$16 sm:$0x30] %v1901_v9  ;;  %2471 = vmatpush.msra.mxu1 %v10328_v48  ;;  %2391 = vmatpush.msrb.mxu3 %v10330_v3  ;;  %v10355_v48 = vunpack.c.l.bf16 %v10348_v15  ;;  %v10357_v3 = vunpack.c.l.bf16 %v10356_v5 }
 0x423   : > { %3941 = vst [vmem:[#allocation4 + $0x4] ss:$16 sm:$0xc0] %v1901_v9  ;;  %2514 = vmatpush.msra.mxu2 %v10332_v51  ;;  %2431 = vmatpush.msra.mxu0 %v10333_v0  ;;  %v10334_v9 = vunpack.c.l.bf16 %v10325_v49  ;;  %v10351_v49 = vunpack.c.l.bf16 %v10342_v2  ;;  %v10359_v51 = vunpack.c.h.bf16 %v10358_v34  ;;  %v10360_v0 = vunpack.c.h.bf16 %v7348_v63  ;;  %v10368_v63 = vld [vmem:[#allocation56_spill] sm:$0xff]  ;;  %v1989_v2 = vpop.f32.mrf.mxu1 }
 0x424   : > { %4082 = vst [vmem:[#allocation4 + $0x7] ss:$16 sm:$0x3] %v2024_v56  ;;  %2540 = vmatpush.msra.mxu3 %v10336_v22  ;;  %2325 = vmatmul.f32.gmra.mxu1 %v7588_v62  ;;  %v10363_v22 = vunpack.c.l.bf16 %v10362_v57 }
 0x425   : > { %4083 = vst [vmem:[#allocation4 + $0x7] ss:$16 sm:$0xc] %v2024_v56  ;;  %2472 = vmatpush.msra.mxu1 %v10334_v9  ;;  %2663 = vmatpush.msrb.mxu2 %v10338_v40  ;;  %v10361_v9 = vunpack.c.l.bf16 %v7353_v25  ;;  %v10365_v40 = vunpack.c.h.bf16 %v10364_v41 }
 0x426   : > { %4084 = vst [vmem:[#allocation4 + $0x7] ss:$16 sm:$0x30] %v2024_v56  ;;  %2284 = vmatmul.f32.gmra.mxu0 %v7588_v62  ;;  %2541 = vmatpush.msra.mxu3 %v10341_v47  ;;  %v1904_v62 = vpop.f32.mrf.mxu3 }
 0x427   : > { %4085 = vst [vmem:[#allocation4 + $0x7] ss:$16 sm:$0xc0] %v2024_v56  ;;  %2432 = vmatpush.msra.mxu0 %v10339_v17  ;;  %2473 = vmatpush.msra.mxu1 %v10340_v11  ;;  %v10346_v56 = vld [vmem:[#allocation50_spill] sm:$0xff]  ;;  %v10367_v17 = vunpack.c.l.bf16 %v10358_v34  ;;  %v10369_v11 = vunpack.c.l.bf16 %v10368_v63  ;;  %v10389_v34 = vld [vmem:[#allocation63_spill] sm:$0xff] }
 0x428   : > { %3991 = vst [vmem:[#allocation4 + $0x85] ss:$16 sm:$0x3] %v1945_v50  ;;  %2246 = vmatmul.f32.gmra.mxu3 %v7714_v59  ;;  %2369 = vmatmul.f32.gmra.mxu2 %v7714_v59  ;;  %v10347_v27 = vunpack.c.l.bf16 %v10346_v56  ;;  %v10354_v54 = vunpack.c.h.bf16 %v10346_v56 }
 0x429   : > { %3992 = vst [vmem:[#allocation4 + $0x85] ss:$16 sm:$0xc] %v1945_v50  ;;  %2664 = vmatpush.msrb.mxu2 %v10343_v12  ;;  %2581 = vmatpush.msrb.mxu0 %v10344_v1  ;;  %v10372_v12 = vunpack.c.h.bf16 %v10362_v57  ;;  %v10374_v1 = vld [vmem:[#allocation70_spill] sm:$0xff]  ;;  %v10393_v57 = vld [vmem:[#allocation64_spill] sm:$0xff] }
 0x42a   : > { %3993 = vst [vmem:[#allocation4 + $0x85] ss:$16 sm:$0x30] %v1945_v50  ;;  %2622 = vmatpush.msrb.mxu1 %v10345_v36  ;;  %2542 = vmatpush.msra.mxu3 %v10347_v27  ;;  %v10375_v36 = vld [vmem:[#allocation58_spill] sm:$0xff]  ;;  %v10377_v27 = vld [vmem:[#allocation59_spill] sm:$0xff] }
 0x42b   : > { %3994 = vst [vmem:[#allocation4 + $0x85] ss:$16 sm:$0xc0] %v1945_v50  ;;  %2665 = vmatpush.msrb.mxu2 %v10349_v6  ;;  %2582 = vmatpush.msrb.mxu0 %v10350_v38  ;;  %v10353_v50 = vunpack.c.h.bf16 %v7353_v25  ;;  %v10370_v25 = vld [vmem:[#allocation57_spill] sm:$0xff]  ;;  %v10376_v56 = vunpack.c.l.bf16 %v10375_v36  ;;  %v10378_v15 = vunpack.c.h.bf16 %v10377_v27  ;;  %v10379_v6 = vunpack.c.h.bf16 %v10368_v63 }
 0x42c   : > { %4039 = vst [vmem:[#allocation4 + $0x86] ss:$16 sm:$0x3] %v1986_v19  ;;  %2623 = vmatpush.msrb.mxu1 %v10351_v49  ;;  %2543 = vmatpush.msra.mxu3 %v10352_v26  ;;  %v10371_v47 = vunpack.c.h.bf16 %v10370_v25  ;;  %v10380_v38 = vunpack.c.l.bf16 %v10370_v25  ;;  %v10381_v49 = vld [vmem:[#allocation60_spill] sm:$0xff]  ;;  %v10398_v63 = vunpack.c.l.bf16 %v10389_v34 }
 0x42d   : > { %4040 = vst [vmem:[#allocation4 + $0x86] ss:$16 sm:$0xc] %v1986_v19  ;;  %2666 = vmatpush.msrb.mxu2 %v10353_v50  ;;  %2328 = vmatmul.f32.gmra.mxu1 %v7714_v59  ;;  %v10382_v26 = vunpack.c.l.bf16 %v10381_v49  ;;  %v10383_v50 = vld [vmem:[#allocation61_spill] sm:$0xff] }
 0x42e   : > { %4041 = vst [vmem:[#allocation4 + $0x86] ss:$16 sm:$0x30] %v1986_v19  ;;  %2287 = vmatmul.f32.gmra.mxu0 %v7714_v59  ;;  %2624 = vmatpush.msrb.mxu1 %v10355_v48  ;;  %v1948_v59 = vpop.f32.mrf.mxu0  ;;  %v10386_v48 = vunpack.c.l.bf16 %v10377_v27  ;;  %v10407_v27 = vld [vmem:[#allocation69_spill] sm:$0xff] }
 0x42f   : > { %4042 = vst [vmem:[#allocation4 + $0x86] ss:$16 sm:$0xc0] %v1986_v19  ;;  %2583 = vmatpush.msrb.mxu0 %v10354_v54  ;;  %2544 = vmatpush.msra.mxu3 %v10357_v3  ;;  %v10366_v19 = vunpack.c.h.bf16 %v10356_v5  ;;  %v10385_v54 = vunpack.c.h.bf16 %v10375_v36  ;;  %v10387_v5 = vld [vmem:[#allocation62_spill] sm:$0xff]  ;;  %v10405_v36 = vld [vmem:[#allocation68_spill] sm:$0xff] }
 0x430   : > { %3943 = vst [vmem:[#allocation4 + $0x84] ss:$16 sm:$0x3] %v1904_v62  ;;  %2249 = vmatmul.f32.gmra.mxu3 %v7795_v42  ;;  %2372 = vmatmul.f32.gmra.mxu2 %v7795_v42  ;;  %v10388_v3 = vunpack.c.l.bf16 %v10387_v5 }
 0x431   : > { %3944 = vst [vmem:[#allocation4 + $0x84] ss:$16 sm:$0xc] %v1904_v62  ;;  %2667 = vmatpush.msrb.mxu2 %v10359_v51  ;;  %2584 = vmatpush.msrb.mxu0 %v10360_v0  ;;  %v10390_v51 = vunpack.c.h.bf16 %v10389_v34  ;;  %v10391_v0 = vunpack.c.h.bf16 %v10381_v49  ;;  %v10417_v34 = vunpack.c.h.bf16 %v7743_v28 }
 0x432   : > { %3945 = vst [vmem:[#allocation4 + $0x84] ss:$16 sm:$0x30] %v1904_v62  ;;  %2625 = vmatpush.msrb.mxu1 %v10361_v9  ;;  %2545 = vmatpush.msra.mxu3 %v10363_v22  ;;  %v10392_v9 = vunpack.c.l.bf16 %v10383_v50  ;;  %v10394_v22 = vunpack.c.l.bf16 %v10393_v57 }
 0x433   : > { %3946 = vst [vmem:[#allocation4 + $0x84] ss:$16 sm:$0xc0] %v1904_v62  ;;  %2668 = vmatpush.msrb.mxu2 %v10365_v40  ;;  %2585 = vmatpush.msrb.mxu0 %v10366_v19  ;;  %v10373_v62 = vunpack.c.l.bf16 %v10364_v41  ;;  %v10395_v41 = vld [vmem:[#allocation65_spill] sm:$0xff] }
 0x434   : > { %4087 = vst [vmem:[#allocation4 + $0x87] ss:$16 sm:$0x3] %v2027_v18  ;;  %2626 = vmatpush.msrb.mxu1 %v10367_v17  ;;  %2546 = vmatpush.msra.mxu3 %v10369_v11  ;;  %v10396_v40 = vunpack.c.h.bf16 %v10395_v41  ;;  %v10397_v17 = vunpack.c.h.bf16 %v10387_v5  ;;  %v10399_v11 = vld [vmem:[#allocation66_spill] sm:$0xff]  ;;  %v10415_v5 = vunpack.c.l.bf16 %v7816_v30 }
 0x435   : > { %4088 = vst [vmem:[#allocation4 + $0x87] ss:$16 sm:$0xc] %v2027_v18  ;;  %2669 = vmatpush.msrb.mxu2 %v10371_v47  ;;  %2331 = vmatmul.f32.gmra.mxu1 %v7795_v42  ;;  %v10400_v25 = vunpack.c.l.bf16 %v10399_v11  ;;  %v10401_v47 = vld [vmem:[#allocation67_spill] sm:$0xff] }
 0x436   : > { %4089 = vst [vmem:[#allocation4 + $0x87] ss:$16 sm:$0x30] %v2027_v18  ;;  %2290 = vmatmul.f32.gmra.mxu0 %v7795_v42  ;;  %2627 = vmatpush.msrb.mxu1 %v10373_v62  ;;  %v1907_v42 = vpop.f32.mrf.mxu3  ;;  %v1951_v19 = vpop.f32.mrf.mxu0  ;;  %v10404_v62 = vunpack.c.l.bf16 %v10395_v41  ;;  %v10425_v41 = vunpack.c.h.bf16 %v7832_v53 }
 0x437   : > { %4090 = vst [vmem:[#allocation4 + $0x87] ss:$16 sm:$0xc0] %v2027_v18  ;;  %2586 = vmatpush.msrb.mxu0 %v10372_v12  ;;  %2547 = vmatpush.msra.mxu3 %v10376_v56  ;;  %v10384_v18 = vunpack.c.h.bf16 %v10383_v50  ;;  %v10403_v12 = vunpack.c.h.bf16 %v10393_v57  ;;  %v10406_v56 = vunpack.c.l.bf16 %v10405_v36  ;;  %v10411_v50 = vunpack.c.l.bf16 %v7743_v28 }
 0x438   : > { %3996 = vst [vmem:[#allocation4 + $0x105] ss:$16 sm:$0x3] %v1948_v59  ;;  %2392 = vmatmul.f32.vlgmr.msrb.gmra.mxu3 %v10374_v1  ;;  %2515 = vmatmul.f32.vlgmr.msra.gmra.mxu2 %v10374_v1  ;;  %v10422_v57 = vunpack.c.h.bf16 %v7816_v30  ;;  %v10423_v28 = vunpack.c.l.bf16 %v7822_v21 }
 0x439   : > { %3997 = vst [vmem:[#allocation4 + $0x105] ss:$16 sm:$0xc] %v1948_v59  ;;  %2670 = vmatpush.msrb.mxu2 %v10378_v15  ;;  %2587 = vmatpush.msrb.mxu0 %v10379_v6  ;;  %v10408_v15 = vunpack.c.h.bf16 %v10407_v27  ;;  %v10409_v6 = vunpack.c.h.bf16 %v10399_v11 }
 0x43a   : > { %3998 = vst [vmem:[#allocation4 + $0x105] ss:$16 sm:$0x30] %v1948_v59  ;;  %2628 = vmatpush.msrb.mxu1 %v10380_v38  ;;  %2548 = vmatpush.msra.mxu3 %v10382_v26  ;;  %v10410_v38 = vunpack.c.l.bf16 %v10401_v47 }
 0x43b   : > { %3999 = vst [vmem:[#allocation4 + $0x105] ss:$16 sm:$0xc0] %v1948_v59  ;;  %2671 = vmatpush.msrb.mxu2 %v10384_v18  ;;  %2588 = vmatpush.msrb.mxu0 %v10385_v54  ;;  %v2030_v59 = vpop.f32.mrf.mxu2  ;;  %v10412_v18 = vunpack.c.h.bf16 %v7748_v16  ;;  %v10413_v54 = vunpack.c.h.bf16 %v10405_v36 }
 0x43c   : > { %4044 = vst [vmem:[#allocation4 + $0x106] ss:$16 sm:$0x3] %v1989_v2  ;;  %2629 = vmatpush.msrb.mxu1 %v10386_v48  ;;  %2549 = vmatpush.msra.mxu3 %v10388_v3  ;;  %v10414_v48 = vunpack.c.l.bf16 %v10407_v27  ;;  %v10416_v3 = vunpack.c.h.bf16 %v7822_v21  ;;  %v10429_v21 = vld [vmem:[#allocation74_spill] sm:$0xff] }
 0x43d   : > { %4045 = vst [vmem:[#allocation4 + $0x106] ss:$16 sm:$0xc] %v1989_v2  ;;  %2672 = vmatpush.msrb.mxu2 %v10390_v51  ;;  %2474 = vmatmul.f32.vlgmr.msra.gmra.mxu1 %v10374_v1  ;;  %v10418_v51 = vunpack.c.l.bf16 %v7748_v16  ;;  %v10424_v16 = vld [vmem:[#allocation72_spill] sm:$0xff]  ;;  %v10430_v11 = vunpack.c.h.bf16 %v10429_v21 }
 0x43e   : > { %4046 = vst [vmem:[#allocation4 + $0x106] ss:$16 sm:$0x30] %v1989_v2  ;;  %2433 = vmatmul.f32.vlgmr.msra.gmra.mxu0 %v10374_v1  ;;  %2630 = vmatpush.msrb.mxu1 %v10392_v9  ;;  %v1910_v49 = vpop.f32.mrf.mxu3 }
 0x43f   : > { %4047 = vst [vmem:[#allocation4 + $0x106] ss:$16 sm:$0xc0] %v1989_v2  ;;  %2589 = vmatpush.msrb.mxu0 %v10391_v0  ;;  %2550 = vmatpush.msra.mxu3 %v10394_v22  ;;  %v10402_v2 = vunpack.c.h.bf16 %v10401_v47  ;;  %v10420_v0 = vld [vmem:[#allocation71_spill] sm:$0xff]  ;;  %v1954_v22 = vpop.f32.mrf.mxu0  ;;  %v10432_v47 = vunpack.c.l.bf16 %v10429_v21  ;;  %v10464_v21 = vunpack.c.l.bf16 %v8042_v24 }
 0x440   : > { %3948 = vst [vmem:[#allocation4 + $0x104] ss:$16 sm:$0x3] %v1907_v42  ;;  %2395 = vmatmul.f32.gmra.mxu3 %v7859_v20  ;;  %2518 = vmatmul.f32.gmra.mxu2 %v7859_v20  ;;  %v10421_v9 = vunpack.c.h.bf16 %v10420_v0 }
 0x441   : > { %3949 = vst [vmem:[#allocation4 + $0x104] ss:$16 sm:$0xc] %v1907_v42  ;;  %2673 = vmatpush.msrb.mxu2 %v10396_v40  ;;  %2590 = vmatpush.msrb.mxu0 %v10397_v17  ;;  %v10426_v40 = vunpack.c.l.bf16 %v10420_v0  ;;  %v10427_v17 = vld [vmem:[#allocation73_spill] sm:$0xff]  ;;  %v10452_v0 = vunpack.c.l.bf16 %v8013_v29 }
 0x442   : > { %3950 = vst [vmem:[#allocation4 + $0x104] ss:$16 sm:$0x30] %v1907_v42  ;;  %2631 = vmatpush.msrb.mxu1 %v10398_v63  ;;  %2551 = vmatpush.msra.mxu3 %v10400_v25  ;;  %v10428_v63 = vunpack.c.l.bf16 %v10427_v17  ;;  %v10431_v25 = vunpack.c.h.bf16 %v10427_v17  ;;  %v10459_v17 = vunpack.c.h.bf16 %v8013_v29  ;;  %v10465_v29 = vunpack.c.l.bf16 %v8086_v45 }
 0x443   : > { %3951 = vst [vmem:[#allocation4 + $0x104] ss:$16 sm:$0xc0] %v1907_v42  ;;  %2674 = vmatpush.msrb.mxu2 %v10402_v2  ;;  %2591 = vmatpush.msrb.mxu0 %v10403_v12  ;;  %v1992_v42 = vpop.f32.mrf.mxu1  ;;  %v2033_v26 = vpop.f32.mrf.mxu2  ;;  %v10435_v12 = vld [vmem:[#allocation76_spill] sm:$0xff] }
 0x444   : > { %4092 = vst [vmem:[#allocation4 + $0x107] ss:$16 sm:$0x3] %v2030_v59  ;;  %2632 = vmatpush.msrb.mxu1 %v10404_v62  ;;  %2552 = vmatpush.msra.mxu3 %v10406_v56  ;;  %v10436_v62 = vunpack.c.h.bf16 %v10435_v12  ;;  %v10438_v27 = vunpack.c.l.bf16 %v10435_v12  ;;  %v10471_v12 = vld [vmem:[#allocation82_spill] sm:$0xff] }
 0x445   : > { %4093 = vst [vmem:[#allocation4 + $0x107] ss:$16 sm:$0xc] %v2030_v59  ;;  %2675 = vmatpush.msrb.mxu2 %v10408_v15  ;;  %2477 = vmatmul.f32.gmra.mxu1 %v7859_v20  ;;  %v10439_v15 = vld [vmem:[#allocation77_spill] sm:$0xff] }
 0x446   : > { %4094 = vst [vmem:[#allocation4 + $0x107] ss:$16 sm:$0x30] %v2030_v59  ;;  %2436 = vmatmul.f32.gmra.mxu0 %v7859_v20  ;;  %2633 = vmatpush.msrb.mxu1 %v10410_v38 }
 0x447   : > { %4095 = vst [vmem:[#allocation4 + $0x107] ss:$16 sm:$0xc0] %v2030_v59  ;;  %2592 = vmatpush.msrb.mxu0 %v10409_v6  ;;  %2553 = vmatpush.msra.mxu3 %v10411_v50  ;;  %v10419_v59 = vunpack.c.l.bf16 %v7832_v53  ;;  %v10433_v53 = vld [vmem:[#allocation75_spill] sm:$0xff]  ;;  %v10441_v6 = vld [vmem:[#allocation78_spill] sm:$0xff]  ;;  %v10445_v50 = vunpack.c.h.bf16 %v7992_v32 }
 0x448   : > { %4001 = vst [vmem:[#allocation4 + $0x185] ss:$16 sm:$0x3] %v1951_v19  ;;  %2398 = vmatmul.f32.gmra.mxu3 %v7880_v46  ;;  %2521 = vmatmul.f32.gmra.mxu2 %v7880_v46  ;;  %v10434_v2 = vunpack.c.l.bf16 %v10433_v53  ;;  %v10437_v56 = vunpack.c.h.bf16 %v10433_v53  ;;  %v10442_v38 = vunpack.c.h.bf16 %v10441_v6  ;;  %v10470_v53 = vld [vmem:[#allocation84_spill] sm:$0xff] }
 0x449   : > { %4002 = vst [vmem:[#allocation4 + $0x185] ss:$16 sm:$0xc] %v1951_v19  ;;  %2676 = vmatpush.msrb.mxu2 %v10412_v18  ;;  %2593 = vmatpush.msrb.mxu0 %v10413_v54  ;;  %v10446_v18 = vunpack.c.h.bf16 %v10439_v15  ;;  %v10447_v54 = vunpack.c.l.bf16 %v10441_v6 }
 0x44a   : > { %4003 = vst [vmem:[#allocation4 + $0x185] ss:$16 sm:$0x30] %v1951_v19  ;;  %2634 = vmatpush.msrb.mxu1 %v10414_v48  ;;  %2554 = vmatpush.msra.mxu3 %v10415_v5  ;;  %v10448_v48 = vunpack.c.l.bf16 %v7997_v7  ;;  %v10449_v5 = vunpack.c.h.bf16 %v8008_v55 }
 0x44b   : > { %4004 = vst [vmem:[#allocation4 + $0x185] ss:$16 sm:$0xc0] %v1951_v19  ;;  %2677 = vmatpush.msrb.mxu2 %v10416_v3  ;;  %2594 = vmatpush.msrb.mxu0 %v10417_v34  ;;  %v1913_v19 = vpop.f32.mrf.mxu3  ;;  %v2036_v30 = vpop.f32.mrf.mxu2 }
 0x44c   : > { %4049 = vst [vmem:[#allocation4 + $0x186] ss:$16 sm:$0x3] %v1992_v42  ;;  %2635 = vmatpush.msrb.mxu1 %v10418_v51  ;;  %2555 = vmatpush.msra.mxu3 %v10419_v59  ;;  %v1995_v36 = vpop.f32.mrf.mxu1  ;;  %v10450_v51 = vunpack.c.h.bf16 %v7987_v58  ;;  %v10451_v59 = vunpack.c.l.bf16 %v7992_v32  ;;  %v10455_v32 = vunpack.c.l.bf16 %v8008_v55  ;;  %v10461_v55 = vunpack.c.l.bf16 %v8062_v35 }
 0x44d   : > { %4050 = vst [vmem:[#allocation4 + $0x186] ss:$16 sm:$0xc] %v1992_v42  ;;  %2678 = vmatpush.msrb.mxu2 %v10421_v9  ;;  %2480 = vmatmul.f32.gmra.mxu1 %v7880_v46  ;;  %v10453_v9 = vunpack.c.h.bf16 %v8018_v10 }
 0x44e   : > { %4051 = vst [vmem:[#allocation4 + $0x186] ss:$16 sm:$0x30] %v1992_v42  ;;  %2439 = vmatmul.f32.gmra.mxu0 %v7880_v46  ;;  %2636 = vmatpush.msrb.mxu1 %v10423_v28 }
 0x44f   : > { %4052 = vst [vmem:[#allocation4 + $0x186] ss:$16 sm:$0xc0] %v1992_v42  ;;  %2595 = vmatpush.msrb.mxu0 %v10422_v57  ;;  %2704 = vmatpush.msrb.mxu3 %v10428_v63  ;;  %v10440_v42 = vunpack.c.l.bf16 %v10439_v15  ;;  %v1957_v57 = vpop.f32.mrf.mxu0  ;;  %v10463_v63 = vunpack.c.h.bf16 %v8031_v43 }
 0x450   : > { %3953 = vst [vmem:[#allocation4 + $0x184] ss:$16 sm:$0x3] %v1910_v49  ;;  %2401 = vmatmul.f32.gmra.mxu3 %v10424_v16  ;;  %2524 = vmatmul.f32.gmra.mxu2 %v10424_v16 }
 0x451   : > { %3954 = vst [vmem:[#allocation4 + $0x184] ss:$16 sm:$0xc] %v1910_v49  ;;  %2596 = vmatpush.msrb.mxu0 %v10425_v41  ;;  %2637 = vmatpush.msrb.mxu1 %v10426_v40  ;;  %v10457_v41 = vunpack.c.l.bf16 %v8031_v43  ;;  %v10458_v40 = vunpack.c.h.bf16 %v8042_v24  ;;  %v10468_v43 = vunpack.c.h.bf16 %v8062_v35  ;;  %v10469_v24 = vunpack.c.l.bf16 %v8067_v33 }
 0x452   : > { %3955 = vst [vmem:[#allocation4 + $0x184] ss:$16 sm:$0x30] %v1910_v49  ;;  %2827 = vmatpush.msra.mxu2 %v10430_v11  ;;  %2705 = vmatpush.msrb.mxu3 %v10434_v2  ;;  %v10475_v35 = vunpack.c.h.bf16 %v8086_v45  ;;  %v10483_v45 = vld [vmem:[#allocation87_spill] sm:$0xff] }
 0x453   : > { %3956 = vst [vmem:[#allocation4 + $0x184] ss:$16 sm:$0xc0] %v1910_v49  ;;  %2745 = vmatpush.msra.mxu0 %v10431_v25  ;;  %2786 = vmatpush.msra.mxu1 %v10432_v47  ;;  %v10443_v49 = vld [vmem:[#allocation79_spill] sm:$0xff]  ;;  %v9028_v3 = vpop.f32.mrf.mxu3  ;;  %v9030_v34 = vpop.f32.mrf.mxu2 }
 0x454   : > { %4097 = vst [vmem:[#allocation4 + $0x187] ss:$16 sm:$0x3] %v2033_v26  ;;  %2828 = vmatpush.msra.mxu2 %v10436_v62  ;;  %2706 = vmatpush.msrb.mxu3 %v10440_v42  ;;  %v1998_v28 = vpop.f32.mrf.mxu1  ;;  %v10472_v62 = vunpack.c.l.bf16 %v10471_v12  ;;  %v10479_v42 = vld [vmem:[#allocation86_spill] sm:$0xff] }
 0x455   : > { %4098 = vst [vmem:[#allocation4 + $0x187] ss:$16 sm:$0xc] %v2033_v26  ;;  %2746 = vmatpush.msra.mxu0 %v10437_v56  ;;  %2787 = vmatpush.msra.mxu1 %v10438_v27  ;;  %v10477_v27 = vld [vmem:[#allocation85_spill] sm:$0xff]  ;;  %v10480_v6 = vunpack.c.h.bf16 %v10479_v42 }
 0x456   : > { %4099 = vst [vmem:[#allocation4 + $0x187] ss:$16 sm:$0x30] %v2033_v26  ;;  %2442 = vmatmul.f32.gmra.mxu0 %v10424_v16  ;;  %2483 = vmatmul.f32.gmra.mxu1 %v10424_v16  ;;  %v10478_v15 = vunpack.c.l.bf16 %v10477_v27 }
 0x457   : > { %4100 = vst [vmem:[#allocation4 + $0x187] ss:$16 sm:$0xc0] %v2033_v26  ;;  %2829 = vmatpush.msra.mxu2 %v10442_v38  ;;  %v10444_v26 = vunpack.c.l.bf16 %v7987_v58  ;;  %2747 = vmatpush.msra.mxu0 %v10446_v18  ;;  %v10454_v58 = vunpack.c.h.bf16 %v7997_v7  ;;  %v10460_v7 = vunpack.c.l.bf16 %v8018_v10  ;;  %v10466_v10 = vld [vmem:[#allocation81_spill] sm:$0xff]  ;;  %v10481_v38 = vunpack.c.h.bf16 %v10471_v12  ;;  %v10485_v18 = vld [vmem:[#allocation88_spill] sm:$0xff] }
 0x458   : > { %4006 = vst [vmem:[#allocation4 + $0x205] ss:$16 sm:$0x3] %v1954_v22  ;;  %2404 = vmatmul.f32.gmra.mxu3 %v10443_v49  ;;  %2527 = vmatmul.f32.gmra.mxu2 %v10443_v49  ;;  %v10467_v11 = vunpack.c.h.bf16 %v10466_v10  ;;  %v10508_v12 = vld [vmem:[#allocation96_spill] sm:$0xff] }
 0x459   : > { %4007 = vst [vmem:[#allocation4 + $0x205] ss:$16 sm:$0xc] %v1954_v22  ;;  %2707 = vmatpush.msrb.mxu3 %v10444_v26  ;;  %2830 = vmatpush.msra.mxu2 %v10445_v50  ;;  %v10484_v50 = vunpack.c.l.bf16 %v10483_v45 }
 0x45a   : > { %4008 = vst [vmem:[#allocation4 + $0x205] ss:$16 sm:$0x30] %v1954_v22  ;;  %2788 = vmatpush.msra.mxu1 %v10447_v54  ;;  %2748 = vmatpush.msra.mxu0 %v10450_v51  ;;  %v10486_v54 = vunpack.c.h.bf16 %v10485_v18 }
 0x45b   : > { %4009 = vst [vmem:[#allocation4 + $0x205] ss:$16 sm:$0xc0] %v1954_v22  ;;  %2708 = vmatpush.msrb.mxu3 %v10448_v48  ;;  %2831 = vmatpush.msra.mxu2 %v10449_v5  ;;  %v10456_v22 = vld [vmem:[#allocation80_spill] sm:$0xff]  ;;  %v9068_v25 = vpop.f32.mrf.mxu3  ;;  %v9070_v47 = vpop.f32.mrf.mxu2  ;;  %v10487_v48 = vunpack.c.h.bf16 %v10477_v27  ;;  %v10488_v5 = vunpack.c.l.bf16 %v10479_v42  ;;  %v10514_v27 = vunpack.c.h.bf16 %v10508_v12 }
 0x45c   : > { %4054 = vst [vmem:[#allocation4 + $0x206] ss:$16 sm:$0x3] %v1995_v36  ;;  %2789 = vmatpush.msra.mxu1 %v10451_v59  ;;  %2749 = vmatpush.msra.mxu0 %v10454_v58  ;;  %v2001_v2 = vpop.f32.mrf.mxu1 }
 0x45d   : > { %4055 = vst [vmem:[#allocation4 + $0x206] ss:$16 sm:$0xc] %v1995_v36  ;;  %2709 = vmatpush.msrb.mxu3 %v10452_v0  ;;  %2832 = vmatpush.msra.mxu2 %v10453_v9  ;;  %v10489_v0 = vld [vmem:[#allocation92_spill] sm:$0xff]  ;;  %v10490_v9 = vld [vmem:[#allocation89_spill] sm:$0xff] }
 0x45e   : > { %4056 = vst [vmem:[#allocation4 + $0x206] ss:$16 sm:$0x30] %v1995_v36  ;;  %2445 = vmatmul.f32.gmra.mxu0 %v10443_v49  ;;  %2486 = vmatmul.f32.gmra.mxu1 %v10443_v49 }
 0x45f   : > { %4057 = vst [vmem:[#allocation4 + $0x206] ss:$16 sm:$0xc0] %v1995_v36  ;;  %2790 = vmatpush.msra.mxu1 %v10455_v32  ;;  %2710 = vmatpush.msrb.mxu3 %v10457_v41  ;;  %v10473_v36 = vld [vmem:[#allocation83_spill] sm:$0xff]  ;;  %v10495_v41 = vunpack.c.l.bf16 %v10485_v18 }
 0x460   : > { %3958 = vst [vmem:[#allocation4 + $0x204] ss:$16 sm:$0x3] %v1913_v19  ;;  %2407 = vmatmul.f32.gmra.mxu3 %v10456_v22  ;;  %2530 = vmatmul.f32.gmra.mxu2 %v10456_v22  ;;  %v10474_v56 = vunpack.c.h.bf16 %v10473_v36  ;;  %v10482_v26 = vunpack.c.l.bf16 %v10473_v36  ;;  %v10510_v36 = vld [vmem:[#allocation97_spill] sm:$0xff]  ;;  %v10520_v18 = vld [vmem:[#allocation99_spill] sm:$0xff] }
 0x461   : > { %3959 = vst [vmem:[#allocation4 + $0x204] ss:$16 sm:$0xc] %v1913_v19  ;;  %2833 = vmatpush.msra.mxu2 %v10458_v40  ;;  %2750 = vmatpush.msra.mxu0 %v10459_v17  ;;  %v10496_v17 = vld [vmem:[#allocation91_spill] sm:$0xff] }
 0x462   : > { %3960 = vst [vmem:[#allocation4 + $0x204] ss:$16 sm:$0x30] %v1913_v19  ;;  %2791 = vmatpush.msra.mxu1 %v10460_v7  ;;  %2711 = vmatpush.msrb.mxu3 %v10461_v55  ;;  %v10497_v7 = vunpack.c.l.bf16 %v10496_v17  ;;  %v10498_v55 = vld [vmem:[#allocation93_spill] sm:$0xff] }
 0x463   : > { %3961 = vst [vmem:[#allocation4 + $0x204] ss:$16 sm:$0xc0] %v1913_v19  ;;  %v10462_v19 = vunpack.c.h.bf16 %v8067_v33  ;;  %2751 = vmatpush.msra.mxu0 %v10463_v63  ;;  %v10476_v33 = vunpack.c.l.bf16 %v10466_v10  ;;  %v9110_v51 = vpop.f32.mrf.mxu3  ;;  %v9112_v59 = vpop.f32.mrf.mxu2  ;;  %v10500_v63 = vunpack.c.h.bf16 %v10490_v9 }
 0x464   : > { %4102 = vst [vmem:[#allocation4 + $0x207] ss:$16 sm:$0x3] %v2036_v30  ;;  %2792 = vmatpush.msra.mxu1 %v10464_v21  ;;  %2712 = vmatpush.msrb.mxu3 %v10465_v29  ;;  %v9129_v40 = vpop.f32.mrf.mxu1  ;;  %v10502_v29 = vld [vmem:[#allocation94_spill] sm:$0xff] }
 0x465   : > { %4103 = vst [vmem:[#allocation4 + $0x207] ss:$16 sm:$0xc] %v2036_v30  ;;  %2834 = vmatpush.msra.mxu2 %v10462_v19  ;;  %2752 = vmatpush.msra.mxu0 %v10468_v43  ;;  %v10499_v19 = vunpack.c.h.bf16 %v10498_v55  ;;  %v10503_v10 = vunpack.c.l.bf16 %v10502_v29 }
 0x466   : > { %4104 = vst [vmem:[#allocation4 + $0x207] ss:$16 sm:$0x30] %v2036_v30  ;;  %2448 = vmatmul.f32.gmra.mxu0 %v10456_v22  ;;  %2489 = vmatmul.f32.gmra.mxu1 %v10456_v22 }
 0x467   : > { %4105 = vst [vmem:[#allocation4 + $0x207] ss:$16 sm:$0xc0] %v2036_v30  ;;  %2835 = vmatpush.msra.mxu2 %v10467_v11  ;;  %2793 = vmatpush.msra.mxu1 %v10469_v24  ;;  %v1960_v30 = vpop.f32.mrf.mxu0  ;;  %v10504_v11 = vld [vmem:[#allocation95_spill] sm:$0xff]  ;;  %v10507_v24 = vunpack.c.l.bf16 %v10498_v55  ;;  %v10534_v55 = vunpack.c.l.bf16 %v8369_v23 }
 0x468   : > { %4011 = vst [vmem:[#allocation4 + $0x285] ss:$16 sm:$0x3] %v1957_v57  ;;  %2410 = vmatmul.f32.gmra.mxu3 %v10470_v53  ;;  %2533 = vmatmul.f32.gmra.mxu2 %v10470_v53  ;;  %v10505_v43 = vunpack.c.h.bf16 %v10504_v11 }
 0x469   : > { %4012 = vst [vmem:[#allocation4 + $0x285] ss:$16 sm:$0xc] %v1957_v57  ;;  %2713 = vmatpush.msrb.mxu3 %v10472_v62  ;;  %2836 = vmatpush.msra.mxu2 %v10474_v56  ;;  %v10509_v62 = vunpack.c.l.bf16 %v10508_v12  ;;  %v10511_v56 = vunpack.c.h.bf16 %v10510_v36 }
 0x46a   : > { %4013 = vst [vmem:[#allocation4 + $0x285] ss:$16 sm:$0x30] %v1957_v57  ;;  %2753 = vmatpush.msra.mxu0 %v10475_v35  ;;  %2794 = vmatpush.msra.mxu1 %v10476_v33  ;;  %v10512_v35 = vunpack.c.h.bf16 %v10502_v29  ;;  %v10513_v33 = vunpack.c.l.bf16 %v10504_v11  ;;  %v10537_v29 = vunpack.c.h.bf16 %v8349_v31 }
 0x46b   : > { %4014 = vst [vmem:[#allocation4 + $0x285] ss:$16 sm:$0xc0] %v1957_v57  ;;  %2714 = vmatpush.msrb.mxu3 %v10478_v15  ;;  %2837 = vmatpush.msra.mxu2 %v10480_v6  ;;  %v10491_v57 = vunpack.c.l.bf16 %v10490_v9  ;;  %v9164_v42 = vpop.f32.mrf.mxu3 }
 0x46c   : > { %4059 = vst [vmem:[#allocation4 + $0x286] ss:$16 sm:$0x3] %v1998_v28  ;;  %2754 = vmatpush.msra.mxu0 %v10481_v38  ;;  %2795 = vmatpush.msra.mxu1 %v10482_v26  ;;  %v9168_v6 = vpop.f32.mrf.mxu1  ;;  %v10516_v38 = vld [vmem:[#allocation98_spill] sm:$0xff] }
 0x46d   : > { %4060 = vst [vmem:[#allocation4 + $0x286] ss:$16 sm:$0xc] %v1998_v28  ;;  %2715 = vmatpush.msrb.mxu3 %v10484_v50  ;;  %2838 = vmatpush.msra.mxu2 %v10486_v54  ;;  %v10517_v26 = vunpack.c.l.bf16 %v10516_v38  ;;  %v9181_v50 = vpop.f32.mrf.mxu2  ;;  %v10521_v54 = vunpack.c.l.bf16 %v10520_v18 }
 0x46e   : > { %4061 = vst [vmem:[#allocation4 + $0x286] ss:$16 sm:$0x30] %v1998_v28  ;;  %2451 = vmatmul.f32.gmra.mxu0 %v10470_v53  ;;  %2492 = vmatmul.f32.gmra.mxu1 %v10470_v53 }
 0x46f   : > { %4062 = vst [vmem:[#allocation4 + $0x286] ss:$16 sm:$0xc0] %v1998_v28  ;;  %2755 = vmatpush.msra.mxu0 %v10487_v48  ;;  %2796 = vmatpush.msra.mxu1 %v10488_v5  ;;  %v10492_v28 = vld [vmem:[#allocation90_spill] sm:$0xff]  ;;  %v9122_v32 = vpop.f32.mrf.mxu0  ;;  %v10522_v48 = vunpack.c.h.bf16 %v10520_v18  ;;  %v10523_v5 = vld [vmem:[#allocation101_spill] sm:$0xff] }
 0x470   : > { %3963 = vst [vmem:[#allocation4 + $0x284] ss:$16 sm:$0x3] %v9028_v3  ;;  %2413 = vmatmul.f32.gmra.mxu3 %v10489_v0  ;;  %2536 = vmatmul.f32.gmra.mxu2 %v10489_v0  ;;  %v10493_v58 = vunpack.c.h.bf16 %v10492_v28  ;;  %v10501_v21 = vunpack.c.l.bf16 %v10492_v28  ;;  %v10524_v9 = vunpack.c.l.bf16 %v10523_v5 }
 0x471   : > { %3964 = vst [vmem:[#allocation4 + $0x284] ss:$16 sm:$0xc] %v9028_v3  ;;  %2716 = vmatpush.msrb.mxu3 %v10491_v57  ;;  %2797 = vmatpush.msra.mxu1 %v10495_v41  ;;  %v10525_v57 = vunpack.c.h.bf16 %v8303_v14  ;;  %v10530_v41 = vunpack.c.h.bf16 %v10523_v5  ;;  %v10561_v5 = vld [vmem:[#allocation111_spill] sm:$0xff] }
 0x472   : > { %3965 = vst [vmem:[#allocation4 + $0x284] ss:$16 sm:$0x30] %v9028_v3  ;;  %2839 = vmatpush.msra.mxu2 %v10493_v58 }
 0x473   : > { %3966 = vst [vmem:[#allocation4 + $0x284] ss:$16 sm:$0xc0] %v9028_v3  ;;  %v10494_v3 = vunpack.c.h.bf16 %v10483_v45  ;;  %2717 = vmatpush.msrb.mxu3 %v10497_v7  ;;  %2798 = vmatpush.msra.mxu1 %v10501_v21  ;;  %v10519_v45 = vunpack.c.h.bf16 %v10516_v38  ;;  %v10536_v21 = vunpack.c.h.bf16 %v8360_v52 }
 0x474   : > { %4107 = vst [vmem:[#allocation4 + $0x287] ss:$16 sm:$0x3] %v9030_v34  ;;  %2840 = vmatpush.msra.mxu2 %v10499_v19 }
 0x475   : > { %4108 = vst [vmem:[#allocation4 + $0x287] ss:$16 sm:$0xc] %v9030_v34  ;;  %2756 = vmatpush.msra.mxu0 %v10494_v3  ;;  %2718 = vmatpush.msrb.mxu3 %v10503_v10  ;;  %v10529_v3 = vunpack.c.l.bf16 %v8349_v31  ;;  %v10538_v10 = vld [vmem:[#allocation104_spill] sm:$0xff]  ;;  %v10546_v31 = vld [vmem:[#allocation105_spill] sm:$0xff] }
 0x476   : > { %4109 = vst [vmem:[#allocation4 + $0x287] ss:$16 sm:$0x30] %v9030_v34  ;;  %2841 = vmatpush.msra.mxu2 %v10505_v43  ;;  %2454 = vmatmul.f32.gmra.mxu0 %v10489_v0  ;;  %v10539_v11 = vunpack.c.l.bf16 %v10538_v10  ;;  %v10540_v43 = vld [vmem:[#allocation103_spill] sm:$0xff] }
 0x477   : > { %4110 = vst [vmem:[#allocation4 + $0x287] ss:$16 sm:$0xc0] %v9030_v34  ;;  %2757 = vmatpush.msra.mxu0 %v10500_v63  ;;  %2495 = vmatmul.f32.gmra.mxu1 %v10489_v0  ;;  %v10506_v34 = vunpack.c.h.bf16 %v10496_v17  ;;  %v9162_v15 = vpop.f32.mrf.mxu0  ;;  %v10531_v17 = vld [vmem:[#allocation102_spill] sm:$0xff]  ;;  %v9218_v63 = vpop.f32.mrf.mxu1 }
 0x478   : > { %4016 = vst [vmem:[#allocation4 + $0x305] ss:$16 sm:$0x3] %v1960_v30  ;;  %2799 = vmatpush.msra.mxu1 %v10507_v24  ;;  %2719 = vmatpush.msrb.mxu3 %v10509_v62  ;;  %v10532_v7 = vunpack.c.l.bf16 %v10531_v17  ;;  %v10542_v24 = vunpack.c.l.bf16 %v10540_v43  ;;  %v10547_v62 = vunpack.c.h.bf16 %v10546_v31 }
 0x479   : > { %4017 = vst [vmem:[#allocation4 + $0x305] ss:$16 sm:$0xc] %v1960_v30  ;;  %2758 = vmatpush.msra.mxu0 %v10506_v34  ;;  %2842 = vmatpush.msra.mxu2 %v10511_v56  ;;  %v10541_v34 = vunpack.c.h.bf16 %v10540_v43  ;;  %v9244_v56 = vpop.f32.mrf.mxu3  ;;  %v10578_v43 = vld [vmem:[#allocation117_spill] sm:$0xff] }
 0x47a   : > { %4018 = vst [vmem:[#allocation4 + $0x305] ss:$16 sm:$0x30] %v1960_v30  ;;  %2800 = vmatpush.msra.mxu1 %v10513_v33  ;;  %2556 = vmatmul.f32.vlgmr.msra.gmra.mxu3 %v10374_v1 }
 0x47b   : > { %4019 = vst [vmem:[#allocation4 + $0x305] ss:$16 sm:$0xc0] %v1960_v30  ;;  %2759 = vmatpush.msra.mxu0 %v10512_v35  ;;  %v10515_v30 = vunpack.c.l.bf16 %v10510_v36  ;;  %2868 = vmatpush.msra.mxu3 %v10517_v26  ;;  %v10548_v36 = vunpack.c.l.bf16 %v10546_v31  ;;  %v10550_v35 = vld [vmem:[#allocation107_spill] sm:$0xff]  ;;  %v10556_v26 = vld [vmem:[#allocation109_spill] sm:$0xff] }
 0x47c   : > { %4064 = vst [vmem:[#allocation4 + $0x306] ss:$16 sm:$0x3] %v2001_v2  ;;  %2679 = vmatmul.f32.vlgmr.msrb.gmra.mxu2 %v10374_v1  ;;  %v10551_v33 = vunpack.c.h.bf16 %v10550_v35 }
 0x47d   : > { %4065 = vst [vmem:[#allocation4 + $0x306] ss:$16 sm:$0xc] %v2001_v2  ;;  %2760 = vmatpush.msra.mxu0 %v10514_v27  ;;  %2801 = vmatpush.msra.mxu1 %v10515_v30  ;;  %v10552_v27 = vld [vmem:[#allocation108_spill] sm:$0xff] }
 0x47e   : > { %4066 = vst [vmem:[#allocation4 + $0x306] ss:$16 sm:$0x30] %v2001_v2  ;;  %2597 = vmatmul.f32.vlgmr.msrb.gmra.mxu0 %v10374_v1  ;;  %2991 = vmatpush.msrb.mxu2 %v10522_v48  ;;  %v10553_v30 = vunpack.c.l.bf16 %v10552_v27  ;;  %v10560_v48 = vunpack.c.h.bf16 %v10552_v27 }
 0x47f   : > { %4067 = vst [vmem:[#allocation4 + $0x306] ss:$16 sm:$0xc0] %v2001_v2  ;;  %2638 = vmatmul.f32.vlgmr.msrb.gmra.mxu1 %v10374_v1  ;;  %v10518_v2 = vunpack.c.l.bf16 %v8303_v14  ;;  %2909 = vmatpush.msrb.mxu0 %v10519_v45  ;;  %v10533_v14 = vunpack.c.h.bf16 %v10531_v17  ;;  %v9212_v19 = vpop.f32.mrf.mxu0  ;;  %v10558_v45 = vld [vmem:[#allocation110_spill] sm:$0xff] }
 0x480   : > { %3968 = vst [vmem:[#allocation4 + $0x304] ss:$16 sm:$0x3] %v9068_v25  ;;  %2950 = vmatpush.msrb.mxu1 %v10521_v54  ;;  %v10559_v18 = vunpack.c.l.bf16 %v10558_v45  ;;  %v9265_v54 = vpop.f32.mrf.mxu2 }
 0x481   : > { %3969 = vst [vmem:[#allocation4 + $0x304] ss:$16 sm:$0xc] %v9068_v25  ;;  %2869 = vmatpush.msra.mxu3 %v10518_v2  ;;  %2910 = vmatpush.msrb.mxu0 %v10525_v57  ;;  %v10557_v2 = vunpack.c.h.bf16 %v10556_v26  ;;  %v10563_v57 = vunpack.c.l.bf16 %v10556_v26  ;;  %v9328_v27 = vpop.f32.mrf.mxu3  ;;  %v10594_v26 = vunpack.c.h.bf16 %v8644_v13 }
 0x482   : > { %3970 = vst [vmem:[#allocation4 + $0x304] ss:$16 sm:$0x30] %v9068_v25  ;;  %2559 = vmatmul.f32.gmra.mxu3 %v7859_v20 }
 0x483   : > { %3971 = vst [vmem:[#allocation4 + $0x304] ss:$16 sm:$0xc0] %v9068_v25  ;;  %2870 = vmatpush.msra.mxu3 %v10524_v9  ;;  %v10526_v25 = vld [vmem:[#allocation100_spill] sm:$0xff]  ;;  %2911 = vmatpush.msrb.mxu0 %v10530_v41  ;;  %v10562_v9 = vunpack.c.h.bf16 %v10561_v5  ;;  %v10569_v41 = vunpack.c.l.bf16 %v10561_v5 }
 0x484   : > { %4112 = vst [vmem:[#allocation4 + $0x307] ss:$16 sm:$0x3] %v9070_v47  ;;  %v10527_v28 = vunpack.c.l.bf16 %v10526_v25  ;;  %v10528_v58 = vunpack.c.h.bf16 %v10526_v25  ;;  %2682 = vmatmul.f32.gmra.mxu2 %v7859_v20  ;;  %v10564_v25 = vld [vmem:[#allocation112_spill] sm:$0xff] }
 0x485   : > { %4113 = vst [vmem:[#allocation4 + $0x307] ss:$16 sm:$0xc] %v9070_v47  ;;  %2871 = vmatpush.msra.mxu3 %v10529_v3  ;;  %2912 = vmatpush.msrb.mxu0 %v10537_v29 }
 0x486   : > { %2951 = vmatpush.msrb.mxu1 %v10527_v28  ;;  %4114 = vst [vmem:[#allocation4 + $0x307] ss:$16 sm:$0x30] %v9070_v47  ;;  %2992 = vmatpush.msrb.mxu2 %v10528_v58  ;;  %v10565_v28 = vunpack.c.l.bf16 %v10564_v25  ;;  %v10567_v58 = vld [vmem:[#allocation113_spill] sm:$0xff] }
 0x487   : > { %4115 = vst [vmem:[#allocation4 + $0x307] ss:$16 sm:$0xc0] %v9070_v47  ;;  %2872 = vmatpush.msra.mxu3 %v10534_v55  ;;  %2600 = vmatmul.f32.gmra.mxu0 %v7859_v20  ;;  %v10535_v47 = vunpack.c.l.bf16 %v8360_v52  ;;  %v10543_v52 = vunpack.c.h.bf16 %v8369_v23  ;;  %v10549_v23 = vunpack.c.h.bf16 %v10538_v10  ;;  %v10568_v3 = vunpack.c.h.bf16 %v10567_v58  ;;  %v9286_v17 = vpop.f32.mrf.mxu0  ;;  %v10572_v55 = vld [vmem:[#allocation115_spill] sm:$0xff] }
 0x488   : > { %2952 = vmatpush.msrb.mxu1 %v10532_v7  ;;  %4021 = vst [vmem:[#allocation4 + $0x385] ss:$16 sm:$0x3] %v9122_v32  ;;  %2993 = vmatpush.msrb.mxu2 %v10533_v14  ;;  %v10570_v7 = vld [vmem:[#allocation114_spill] sm:$0xff]  ;;  %v10575_v29 = vunpack.c.l.bf16 %v10567_v58 }
 0x489   : > { %4022 = vst [vmem:[#allocation4 + $0x385] ss:$16 sm:$0xc] %v9122_v32  ;;  %2641 = vmatmul.f32.gmra.mxu1 %v7859_v20  ;;  %2873 = vmatpush.msra.mxu3 %v10539_v11  ;;  %v10571_v14 = vunpack.c.l.bf16 %v10570_v7  ;;  %v9302_v11 = vpop.f32.mrf.mxu1 }
 0x48a   : > { %2953 = vmatpush.msrb.mxu1 %v10535_v47  ;;  %4023 = vst [vmem:[#allocation4 + $0x385] ss:$16 sm:$0x30] %v9122_v32  ;;  %2994 = vmatpush.msrb.mxu2 %v10536_v21  ;;  %v10573_v47 = vunpack.c.h.bf16 %v10572_v55  ;;  %v10574_v21 = vunpack.c.h.bf16 %v10564_v25 }
 0x48b   : > { %4024 = vst [vmem:[#allocation4 + $0x385] ss:$16 sm:$0xc0] %v9122_v32  ;;  %2913 = vmatpush.msrb.mxu0 %v10543_v52  ;;  %v10544_v32 = vld [vmem:[#allocation106_spill] sm:$0xff]  ;;  %v10581_v52 = vunpack.c.l.bf16 %v10572_v55  ;;  %2562 = vmatmul.f32.gmra.mxu3 %v7880_v46 }
 0x48c   : > { %4069 = vst [vmem:[#allocation4 + $0x386] ss:$16 sm:$0x3] %v9129_v40  ;;  %2995 = vmatpush.msrb.mxu2 %v10541_v34  ;;  %2954 = vmatpush.msrb.mxu1 %v10542_v24  ;;  %v10545_v12 = vunpack.c.l.bf16 %v10544_v32  ;;  %v10554_v38 = vunpack.c.h.bf16 %v10544_v32  ;;  %v10579_v34 = vunpack.c.h.bf16 %v10578_v43  ;;  %v10580_v24 = vunpack.c.h.bf16 %v10570_v7 }
 0x48d   : > { %4070 = vst [vmem:[#allocation4 + $0x386] ss:$16 sm:$0xc] %v9129_v40  ;;  %2914 = vmatpush.msrb.mxu0 %v10549_v23  ;;  %v10582_v32 = vunpack.c.l.bf16 %v8591_v39 }
 0x48e   : > { %2874 = vmatpush.msra.mxu3 %v10545_v12  ;;  %4071 = vst [vmem:[#allocation4 + $0x386] ss:$16 sm:$0x30] %v9129_v40  ;;  %2996 = vmatpush.msrb.mxu2 %v10547_v62  ;;  %v10583_v12 = vld [vmem:[#allocation118_spill] sm:$0xff] }
 0x48f   : > { %2955 = vmatpush.msrb.mxu1 %v10548_v36  ;;  %4072 = vst [vmem:[#allocation4 + $0x386] ss:$16 sm:$0xc0] %v9129_v40  ;;  %2915 = vmatpush.msrb.mxu0 %v10554_v38  ;;  %v10555_v40 = vunpack.c.l.bf16 %v10550_v35  ;;  %v10584_v31 = vunpack.c.h.bf16 %v10583_v12  ;;  %v10587_v36 = vld [vmem:[#allocation119_spill] sm:$0xff]  ;;  %v10589_v35 = vld [vmem:[#allocation120_spill] sm:$0xff]  ;;  %v10592_v38 = vunpack.c.l.bf16 %v10583_v12 }
 0x490   : > { %3973 = vst [vmem:[#allocation4 + $0x384] ss:$16 sm:$0x3] %v9110_v51  ;;  %2997 = vmatpush.msrb.mxu2 %v10551_v33  ;;  %2875 = vmatpush.msra.mxu3 %v10553_v30  ;;  %v10588_v23 = vunpack.c.l.bf16 %v10587_v36  ;;  %v10590_v33 = vunpack.c.h.bf16 %v10589_v35  ;;  %v10591_v30 = vunpack.c.h.bf16 %v8591_v39  ;;  %v10596_v39 = vunpack.c.l.bf16 %v10589_v35 }
 0x491   : > { %3974 = vst [vmem:[#allocation4 + $0x384] ss:$16 sm:$0xc] %v9110_v51  ;;  %2956 = vmatpush.msrb.mxu1 %v10555_v40  ;;  %2916 = vmatpush.msrb.mxu0 %v10560_v48  ;;  %v10593_v40 = vunpack.c.l.bf16 %v8639_v8  ;;  %v2115_v8 = vpop.f32.mrf.mxu0  ;;  %v2156_v13 = vpop.f32.mrf.mxu1 }
 0x492   : > { %3975 = vst [vmem:[#allocation4 + $0x384] ss:$16 sm:$0x30] %v9110_v51  ;;  %2998 = vmatpush.msrb.mxu2 %v10557_v2  ;;  %2876 = vmatpush.msra.mxu3 %v10559_v18  ;;  %v10597_v2 = vunpack.c.l.bf16 %v8665_v60  ;;  %v10598_v18 = vunpack.c.h.bf16 %v8670_v44 }
 0x493   : > { %3976 = vst [vmem:[#allocation4 + $0x384] ss:$16 sm:$0xc0] %v9110_v51  ;;  %2957 = vmatpush.msrb.mxu1 %v10563_v57  ;;  %v10566_v51 = vunpack.c.h.bf16 %v10558_v45  ;;  %2603 = vmatmul.f32.gmra.mxu0 %v7880_v46  ;;  %v2194_v45 = vpop.f32.mrf.mxu2 }
 0x494   : > { %4117 = vst [vmem:[#allocation4 + $0x387] ss:$16 sm:$0x3] %v9112_v59  ;;  %2999 = vmatpush.msrb.mxu2 %v10562_v9  ;;  %2877 = vmatpush.msra.mxu3 %v10565_v28 }
 0x495   : > { %4118 = vst [vmem:[#allocation4 + $0x387] ss:$16 sm:$0xc] %v9112_v59  ;;  %2917 = vmatpush.msrb.mxu0 %v10566_v51  ;;  %2958 = vmatpush.msrb.mxu1 %v10569_v41 }
 0x496   : > { %4119 = vst [vmem:[#allocation4 + $0x387] ss:$16 sm:$0x30] %v9112_v59  ;;  %3000 = vmatpush.msrb.mxu2 %v10568_v3  ;;  %2878 = vmatpush.msra.mxu3 %v10571_v14 }
 0x497   : > { %4120 = vst [vmem:[#allocation4 + $0x387] ss:$16 sm:$0xc0] %v9112_v59  ;;  %2918 = vmatpush.msrb.mxu0 %v10574_v21  ;;  %2959 = vmatpush.msrb.mxu1 %v10575_v29  ;;  %v10576_v59 = vld [vmem:[#allocation116_spill] sm:$0xff] }
 0x498   : > { %4178 = vst [vmem:[#allocation4 + $0x9] ss:$16 sm:$0x3] %v9162_v15  ;;  %3001 = vmatpush.msrb.mxu2 %v10573_v47  ;;  %v10577_v10 = vunpack.c.l.bf16 %v10576_v59  ;;  %2644 = vmatmul.f32.gmra.mxu1 %v7880_v46  ;;  %v10585_v62 = vunpack.c.h.bf16 %v10576_v59 }
 0x499   : > { %4179 = vst [vmem:[#allocation4 + $0x9] ss:$16 sm:$0xc] %v9162_v15  ;;  %2919 = vmatpush.msrb.mxu0 %v10580_v24  ;;  %2960 = vmatpush.msrb.mxu1 %v10581_v52 }
 0x49a   : > { %2879 = vmatpush.msra.mxu3 %v10577_v10  ;;  %4180 = vst [vmem:[#allocation4 + $0x9] ss:$16 sm:$0x30] %v9162_v15  ;;  %3002 = vmatpush.msrb.mxu2 %v10579_v34 }
 0x49b   : > { %4181 = vst [vmem:[#allocation4 + $0x9] ss:$16 sm:$0xc0] %v9162_v15  ;;  %2920 = vmatpush.msrb.mxu0 %v10585_v62  ;;  %v10586_v15 = vunpack.c.l.bf16 %v10578_v43  ;;  %2685 = vmatmul.f32.gmra.mxu2 %v7880_v46  ;;  %v2197_v60 = vpop.f32.mrf.mxu2 }
 0x49c   : > { %4226 = vst [vmem:[#allocation4 + $0xa] ss:$16 sm:$0x3] %v9168_v6  ;;  %2880 = vmatpush.msra.mxu3 %v10582_v32  ;;  %3003 = vmatpush.msrb.mxu2 %v10584_v31 }
 0x49d   : > { %4227 = vst [vmem:[#allocation4 + $0xa] ss:$16 sm:$0xc] %v9168_v6  ;;  %2961 = vmatpush.msrb.mxu1 %v10586_v15  ;;  %2921 = vmatpush.msrb.mxu0 %v10591_v30 }
 0x49e   : > { %4228 = vst [vmem:[#allocation4 + $0xa] ss:$16 sm:$0x30] %v9168_v6  ;;  %2881 = vmatpush.msra.mxu3 %v10588_v23  ;;  %3004 = vmatpush.msrb.mxu2 %v10590_v33 }
 0x49f   : > { %4229 = vst [vmem:[#allocation4 + $0xa] ss:$16 sm:$0xc0] %v9168_v6  ;;  %2962 = vmatpush.msrb.mxu1 %v10592_v38  ;;  %v10595_v6 = vunpack.c.h.bf16 %v10587_v36  ;;  %2606 = vmatmul.f32.gmra.mxu0 %v10424_v16 }
 0x4a0   : > { %4130 = vst [vmem:[#allocation4 + $0x8] ss:$16 sm:$0x3] %v9164_v42  ;;  %2882 = vmatpush.msra.mxu3 %v10593_v40  ;;  %3005 = vmatpush.msrb.mxu2 %v10594_v26 }
 0x4a1   : > { %4131 = vst [vmem:[#allocation4 + $0x8] ss:$16 sm:$0xc] %v9164_v42  ;;  %2922 = vmatpush.msrb.mxu0 %v10595_v6  ;;  %2963 = vmatpush.msrb.mxu1 %v10596_v39 }
 0x4a2   : > { %4132 = vst [vmem:[#allocation4 + $0x8] ss:$16 sm:$0x30] %v9164_v42  ;;  %2883 = vmatpush.msra.mxu3 %v10597_v2  ;;  %3006 = vmatpush.msrb.mxu2 %v10598_v18 }
 0x4a3   : > { %4133 = vst [vmem:[#allocation4 + $0x8] ss:$16 sm:$0xc0] %v9164_v42  ;;  %2923 = vmatpush.msrb.mxu0 %v1493_v37  ;;  %2964 = vmatpush.msrb.mxu1 %v1494_v61  ;;  %v10599_v42 = vunpack.c.l.bf16 %v8670_v44  ;;  %v2074_v61 = vpop.f32.mrf.mxu3  ;;  %v2118_v44 = vpop.f32.mrf.mxu0 }
 0x4a4   : > { %4274 = vst [vmem:[#allocation4 + $0xb] ss:$16 sm:$0x3] %v9181_v50  ;;  %2647 = vmatmul.f32.gmra.mxu1 %v10424_v16  ;;  %2565 = vmatmul.f32.gmra.mxu3 %v10424_v16  ;;  %v2159_v37 = vpop.f32.mrf.mxu1 }
 0x4a5   : > { %4275 = vst [vmem:[#allocation4 + $0xb] ss:$16 sm:$0xc] %v9181_v50  ;;  %2924 = vmatpush.msrb.mxu0 %v1477_v4  ;;  %2965 = vmatpush.msrb.mxu1 %v10599_v42 }
 0x4a6   : > { %4276 = vst [vmem:[#allocation4 + $0xb] ss:$16 sm:$0x30] %v9181_v50  ;;  %2688 = vmatmul.f32.gmra.mxu2 %v10424_v16 }
 0x4a7   : > { %4277 = vst [vmem:[#allocation4 + $0xb] ss:$16 sm:$0xc0] %v9181_v50  ;;  %2609 = vmatmul.f32.gmra.mxu0 %v10443_v49  ;;  %v2200_v50 = vpop.f32.mrf.mxu2 }
 0x4a8   : > { %4183 = vst [vmem:[#allocation4 + $0x89] ss:$16 sm:$0x3] %v9212_v19 }
 0x4a9   : > { %4184 = vst [vmem:[#allocation4 + $0x89] ss:$16 sm:$0xc] %v9212_v19 }
 0x4aa   : > { %4185 = vst [vmem:[#allocation4 + $0x89] ss:$16 sm:$0x30] %v9212_v19 }
 0x4ab   : > { %4186 = vst [vmem:[#allocation4 + $0x89] ss:$16 sm:$0xc0] %v9212_v19  ;;  %v2077_v4 = vpop.f32.mrf.mxu3  ;;  %v2121_v19 = vpop.f32.mrf.mxu0 }
 0x4ac   : > { %4231 = vst [vmem:[#allocation4 + $0x8a] ss:$16 sm:$0x3] %v9218_v63  ;;  %2650 = vmatmul.f32.gmra.mxu1 %v10443_v49  ;;  %2568 = vmatmul.f32.gmra.mxu3 %v10443_v49 }
 0x4ad   : > { %4232 = vst [vmem:[#allocation4 + $0x8a] ss:$16 sm:$0xc] %v9218_v63 }
 0x4ae   : > { %4233 = vst [vmem:[#allocation4 + $0x8a] ss:$16 sm:$0x30] %v9218_v63  ;;  %2691 = vmatmul.f32.gmra.mxu2 %v10443_v49 }
 0x4af   : > { %4234 = vst [vmem:[#allocation4 + $0x8a] ss:$16 sm:$0xc0] %v9218_v63  ;;  %2612 = vmatmul.f32.gmra.mxu0 %v10456_v22  ;;  %v2162_v63 = vpop.f32.mrf.mxu1 }
 0x4b0   : > { %4135 = vst [vmem:[#allocation4 + $0x88] ss:$16 sm:$0x3] %v9244_v56 }
 0x4b1   : > { %4136 = vst [vmem:[#allocation4 + $0x88] ss:$16 sm:$0xc] %v9244_v56 }
 0x4b2   : > { %4137 = vst [vmem:[#allocation4 + $0x88] ss:$16 sm:$0x30] %v9244_v56 }
 0x4b3   : > { %4138 = vst [vmem:[#allocation4 + $0x88] ss:$16 sm:$0xc0] %v9244_v56  ;;  %v2080_v56 = vpop.f32.mrf.mxu3  ;;  %v2124_v48 = vpop.f32.mrf.mxu0 }
 0x4b4   : > { %4279 = vst [vmem:[#allocation4 + $0x8b] ss:$16 sm:$0x3] %v9265_v54  ;;  %2653 = vmatmul.f32.gmra.mxu1 %v10456_v22  ;;  %2571 = vmatmul.f32.gmra.mxu3 %v10456_v22 }
 0x4b5   : > { %4280 = vst [vmem:[#allocation4 + $0x8b] ss:$16 sm:$0xc] %v9265_v54 }
 0x4b6   : > { %4281 = vst [vmem:[#allocation4 + $0x8b] ss:$16 sm:$0x30] %v9265_v54 }
 0x4b7   : > { %4282 = vst [vmem:[#allocation4 + $0x8b] ss:$16 sm:$0xc0] %v9265_v54  ;;  %v2203_v54 = vpop.f32.mrf.mxu2  ;;  %2694 = vmatmul.f32.gmra.mxu2 %v10456_v22  ;;  %2615 = vmatmul.f32.gmra.mxu0 %v10470_v53  ;;  %v2165_v5 = vpop.f32.mrf.mxu1 }
 0x4b8   : > { %4188 = vst [vmem:[#allocation4 + $0x109] ss:$16 sm:$0x3] %v9286_v17 }
 0x4b9   : > { %4189 = vst [vmem:[#allocation4 + $0x109] ss:$16 sm:$0xc] %v9286_v17 }
 0x4ba   : > { %4190 = vst [vmem:[#allocation4 + $0x109] ss:$16 sm:$0x30] %v9286_v17 }
 0x4bb   : > { %4191 = vst [vmem:[#allocation4 + $0x109] ss:$16 sm:$0xc0] %v9286_v17  ;;  %v2083_v9 = vpop.f32.mrf.mxu3  ;;  %v2127_v25 = vpop.f32.mrf.mxu0 }
 0x4bc   : > { %4236 = vst [vmem:[#allocation4 + $0x10a] ss:$16 sm:$0x3] %v9302_v11  ;;  %2656 = vmatmul.f32.gmra.mxu1 %v10470_v53  ;;  %2574 = vmatmul.f32.gmra.mxu3 %v10470_v53 }
 0x4bd   : > { %4237 = vst [vmem:[#allocation4 + $0x10a] ss:$16 sm:$0xc] %v9302_v11 }
 0x4be   : > { %4238 = vst [vmem:[#allocation4 + $0x10a] ss:$16 sm:$0x30] %v9302_v11 }
 0x4bf   : > { %4239 = vst [vmem:[#allocation4 + $0x10a] ss:$16 sm:$0xc0] %v9302_v11  ;;  %v2206_v57 = vpop.f32.mrf.mxu2  ;;  %2697 = vmatmul.f32.gmra.mxu2 %v10470_v53  ;;  %2618 = vmatmul.f32.gmra.mxu0 %v10489_v0  ;;  %v2168_v28 = vpop.f32.mrf.mxu1 }
 0x4c0   : > { %4140 = vst [vmem:[#allocation4 + $0x108] ss:$16 sm:$0x3] %v9328_v27 }
 0x4c1   : > { %4141 = vst [vmem:[#allocation4 + $0x108] ss:$16 sm:$0xc] %v9328_v27 }
 0x4c2   : > { %4142 = vst [vmem:[#allocation4 + $0x108] ss:$16 sm:$0x30] %v9328_v27 }
 0x4c3   : > { %4143 = vst [vmem:[#allocation4 + $0x108] ss:$16 sm:$0xc0] %v9328_v27  ;;  %v2086_v51 = vpop.f32.mrf.mxu3  ;;  %v2270_v3 = vpop.f32.mrf.mxu0 }
 0x4c4   : > { %4284 = vst [vmem:[#allocation4 + $0x10b] ss:$16 sm:$0x3] %v2194_v45  ;;  %2659 = vmatmul.f32.gmra.mxu1 %v10489_v0  ;;  %2577 = vmatmul.f32.gmra.mxu3 %v10489_v0 }
 0x4c5   : > { %4285 = vst [vmem:[#allocation4 + $0x10b] ss:$16 sm:$0xc] %v2194_v45 }
 0x4c6   : > { %4286 = vst [vmem:[#allocation4 + $0x10b] ss:$16 sm:$0x30] %v2194_v45 }
 0x4c7   : > { %4287 = vst [vmem:[#allocation4 + $0x10b] ss:$16 sm:$0xc0] %v2194_v45  ;;  %v2209_v58 = vpop.f32.mrf.mxu2  ;;  %2700 = vmatmul.f32.gmra.mxu2 %v10489_v0  ;;  %2761 = vmatmul.f32.vlgmr.msra.gmra.mxu0 %v10374_v1  ;;  %v2311_v41 = vpop.f32.mrf.mxu1 }
 0x4c8   : > { %4193 = vst [vmem:[#allocation4 + $0x189] ss:$16 sm:$0x3] %v2115_v8 }
 0x4c9   : > { %4194 = vst [vmem:[#allocation4 + $0x189] ss:$16 sm:$0xc] %v2115_v8 }
 0x4ca   : > { %4195 = vst [vmem:[#allocation4 + $0x189] ss:$16 sm:$0x30] %v2115_v8 }
 0x4cb   : > { %4196 = vst [vmem:[#allocation4 + $0x189] ss:$16 sm:$0xc0] %v2115_v8  ;;  %v2229_v17 = vpop.f32.mrf.mxu3  ;;  %v2273_v14 = vpop.f32.mrf.mxu0 }
 0x4cc   : > { %4241 = vst [vmem:[#allocation4 + $0x18a] ss:$16 sm:$0x3] %v2156_v13  ;;  %2802 = vmatmul.f32.vlgmr.msra.gmra.mxu1 %v10374_v1  ;;  %2720 = vmatmul.f32.vlgmr.msrb.gmra.mxu3 %v10374_v1 }
 0x4cd   : > { %4242 = vst [vmem:[#allocation4 + $0x18a] ss:$16 sm:$0xc] %v2156_v13 }
 0x4ce   : > { %4243 = vst [vmem:[#allocation4 + $0x18a] ss:$16 sm:$0x30] %v2156_v13 }
 0x4cf   : > { %4244 = vst [vmem:[#allocation4 + $0x18a] ss:$16 sm:$0xc0] %v2156_v13  ;;  %v2352_v7 = vpop.f32.mrf.mxu2  ;;  %2843 = vmatmul.f32.vlgmr.msra.gmra.mxu2 %v10374_v1  ;;  %2764 = vmatmul.f32.gmra.mxu0 %v7859_v20  ;;  %v2314_v55 = vpop.f32.mrf.mxu1 }
 0x4d0   : > { %4145 = vst [vmem:[#allocation4 + $0x188] ss:$16 sm:$0x3] %v2074_v61 }
 0x4d1   : > { %4146 = vst [vmem:[#allocation4 + $0x188] ss:$16 sm:$0xc] %v2074_v61 }
 0x4d2   : > { %4147 = vst [vmem:[#allocation4 + $0x188] ss:$16 sm:$0x30] %v2074_v61 }
 0x4d3   : > { %4148 = vst [vmem:[#allocation4 + $0x188] ss:$16 sm:$0xc0] %v2074_v61  ;;  %v2232_v47 = vpop.f32.mrf.mxu3  ;;  %v2276_v29 = vpop.f32.mrf.mxu0 }
 0x4d4   : > { %4289 = vst [vmem:[#allocation4 + $0x18b] ss:$16 sm:$0x3] %v2197_v60  ;;  %2805 = vmatmul.f32.gmra.mxu1 %v7859_v20  ;;  %2723 = vmatmul.f32.gmra.mxu3 %v7859_v20 }
 0x4d5   : > { %4290 = vst [vmem:[#allocation4 + $0x18b] ss:$16 sm:$0xc] %v2197_v60 }
 0x4d6   : > { %4291 = vst [vmem:[#allocation4 + $0x18b] ss:$16 sm:$0x30] %v2197_v60 }
 0x4d7   : > { %4292 = vst [vmem:[#allocation4 + $0x18b] ss:$16 sm:$0xc0] %v2197_v60  ;;  %v2355_v21 = vpop.f32.mrf.mxu2  ;;  %2846 = vmatmul.f32.gmra.mxu2 %v7859_v20  ;;  %2767 = vmatmul.f32.gmra.mxu0 %v7880_v46  ;;  %v2317_v59 = vpop.f32.mrf.mxu1 }
 0x4d8   : > { %4198 = vst [vmem:[#allocation4 + $0x209] ss:$16 sm:$0x3] %v2118_v44 }
 0x4d9   : > { %4199 = vst [vmem:[#allocation4 + $0x209] ss:$16 sm:$0xc] %v2118_v44 }
 0x4da   : > { %4200 = vst [vmem:[#allocation4 + $0x209] ss:$16 sm:$0x30] %v2118_v44 }
 0x4db   : > { %4201 = vst [vmem:[#allocation4 + $0x209] ss:$16 sm:$0xc0] %v2118_v44  ;;  %v2235_v10 = vpop.f32.mrf.mxu3  ;;  %v2279_v43 = vpop.f32.mrf.mxu0 }
 0x4dc   : > { %4246 = vst [vmem:[#allocation4 + $0x20a] ss:$16 sm:$0x3] %v2159_v37  ;;  %2808 = vmatmul.f32.gmra.mxu1 %v7880_v46  ;;  %2726 = vmatmul.f32.gmra.mxu3 %v7880_v46 }
 0x4dd   : > { %4247 = vst [vmem:[#allocation4 + $0x20a] ss:$16 sm:$0xc] %v2159_v37 }
 0x4de   : > { %4248 = vst [vmem:[#allocation4 + $0x20a] ss:$16 sm:$0x30] %v2159_v37 }
 0x4df   : > { %4249 = vst [vmem:[#allocation4 + $0x20a] ss:$16 sm:$0xc0] %v2159_v37  ;;  %v2358_v11 = vpop.f32.mrf.mxu2  ;;  %2849 = vmatmul.f32.gmra.mxu2 %v7880_v46  ;;  %2770 = vmatmul.f32.gmra.mxu0 %v10424_v16  ;;  %v2320_v34 = vpop.f32.mrf.mxu1 }
 0x4e0   : > { %4150 = vst [vmem:[#allocation4 + $0x208] ss:$16 sm:$0x3] %v2077_v4 }
 0x4e1   : > { %4151 = vst [vmem:[#allocation4 + $0x208] ss:$16 sm:$0xc] %v2077_v4 }
 0x4e2   : > { %4152 = vst [vmem:[#allocation4 + $0x208] ss:$16 sm:$0x30] %v2077_v4 }
 0x4e3   : > { %4153 = vst [vmem:[#allocation4 + $0x208] ss:$16 sm:$0xc0] %v2077_v4  ;;  %v2238_v24 = vpop.f32.mrf.mxu3  ;;  %v2282_v32 = vpop.f32.mrf.mxu0 }
 0x4e4   : > { %4294 = vst [vmem:[#allocation4 + $0x20b] ss:$16 sm:$0x3] %v2200_v50  ;;  %2811 = vmatmul.f32.gmra.mxu1 %v10424_v16  ;;  %2729 = vmatmul.f32.gmra.mxu3 %v10424_v16 }
 0x4e5   : > { %4295 = vst [vmem:[#allocation4 + $0x20b] ss:$16 sm:$0xc] %v2200_v50 }
 0x4e6   : > { %4296 = vst [vmem:[#allocation4 + $0x20b] ss:$16 sm:$0x30] %v2200_v50 }
 0x4e7   : > { %4297 = vst [vmem:[#allocation4 + $0x20b] ss:$16 sm:$0xc0] %v2200_v50  ;;  %v2361_v52 = vpop.f32.mrf.mxu2  ;;  %2852 = vmatmul.f32.gmra.mxu2 %v10424_v16  ;;  %2773 = vmatmul.f32.gmra.mxu0 %v10443_v49  ;;  %v2323_v12 = vpop.f32.mrf.mxu1 }
 0x4e8   : > { %4203 = vst [vmem:[#allocation4 + $0x289] ss:$16 sm:$0x3] %v2121_v19 }
 0x4e9   : > { %4204 = vst [vmem:[#allocation4 + $0x289] ss:$16 sm:$0xc] %v2121_v19 }
 0x4ea   : > { %4205 = vst [vmem:[#allocation4 + $0x289] ss:$16 sm:$0x30] %v2121_v19 }
 0x4eb   : > { %4206 = vst [vmem:[#allocation4 + $0x289] ss:$16 sm:$0xc0] %v2121_v19  ;;  %v2241_v31 = vpop.f32.mrf.mxu3  ;;  %v2285_v15 = vpop.f32.mrf.mxu0 }
 0x4ec   : > { %4251 = vst [vmem:[#allocation4 + $0x28a] ss:$16 sm:$0x3] %v2162_v63  ;;  %2814 = vmatmul.f32.gmra.mxu1 %v10443_v49  ;;  %2732 = vmatmul.f32.gmra.mxu3 %v10443_v49 }
 0x4ed   : > { %4252 = vst [vmem:[#allocation4 + $0x28a] ss:$16 sm:$0xc] %v2162_v63 }
 0x4ee   : > { %4253 = vst [vmem:[#allocation4 + $0x28a] ss:$16 sm:$0x30] %v2162_v63 }
 0x4ef   : > { %4254 = vst [vmem:[#allocation4 + $0x28a] ss:$16 sm:$0xc0] %v2162_v63  ;;  %v2364_v62 = vpop.f32.mrf.mxu2  ;;  %2855 = vmatmul.f32.gmra.mxu2 %v10443_v49  ;;  %2776 = vmatmul.f32.gmra.mxu0 %v10456_v22  ;;  %v2326_v36 = vpop.f32.mrf.mxu1 }
 0x4f0   : > { %4155 = vst [vmem:[#allocation4 + $0x288] ss:$16 sm:$0x3] %v2080_v56 }
 0x4f1   : > { %4156 = vst [vmem:[#allocation4 + $0x288] ss:$16 sm:$0xc] %v2080_v56 }
 0x4f2   : > { %4157 = vst [vmem:[#allocation4 + $0x288] ss:$16 sm:$0x30] %v2080_v56 }
 0x4f3   : > { %4158 = vst [vmem:[#allocation4 + $0x288] ss:$16 sm:$0xc0] %v2080_v56  ;;  %v2244_v23 = vpop.f32.mrf.mxu3  ;;  %v2288_v33 = vpop.f32.mrf.mxu0 }
 0x4f4   : > { %4299 = vst [vmem:[#allocation4 + $0x28b] ss:$16 sm:$0x3] %v2203_v54  ;;  %2817 = vmatmul.f32.gmra.mxu1 %v10456_v22  ;;  %2735 = vmatmul.f32.gmra.mxu3 %v10456_v22 }
 0x4f5   : > { %4300 = vst [vmem:[#allocation4 + $0x28b] ss:$16 sm:$0xc] %v2203_v54 }
 0x4f6   : > { %4301 = vst [vmem:[#allocation4 + $0x28b] ss:$16 sm:$0x30] %v2203_v54 }
 0x4f7   : > { %4302 = vst [vmem:[#allocation4 + $0x28b] ss:$16 sm:$0xc0] %v2203_v54  ;;  %v2367_v35 = vpop.f32.mrf.mxu2  ;;  %2858 = vmatmul.f32.gmra.mxu2 %v10456_v22  ;;  %2779 = vmatmul.f32.gmra.mxu0 %v10470_v53  ;;  %v2329_v27 = vpop.f32.mrf.mxu1 }
 0x4f8   : > { %4208 = vst [vmem:[#allocation4 + $0x309] ss:$16 sm:$0x3] %v2124_v48 }
 0x4f9   : > { %4209 = vst [vmem:[#allocation4 + $0x309] ss:$16 sm:$0xc] %v2124_v48 }
 0x4fa   : > { %4210 = vst [vmem:[#allocation4 + $0x309] ss:$16 sm:$0x30] %v2124_v48 }
 0x4fb   : > { %4211 = vst [vmem:[#allocation4 + $0x309] ss:$16 sm:$0xc0] %v2124_v48  ;;  %v2247_v30 = vpop.f32.mrf.mxu3  ;;  %v2291_v40 = vpop.f32.mrf.mxu0 }
 0x4fc   : > { %4256 = vst [vmem:[#allocation4 + $0x30a] ss:$16 sm:$0x3] %v2165_v5  ;;  %2820 = vmatmul.f32.gmra.mxu1 %v10470_v53  ;;  %2738 = vmatmul.f32.gmra.mxu3 %v10470_v53 }
 0x4fd   : > { %4257 = vst [vmem:[#allocation4 + $0x30a] ss:$16 sm:$0xc] %v2165_v5 }
 0x4fe   : > { %4258 = vst [vmem:[#allocation4 + $0x30a] ss:$16 sm:$0x30] %v2165_v5 }
 0x4ff   : > { %4259 = vst [vmem:[#allocation4 + $0x30a] ss:$16 sm:$0xc0] %v2165_v5  ;;  %v2370_v38 = vpop.f32.mrf.mxu2  ;;  %2861 = vmatmul.f32.gmra.mxu2 %v10470_v53  ;;  %2782 = vmatmul.f32.gmra.mxu0 %v10489_v0  ;;  %v2332_v26 = vpop.f32.mrf.mxu1 }
 0x500   : > { %4160 = vst [vmem:[#allocation4 + $0x308] ss:$16 sm:$0x3] %v2083_v9 }
 0x501   : > { %4161 = vst [vmem:[#allocation4 + $0x308] ss:$16 sm:$0xc] %v2083_v9 }
 0x502   : > { %4162 = vst [vmem:[#allocation4 + $0x308] ss:$16 sm:$0x30] %v2083_v9 }
 0x503   : > { %4163 = vst [vmem:[#allocation4 + $0x308] ss:$16 sm:$0xc0] %v2083_v9  ;;  %v2250_v6 = vpop.f32.mrf.mxu3  ;;  %v2434_v2 = vpop.f32.mrf.mxu0 }
 0x504   : > { %4304 = vst [vmem:[#allocation4 + $0x30b] ss:$16 sm:$0x3] %v2206_v57  ;;  %2823 = vmatmul.f32.gmra.mxu1 %v10489_v0  ;;  %2741 = vmatmul.f32.gmra.mxu3 %v10489_v0 }
 0x505   : > { %4305 = vst [vmem:[#allocation4 + $0x30b] ss:$16 sm:$0xc] %v2206_v57 }
 0x506   : > { %4306 = vst [vmem:[#allocation4 + $0x30b] ss:$16 sm:$0x30] %v2206_v57 }
 0x507   : > { %4307 = vst [vmem:[#allocation4 + $0x30b] ss:$16 sm:$0xc0] %v2206_v57  ;;  %v2373_v39 = vpop.f32.mrf.mxu2  ;;  %2864 = vmatmul.f32.gmra.mxu2 %v10489_v0  ;;  %2925 = vmatmul.f32.vlgmr.msrb.gmra.mxu0 %v10374_v1  ;;  %v2475_v45 = vpop.f32.mrf.mxu1 }
 0x508   : > { %4213 = vst [vmem:[#allocation4 + $0x389] ss:$16 sm:$0x3] %v2127_v25 }
 0x509   : > { %4214 = vst [vmem:[#allocation4 + $0x389] ss:$16 sm:$0xc] %v2127_v25 }
 0x50a   : > { %4215 = vst [vmem:[#allocation4 + $0x389] ss:$16 sm:$0x30] %v2127_v25 }
 0x50b   : > { %4216 = vst [vmem:[#allocation4 + $0x389] ss:$16 sm:$0xc0] %v2127_v25  ;;  %v2393_v18 = vpop.f32.mrf.mxu3  ;;  %v2437_v8 = vpop.f32.mrf.mxu0 }
 0x50c   : > { %4261 = vst [vmem:[#allocation4 + $0x38a] ss:$16 sm:$0x3] %v2168_v28  ;;  %2966 = vmatmul.f32.vlgmr.msrb.gmra.mxu1 %v10374_v1  ;;  %2884 = vmatmul.f32.vlgmr.msra.gmra.mxu3 %v10374_v1 }
 0x50d   : > { %4262 = vst [vmem:[#allocation4 + $0x38a] ss:$16 sm:$0xc] %v2168_v28 }
 0x50e   : > { %4263 = vst [vmem:[#allocation4 + $0x38a] ss:$16 sm:$0x30] %v2168_v28 }
 0x50f   : > { %4264 = vst [vmem:[#allocation4 + $0x38a] ss:$16 sm:$0xc0] %v2168_v28  ;;  %v2516_v42 = vpop.f32.mrf.mxu2  ;;  %3007 = vmatmul.f32.vlgmr.msrb.gmra.mxu2 %v10374_v1  ;;  %2928 = vmatmul.f32.gmra.mxu0 %v7859_v20  ;;  %v2478_v13 = vpop.f32.mrf.mxu1 }
 0x510   : > { %4165 = vst [vmem:[#allocation4 + $0x388] ss:$16 sm:$0x3] %v2086_v51 }
 0x511   : > { %4166 = vst [vmem:[#allocation4 + $0x388] ss:$16 sm:$0xc] %v2086_v51 }
 0x512   : > { %4167 = vst [vmem:[#allocation4 + $0x388] ss:$16 sm:$0x30] %v2086_v51 }
 0x513   : > { %4168 = vst [vmem:[#allocation4 + $0x388] ss:$16 sm:$0xc0] %v2086_v51  ;;  %v2396_v61 = vpop.f32.mrf.mxu3  ;;  %v2440_v60 = vpop.f32.mrf.mxu0 }
 0x514   : > { %4309 = vst [vmem:[#allocation4 + $0x38b] ss:$16 sm:$0x3] %v2209_v58  ;;  %2969 = vmatmul.f32.gmra.mxu1 %v7859_v20  ;;  %2887 = vmatmul.f32.gmra.mxu3 %v7859_v20 }
 0x515   : > { %4310 = vst [vmem:[#allocation4 + $0x38b] ss:$16 sm:$0xc] %v2209_v58 }
 0x516   : > { %4311 = vst [vmem:[#allocation4 + $0x38b] ss:$16 sm:$0x30] %v2209_v58 }
 0x517   : > { %4312 = vst [vmem:[#allocation4 + $0x38b] ss:$16 sm:$0xc0] %v2209_v58  ;;  %v2519_v1 = vpop.f32.mrf.mxu2  ;;  %3010 = vmatmul.f32.gmra.mxu2 %v7859_v20  ;;  %2931 = vmatmul.f32.gmra.mxu0 %v7880_v46  ;;  %v2481_v44 = vpop.f32.mrf.mxu1 }
 0x518   : > { %4370 = vst [vmem:[#allocation4 + $0xd] ss:$16 sm:$0x3] %v2270_v3 }
 0x519   : > { %4371 = vst [vmem:[#allocation4 + $0xd] ss:$16 sm:$0xc] %v2270_v3 }
 0x51a   : > { %4372 = vst [vmem:[#allocation4 + $0xd] ss:$16 sm:$0x30] %v2270_v3 }
 0x51b   : > { %4373 = vst [vmem:[#allocation4 + $0xd] ss:$16 sm:$0xc0] %v2270_v3  ;;  %v2399_v37 = vpop.f32.mrf.mxu3  ;;  %v2443_v4 = vpop.f32.mrf.mxu0 }
 0x51c   : > { %4418 = vst [vmem:[#allocation4 + $0xe] ss:$16 sm:$0x3] %v2311_v41  ;;  %2972 = vmatmul.f32.gmra.mxu1 %v7880_v46  ;;  %2890 = vmatmul.f32.gmra.mxu3 %v7880_v46 }
 0x51d   : > { %4419 = vst [vmem:[#allocation4 + $0xe] ss:$16 sm:$0xc] %v2311_v41 }
 0x51e   : > { %4420 = vst [vmem:[#allocation4 + $0xe] ss:$16 sm:$0x30] %v2311_v41 }
 0x51f   : > { %4421 = vst [vmem:[#allocation4 + $0xe] ss:$16 sm:$0xc0] %v2311_v41  ;;  %v2522_v20 = vpop.f32.mrf.mxu2  ;;  %3013 = vmatmul.f32.gmra.mxu2 %v7880_v46  ;;  %2934 = vmatmul.f32.gmra.mxu0 %v10424_v16  ;;  %v2484_v50 = vpop.f32.mrf.mxu1 }
 0x520   : > { %4322 = vst [vmem:[#allocation4 + $0xc] ss:$16 sm:$0x3] %v2229_v17 }
 0x521   : > { %4323 = vst [vmem:[#allocation4 + $0xc] ss:$16 sm:$0xc] %v2229_v17 }
 0x522   : > { %4324 = vst [vmem:[#allocation4 + $0xc] ss:$16 sm:$0x30] %v2229_v17 }
 0x523   : > { %4325 = vst [vmem:[#allocation4 + $0xc] ss:$16 sm:$0xc0] %v2229_v17  ;;  %v2402_v19 = vpop.f32.mrf.mxu3  ;;  %v2446_v63 = vpop.f32.mrf.mxu0 }
 0x524   : > { %4466 = vst [vmem:[#allocation4 + $0xf] ss:$16 sm:$0x3] %v2352_v7  ;;  %2975 = vmatmul.f32.gmra.mxu1 %v10424_v16  ;;  %2893 = vmatmul.f32.gmra.mxu3 %v10424_v16 }
 0x525   : > { %4467 = vst [vmem:[#allocation4 + $0xf] ss:$16 sm:$0xc] %v2352_v7 }
 0x526   : > { %4468 = vst [vmem:[#allocation4 + $0xf] ss:$16 sm:$0x30] %v2352_v7 }
 0x527   : > { %4469 = vst [vmem:[#allocation4 + $0xf] ss:$16 sm:$0xc0] %v2352_v7  ;;  %v2525_v46 = vpop.f32.mrf.mxu2  ;;  %3016 = vmatmul.f32.gmra.mxu2 %v10424_v16  ;;  %2937 = vmatmul.f32.gmra.mxu0 %v10443_v49  ;;  %v2487_v56 = vpop.f32.mrf.mxu1 }
 0x528   : > { %4375 = vst [vmem:[#allocation4 + $0x8d] ss:$16 sm:$0x3] %v2273_v14 }
 0x529   : > { %4376 = vst [vmem:[#allocation4 + $0x8d] ss:$16 sm:$0xc] %v2273_v14 }
 0x52a   : > { %4377 = vst [vmem:[#allocation4 + $0x8d] ss:$16 sm:$0x30] %v2273_v14 }
 0x52b   : > { %4378 = vst [vmem:[#allocation4 + $0x8d] ss:$16 sm:$0xc0] %v2273_v14  ;;  %v2405_v54 = vpop.f32.mrf.mxu3  ;;  %v2449_v48 = vpop.f32.mrf.mxu0 }
 0x52c   : > { %4423 = vst [vmem:[#allocation4 + $0x8e] ss:$16 sm:$0x3] %v2314_v55  ;;  %2978 = vmatmul.f32.gmra.mxu1 %v10443_v49  ;;  %2896 = vmatmul.f32.gmra.mxu3 %v10443_v49 }
 0x52d   : > { %4424 = vst [vmem:[#allocation4 + $0x8e] ss:$16 sm:$0xc] %v2314_v55 }
 0x52e   : > { %4425 = vst [vmem:[#allocation4 + $0x8e] ss:$16 sm:$0x30] %v2314_v55 }
 0x52f   : > { %4426 = vst [vmem:[#allocation4 + $0x8e] ss:$16 sm:$0xc0] %v2314_v55  ;;  %v2528_v16 = vpop.f32.mrf.mxu2  ;;  %3019 = vmatmul.f32.gmra.mxu2 %v10443_v49  ;;  %2940 = vmatmul.f32.gmra.mxu0 %v10456_v22  ;;  %v2490_v5 = vpop.f32.mrf.mxu1 }
 0x530   : > { %4327 = vst [vmem:[#allocation4 + $0x8c] ss:$16 sm:$0x3] %v2232_v47 }
 0x531   : > { %4328 = vst [vmem:[#allocation4 + $0x8c] ss:$16 sm:$0xc] %v2232_v47 }
 0x532   : > { %4329 = vst [vmem:[#allocation4 + $0x8c] ss:$16 sm:$0x30] %v2232_v47 }
 0x533   : > { %4330 = vst [vmem:[#allocation4 + $0x8c] ss:$16 sm:$0xc0] %v2232_v47  ;;  %v2408_v9 = vpop.f32.mrf.mxu3  ;;  %v2452_v57 = vpop.f32.mrf.mxu0 }
 0x534   : > { %4471 = vst [vmem:[#allocation4 + $0x8f] ss:$16 sm:$0x3] %v2355_v21  ;;  %2981 = vmatmul.f32.gmra.mxu1 %v10456_v22  ;;  %2899 = vmatmul.f32.gmra.mxu3 %v10456_v22 }
 0x535   : > { %4472 = vst [vmem:[#allocation4 + $0x8f] ss:$16 sm:$0xc] %v2355_v21 }
 0x536   : > { %4473 = vst [vmem:[#allocation4 + $0x8f] ss:$16 sm:$0x30] %v2355_v21 }
 0x537   : > { %4474 = vst [vmem:[#allocation4 + $0x8f] ss:$16 sm:$0xc0] %v2355_v21  ;;  %v2531_v49 = vpop.f32.mrf.mxu2  ;;  %3022 = vmatmul.f32.gmra.mxu2 %v10456_v22  ;;  %2943 = vmatmul.f32.gmra.mxu0 %v10470_v53  ;;  %v2493_v25 = vpop.f32.mrf.mxu1 }
 0x538   : > { %4380 = vst [vmem:[#allocation4 + $0x10d] ss:$16 sm:$0x3] %v2276_v29 }
 0x539   : > { %4381 = vst [vmem:[#allocation4 + $0x10d] ss:$16 sm:$0xc] %v2276_v29 }
 0x53a   : > { %4382 = vst [vmem:[#allocation4 + $0x10d] ss:$16 sm:$0x30] %v2276_v29 }
 0x53b   : > { %4383 = vst [vmem:[#allocation4 + $0x10d] ss:$16 sm:$0xc0] %v2276_v29  ;;  %v2411_v28 = vpop.f32.mrf.mxu3  ;;  %v2455_v51 = vpop.f32.mrf.mxu0 }
 0x53c   : > { %4428 = vst [vmem:[#allocation4 + $0x10e] ss:$16 sm:$0x3] %v2317_v59  ;;  %2984 = vmatmul.f32.gmra.mxu1 %v10470_v53  ;;  %2902 = vmatmul.f32.gmra.mxu3 %v10470_v53 }
 0x53d   : > { %4429 = vst [vmem:[#allocation4 + $0x10e] ss:$16 sm:$0xc] %v2317_v59 }
 0x53e   : > { %4430 = vst [vmem:[#allocation4 + $0x10e] ss:$16 sm:$0x30] %v2317_v59 }
 0x53f   : > { %4431 = vst [vmem:[#allocation4 + $0x10e] ss:$16 sm:$0xc0] %v2317_v59  ;;  %v2534_v22 = vpop.f32.mrf.mxu2  ;;  %3025 = vmatmul.f32.gmra.mxu2 %v10470_v53  ;;  %2946 = vmatmul.f32.gmra.mxu0 %v10489_v0  ;;  %v2496_v58 = vpop.f32.mrf.mxu1 }
 0x540   : > { %4332 = vst [vmem:[#allocation4 + $0x10c] ss:$16 sm:$0x3] %v2235_v10 }
 0x541   : > { %4333 = vst [vmem:[#allocation4 + $0x10c] ss:$16 sm:$0xc] %v2235_v10 }
 0x542   : > { %4334 = vst [vmem:[#allocation4 + $0x10c] ss:$16 sm:$0x30] %v2235_v10 }
 0x543   : > { %4335 = vst [vmem:[#allocation4 + $0x10c] ss:$16 sm:$0xc0] %v2235_v10  ;;  %v2414_v3 = vpop.f32.mrf.mxu3 }
 0x544   : > { %4476 = vst [vmem:[#allocation4 + $0x10f] ss:$16 sm:$0x3] %v2358_v11  ;;  %2987 = vmatmul.f32.gmra.mxu1 %v10489_v0  ;;  %2905 = vmatmul.f32.gmra.mxu3 %v10489_v0 }
 0x545   : > { %4477 = vst [vmem:[#allocation4 + $0x10f] ss:$16 sm:$0xc] %v2358_v11 }
 0x546   : > { %4478 = vst [vmem:[#allocation4 + $0x10f] ss:$16 sm:$0x30] %v2358_v11 }
 0x547   : > { %4479 = vst [vmem:[#allocation4 + $0x10f] ss:$16 sm:$0xc0] %v2358_v11  ;;  %v2537_v53 = vpop.f32.mrf.mxu2  ;;  %3028 = vmatmul.f32.gmra.mxu2 %v10489_v0  ;;  %v2598_v0 = vpop.f32.mrf.mxu0 }
 0x548   : > { %4385 = vst [vmem:[#allocation4 + $0x18d] ss:$16 sm:$0x3] %v2279_v43  ;;  %v2639_v41 = vpop.f32.mrf.mxu1 }
 0x549   : > { %4386 = vst [vmem:[#allocation4 + $0x18d] ss:$16 sm:$0xc] %v2279_v43 }
 0x54a   : > { %4387 = vst [vmem:[#allocation4 + $0x18d] ss:$16 sm:$0x30] %v2279_v43 }
 0x54b   : > { %4388 = vst [vmem:[#allocation4 + $0x18d] ss:$16 sm:$0xc0] %v2279_v43  ;;  %v2557_v17 = vpop.f32.mrf.mxu3 }
 0x54c   : > { %4433 = vst [vmem:[#allocation4 + $0x18e] ss:$16 sm:$0x3] %v2320_v34 }
 0x54d   : > { %4434 = vst [vmem:[#allocation4 + $0x18e] ss:$16 sm:$0xc] %v2320_v34 }
 0x54e   : > { %4435 = vst [vmem:[#allocation4 + $0x18e] ss:$16 sm:$0x30] %v2320_v34 }
 0x54f   : > { %4436 = vst [vmem:[#allocation4 + $0x18e] ss:$16 sm:$0xc0] %v2320_v34  ;;  %v2680_v7 = vpop.f32.mrf.mxu2  ;;  %v2601_v14 = vpop.f32.mrf.mxu0 }
 0x550   : > { %4337 = vst [vmem:[#allocation4 + $0x18c] ss:$16 sm:$0x3] %v2238_v24  ;;  %v2642_v55 = vpop.f32.mrf.mxu1 }
 0x551   : > { %4338 = vst [vmem:[#allocation4 + $0x18c] ss:$16 sm:$0xc] %v2238_v24 }
 0x552   : > { %4339 = vst [vmem:[#allocation4 + $0x18c] ss:$16 sm:$0x30] %v2238_v24 }
 0x553   : > { %4340 = vst [vmem:[#allocation4 + $0x18c] ss:$16 sm:$0xc0] %v2238_v24  ;;  %v2560_v47 = vpop.f32.mrf.mxu3 }
 0x554   : > { %4481 = vst [vmem:[#allocation4 + $0x18f] ss:$16 sm:$0x3] %v2361_v52 }
 0x555   : > { %4482 = vst [vmem:[#allocation4 + $0x18f] ss:$16 sm:$0xc] %v2361_v52 }
 0x556   : > { %4483 = vst [vmem:[#allocation4 + $0x18f] ss:$16 sm:$0x30] %v2361_v52 }
 0x557   : > { %4484 = vst [vmem:[#allocation4 + $0x18f] ss:$16 sm:$0xc0] %v2361_v52  ;;  %v2683_v21 = vpop.f32.mrf.mxu2  ;;  %v2604_v29 = vpop.f32.mrf.mxu0 }
 0x558   : > { %4390 = vst [vmem:[#allocation4 + $0x20d] ss:$16 sm:$0x3] %v2282_v32  ;;  %v2645_v59 = vpop.f32.mrf.mxu1 }
 0x559   : > { %4391 = vst [vmem:[#allocation4 + $0x20d] ss:$16 sm:$0xc] %v2282_v32 }
 0x55a   : > { %4392 = vst [vmem:[#allocation4 + $0x20d] ss:$16 sm:$0x30] %v2282_v32 }
 0x55b   : > { %4393 = vst [vmem:[#allocation4 + $0x20d] ss:$16 sm:$0xc0] %v2282_v32  ;;  %v2563_v10 = vpop.f32.mrf.mxu3 }
 0x55c   : > { %4438 = vst [vmem:[#allocation4 + $0x20e] ss:$16 sm:$0x3] %v2323_v12 }
 0x55d   : > { %4439 = vst [vmem:[#allocation4 + $0x20e] ss:$16 sm:$0xc] %v2323_v12 }
 0x55e   : > { %4440 = vst [vmem:[#allocation4 + $0x20e] ss:$16 sm:$0x30] %v2323_v12 }
 0x55f   : > { %4441 = vst [vmem:[#allocation4 + $0x20e] ss:$16 sm:$0xc0] %v2323_v12  ;;  %v2686_v11 = vpop.f32.mrf.mxu2  ;;  %v2607_v43 = vpop.f32.mrf.mxu0 }
 0x560   : > { %4342 = vst [vmem:[#allocation4 + $0x20c] ss:$16 sm:$0x3] %v2241_v31  ;;  %v2648_v34 = vpop.f32.mrf.mxu1 }
 0x561   : > { %4343 = vst [vmem:[#allocation4 + $0x20c] ss:$16 sm:$0xc] %v2241_v31 }
 0x562   : > { %4344 = vst [vmem:[#allocation4 + $0x20c] ss:$16 sm:$0x30] %v2241_v31 }
 0x563   : > { %4345 = vst [vmem:[#allocation4 + $0x20c] ss:$16 sm:$0xc0] %v2241_v31  ;;  %v2566_v24 = vpop.f32.mrf.mxu3 }
 0x564   : > { %4486 = vst [vmem:[#allocation4 + $0x20f] ss:$16 sm:$0x3] %v2364_v62 }
 0x565   : > { %4487 = vst [vmem:[#allocation4 + $0x20f] ss:$16 sm:$0xc] %v2364_v62 }
 0x566   : > { %4488 = vst [vmem:[#allocation4 + $0x20f] ss:$16 sm:$0x30] %v2364_v62 }
 0x567   : > { %4489 = vst [vmem:[#allocation4 + $0x20f] ss:$16 sm:$0xc0] %v2364_v62  ;;  %v2689_v52 = vpop.f32.mrf.mxu2  ;;  %v2610_v32 = vpop.f32.mrf.mxu0 }
 0x568   : > { %4395 = vst [vmem:[#allocation4 + $0x28d] ss:$16 sm:$0x3] %v2285_v15  ;;  %v2651_v12 = vpop.f32.mrf.mxu1 }
 0x569   : > { %4396 = vst [vmem:[#allocation4 + $0x28d] ss:$16 sm:$0xc] %v2285_v15 }
 0x56a   : > { %4397 = vst [vmem:[#allocation4 + $0x28d] ss:$16 sm:$0x30] %v2285_v15 }
 0x56b   : > { %4398 = vst [vmem:[#allocation4 + $0x28d] ss:$16 sm:$0xc0] %v2285_v15  ;;  %v2569_v31 = vpop.f32.mrf.mxu3 }
 0x56c   : > { %4443 = vst [vmem:[#allocation4 + $0x28e] ss:$16 sm:$0x3] %v2326_v36 }
 0x56d   : > { %4444 = vst [vmem:[#allocation4 + $0x28e] ss:$16 sm:$0xc] %v2326_v36 }
 0x56e   : > { %4445 = vst [vmem:[#allocation4 + $0x28e] ss:$16 sm:$0x30] %v2326_v36 }
 0x56f   : > { %4446 = vst [vmem:[#allocation4 + $0x28e] ss:$16 sm:$0xc0] %v2326_v36  ;;  %v2692_v62 = vpop.f32.mrf.mxu2  ;;  %v2613_v15 = vpop.f32.mrf.mxu0 }
 0x570   : > { %4347 = vst [vmem:[#allocation4 + $0x28c] ss:$16 sm:$0x3] %v2244_v23  ;;  %v2654_v36 = vpop.f32.mrf.mxu1 }
 0x571   : > { %4348 = vst [vmem:[#allocation4 + $0x28c] ss:$16 sm:$0xc] %v2244_v23 }
 0x572   : > { %4349 = vst [vmem:[#allocation4 + $0x28c] ss:$16 sm:$0x30] %v2244_v23 }
 0x573   : > { %4350 = vst [vmem:[#allocation4 + $0x28c] ss:$16 sm:$0xc0] %v2244_v23  ;;  %v2572_v23 = vpop.f32.mrf.mxu3 }
 0x574   : > { %4491 = vst [vmem:[#allocation4 + $0x28f] ss:$16 sm:$0x3] %v2367_v35 }
 0x575   : > { %4492 = vst [vmem:[#allocation4 + $0x28f] ss:$16 sm:$0xc] %v2367_v35 }
 0x576   : > { %4493 = vst [vmem:[#allocation4 + $0x28f] ss:$16 sm:$0x30] %v2367_v35 }
 0x577   : > { %4494 = vst [vmem:[#allocation4 + $0x28f] ss:$16 sm:$0xc0] %v2367_v35  ;;  %v2695_v35 = vpop.f32.mrf.mxu2 }
 0x578   : > { %4400 = vst [vmem:[#allocation4 + $0x30d] ss:$16 sm:$0x3] %v2288_v33 }
 0x579   : > { %4401 = vst [vmem:[#allocation4 + $0x30d] ss:$16 sm:$0xc] %v2288_v33 }
 0x57a   : > { %4402 = vst [vmem:[#allocation4 + $0x30d] ss:$16 sm:$0x30] %v2288_v33 }
 0x57b   : > { %4403 = vst [vmem:[#allocation4 + $0x30d] ss:$16 sm:$0xc0] %v2288_v33  ;;  %v2616_v33 = vpop.f32.mrf.mxu0 }
 0x57c   : > { %4448 = vst [vmem:[#allocation4 + $0x30e] ss:$16 sm:$0x3] %v2329_v27 }
 0x57d   : > { %4449 = vst [vmem:[#allocation4 + $0x30e] ss:$16 sm:$0xc] %v2329_v27 }
 0x57e   : > { %4450 = vst [vmem:[#allocation4 + $0x30e] ss:$16 sm:$0x30] %v2329_v27 }
 0x57f   : > { %4451 = vst [vmem:[#allocation4 + $0x30e] ss:$16 sm:$0xc0] %v2329_v27  ;;  %v2657_v27 = vpop.f32.mrf.mxu1 }
 0x580   : > { %4352 = vst [vmem:[#allocation4 + $0x30c] ss:$16 sm:$0x3] %v2247_v30 }
 0x581   : > { %4353 = vst [vmem:[#allocation4 + $0x30c] ss:$16 sm:$0xc] %v2247_v30 }
 0x582   : > { %4354 = vst [vmem:[#allocation4 + $0x30c] ss:$16 sm:$0x30] %v2247_v30 }
 0x583   : > { %4355 = vst [vmem:[#allocation4 + $0x30c] ss:$16 sm:$0xc0] %v2247_v30  ;;  %v2575_v30 = vpop.f32.mrf.mxu3 }
 0x584   : > { %4496 = vst [vmem:[#allocation4 + $0x30f] ss:$16 sm:$0x3] %v2370_v38 }
 0x585   : > { %4497 = vst [vmem:[#allocation4 + $0x30f] ss:$16 sm:$0xc] %v2370_v38 }
 0x586   : > { %4498 = vst [vmem:[#allocation4 + $0x30f] ss:$16 sm:$0x30] %v2370_v38 }
 0x587   : > { %4499 = vst [vmem:[#allocation4 + $0x30f] ss:$16 sm:$0xc0] %v2370_v38  ;;  %v2698_v38 = vpop.f32.mrf.mxu2 }
 0x588   : > { %4405 = vst [vmem:[#allocation4 + $0x38d] ss:$16 sm:$0x3] %v2291_v40 }
 0x589   : > { %4406 = vst [vmem:[#allocation4 + $0x38d] ss:$16 sm:$0xc] %v2291_v40 }
 0x58a   : > { %4407 = vst [vmem:[#allocation4 + $0x38d] ss:$16 sm:$0x30] %v2291_v40 }
 0x58b   : > { %4408 = vst [vmem:[#allocation4 + $0x38d] ss:$16 sm:$0xc0] %v2291_v40  ;;  %v2619_v40 = vpop.f32.mrf.mxu0 }
 0x58c   : > { %4453 = vst [vmem:[#allocation4 + $0x38e] ss:$16 sm:$0x3] %v2332_v26 }
 0x58d   : > { %4454 = vst [vmem:[#allocation4 + $0x38e] ss:$16 sm:$0xc] %v2332_v26 }
 0x58e   : > { %4455 = vst [vmem:[#allocation4 + $0x38e] ss:$16 sm:$0x30] %v2332_v26 }
 0x58f   : > { %4456 = vst [vmem:[#allocation4 + $0x38e] ss:$16 sm:$0xc0] %v2332_v26  ;;  %v2660_v26 = vpop.f32.mrf.mxu1 }
 0x590   : > { %4357 = vst [vmem:[#allocation4 + $0x38c] ss:$16 sm:$0x3] %v2250_v6 }
 0x591   : > { %4358 = vst [vmem:[#allocation4 + $0x38c] ss:$16 sm:$0xc] %v2250_v6 }
 0x592   : > { %4359 = vst [vmem:[#allocation4 + $0x38c] ss:$16 sm:$0x30] %v2250_v6 }
 0x593   : > { %4360 = vst [vmem:[#allocation4 + $0x38c] ss:$16 sm:$0xc0] %v2250_v6  ;;  %v2578_v6 = vpop.f32.mrf.mxu3 }
 0x594   : > { %4501 = vst [vmem:[#allocation4 + $0x38f] ss:$16 sm:$0x3] %v2373_v39 }
 0x595   : > { %4502 = vst [vmem:[#allocation4 + $0x38f] ss:$16 sm:$0xc] %v2373_v39 }
 0x596   : > { %4503 = vst [vmem:[#allocation4 + $0x38f] ss:$16 sm:$0x30] %v2373_v39 }
 0x597   : > { %4504 = vst [vmem:[#allocation4 + $0x38f] ss:$16 sm:$0xc0] %v2373_v39  ;;  %v2701_v39 = vpop.f32.mrf.mxu2 }
 0x598   : > { %4561 = vst [vmem:[#allocation5 + $0x1] ss:$16 sm:$0x3] %v2434_v2 }
 0x599   : > { %4562 = vst [vmem:[#allocation5 + $0x1] ss:$16 sm:$0xc] %v2434_v2 }
 0x59a   : > { %4563 = vst [vmem:[#allocation5 + $0x1] ss:$16 sm:$0x30] %v2434_v2 }
 0x59b   : > { %4564 = vst [vmem:[#allocation5 + $0x1] ss:$16 sm:$0xc0] %v2434_v2  ;;  %v2762_v2 = vpop.f32.mrf.mxu0 }
 0x59c   : > { %4609 = vst [vmem:[#allocation5 + $0x2] ss:$16 sm:$0x3] %v2475_v45 }
 0x59d   : > { %4610 = vst [vmem:[#allocation5 + $0x2] ss:$16 sm:$0xc] %v2475_v45 }
 0x59e   : > { %4611 = vst [vmem:[#allocation5 + $0x2] ss:$16 sm:$0x30] %v2475_v45 }
 0x59f   : > { %4612 = vst [vmem:[#allocation5 + $0x2] ss:$16 sm:$0xc0] %v2475_v45  ;;  %v2803_v45 = vpop.f32.mrf.mxu1 }
 0x5a0   : > { %4513 = vst [vmem:[#allocation5] ss:$16 sm:$0x3] %v2393_v18 }
 0x5a1   : > { %4514 = vst [vmem:[#allocation5] ss:$16 sm:$0xc] %v2393_v18 }
 0x5a2   : > { %4515 = vst [vmem:[#allocation5] ss:$16 sm:$0x30] %v2393_v18 }
 0x5a3   : > { %4516 = vst [vmem:[#allocation5] ss:$16 sm:$0xc0] %v2393_v18  ;;  %v2721_v18 = vpop.f32.mrf.mxu3 }
 0x5a4   : > { %4657 = vst [vmem:[#allocation5 + $0x3] ss:$16 sm:$0x3] %v2516_v42 }
 0x5a5   : > { %4658 = vst [vmem:[#allocation5 + $0x3] ss:$16 sm:$0xc] %v2516_v42 }
 0x5a6   : > { %4659 = vst [vmem:[#allocation5 + $0x3] ss:$16 sm:$0x30] %v2516_v42 }
 0x5a7   : > { %4660 = vst [vmem:[#allocation5 + $0x3] ss:$16 sm:$0xc0] %v2516_v42  ;;  %v2844_v42 = vpop.f32.mrf.mxu2 }
 0x5a8   : > { %4566 = vst [vmem:[#allocation5 + $0x81] ss:$16 sm:$0x3] %v2437_v8 }
 0x5a9   : > { %4567 = vst [vmem:[#allocation5 + $0x81] ss:$16 sm:$0xc] %v2437_v8 }
 0x5aa   : > { %4568 = vst [vmem:[#allocation5 + $0x81] ss:$16 sm:$0x30] %v2437_v8 }
 0x5ab   : > { %4569 = vst [vmem:[#allocation5 + $0x81] ss:$16 sm:$0xc0] %v2437_v8  ;;  %v2765_v8 = vpop.f32.mrf.mxu0 }
 0x5ac   : > { %4614 = vst [vmem:[#allocation5 + $0x82] ss:$16 sm:$0x3] %v2478_v13 }
 0x5ad   : > { %4615 = vst [vmem:[#allocation5 + $0x82] ss:$16 sm:$0xc] %v2478_v13 }
 0x5ae   : > { %4616 = vst [vmem:[#allocation5 + $0x82] ss:$16 sm:$0x30] %v2478_v13 }
 0x5af   : > { %4617 = vst [vmem:[#allocation5 + $0x82] ss:$16 sm:$0xc0] %v2478_v13  ;;  %v2806_v13 = vpop.f32.mrf.mxu1 }
 0x5b0   : > { %4518 = vst [vmem:[#allocation5 + $0x80] ss:$16 sm:$0x3] %v2396_v61 }
 0x5b1   : > { %4519 = vst [vmem:[#allocation5 + $0x80] ss:$16 sm:$0xc] %v2396_v61 }
 0x5b2   : > { %4520 = vst [vmem:[#allocation5 + $0x80] ss:$16 sm:$0x30] %v2396_v61 }
 0x5b3   : > { %4521 = vst [vmem:[#allocation5 + $0x80] ss:$16 sm:$0xc0] %v2396_v61  ;;  %v2724_v61 = vpop.f32.mrf.mxu3 }
 0x5b4   : > { %4662 = vst [vmem:[#allocation5 + $0x83] ss:$16 sm:$0x3] %v2519_v1 }
 0x5b5   : > { %4663 = vst [vmem:[#allocation5 + $0x83] ss:$16 sm:$0xc] %v2519_v1 }
 0x5b6   : > { %4664 = vst [vmem:[#allocation5 + $0x83] ss:$16 sm:$0x30] %v2519_v1 }
 0x5b7   : > { %4665 = vst [vmem:[#allocation5 + $0x83] ss:$16 sm:$0xc0] %v2519_v1  ;;  %v2847_v1 = vpop.f32.mrf.mxu2 }
 0x5b8   : > { %4571 = vst [vmem:[#allocation5 + $0x101] ss:$16 sm:$0x3] %v2440_v60 }
 0x5b9   : > { %4572 = vst [vmem:[#allocation5 + $0x101] ss:$16 sm:$0xc] %v2440_v60 }
 0x5ba   : > { %4573 = vst [vmem:[#allocation5 + $0x101] ss:$16 sm:$0x30] %v2440_v60 }
 0x5bb   : > { %4574 = vst [vmem:[#allocation5 + $0x101] ss:$16 sm:$0xc0] %v2440_v60  ;;  %v2768_v60 = vpop.f32.mrf.mxu0 }
 0x5bc   : > { %4619 = vst [vmem:[#allocation5 + $0x102] ss:$16 sm:$0x3] %v2481_v44 }
 0x5bd   : > { %4620 = vst [vmem:[#allocation5 + $0x102] ss:$16 sm:$0xc] %v2481_v44 }
 0x5be   : > { %4621 = vst [vmem:[#allocation5 + $0x102] ss:$16 sm:$0x30] %v2481_v44 }
 0x5bf   : > { %4622 = vst [vmem:[#allocation5 + $0x102] ss:$16 sm:$0xc0] %v2481_v44  ;;  %v2809_v44 = vpop.f32.mrf.mxu1 }
 0x5c0   : > { %4523 = vst [vmem:[#allocation5 + $0x100] ss:$16 sm:$0x3] %v2399_v37 }
 0x5c1   : > { %4524 = vst [vmem:[#allocation5 + $0x100] ss:$16 sm:$0xc] %v2399_v37 }
 0x5c2   : > { %4525 = vst [vmem:[#allocation5 + $0x100] ss:$16 sm:$0x30] %v2399_v37 }
 0x5c3   : > { %4526 = vst [vmem:[#allocation5 + $0x100] ss:$16 sm:$0xc0] %v2399_v37  ;;  %v2727_v37 = vpop.f32.mrf.mxu3 }
 0x5c4   : > { %4667 = vst [vmem:[#allocation5 + $0x103] ss:$16 sm:$0x3] %v2522_v20 }
 0x5c5   : > { %4668 = vst [vmem:[#allocation5 + $0x103] ss:$16 sm:$0xc] %v2522_v20 }
 0x5c6   : > { %4669 = vst [vmem:[#allocation5 + $0x103] ss:$16 sm:$0x30] %v2522_v20 }
 0x5c7   : > { %4670 = vst [vmem:[#allocation5 + $0x103] ss:$16 sm:$0xc0] %v2522_v20  ;;  %v2850_v20 = vpop.f32.mrf.mxu2 }
 0x5c8   : > { %4576 = vst [vmem:[#allocation5 + $0x181] ss:$16 sm:$0x3] %v2443_v4 }
 0x5c9   : > { %4577 = vst [vmem:[#allocation5 + $0x181] ss:$16 sm:$0xc] %v2443_v4 }
 0x5ca   : > { %4578 = vst [vmem:[#allocation5 + $0x181] ss:$16 sm:$0x30] %v2443_v4 }
 0x5cb   : > { %4579 = vst [vmem:[#allocation5 + $0x181] ss:$16 sm:$0xc0] %v2443_v4  ;;  %v2771_v4 = vpop.f32.mrf.mxu0 }
 0x5cc   : > { %4624 = vst [vmem:[#allocation5 + $0x182] ss:$16 sm:$0x3] %v2484_v50 }
 0x5cd   : > { %4625 = vst [vmem:[#allocation5 + $0x182] ss:$16 sm:$0xc] %v2484_v50 }
 0x5ce   : > { %4626 = vst [vmem:[#allocation5 + $0x182] ss:$16 sm:$0x30] %v2484_v50 }
 0x5cf   : > { %4627 = vst [vmem:[#allocation5 + $0x182] ss:$16 sm:$0xc0] %v2484_v50  ;;  %v2812_v50 = vpop.f32.mrf.mxu1 }
 0x5d0   : > { %4528 = vst [vmem:[#allocation5 + $0x180] ss:$16 sm:$0x3] %v2402_v19 }
 0x5d1   : > { %4529 = vst [vmem:[#allocation5 + $0x180] ss:$16 sm:$0xc] %v2402_v19 }
 0x5d2   : > { %4530 = vst [vmem:[#allocation5 + $0x180] ss:$16 sm:$0x30] %v2402_v19 }
 0x5d3   : > { %4531 = vst [vmem:[#allocation5 + $0x180] ss:$16 sm:$0xc0] %v2402_v19  ;;  %v2730_v19 = vpop.f32.mrf.mxu3 }
 0x5d4   : > { %4672 = vst [vmem:[#allocation5 + $0x183] ss:$16 sm:$0x3] %v2525_v46 }
 0x5d5   : > { %4673 = vst [vmem:[#allocation5 + $0x183] ss:$16 sm:$0xc] %v2525_v46 }
 0x5d6   : > { %4674 = vst [vmem:[#allocation5 + $0x183] ss:$16 sm:$0x30] %v2525_v46 }
 0x5d7   : > { %4675 = vst [vmem:[#allocation5 + $0x183] ss:$16 sm:$0xc0] %v2525_v46  ;;  %v2853_v46 = vpop.f32.mrf.mxu2 }
 0x5d8   : > { %4581 = vst [vmem:[#allocation5 + $0x201] ss:$16 sm:$0x3] %v2446_v63 }
 0x5d9   : > { %4582 = vst [vmem:[#allocation5 + $0x201] ss:$16 sm:$0xc] %v2446_v63 }
 0x5da   : > { %4583 = vst [vmem:[#allocation5 + $0x201] ss:$16 sm:$0x30] %v2446_v63 }
 0x5db   : > { %4584 = vst [vmem:[#allocation5 + $0x201] ss:$16 sm:$0xc0] %v2446_v63  ;;  %v2774_v63 = vpop.f32.mrf.mxu0 }
 0x5dc   : > { %4629 = vst [vmem:[#allocation5 + $0x202] ss:$16 sm:$0x3] %v2487_v56 }
 0x5dd   : > { %4630 = vst [vmem:[#allocation5 + $0x202] ss:$16 sm:$0xc] %v2487_v56 }
 0x5de   : > { %4631 = vst [vmem:[#allocation5 + $0x202] ss:$16 sm:$0x30] %v2487_v56 }
 0x5df   : > { %4632 = vst [vmem:[#allocation5 + $0x202] ss:$16 sm:$0xc0] %v2487_v56  ;;  %v2815_v56 = vpop.f32.mrf.mxu1 }
 0x5e0   : > { %4533 = vst [vmem:[#allocation5 + $0x200] ss:$16 sm:$0x3] %v2405_v54 }
 0x5e1   : > { %4534 = vst [vmem:[#allocation5 + $0x200] ss:$16 sm:$0xc] %v2405_v54 }
 0x5e2   : > { %4535 = vst [vmem:[#allocation5 + $0x200] ss:$16 sm:$0x30] %v2405_v54 }
 0x5e3   : > { %4536 = vst [vmem:[#allocation5 + $0x200] ss:$16 sm:$0xc0] %v2405_v54  ;;  %v2733_v54 = vpop.f32.mrf.mxu3 }
 0x5e4   : > { %4677 = vst [vmem:[#allocation5 + $0x203] ss:$16 sm:$0x3] %v2528_v16 }
 0x5e5   : > { %4678 = vst [vmem:[#allocation5 + $0x203] ss:$16 sm:$0xc] %v2528_v16 }
 0x5e6   : > { %4679 = vst [vmem:[#allocation5 + $0x203] ss:$16 sm:$0x30] %v2528_v16 }
 0x5e7   : > { %4680 = vst [vmem:[#allocation5 + $0x203] ss:$16 sm:$0xc0] %v2528_v16  ;;  %v2856_v16 = vpop.f32.mrf.mxu2 }
 0x5e8   : > { %4586 = vst [vmem:[#allocation5 + $0x281] ss:$16 sm:$0x3] %v2449_v48 }
 0x5e9   : > { %4587 = vst [vmem:[#allocation5 + $0x281] ss:$16 sm:$0xc] %v2449_v48 }
 0x5ea   : > { %4588 = vst [vmem:[#allocation5 + $0x281] ss:$16 sm:$0x30] %v2449_v48 }
 0x5eb   : > { %4589 = vst [vmem:[#allocation5 + $0x281] ss:$16 sm:$0xc0] %v2449_v48  ;;  %v2777_v48 = vpop.f32.mrf.mxu0 }
 0x5ec   : > { %4634 = vst [vmem:[#allocation5 + $0x282] ss:$16 sm:$0x3] %v2490_v5 }
 0x5ed   : > { %4635 = vst [vmem:[#allocation5 + $0x282] ss:$16 sm:$0xc] %v2490_v5 }
 0x5ee   : > { %4636 = vst [vmem:[#allocation5 + $0x282] ss:$16 sm:$0x30] %v2490_v5 }
 0x5ef   : > { %4637 = vst [vmem:[#allocation5 + $0x282] ss:$16 sm:$0xc0] %v2490_v5  ;;  %v2818_v5 = vpop.f32.mrf.mxu1 }
 0x5f0   : > { %4538 = vst [vmem:[#allocation5 + $0x280] ss:$16 sm:$0x3] %v2408_v9 }
 0x5f1   : > { %4539 = vst [vmem:[#allocation5 + $0x280] ss:$16 sm:$0xc] %v2408_v9 }
 0x5f2   : > { %4540 = vst [vmem:[#allocation5 + $0x280] ss:$16 sm:$0x30] %v2408_v9 }
 0x5f3   : > { %4541 = vst [vmem:[#allocation5 + $0x280] ss:$16 sm:$0xc0] %v2408_v9  ;;  %v2736_v9 = vpop.f32.mrf.mxu3 }
 0x5f4   : > { %4682 = vst [vmem:[#allocation5 + $0x283] ss:$16 sm:$0x3] %v2531_v49 }
 0x5f5   : > { %4683 = vst [vmem:[#allocation5 + $0x283] ss:$16 sm:$0xc] %v2531_v49 }
 0x5f6   : > { %4684 = vst [vmem:[#allocation5 + $0x283] ss:$16 sm:$0x30] %v2531_v49 }
 0x5f7   : > { %4685 = vst [vmem:[#allocation5 + $0x283] ss:$16 sm:$0xc0] %v2531_v49  ;;  %v2859_v49 = vpop.f32.mrf.mxu2 }
 0x5f8   : > { %4591 = vst [vmem:[#allocation5 + $0x301] ss:$16 sm:$0x3] %v2452_v57 }
 0x5f9   : > { %4592 = vst [vmem:[#allocation5 + $0x301] ss:$16 sm:$0xc] %v2452_v57 }
 0x5fa   : > { %4593 = vst [vmem:[#allocation5 + $0x301] ss:$16 sm:$0x30] %v2452_v57 }
 0x5fb   : > { %4594 = vst [vmem:[#allocation5 + $0x301] ss:$16 sm:$0xc0] %v2452_v57  ;;  %v2780_v57 = vpop.f32.mrf.mxu0 }
 0x5fc   : > { %4639 = vst [vmem:[#allocation5 + $0x302] ss:$16 sm:$0x3] %v2493_v25 }
 0x5fd   : > { %4640 = vst [vmem:[#allocation5 + $0x302] ss:$16 sm:$0xc] %v2493_v25 }
 0x5fe   : > { %4641 = vst [vmem:[#allocation5 + $0x302] ss:$16 sm:$0x30] %v2493_v25 }
 0x5ff   : > { %4642 = vst [vmem:[#allocation5 + $0x302] ss:$16 sm:$0xc0] %v2493_v25  ;;  %v2821_v25 = vpop.f32.mrf.mxu1 }
 0x600   : > { %4543 = vst [vmem:[#allocation5 + $0x300] ss:$16 sm:$0x3] %v2411_v28 }
 0x601   : > { %4544 = vst [vmem:[#allocation5 + $0x300] ss:$16 sm:$0xc] %v2411_v28 }
 0x602   : > { %4545 = vst [vmem:[#allocation5 + $0x300] ss:$16 sm:$0x30] %v2411_v28 }
 0x603   : > { %4546 = vst [vmem:[#allocation5 + $0x300] ss:$16 sm:$0xc0] %v2411_v28  ;;  %v2739_v28 = vpop.f32.mrf.mxu3 }
 0x604   : > { %4687 = vst [vmem:[#allocation5 + $0x303] ss:$16 sm:$0x3] %v2534_v22 }
 0x605   : > { %4688 = vst [vmem:[#allocation5 + $0x303] ss:$16 sm:$0xc] %v2534_v22 }
 0x606   : > { %4689 = vst [vmem:[#allocation5 + $0x303] ss:$16 sm:$0x30] %v2534_v22 }
 0x607   : > { %4690 = vst [vmem:[#allocation5 + $0x303] ss:$16 sm:$0xc0] %v2534_v22  ;;  %v2862_v22 = vpop.f32.mrf.mxu2 }
 0x608   : > { %4596 = vst [vmem:[#allocation5 + $0x381] ss:$16 sm:$0x3] %v2455_v51 }
 0x609   : > { %4597 = vst [vmem:[#allocation5 + $0x381] ss:$16 sm:$0xc] %v2455_v51 }
 0x60a   : > { %4598 = vst [vmem:[#allocation5 + $0x381] ss:$16 sm:$0x30] %v2455_v51 }
 0x60b   : > { %4599 = vst [vmem:[#allocation5 + $0x381] ss:$16 sm:$0xc0] %v2455_v51  ;;  %v2783_v51 = vpop.f32.mrf.mxu0 }
 0x60c   : > { %4644 = vst [vmem:[#allocation5 + $0x382] ss:$16 sm:$0x3] %v2496_v58 }
 0x60d   : > { %4645 = vst [vmem:[#allocation5 + $0x382] ss:$16 sm:$0xc] %v2496_v58 }
 0x60e   : > { %4646 = vst [vmem:[#allocation5 + $0x382] ss:$16 sm:$0x30] %v2496_v58 }
 0x60f   : > { %4647 = vst [vmem:[#allocation5 + $0x382] ss:$16 sm:$0xc0] %v2496_v58  ;;  %v2824_v58 = vpop.f32.mrf.mxu1 }
 0x610   : > { %4548 = vst [vmem:[#allocation5 + $0x380] ss:$16 sm:$0x3] %v2414_v3 }
 0x611   : > { %4549 = vst [vmem:[#allocation5 + $0x380] ss:$16 sm:$0xc] %v2414_v3 }
 0x612   : > { %4550 = vst [vmem:[#allocation5 + $0x380] ss:$16 sm:$0x30] %v2414_v3 }
 0x613   : > { %4551 = vst [vmem:[#allocation5 + $0x380] ss:$16 sm:$0xc0] %v2414_v3  ;;  %v2742_v3 = vpop.f32.mrf.mxu3 }
 0x614   : > { %4692 = vst [vmem:[#allocation5 + $0x383] ss:$16 sm:$0x3] %v2537_v53 }
 0x615   : > { %4693 = vst [vmem:[#allocation5 + $0x383] ss:$16 sm:$0xc] %v2537_v53 }
 0x616   : > { %4694 = vst [vmem:[#allocation5 + $0x383] ss:$16 sm:$0x30] %v2537_v53 }
 0x617   : > { %4695 = vst [vmem:[#allocation5 + $0x383] ss:$16 sm:$0xc0] %v2537_v53  ;;  %v2865_v53 = vpop.f32.mrf.mxu2 }
 0x618   : > { %4753 = vst [vmem:[#allocation5 + $0x5] ss:$16 sm:$0x3] %v2598_v0 }
 0x619   : > { %4754 = vst [vmem:[#allocation5 + $0x5] ss:$16 sm:$0xc] %v2598_v0 }
 0x61a   : > { %4755 = vst [vmem:[#allocation5 + $0x5] ss:$16 sm:$0x30] %v2598_v0 }
 0x61b   : > { %4756 = vst [vmem:[#allocation5 + $0x5] ss:$16 sm:$0xc0] %v2598_v0  ;;  %v2926_v0 = vpop.f32.mrf.mxu0 }
 0x61c   : > { %4801 = vst [vmem:[#allocation5 + $0x6] ss:$16 sm:$0x3] %v2639_v41 }
 0x61d   : > { %4802 = vst [vmem:[#allocation5 + $0x6] ss:$16 sm:$0xc] %v2639_v41 }
 0x61e   : > { %4803 = vst [vmem:[#allocation5 + $0x6] ss:$16 sm:$0x30] %v2639_v41 }
 0x61f   : > { %4804 = vst [vmem:[#allocation5 + $0x6] ss:$16 sm:$0xc0] %v2639_v41  ;;  %v2967_v41 = vpop.f32.mrf.mxu1 }
 0x620   : > { %4705 = vst [vmem:[#allocation5 + $0x4] ss:$16 sm:$0x3] %v2557_v17 }
 0x621   : > { %4706 = vst [vmem:[#allocation5 + $0x4] ss:$16 sm:$0xc] %v2557_v17 }
 0x622   : > { %4707 = vst [vmem:[#allocation5 + $0x4] ss:$16 sm:$0x30] %v2557_v17 }
 0x623   : > { %4708 = vst [vmem:[#allocation5 + $0x4] ss:$16 sm:$0xc0] %v2557_v17  ;;  %v2885_v17 = vpop.f32.mrf.mxu3 }
 0x624   : > { %4849 = vst [vmem:[#allocation5 + $0x7] ss:$16 sm:$0x3] %v2680_v7 }
 0x625   : > { %4850 = vst [vmem:[#allocation5 + $0x7] ss:$16 sm:$0xc] %v2680_v7 }
 0x626   : > { %4851 = vst [vmem:[#allocation5 + $0x7] ss:$16 sm:$0x30] %v2680_v7 }
 0x627   : > { %4852 = vst [vmem:[#allocation5 + $0x7] ss:$16 sm:$0xc0] %v2680_v7  ;;  %v3008_v7 = vpop.f32.mrf.mxu2 }
 0x628   : > { %4758 = vst [vmem:[#allocation5 + $0x85] ss:$16 sm:$0x3] %v2601_v14 }
 0x629   : > { %4759 = vst [vmem:[#allocation5 + $0x85] ss:$16 sm:$0xc] %v2601_v14 }
 0x62a   : > { %4760 = vst [vmem:[#allocation5 + $0x85] ss:$16 sm:$0x30] %v2601_v14 }
 0x62b   : > { %4761 = vst [vmem:[#allocation5 + $0x85] ss:$16 sm:$0xc0] %v2601_v14  ;;  %v2929_v14 = vpop.f32.mrf.mxu0 }
 0x62c   : > { %4806 = vst [vmem:[#allocation5 + $0x86] ss:$16 sm:$0x3] %v2642_v55 }
 0x62d   : > { %4807 = vst [vmem:[#allocation5 + $0x86] ss:$16 sm:$0xc] %v2642_v55 }
 0x62e   : > { %4808 = vst [vmem:[#allocation5 + $0x86] ss:$16 sm:$0x30] %v2642_v55 }
 0x62f   : > { %4809 = vst [vmem:[#allocation5 + $0x86] ss:$16 sm:$0xc0] %v2642_v55  ;;  %v2970_v55 = vpop.f32.mrf.mxu1 }
 0x630   : > { %4710 = vst [vmem:[#allocation5 + $0x84] ss:$16 sm:$0x3] %v2560_v47 }
 0x631   : > { %4711 = vst [vmem:[#allocation5 + $0x84] ss:$16 sm:$0xc] %v2560_v47 }
 0x632   : > { %4712 = vst [vmem:[#allocation5 + $0x84] ss:$16 sm:$0x30] %v2560_v47 }
 0x633   : > { %4713 = vst [vmem:[#allocation5 + $0x84] ss:$16 sm:$0xc0] %v2560_v47  ;;  %v2888_v47 = vpop.f32.mrf.mxu3 }
 0x634   : > { %4854 = vst [vmem:[#allocation5 + $0x87] ss:$16 sm:$0x3] %v2683_v21 }
 0x635   : > { %4855 = vst [vmem:[#allocation5 + $0x87] ss:$16 sm:$0xc] %v2683_v21 }
 0x636   : > { %4856 = vst [vmem:[#allocation5 + $0x87] ss:$16 sm:$0x30] %v2683_v21 }
 0x637   : > { %4857 = vst [vmem:[#allocation5 + $0x87] ss:$16 sm:$0xc0] %v2683_v21  ;;  %v3011_v21 = vpop.f32.mrf.mxu2 }
 0x638   : > { %4763 = vst [vmem:[#allocation5 + $0x105] ss:$16 sm:$0x3] %v2604_v29 }
 0x639   : > { %4764 = vst [vmem:[#allocation5 + $0x105] ss:$16 sm:$0xc] %v2604_v29 }
 0x63a   : > { %4765 = vst [vmem:[#allocation5 + $0x105] ss:$16 sm:$0x30] %v2604_v29 }
 0x63b   : > { %4766 = vst [vmem:[#allocation5 + $0x105] ss:$16 sm:$0xc0] %v2604_v29  ;;  %v2932_v29 = vpop.f32.mrf.mxu0 }
 0x63c   : > { %4811 = vst [vmem:[#allocation5 + $0x106] ss:$16 sm:$0x3] %v2645_v59 }
 0x63d   : > { %4812 = vst [vmem:[#allocation5 + $0x106] ss:$16 sm:$0xc] %v2645_v59 }
 0x63e   : > { %4813 = vst [vmem:[#allocation5 + $0x106] ss:$16 sm:$0x30] %v2645_v59 }
 0x63f   : > { %4814 = vst [vmem:[#allocation5 + $0x106] ss:$16 sm:$0xc0] %v2645_v59  ;;  %v2973_v59 = vpop.f32.mrf.mxu1 }
 0x640   : > { %4715 = vst [vmem:[#allocation5 + $0x104] ss:$16 sm:$0x3] %v2563_v10 }
 0x641   : > { %4716 = vst [vmem:[#allocation5 + $0x104] ss:$16 sm:$0xc] %v2563_v10 }
 0x642   : > { %4717 = vst [vmem:[#allocation5 + $0x104] ss:$16 sm:$0x30] %v2563_v10 }
 0x643   : > { %4718 = vst [vmem:[#allocation5 + $0x104] ss:$16 sm:$0xc0] %v2563_v10  ;;  %v2891_v10 = vpop.f32.mrf.mxu3 }
 0x644   : > { %4859 = vst [vmem:[#allocation5 + $0x107] ss:$16 sm:$0x3] %v2686_v11 }
 0x645   : > { %4860 = vst [vmem:[#allocation5 + $0x107] ss:$16 sm:$0xc] %v2686_v11 }
 0x646   : > { %4861 = vst [vmem:[#allocation5 + $0x107] ss:$16 sm:$0x30] %v2686_v11 }
 0x647   : > { %4862 = vst [vmem:[#allocation5 + $0x107] ss:$16 sm:$0xc0] %v2686_v11  ;;  %v3014_v11 = vpop.f32.mrf.mxu2 }
 0x648   : > { %4768 = vst [vmem:[#allocation5 + $0x185] ss:$16 sm:$0x3] %v2607_v43 }
 0x649   : > { %4769 = vst [vmem:[#allocation5 + $0x185] ss:$16 sm:$0xc] %v2607_v43 }
 0x64a   : > { %4770 = vst [vmem:[#allocation5 + $0x185] ss:$16 sm:$0x30] %v2607_v43 }
 0x64b   : > { %4771 = vst [vmem:[#allocation5 + $0x185] ss:$16 sm:$0xc0] %v2607_v43  ;;  %v2935_v43 = vpop.f32.mrf.mxu0 }
 0x64c   : > { %4816 = vst [vmem:[#allocation5 + $0x186] ss:$16 sm:$0x3] %v2648_v34 }
 0x64d   : > { %4817 = vst [vmem:[#allocation5 + $0x186] ss:$16 sm:$0xc] %v2648_v34 }
 0x64e   : > { %4818 = vst [vmem:[#allocation5 + $0x186] ss:$16 sm:$0x30] %v2648_v34 }
 0x64f   : > { %4819 = vst [vmem:[#allocation5 + $0x186] ss:$16 sm:$0xc0] %v2648_v34  ;;  %v2976_v34 = vpop.f32.mrf.mxu1 }
 0x650   : > { %4720 = vst [vmem:[#allocation5 + $0x184] ss:$16 sm:$0x3] %v2566_v24 }
 0x651   : > { %4721 = vst [vmem:[#allocation5 + $0x184] ss:$16 sm:$0xc] %v2566_v24 }
 0x652   : > { %4722 = vst [vmem:[#allocation5 + $0x184] ss:$16 sm:$0x30] %v2566_v24 }
 0x653   : > { %4723 = vst [vmem:[#allocation5 + $0x184] ss:$16 sm:$0xc0] %v2566_v24  ;;  %v2894_v24 = vpop.f32.mrf.mxu3 }
 0x654   : > { %4864 = vst [vmem:[#allocation5 + $0x187] ss:$16 sm:$0x3] %v2689_v52 }
 0x655   : > { %4865 = vst [vmem:[#allocation5 + $0x187] ss:$16 sm:$0xc] %v2689_v52 }
 0x656   : > { %4866 = vst [vmem:[#allocation5 + $0x187] ss:$16 sm:$0x30] %v2689_v52 }
 0x657   : > { %4867 = vst [vmem:[#allocation5 + $0x187] ss:$16 sm:$0xc0] %v2689_v52  ;;  %v3017_v52 = vpop.f32.mrf.mxu2 }
 0x658   : > { %4773 = vst [vmem:[#allocation5 + $0x205] ss:$16 sm:$0x3] %v2610_v32 }
 0x659   : > { %4774 = vst [vmem:[#allocation5 + $0x205] ss:$16 sm:$0xc] %v2610_v32 }
 0x65a   : > { %4775 = vst [vmem:[#allocation5 + $0x205] ss:$16 sm:$0x30] %v2610_v32 }
 0x65b   : > { %4776 = vst [vmem:[#allocation5 + $0x205] ss:$16 sm:$0xc0] %v2610_v32  ;;  %v2938_v32 = vpop.f32.mrf.mxu0 }
 0x65c   : > { %4821 = vst [vmem:[#allocation5 + $0x206] ss:$16 sm:$0x3] %v2651_v12 }
 0x65d   : > { %4822 = vst [vmem:[#allocation5 + $0x206] ss:$16 sm:$0xc] %v2651_v12 }
 0x65e   : > { %4823 = vst [vmem:[#allocation5 + $0x206] ss:$16 sm:$0x30] %v2651_v12 }
 0x65f   : > { %4824 = vst [vmem:[#allocation5 + $0x206] ss:$16 sm:$0xc0] %v2651_v12  ;;  %v2979_v12 = vpop.f32.mrf.mxu1 }
 0x660   : > { %4725 = vst [vmem:[#allocation5 + $0x204] ss:$16 sm:$0x3] %v2569_v31 }
 0x661   : > { %4726 = vst [vmem:[#allocation5 + $0x204] ss:$16 sm:$0xc] %v2569_v31 }
 0x662   : > { %4727 = vst [vmem:[#allocation5 + $0x204] ss:$16 sm:$0x30] %v2569_v31 }
 0x663   : > { %4728 = vst [vmem:[#allocation5 + $0x204] ss:$16 sm:$0xc0] %v2569_v31  ;;  %v2897_v31 = vpop.f32.mrf.mxu3 }
 0x664   : > { %4869 = vst [vmem:[#allocation5 + $0x207] ss:$16 sm:$0x3] %v2692_v62 }
 0x665   : > { %4870 = vst [vmem:[#allocation5 + $0x207] ss:$16 sm:$0xc] %v2692_v62 }
 0x666   : > { %4871 = vst [vmem:[#allocation5 + $0x207] ss:$16 sm:$0x30] %v2692_v62 }
 0x667   : > { %4872 = vst [vmem:[#allocation5 + $0x207] ss:$16 sm:$0xc0] %v2692_v62  ;;  %v3020_v62 = vpop.f32.mrf.mxu2 }
 0x668   : > { %4778 = vst [vmem:[#allocation5 + $0x285] ss:$16 sm:$0x3] %v2613_v15 }
 0x669   : > { %4779 = vst [vmem:[#allocation5 + $0x285] ss:$16 sm:$0xc] %v2613_v15 }
 0x66a   : > { %4780 = vst [vmem:[#allocation5 + $0x285] ss:$16 sm:$0x30] %v2613_v15 }
 0x66b   : > { %4781 = vst [vmem:[#allocation5 + $0x285] ss:$16 sm:$0xc0] %v2613_v15  ;;  %v2941_v15 = vpop.f32.mrf.mxu0 }
 0x66c   : > { %4826 = vst [vmem:[#allocation5 + $0x286] ss:$16 sm:$0x3] %v2654_v36 }
 0x66d   : > { %4827 = vst [vmem:[#allocation5 + $0x286] ss:$16 sm:$0xc] %v2654_v36 }
 0x66e   : > { %4828 = vst [vmem:[#allocation5 + $0x286] ss:$16 sm:$0x30] %v2654_v36 }
 0x66f   : > { %4829 = vst [vmem:[#allocation5 + $0x286] ss:$16 sm:$0xc0] %v2654_v36  ;;  %v2982_v36 = vpop.f32.mrf.mxu1 }
 0x670   : > { %4730 = vst [vmem:[#allocation5 + $0x284] ss:$16 sm:$0x3] %v2572_v23 }
 0x671   : > { %4731 = vst [vmem:[#allocation5 + $0x284] ss:$16 sm:$0xc] %v2572_v23 }
 0x672   : > { %4732 = vst [vmem:[#allocation5 + $0x284] ss:$16 sm:$0x30] %v2572_v23 }
 0x673   : > { %4733 = vst [vmem:[#allocation5 + $0x284] ss:$16 sm:$0xc0] %v2572_v23  ;;  %v2900_v23 = vpop.f32.mrf.mxu3 }
 0x674   : > { %4874 = vst [vmem:[#allocation5 + $0x287] ss:$16 sm:$0x3] %v2695_v35 }
 0x675   : > { %4875 = vst [vmem:[#allocation5 + $0x287] ss:$16 sm:$0xc] %v2695_v35 }
 0x676   : > { %4876 = vst [vmem:[#allocation5 + $0x287] ss:$16 sm:$0x30] %v2695_v35 }
 0x677   : > { %4877 = vst [vmem:[#allocation5 + $0x287] ss:$16 sm:$0xc0] %v2695_v35  ;;  %v3023_v35 = vpop.f32.mrf.mxu2 }
 0x678   : > { %4783 = vst [vmem:[#allocation5 + $0x305] ss:$16 sm:$0x3] %v2616_v33 }
 0x679   : > { %4784 = vst [vmem:[#allocation5 + $0x305] ss:$16 sm:$0xc] %v2616_v33 }
 0x67a   : > { %4785 = vst [vmem:[#allocation5 + $0x305] ss:$16 sm:$0x30] %v2616_v33 }
 0x67b   : > { %4786 = vst [vmem:[#allocation5 + $0x305] ss:$16 sm:$0xc0] %v2616_v33  ;;  %v2944_v33 = vpop.f32.mrf.mxu0 }
 0x67c   : > { %4831 = vst [vmem:[#allocation5 + $0x306] ss:$16 sm:$0x3] %v2657_v27 }
 0x67d   : > { %4832 = vst [vmem:[#allocation5 + $0x306] ss:$16 sm:$0xc] %v2657_v27 }
 0x67e   : > { %4833 = vst [vmem:[#allocation5 + $0x306] ss:$16 sm:$0x30] %v2657_v27 }
 0x67f   : > { %4834 = vst [vmem:[#allocation5 + $0x306] ss:$16 sm:$0xc0] %v2657_v27  ;;  %v2985_v27 = vpop.f32.mrf.mxu1 }
 0x680   : > { %4735 = vst [vmem:[#allocation5 + $0x304] ss:$16 sm:$0x3] %v2575_v30 }
 0x681   : > { %4736 = vst [vmem:[#allocation5 + $0x304] ss:$16 sm:$0xc] %v2575_v30 }
 0x682   : > { %4737 = vst [vmem:[#allocation5 + $0x304] ss:$16 sm:$0x30] %v2575_v30 }
 0x683   : > { %4738 = vst [vmem:[#allocation5 + $0x304] ss:$16 sm:$0xc0] %v2575_v30  ;;  %v2903_v30 = vpop.f32.mrf.mxu3 }
 0x684   : > { %4879 = vst [vmem:[#allocation5 + $0x307] ss:$16 sm:$0x3] %v2698_v38 }
 0x685   : > { %4880 = vst [vmem:[#allocation5 + $0x307] ss:$16 sm:$0xc] %v2698_v38 }
 0x686   : > { %4881 = vst [vmem:[#allocation5 + $0x307] ss:$16 sm:$0x30] %v2698_v38 }
 0x687   : > { %4882 = vst [vmem:[#allocation5 + $0x307] ss:$16 sm:$0xc0] %v2698_v38  ;;  %v3026_v38 = vpop.f32.mrf.mxu2 }
 0x688   : > { %4788 = vst [vmem:[#allocation5 + $0x385] ss:$16 sm:$0x3] %v2619_v40 }
 0x689   : > { %4789 = vst [vmem:[#allocation5 + $0x385] ss:$16 sm:$0xc] %v2619_v40 }
 0x68a   : > { %4790 = vst [vmem:[#allocation5 + $0x385] ss:$16 sm:$0x30] %v2619_v40 }
 0x68b   : > { %4791 = vst [vmem:[#allocation5 + $0x385] ss:$16 sm:$0xc0] %v2619_v40  ;;  %v2947_v40 = vpop.f32.mrf.mxu0 }
 0x68c   : > { %4836 = vst [vmem:[#allocation5 + $0x386] ss:$16 sm:$0x3] %v2660_v26 }
 0x68d   : > { %4837 = vst [vmem:[#allocation5 + $0x386] ss:$16 sm:$0xc] %v2660_v26 }
 0x68e   : > { %4838 = vst [vmem:[#allocation5 + $0x386] ss:$16 sm:$0x30] %v2660_v26 }
 0x68f   : > { %4839 = vst [vmem:[#allocation5 + $0x386] ss:$16 sm:$0xc0] %v2660_v26  ;;  %v2988_v26 = vpop.f32.mrf.mxu1 }
 0x690   : > { %4740 = vst [vmem:[#allocation5 + $0x384] ss:$16 sm:$0x3] %v2578_v6 }
 0x691   : > { %4741 = vst [vmem:[#allocation5 + $0x384] ss:$16 sm:$0xc] %v2578_v6 }
 0x692   : > { %4742 = vst [vmem:[#allocation5 + $0x384] ss:$16 sm:$0x30] %v2578_v6 }
 0x693   : > { %4743 = vst [vmem:[#allocation5 + $0x384] ss:$16 sm:$0xc0] %v2578_v6  ;;  %v2906_v6 = vpop.f32.mrf.mxu3 }
 0x694   : > { %4884 = vst [vmem:[#allocation5 + $0x387] ss:$16 sm:$0x3] %v2701_v39 }
 0x695   : > { %4885 = vst [vmem:[#allocation5 + $0x387] ss:$16 sm:$0xc] %v2701_v39 }
 0x696   : > { %4886 = vst [vmem:[#allocation5 + $0x387] ss:$16 sm:$0x30] %v2701_v39 }
 0x697   : > { %4887 = vst [vmem:[#allocation5 + $0x387] ss:$16 sm:$0xc0] %v2701_v39  ;;  %v3029_v39 = vpop.f32.mrf.mxu2 }
 0x698   : > { %4945 = vst [vmem:[#allocation5 + $0x9] ss:$16 sm:$0x3] %v2762_v2 }
 0x699   : > { %4946 = vst [vmem:[#allocation5 + $0x9] ss:$16 sm:$0xc] %v2762_v2 }
 0x69a   : > { %4947 = vst [vmem:[#allocation5 + $0x9] ss:$16 sm:$0x30] %v2762_v2 }
 0x69b   : > { %4948 = vst [vmem:[#allocation5 + $0x9] ss:$16 sm:$0xc0] %v2762_v2  ;;  %v9476_v2 = vmov 0.0  }
 0x69c   : > { %4993 = vst [vmem:[#allocation5 + $0xa] ss:$16 sm:$0x3] %v2803_v45 }
 0x69d   : > { %4994 = vst [vmem:[#allocation5 + $0xa] ss:$16 sm:$0xc] %v2803_v45 }
 0x69e   : > { %4995 = vst [vmem:[#allocation5 + $0xa] ss:$16 sm:$0x30] %v2803_v45 }
 0x69f   : > { %4996 = vst [vmem:[#allocation5 + $0xa] ss:$16 sm:$0xc0] %v2803_v45  ;;  %v9478_v45 = vmov 0.0  }
 0x6a0   : > { %4897 = vst [vmem:[#allocation5 + $0x8] ss:$16 sm:$0x3] %v2721_v18 }
 0x6a1   : > { %4898 = vst [vmem:[#allocation5 + $0x8] ss:$16 sm:$0xc] %v2721_v18 }
 0x6a2   : > { %4899 = vst [vmem:[#allocation5 + $0x8] ss:$16 sm:$0x30] %v2721_v18 }
 0x6a3   : > { %4900 = vst [vmem:[#allocation5 + $0x8] ss:$16 sm:$0xc0] %v2721_v18 }
 0x6a4   : > { %5041 = vst [vmem:[#allocation5 + $0xb] ss:$16 sm:$0x3] %v2844_v42 }
 0x6a5   : > { %5042 = vst [vmem:[#allocation5 + $0xb] ss:$16 sm:$0xc] %v2844_v42 }
 0x6a6   : > { %5043 = vst [vmem:[#allocation5 + $0xb] ss:$16 sm:$0x30] %v2844_v42 }
 0x6a7   : > { %5044 = vst [vmem:[#allocation5 + $0xb] ss:$16 sm:$0xc0] %v2844_v42 }
 0x6a8   : > { %4950 = vst [vmem:[#allocation5 + $0x89] ss:$16 sm:$0x3] %v2765_v8 }
 0x6a9   : > { %4951 = vst [vmem:[#allocation5 + $0x89] ss:$16 sm:$0xc] %v2765_v8 }
 0x6aa   : > { %4952 = vst [vmem:[#allocation5 + $0x89] ss:$16 sm:$0x30] %v2765_v8 }
 0x6ab   : > { %4953 = vst [vmem:[#allocation5 + $0x89] ss:$16 sm:$0xc0] %v2765_v8 }
 0x6ac   : > { %4998 = vst [vmem:[#allocation5 + $0x8a] ss:$16 sm:$0x3] %v2806_v13 }
 0x6ad   : > { %4999 = vst [vmem:[#allocation5 + $0x8a] ss:$16 sm:$0xc] %v2806_v13 }
 0x6ae   : > { %5000 = vst [vmem:[#allocation5 + $0x8a] ss:$16 sm:$0x30] %v2806_v13 }
 0x6af   : > { %5001 = vst [vmem:[#allocation5 + $0x8a] ss:$16 sm:$0xc0] %v2806_v13 }
 0x6b0   : > { %4902 = vst [vmem:[#allocation5 + $0x88] ss:$16 sm:$0x3] %v2724_v61 }
 0x6b1   : > { %4903 = vst [vmem:[#allocation5 + $0x88] ss:$16 sm:$0xc] %v2724_v61 }
 0x6b2   : > { %4904 = vst [vmem:[#allocation5 + $0x88] ss:$16 sm:$0x30] %v2724_v61 }
 0x6b3   : > { %4905 = vst [vmem:[#allocation5 + $0x88] ss:$16 sm:$0xc0] %v2724_v61 }
 0x6b4   : > { %5046 = vst [vmem:[#allocation5 + $0x8b] ss:$16 sm:$0x3] %v2847_v1 }
 0x6b5   : > { %5047 = vst [vmem:[#allocation5 + $0x8b] ss:$16 sm:$0xc] %v2847_v1 }
 0x6b6   : > { %5048 = vst [vmem:[#allocation5 + $0x8b] ss:$16 sm:$0x30] %v2847_v1 }
 0x6b7   : > { %5049 = vst [vmem:[#allocation5 + $0x8b] ss:$16 sm:$0xc0] %v2847_v1 }
 0x6b8   : > { %4955 = vst [vmem:[#allocation5 + $0x109] ss:$16 sm:$0x3] %v2768_v60 }
 0x6b9   : > { %4956 = vst [vmem:[#allocation5 + $0x109] ss:$16 sm:$0xc] %v2768_v60 }
 0x6ba   : > { %4957 = vst [vmem:[#allocation5 + $0x109] ss:$16 sm:$0x30] %v2768_v60 }
 0x6bb   : > { %4958 = vst [vmem:[#allocation5 + $0x109] ss:$16 sm:$0xc0] %v2768_v60 }
 0x6bc   : > { %5003 = vst [vmem:[#allocation5 + $0x10a] ss:$16 sm:$0x3] %v2809_v44 }
 0x6bd   : > { %5004 = vst [vmem:[#allocation5 + $0x10a] ss:$16 sm:$0xc] %v2809_v44 }
 0x6be   : > { %5005 = vst [vmem:[#allocation5 + $0x10a] ss:$16 sm:$0x30] %v2809_v44 }
 0x6bf   : > { %5006 = vst [vmem:[#allocation5 + $0x10a] ss:$16 sm:$0xc0] %v2809_v44 }
 0x6c0   : > { %4907 = vst [vmem:[#allocation5 + $0x108] ss:$16 sm:$0x3] %v2727_v37 }
 0x6c1   : > { %4908 = vst [vmem:[#allocation5 + $0x108] ss:$16 sm:$0xc] %v2727_v37 }
 0x6c2   : > { %4909 = vst [vmem:[#allocation5 + $0x108] ss:$16 sm:$0x30] %v2727_v37 }
 0x6c3   : > { %4910 = vst [vmem:[#allocation5 + $0x108] ss:$16 sm:$0xc0] %v2727_v37 }
 0x6c4   : > { %5051 = vst [vmem:[#allocation5 + $0x10b] ss:$16 sm:$0x3] %v2850_v20 }
 0x6c5   : > { %5052 = vst [vmem:[#allocation5 + $0x10b] ss:$16 sm:$0xc] %v2850_v20 }
 0x6c6   : > { %5053 = vst [vmem:[#allocation5 + $0x10b] ss:$16 sm:$0x30] %v2850_v20 }
 0x6c7   : > { %5054 = vst [vmem:[#allocation5 + $0x10b] ss:$16 sm:$0xc0] %v2850_v20 }
 0x6c8   : > { %4960 = vst [vmem:[#allocation5 + $0x189] ss:$16 sm:$0x3] %v2771_v4 }
 0x6c9   : > { %4961 = vst [vmem:[#allocation5 + $0x189] ss:$16 sm:$0xc] %v2771_v4 }
 0x6ca   : > { %4962 = vst [vmem:[#allocation5 + $0x189] ss:$16 sm:$0x30] %v2771_v4 }
 0x6cb   : > { %4963 = vst [vmem:[#allocation5 + $0x189] ss:$16 sm:$0xc0] %v2771_v4 }
 0x6cc   : > { %5008 = vst [vmem:[#allocation5 + $0x18a] ss:$16 sm:$0x3] %v2812_v50 }
 0x6cd   : > { %5009 = vst [vmem:[#allocation5 + $0x18a] ss:$16 sm:$0xc] %v2812_v50 }
 0x6ce   : > { %5010 = vst [vmem:[#allocation5 + $0x18a] ss:$16 sm:$0x30] %v2812_v50 }
 0x6cf   : > { %5011 = vst [vmem:[#allocation5 + $0x18a] ss:$16 sm:$0xc0] %v2812_v50 }
 0x6d0   : > { %4912 = vst [vmem:[#allocation5 + $0x188] ss:$16 sm:$0x3] %v2730_v19 }
 0x6d1   : > { %4913 = vst [vmem:[#allocation5 + $0x188] ss:$16 sm:$0xc] %v2730_v19 }
 0x6d2   : > { %4914 = vst [vmem:[#allocation5 + $0x188] ss:$16 sm:$0x30] %v2730_v19 }
 0x6d3   : > { %4915 = vst [vmem:[#allocation5 + $0x188] ss:$16 sm:$0xc0] %v2730_v19 }
 0x6d4   : > { %5056 = vst [vmem:[#allocation5 + $0x18b] ss:$16 sm:$0x3] %v2853_v46 }
 0x6d5   : > { %5057 = vst [vmem:[#allocation5 + $0x18b] ss:$16 sm:$0xc] %v2853_v46 }
 0x6d6   : > { %5058 = vst [vmem:[#allocation5 + $0x18b] ss:$16 sm:$0x30] %v2853_v46 }
 0x6d7   : > { %5059 = vst [vmem:[#allocation5 + $0x18b] ss:$16 sm:$0xc0] %v2853_v46 }
 0x6d8   : > { %4965 = vst [vmem:[#allocation5 + $0x209] ss:$16 sm:$0x3] %v2774_v63 }
 0x6d9   : > { %4966 = vst [vmem:[#allocation5 + $0x209] ss:$16 sm:$0xc] %v2774_v63 }
 0x6da   : > { %4967 = vst [vmem:[#allocation5 + $0x209] ss:$16 sm:$0x30] %v2774_v63 }
 0x6db   : > { %4968 = vst [vmem:[#allocation5 + $0x209] ss:$16 sm:$0xc0] %v2774_v63 }
 0x6dc   : > { %5013 = vst [vmem:[#allocation5 + $0x20a] ss:$16 sm:$0x3] %v2815_v56 }
 0x6dd   : > { %5014 = vst [vmem:[#allocation5 + $0x20a] ss:$16 sm:$0xc] %v2815_v56 }
 0x6de   : > { %5015 = vst [vmem:[#allocation5 + $0x20a] ss:$16 sm:$0x30] %v2815_v56 }
 0x6df   : > { %5016 = vst [vmem:[#allocation5 + $0x20a] ss:$16 sm:$0xc0] %v2815_v56 }
 0x6e0   : > { %4917 = vst [vmem:[#allocation5 + $0x208] ss:$16 sm:$0x3] %v2733_v54 }
 0x6e1   : > { %4918 = vst [vmem:[#allocation5 + $0x208] ss:$16 sm:$0xc] %v2733_v54 }
 0x6e2   : > { %4919 = vst [vmem:[#allocation5 + $0x208] ss:$16 sm:$0x30] %v2733_v54 }
 0x6e3   : > { %4920 = vst [vmem:[#allocation5 + $0x208] ss:$16 sm:$0xc0] %v2733_v54 }
 0x6e4   : > { %5061 = vst [vmem:[#allocation5 + $0x20b] ss:$16 sm:$0x3] %v2856_v16 }
 0x6e5   : > { %5062 = vst [vmem:[#allocation5 + $0x20b] ss:$16 sm:$0xc] %v2856_v16 }
 0x6e6   : > { %5063 = vst [vmem:[#allocation5 + $0x20b] ss:$16 sm:$0x30] %v2856_v16 }
 0x6e7   : > { %5064 = vst [vmem:[#allocation5 + $0x20b] ss:$16 sm:$0xc0] %v2856_v16 }
 0x6e8   : > { %4970 = vst [vmem:[#allocation5 + $0x289] ss:$16 sm:$0x3] %v2777_v48 }
 0x6e9   : > { %4971 = vst [vmem:[#allocation5 + $0x289] ss:$16 sm:$0xc] %v2777_v48 }
 0x6ea   : > { %4972 = vst [vmem:[#allocation5 + $0x289] ss:$16 sm:$0x30] %v2777_v48 }
 0x6eb   : > { %4973 = vst [vmem:[#allocation5 + $0x289] ss:$16 sm:$0xc0] %v2777_v48 }
 0x6ec   : > { %5018 = vst [vmem:[#allocation5 + $0x28a] ss:$16 sm:$0x3] %v2818_v5 }
 0x6ed   : > { %5019 = vst [vmem:[#allocation5 + $0x28a] ss:$16 sm:$0xc] %v2818_v5 }
 0x6ee   : > { %5020 = vst [vmem:[#allocation5 + $0x28a] ss:$16 sm:$0x30] %v2818_v5 }
 0x6ef   : > { %5021 = vst [vmem:[#allocation5 + $0x28a] ss:$16 sm:$0xc0] %v2818_v5 }
 0x6f0   : > { %4922 = vst [vmem:[#allocation5 + $0x288] ss:$16 sm:$0x3] %v2736_v9 }
 0x6f1   : > { %4923 = vst [vmem:[#allocation5 + $0x288] ss:$16 sm:$0xc] %v2736_v9 }
 0x6f2   : > { %4924 = vst [vmem:[#allocation5 + $0x288] ss:$16 sm:$0x30] %v2736_v9 }
 0x6f3   : > { %4925 = vst [vmem:[#allocation5 + $0x288] ss:$16 sm:$0xc0] %v2736_v9 }
 0x6f4   : > { %5066 = vst [vmem:[#allocation5 + $0x28b] ss:$16 sm:$0x3] %v2859_v49 }
 0x6f5   : > { %5067 = vst [vmem:[#allocation5 + $0x28b] ss:$16 sm:$0xc] %v2859_v49 }
 0x6f6   : > { %5068 = vst [vmem:[#allocation5 + $0x28b] ss:$16 sm:$0x30] %v2859_v49 }
 0x6f7   : > { %5069 = vst [vmem:[#allocation5 + $0x28b] ss:$16 sm:$0xc0] %v2859_v49 }
 0x6f8   : > { %4975 = vst [vmem:[#allocation5 + $0x309] ss:$16 sm:$0x3] %v2780_v57 }
 0x6f9   : > { %4976 = vst [vmem:[#allocation5 + $0x309] ss:$16 sm:$0xc] %v2780_v57 }
 0x6fa   : > { %4977 = vst [vmem:[#allocation5 + $0x309] ss:$16 sm:$0x30] %v2780_v57 }
 0x6fb   : > { %4978 = vst [vmem:[#allocation5 + $0x309] ss:$16 sm:$0xc0] %v2780_v57 }
 0x6fc   : > { %5023 = vst [vmem:[#allocation5 + $0x30a] ss:$16 sm:$0x3] %v2821_v25 }
 0x6fd   : > { %5024 = vst [vmem:[#allocation5 + $0x30a] ss:$16 sm:$0xc] %v2821_v25 }
 0x6fe   : > { %5025 = vst [vmem:[#allocation5 + $0x30a] ss:$16 sm:$0x30] %v2821_v25 }
 0x6ff   : > { %5026 = vst [vmem:[#allocation5 + $0x30a] ss:$16 sm:$0xc0] %v2821_v25 }
 0x700   : > { %4927 = vst [vmem:[#allocation5 + $0x308] ss:$16 sm:$0x3] %v2739_v28 }
 0x701   : > { %4928 = vst [vmem:[#allocation5 + $0x308] ss:$16 sm:$0xc] %v2739_v28 }
 0x702   : > { %4929 = vst [vmem:[#allocation5 + $0x308] ss:$16 sm:$0x30] %v2739_v28 }
 0x703   : > { %4930 = vst [vmem:[#allocation5 + $0x308] ss:$16 sm:$0xc0] %v2739_v28 }
 0x704   : > { %5071 = vst [vmem:[#allocation5 + $0x30b] ss:$16 sm:$0x3] %v2862_v22 }
 0x705   : > { %5072 = vst [vmem:[#allocation5 + $0x30b] ss:$16 sm:$0xc] %v2862_v22 }
 0x706   : > { %5073 = vst [vmem:[#allocation5 + $0x30b] ss:$16 sm:$0x30] %v2862_v22 }
 0x707   : > { %5074 = vst [vmem:[#allocation5 + $0x30b] ss:$16 sm:$0xc0] %v2862_v22 }
 0x708   : > { %4980 = vst [vmem:[#allocation5 + $0x389] ss:$16 sm:$0x3] %v2783_v51 }
 0x709   : > { %4981 = vst [vmem:[#allocation5 + $0x389] ss:$16 sm:$0xc] %v2783_v51 }
 0x70a   : > { %4982 = vst [vmem:[#allocation5 + $0x389] ss:$16 sm:$0x30] %v2783_v51 }
 0x70b   : > { %4983 = vst [vmem:[#allocation5 + $0x389] ss:$16 sm:$0xc0] %v2783_v51 }
 0x70c   : > { %5028 = vst [vmem:[#allocation5 + $0x38a] ss:$16 sm:$0x3] %v2824_v58 }
 0x70d   : > { %5029 = vst [vmem:[#allocation5 + $0x38a] ss:$16 sm:$0xc] %v2824_v58 }
 0x70e   : > { %5030 = vst [vmem:[#allocation5 + $0x38a] ss:$16 sm:$0x30] %v2824_v58 }
 0x70f   : > { %5031 = vst [vmem:[#allocation5 + $0x38a] ss:$16 sm:$0xc0] %v2824_v58 }
 0x710   : > { %4932 = vst [vmem:[#allocation5 + $0x388] ss:$16 sm:$0x3] %v2742_v3 }
 0x711   : > { %4933 = vst [vmem:[#allocation5 + $0x388] ss:$16 sm:$0xc] %v2742_v3 }
 0x712   : > { %4934 = vst [vmem:[#allocation5 + $0x388] ss:$16 sm:$0x30] %v2742_v3 }
 0x713   : > { %4935 = vst [vmem:[#allocation5 + $0x388] ss:$16 sm:$0xc0] %v2742_v3 }
 0x714   : > { %5076 = vst [vmem:[#allocation5 + $0x38b] ss:$16 sm:$0x3] %v2865_v53 }
 0x715   : > { %5077 = vst [vmem:[#allocation5 + $0x38b] ss:$16 sm:$0xc] %v2865_v53 }
 0x716   : > { %5078 = vst [vmem:[#allocation5 + $0x38b] ss:$16 sm:$0x30] %v2865_v53 }
 0x717   : > { %5079 = vst [vmem:[#allocation5 + $0x38b] ss:$16 sm:$0xc0] %v2865_v53 }
 0x718   : > { %5137 = vst [vmem:[#allocation5 + $0xd] ss:$16 sm:$0x3] %v2926_v0 }
 0x719   : > { %5138 = vst [vmem:[#allocation5 + $0xd] ss:$16 sm:$0xc] %v2926_v0 }
 0x71a   : > { %5139 = vst [vmem:[#allocation5 + $0xd] ss:$16 sm:$0x30] %v2926_v0 }
 0x71b   : > { %5140 = vst [vmem:[#allocation5 + $0xd] ss:$16 sm:$0xc0] %v2926_v0 }
 0x71c   : > { %5185 = vst [vmem:[#allocation5 + $0xe] ss:$16 sm:$0x3] %v2967_v41 }
 0x71d   : > { %5186 = vst [vmem:[#allocation5 + $0xe] ss:$16 sm:$0xc] %v2967_v41 }
 0x71e   : > { %5187 = vst [vmem:[#allocation5 + $0xe] ss:$16 sm:$0x30] %v2967_v41 }
 0x71f   : > { %5188 = vst [vmem:[#allocation5 + $0xe] ss:$16 sm:$0xc0] %v2967_v41 }
 0x720   : > { %5089 = vst [vmem:[#allocation5 + $0xc] ss:$16 sm:$0x3] %v2885_v17 }
 0x721   : > { %5090 = vst [vmem:[#allocation5 + $0xc] ss:$16 sm:$0xc] %v2885_v17 }
 0x722   : > { %5091 = vst [vmem:[#allocation5 + $0xc] ss:$16 sm:$0x30] %v2885_v17 }
 0x723   : > { %5092 = vst [vmem:[#allocation5 + $0xc] ss:$16 sm:$0xc0] %v2885_v17 }
 0x724   : > { %5233 = vst [vmem:[#allocation5 + $0xf] ss:$16 sm:$0x3] %v3008_v7 }
 0x725   : > { %5234 = vst [vmem:[#allocation5 + $0xf] ss:$16 sm:$0xc] %v3008_v7 }
 0x726   : > { %5235 = vst [vmem:[#allocation5 + $0xf] ss:$16 sm:$0x30] %v3008_v7 }
 0x727   : > { %5236 = vst [vmem:[#allocation5 + $0xf] ss:$16 sm:$0xc0] %v3008_v7 }
 0x728   : > { %5142 = vst [vmem:[#allocation5 + $0x8d] ss:$16 sm:$0x3] %v2929_v14 }
 0x729   : > { %5143 = vst [vmem:[#allocation5 + $0x8d] ss:$16 sm:$0xc] %v2929_v14 }
 0x72a   : > { %5144 = vst [vmem:[#allocation5 + $0x8d] ss:$16 sm:$0x30] %v2929_v14 }
 0x72b   : > { %5145 = vst [vmem:[#allocation5 + $0x8d] ss:$16 sm:$0xc0] %v2929_v14 }
 0x72c   : > { %5190 = vst [vmem:[#allocation5 + $0x8e] ss:$16 sm:$0x3] %v2970_v55 }
 0x72d   : > { %5191 = vst [vmem:[#allocation5 + $0x8e] ss:$16 sm:$0xc] %v2970_v55 }
 0x72e   : > { %5192 = vst [vmem:[#allocation5 + $0x8e] ss:$16 sm:$0x30] %v2970_v55 }
 0x72f   : > { %5193 = vst [vmem:[#allocation5 + $0x8e] ss:$16 sm:$0xc0] %v2970_v55 }
 0x730   : > { %5094 = vst [vmem:[#allocation5 + $0x8c] ss:$16 sm:$0x3] %v2888_v47 }
 0x731   : > { %5095 = vst [vmem:[#allocation5 + $0x8c] ss:$16 sm:$0xc] %v2888_v47 }
 0x732   : > { %5096 = vst [vmem:[#allocation5 + $0x8c] ss:$16 sm:$0x30] %v2888_v47 }
 0x733   : > { %5097 = vst [vmem:[#allocation5 + $0x8c] ss:$16 sm:$0xc0] %v2888_v47 }
 0x734   : > { %5238 = vst [vmem:[#allocation5 + $0x8f] ss:$16 sm:$0x3] %v3011_v21 }
 0x735   : > { %5239 = vst [vmem:[#allocation5 + $0x8f] ss:$16 sm:$0xc] %v3011_v21 }
 0x736   : > { %5240 = vst [vmem:[#allocation5 + $0x8f] ss:$16 sm:$0x30] %v3011_v21 }
 0x737   : > { %5241 = vst [vmem:[#allocation5 + $0x8f] ss:$16 sm:$0xc0] %v3011_v21 }
 0x738   : > { %5147 = vst [vmem:[#allocation5 + $0x10d] ss:$16 sm:$0x3] %v2932_v29 }
 0x739   : > { %5148 = vst [vmem:[#allocation5 + $0x10d] ss:$16 sm:$0xc] %v2932_v29 }
 0x73a   : > { %5149 = vst [vmem:[#allocation5 + $0x10d] ss:$16 sm:$0x30] %v2932_v29 }
 0x73b   : > { %5150 = vst [vmem:[#allocation5 + $0x10d] ss:$16 sm:$0xc0] %v2932_v29 }
 0x73c   : > { %5195 = vst [vmem:[#allocation5 + $0x10e] ss:$16 sm:$0x3] %v2973_v59 }
 0x73d   : > { %5196 = vst [vmem:[#allocation5 + $0x10e] ss:$16 sm:$0xc] %v2973_v59 }
 0x73e   : > { %5197 = vst [vmem:[#allocation5 + $0x10e] ss:$16 sm:$0x30] %v2973_v59 }
 0x73f   : > { %5198 = vst [vmem:[#allocation5 + $0x10e] ss:$16 sm:$0xc0] %v2973_v59 }
 0x740   : > { %5099 = vst [vmem:[#allocation5 + $0x10c] ss:$16 sm:$0x3] %v2891_v10 }
 0x741   : > { %5100 = vst [vmem:[#allocation5 + $0x10c] ss:$16 sm:$0xc] %v2891_v10 }
 0x742   : > { %5101 = vst [vmem:[#allocation5 + $0x10c] ss:$16 sm:$0x30] %v2891_v10 }
 0x743   : > { %5102 = vst [vmem:[#allocation5 + $0x10c] ss:$16 sm:$0xc0] %v2891_v10 }
 0x744   : > { %5243 = vst [vmem:[#allocation5 + $0x10f] ss:$16 sm:$0x3] %v3014_v11 }
 0x745   : > { %5244 = vst [vmem:[#allocation5 + $0x10f] ss:$16 sm:$0xc] %v3014_v11 }
 0x746   : > { %5245 = vst [vmem:[#allocation5 + $0x10f] ss:$16 sm:$0x30] %v3014_v11 }
 0x747   : > { %5246 = vst [vmem:[#allocation5 + $0x10f] ss:$16 sm:$0xc0] %v3014_v11 }
 0x748   : > { %5152 = vst [vmem:[#allocation5 + $0x18d] ss:$16 sm:$0x3] %v2935_v43 }
 0x749   : > { %5153 = vst [vmem:[#allocation5 + $0x18d] ss:$16 sm:$0xc] %v2935_v43 }
 0x74a   : > { %5154 = vst [vmem:[#allocation5 + $0x18d] ss:$16 sm:$0x30] %v2935_v43 }
 0x74b   : > { %5155 = vst [vmem:[#allocation5 + $0x18d] ss:$16 sm:$0xc0] %v2935_v43 }
 0x74c   : > { %5200 = vst [vmem:[#allocation5 + $0x18e] ss:$16 sm:$0x3] %v2976_v34 }
 0x74d   : > { %5201 = vst [vmem:[#allocation5 + $0x18e] ss:$16 sm:$0xc] %v2976_v34 }
 0x74e   : > { %5202 = vst [vmem:[#allocation5 + $0x18e] ss:$16 sm:$0x30] %v2976_v34 }
 0x74f   : > { %5203 = vst [vmem:[#allocation5 + $0x18e] ss:$16 sm:$0xc0] %v2976_v34 }
 0x750   : > { %5104 = vst [vmem:[#allocation5 + $0x18c] ss:$16 sm:$0x3] %v2894_v24 }
 0x751   : > { %5105 = vst [vmem:[#allocation5 + $0x18c] ss:$16 sm:$0xc] %v2894_v24 }
 0x752   : > { %5106 = vst [vmem:[#allocation5 + $0x18c] ss:$16 sm:$0x30] %v2894_v24 }
 0x753   : > { %5107 = vst [vmem:[#allocation5 + $0x18c] ss:$16 sm:$0xc0] %v2894_v24 }
 0x754   : > { %5248 = vst [vmem:[#allocation5 + $0x18f] ss:$16 sm:$0x3] %v3017_v52 }
 0x755   : > { %5249 = vst [vmem:[#allocation5 + $0x18f] ss:$16 sm:$0xc] %v3017_v52 }
 0x756   : > { %5250 = vst [vmem:[#allocation5 + $0x18f] ss:$16 sm:$0x30] %v3017_v52 }
 0x757   : > { %5251 = vst [vmem:[#allocation5 + $0x18f] ss:$16 sm:$0xc0] %v3017_v52 }
 0x758   : > { %5157 = vst [vmem:[#allocation5 + $0x20d] ss:$16 sm:$0x3] %v2938_v32 }
 0x759   : > { %5158 = vst [vmem:[#allocation5 + $0x20d] ss:$16 sm:$0xc] %v2938_v32 }
 0x75a   : > { %5159 = vst [vmem:[#allocation5 + $0x20d] ss:$16 sm:$0x30] %v2938_v32 }
 0x75b   : > { %5160 = vst [vmem:[#allocation5 + $0x20d] ss:$16 sm:$0xc0] %v2938_v32 }
 0x75c   : > { %5205 = vst [vmem:[#allocation5 + $0x20e] ss:$16 sm:$0x3] %v2979_v12 }
 0x75d   : > { %5206 = vst [vmem:[#allocation5 + $0x20e] ss:$16 sm:$0xc] %v2979_v12 }
 0x75e   : > { %5207 = vst [vmem:[#allocation5 + $0x20e] ss:$16 sm:$0x30] %v2979_v12 }
 0x75f   : > { %5208 = vst [vmem:[#allocation5 + $0x20e] ss:$16 sm:$0xc0] %v2979_v12 }
 0x760   : > { %5109 = vst [vmem:[#allocation5 + $0x20c] ss:$16 sm:$0x3] %v2897_v31 }
 0x761   : > { %5110 = vst [vmem:[#allocation5 + $0x20c] ss:$16 sm:$0xc] %v2897_v31 }
 0x762   : > { %5111 = vst [vmem:[#allocation5 + $0x20c] ss:$16 sm:$0x30] %v2897_v31 }
 0x763   : > { %5112 = vst [vmem:[#allocation5 + $0x20c] ss:$16 sm:$0xc0] %v2897_v31 }
 0x764   : > { %5253 = vst [vmem:[#allocation5 + $0x20f] ss:$16 sm:$0x3] %v3020_v62 }
 0x765   : > { %5254 = vst [vmem:[#allocation5 + $0x20f] ss:$16 sm:$0xc] %v3020_v62 }
 0x766   : > { %5255 = vst [vmem:[#allocation5 + $0x20f] ss:$16 sm:$0x30] %v3020_v62 }
 0x767   : > { %5256 = vst [vmem:[#allocation5 + $0x20f] ss:$16 sm:$0xc0] %v3020_v62 }
 0x768   : > { %5162 = vst [vmem:[#allocation5 + $0x28d] ss:$16 sm:$0x3] %v2941_v15 }
 0x769   : > { %5163 = vst [vmem:[#allocation5 + $0x28d] ss:$16 sm:$0xc] %v2941_v15 }
 0x76a   : > { %5164 = vst [vmem:[#allocation5 + $0x28d] ss:$16 sm:$0x30] %v2941_v15 }
 0x76b   : > { %5165 = vst [vmem:[#allocation5 + $0x28d] ss:$16 sm:$0xc0] %v2941_v15 }
 0x76c   : > { %5210 = vst [vmem:[#allocation5 + $0x28e] ss:$16 sm:$0x3] %v2982_v36 }
 0x76d   : > { %5211 = vst [vmem:[#allocation5 + $0x28e] ss:$16 sm:$0xc] %v2982_v36 }
 0x76e   : > { %5212 = vst [vmem:[#allocation5 + $0x28e] ss:$16 sm:$0x30] %v2982_v36 }
 0x76f   : > { %5213 = vst [vmem:[#allocation5 + $0x28e] ss:$16 sm:$0xc0] %v2982_v36 }
 0x770   : > { %5114 = vst [vmem:[#allocation5 + $0x28c] ss:$16 sm:$0x3] %v2900_v23 }
 0x771   : > { %5115 = vst [vmem:[#allocation5 + $0x28c] ss:$16 sm:$0xc] %v2900_v23 }
 0x772   : > { %5116 = vst [vmem:[#allocation5 + $0x28c] ss:$16 sm:$0x30] %v2900_v23 }
 0x773   : > { %5117 = vst [vmem:[#allocation5 + $0x28c] ss:$16 sm:$0xc0] %v2900_v23 }
 0x774   : > { %5258 = vst [vmem:[#allocation5 + $0x28f] ss:$16 sm:$0x3] %v3023_v35 }
 0x775   : > { %5259 = vst [vmem:[#allocation5 + $0x28f] ss:$16 sm:$0xc] %v3023_v35 }
 0x776   : > { %5260 = vst [vmem:[#allocation5 + $0x28f] ss:$16 sm:$0x30] %v3023_v35 }
 0x777   : > { %5261 = vst [vmem:[#allocation5 + $0x28f] ss:$16 sm:$0xc0] %v3023_v35 }
 0x778   : > { %5167 = vst [vmem:[#allocation5 + $0x30d] ss:$16 sm:$0x3] %v2944_v33 }
 0x779   : > { %5168 = vst [vmem:[#allocation5 + $0x30d] ss:$16 sm:$0xc] %v2944_v33 }
 0x77a   : > { %5169 = vst [vmem:[#allocation5 + $0x30d] ss:$16 sm:$0x30] %v2944_v33 }
 0x77b   : > { %5170 = vst [vmem:[#allocation5 + $0x30d] ss:$16 sm:$0xc0] %v2944_v33 }
 0x77c   : > { %5215 = vst [vmem:[#allocation5 + $0x30e] ss:$16 sm:$0x3] %v2985_v27 }
 0x77d   : > { %5216 = vst [vmem:[#allocation5 + $0x30e] ss:$16 sm:$0xc] %v2985_v27 }
 0x77e   : > { %5217 = vst [vmem:[#allocation5 + $0x30e] ss:$16 sm:$0x30] %v2985_v27 }
 0x77f   : > { %5218 = vst [vmem:[#allocation5 + $0x30e] ss:$16 sm:$0xc0] %v2985_v27 }
 0x780   : > { %5119 = vst [vmem:[#allocation5 + $0x30c] ss:$16 sm:$0x3] %v2903_v30 }
 0x781   : > { %5120 = vst [vmem:[#allocation5 + $0x30c] ss:$16 sm:$0xc] %v2903_v30 }
 0x782   : > { %5121 = vst [vmem:[#allocation5 + $0x30c] ss:$16 sm:$0x30] %v2903_v30 }
 0x783   : > { %5122 = vst [vmem:[#allocation5 + $0x30c] ss:$16 sm:$0xc0] %v2903_v30 }
 0x784   : > { %5263 = vst [vmem:[#allocation5 + $0x30f] ss:$16 sm:$0x3] %v3026_v38 }
 0x785   : > { %5264 = vst [vmem:[#allocation5 + $0x30f] ss:$16 sm:$0xc] %v3026_v38 }
 0x786   : > { %5265 = vst [vmem:[#allocation5 + $0x30f] ss:$16 sm:$0x30] %v3026_v38 }
 0x787   : > { %5266 = vst [vmem:[#allocation5 + $0x30f] ss:$16 sm:$0xc0] %v3026_v38 }
 0x788   : > { %5172 = vst [vmem:[#allocation5 + $0x38d] ss:$16 sm:$0x3] %v2947_v40 }
 0x789   : > { %5173 = vst [vmem:[#allocation5 + $0x38d] ss:$16 sm:$0xc] %v2947_v40 }
 0x78a   : > { %5174 = vst [vmem:[#allocation5 + $0x38d] ss:$16 sm:$0x30] %v2947_v40 }
 0x78b   : > { %5175 = vst [vmem:[#allocation5 + $0x38d] ss:$16 sm:$0xc0] %v2947_v40 }
 0x78c   : > { %5220 = vst [vmem:[#allocation5 + $0x38e] ss:$16 sm:$0x3] %v2988_v26 }
 0x78d   : > { %5221 = vst [vmem:[#allocation5 + $0x38e] ss:$16 sm:$0xc] %v2988_v26 }
 0x78e   : > { %5222 = vst [vmem:[#allocation5 + $0x38e] ss:$16 sm:$0x30] %v2988_v26 }
 0x78f   : > { %5223 = vst [vmem:[#allocation5 + $0x38e] ss:$16 sm:$0xc0] %v2988_v26 }
 0x790   : > { %5124 = vst [vmem:[#allocation5 + $0x38c] ss:$16 sm:$0x3] %v2906_v6 }
 0x791   : > { %5125 = vst [vmem:[#allocation5 + $0x38c] ss:$16 sm:$0xc] %v2906_v6 }
 0x792   : > { %5126 = vst [vmem:[#allocation5 + $0x38c] ss:$16 sm:$0x30] %v2906_v6 }
 0x793   : > { %5127 = vst [vmem:[#allocation5 + $0x38c] ss:$16 sm:$0xc0] %v2906_v6 }
 0x794   : > { %5268 = vst [vmem:[#allocation5 + $0x38f] ss:$16 sm:$0x3] %v3029_v39 }
 0x795   : > { %5269 = vst [vmem:[#allocation5 + $0x38f] ss:$16 sm:$0xc] %v3029_v39 }
 0x796   : > { %5270 = vst [vmem:[#allocation5 + $0x38f] ss:$16 sm:$0x30] %v3029_v39 }
 0x797   : > { %5271 = vst [vmem:[#allocation5 + $0x38f] ss:$16 sm:$0xc0] %v3029_v39 }
 0x798 LB: >> { %s5767_s22 = sshll.u32 %s6209_s20, 7  ;;  %s5761_s23 = sshll.u32 %s6209_s20, 3  ;;  %vm5479_vm12 = vcmask 1040384   ;;  %vm5481_vm13 = vcmask 1041408   ;;  %vm5483_vm14 = vcmask 1042432   ;;  %vm5485_vm15 = vcmask 1043456   ;;  %s6209_s20 = sphi %s9480_s20, %s5293_s20   ;;  %v6205_v45 = vphi %v9478_v45, %v5468_v45   ;;  %v6201_v2 = vphi %v9476_v2, %v5469_v2  }
 0x799   : >> { %s9489_s24 = scalar_lea.vmem [#allocation3], %s5767_s22  ;;  %s9493_s27 = scalar_lea.vmem [#allocation4], %s5767_s22  ;;  %vm5487_vm1 = vcmask 1044480   ;;  %vm5489_vm2 = vcmask 1045504   ;;  %vm5491_vm3 = vcmask 1046528  }
 0x79a   : >> { %v5299_v18 = vld [vmem:[%s9489_s24] sm:$0xff]  ;;  %v5300_v42 = vld [vmem:[%s9489_s24 + $0x8] sm:$0xff]  ;;  %s5349_s26 = scalar_lea.vmem [#allocation6], %s5761_s23  ;;  %v5318_v20 = vld [vmem:[%s9493_s27 + $0x10] sm:$0xff]  ;;  %s9507_s28 = scalar_lea.vmem [#allocation5], %s5767_s22 }
 0x79b   : >> { %v5316_v8 = vld [vmem:[%s9493_s27] sm:$0xff]  ;;  %v5317_v13 = vld [vmem:[%s9493_s27 + $0x8] sm:$0xff]  ;;  %v5351_v1 = vmul.f32 %v6205_v45, %v5299_v18  ;;  %v5352_v60 = vmul.f32 %v6201_v2, %v5300_v42  ;;  %v5319_v4 = vld [vmem:[%s9493_s27 + $0x18] sm:$0xff]  ;;  %s5493_s29 = scalar_lea.vmem [#allocation7], %s5761_s23  ;;  %s5293_s20 = sadd.s32 1, %s6209_s20  }
 0x79c   : >> { %v9499_v61 = vld [vmem:[%s5349_s26] sm:$0xff]  ;;  %v5301_v50 = vld [vmem:[%s9489_s24 + $0x10] sm:$0xff]  ;;  %v5302_v63 = vld [vmem:[%s9489_s24 + $0x18] sm:$0xff]  ;;  %p5290_p4 = scmp.ge.s32.totalorder %s5293_s20, 8  }
 0x79d   : >> { %v5353_v44 = vperm.slane %v9499_v61, 0  ;;  %v5369_v37 = vperm.slane %v9499_v61, 1  ;;  %v5385_v16 = vperm.slane %v9499_v61, 2  ;;  %v5320_v57 = vld [vmem:[%s9493_s27 + $0x20] sm:$0xff]  ;;  %v5321_v25 = vld [vmem:[%s9493_s27 + $0x28] sm:$0xff]  ;;  %v5401_v41 = vperm.slane %v9499_v61, 3 }
 0x79e   : >> { %v5333_v56 = vld [vmem:[%s9507_s28] sm:$0xff]  ;;  %v5334_v54 = vld [vmem:[%s9507_s28 + $0x8] sm:$0xff]  ;;  %v5335_v53 = vld [vmem:[%s9507_s28 + $0x10] sm:$0xff]  ;;  %v5417_v12 = vperm.slane %v9499_v61, 4  ;;  %v5433_v42 = vperm.slane %v9499_v61, 5 }
 0x79f   : >> { %v5354_v19 = vmul.f32 %v5353_v44, %v5316_v8  ;;  %v5355_v46 = vmul.f32 %v5353_v44, %v5317_v13  ;;  %v5370_v9 = vmul.f32 %v5369_v37, %v5318_v20  ;;  %v5371_v49 = vmul.f32 %v5369_v37, %v5319_v4  ;;  %v5303_v3 = vld [vmem:[%s9489_s24 + $0x20] sm:$0xff]  ;;  %v5336_v0 = vld [vmem:[%s9507_s28 + $0x18] sm:$0xff]  ;;  %v5304_v17 = vld [vmem:[%s9489_s24 + $0x28] sm:$0xff] }
 0x7a0   : >> { %v5386_v47 = vmul.f32 %v5385_v16, %v5320_v57  ;;  %v5322_v21 = vld [vmem:[%s9493_s27 + $0x30] sm:$0xff]  ;;  %v5387_v29 = vmul.f32 %v5385_v16, %v5321_v25  ;;  %v5323_v59 = vld [vmem:[%s9493_s27 + $0x38] sm:$0xff]  ;;  %v5337_v52 = vld [vmem:[%s9507_s28 + $0x20] sm:$0xff] }
 0x7a1   : >> { %v5356_v48 = vadd.f32 %v5354_v19, %v5351_v1  ;;  %v5357_v5 = vadd.f32 %v5355_v46, %v5352_v60  ;;  %v5305_v24 = vld [vmem:[%s9489_s24 + $0x30] sm:$0xff]  ;;  %v5306_v31 = vld [vmem:[%s9489_s24 + $0x38] sm:$0xff]  ;;  %v5338_v62 = vld [vmem:[%s9507_s28 + $0x28] sm:$0xff]  ;;  %v5402_v35 = vmul.f32 %v5401_v41, %v5322_v21  ;;  %v5403_v30 = vmul.f32 %v5401_v41, %v5323_v59 }
 0x7a2   : >> { %v5324_v33 = vld [vmem:[%s9493_s27 + $0x40] sm:$0xff]  ;;  %v5325_v38 = vld [vmem:[%s9493_s27 + $0x48] sm:$0xff]  ;;  %v5339_v2 = vld [vmem:[%s9507_s28 + $0x30] sm:$0xff] }
 0x7a3   : >> { %v5358_v28 = vmul.f32 %v5356_v48, %v5333_v56  ;;  %v5359_v22 = vmul.f32 %v5357_v5, %v5334_v54  ;;  %v5367_v51 = vmul.f32 %v5356_v48, %v5301_v50  ;;  %v5368_v58 = vmul.f32 %v5357_v5, %v5302_v63  ;;  %v5307_v39 = vld [vmem:[%s9489_s24 + $0x40] sm:$0xff]  ;;  %v5308_v8 = vld [vmem:[%s9489_s24 + $0x48] sm:$0xff]  ;;  %v5340_v13 = vld [vmem:[%s9507_s28 + $0x38] sm:$0xff] }
 0x7a4   : >> { %v5418_v37 = vmul.f32 %v5417_v12, %v5324_v33  ;;  %v5326_v20 = vld [vmem:[%s9493_s27 + $0x50] sm:$0xff]  ;;  %v5419_v19 = vmul.f32 %v5417_v12, %v5325_v38  ;;  %v5327_v46 = vld [vmem:[%s9493_s27 + $0x58] sm:$0xff]  ;;  %v5341_v48 = vld [vmem:[%s9507_s28 + $0x40] sm:$0xff] }
 0x7a5   : >> { %v5360_v7 = vadd.f32 %v5359_v22, %v5358_v28  ;;  %v5372_v14 = vadd.f32 %v5370_v9, %v5367_v51  ;;  %v5373_v55 = vadd.f32 %v5371_v49, %v5368_v58  ;;  %v5309_v16 = vld [vmem:[%s9489_s24 + $0x50] sm:$0xff]  ;;  %v5310_v57 = vld [vmem:[%s9489_s24 + $0x58] sm:$0xff]  ;;  %v5342_v25 = vld [vmem:[%s9507_s28 + $0x48] sm:$0xff]  ;;  %v5434_v51 = vmul.f32 %v5433_v42, %v5326_v20 }
 0x7a6   : >> { %v5449_v58 = vperm.slane %v9499_v61, 6  ;;  %v5311_v21 = vld [vmem:[%s9489_s24 + $0x60] sm:$0xff]  ;;  %v5343_v59 = vld [vmem:[%s9507_s28 + $0x50] sm:$0xff] }
 0x7a7   : >> { %v5361_v10 = vrot.slane %v5360_v7, 4  ;;  %v5374_v11 = vmul.f32 %v5372_v14, %v5335_v53  ;;  %v5375_v43 = vmul.f32 %v5373_v55, %v5336_v0  ;;  %v5383_v34 = vmul.f32 %v5372_v14, %v5303_v3  ;;  %v5328_v3 = vld [vmem:[%s9493_s27 + $0x60] sm:$0xff] }
 0x7a8   : >> { %v5384_v32 = vmul.f32 %v5373_v55, %v5304_v17  ;;  %v5435_v17 = vmul.f32 %v5433_v42, %v5327_v46 }
 0x7a9   : >> { %v5362_v15 = vadd.f32 %v5361_v10, %v5360_v7  ;;  %v5376_v36 = vadd.f32 %v5375_v43, %v5374_v11  ;;  %v5388_v23 = vadd.f32 %v5386_v47, %v5383_v34  ;;  %v5465_v47 = vperm.slane %v9499_v61, 7 }
 0x7aa   : >> { %v5389_v27 = vadd.f32 %v5387_v29, %v5384_v32  ;;  %v5329_v29 = vld [vmem:[%s9493_s27 + $0x68] sm:$0xff] }
 0x7ab   : >> { %v5377_v40 = vrot.slane %v5376_v36, 4  ;;  %v5390_v26 = vmul.f32 %v5388_v23, %v5337_v52  ;;  %v5399_v6 = vmul.f32 %v5388_v23, %v5305_v24  ;;  %v5363_v1 = vrot.slane %v5362_v15, 2  ;;  %v5330_v24 = vld [vmem:[%s9493_s27 + $0x70] sm:$0xff]  ;;  %v5344_v52 = vld [vmem:[%s9507_s28 + $0x58] sm:$0xff] }
 0x7ac   : >> { %v5391_v45 = vmul.f32 %v5389_v27, %v5338_v62  ;;  %v5400_v18 = vmul.f32 %v5389_v27, %v5306_v31  ;;  %v5450_v31 = vmul.f32 %v5449_v58, %v5328_v3  ;;  %v5312_v62 = vld [vmem:[%s9489_s24 + $0x68] sm:$0xff]  ;;  %v5451_v38 = vmul.f32 %v5449_v58, %v5329_v29 }
 0x7ad   : >> { %v5378_v60 = vadd.f32 %v5377_v40, %v5376_v36  ;;  %v5404_v44 = vadd.f32 %v5402_v35, %v5399_v6  ;;  %v5364_v28 = vadd.f32 %v5363_v1, %v5362_v15  ;;  %v5331_v15 = vld [vmem:[%s9493_s27 + $0x78] sm:$0xff]  ;;  %v5313_v40 = vld [vmem:[%s9489_s24 + $0x70] sm:$0xff] }
 0x7ae   : >> { %v5392_v4 = vadd.f32 %v5391_v45, %v5390_v26  ;;  %v5405_v50 = vadd.f32 %v5403_v30, %v5400_v18  ;;  %v5345_v26 = vld [vmem:[%s9507_s28 + $0x60] sm:$0xff]  ;;  %v5466_v45 = vmul.f32 %v5465_v47, %v5330_v24  ;;  %v5314_v1 = vld [vmem:[%s9489_s24 + $0x78] sm:$0xff] }
 0x7af   : >> { %v5379_v63 = vrot.slane %v5378_v60, 2  ;;  %v5406_v56 = vmul.f32 %v5404_v44, %v5339_v2  ;;  %v5415_v54 = vmul.f32 %v5404_v44, %v5307_v39  ;;  %v5365_v32 = vrot.slane %v5364_v28, 1 }
 0x7b0   : >> { %v5393_v5 = vrot.slane %v5392_v4, 4  ;;  %v5407_v9 = vmul.f32 %v5405_v50, %v5340_v13  ;;  %v5416_v49 = vmul.f32 %v5405_v50, %v5308_v8  ;;  %v5467_v13 = vmul.f32 %v5465_v47, %v5331_v15 }
 0x7b1   : >> { %v5420_v22 = vadd.f32 %v5418_v37, %v5415_v54  ;;  %v5380_v7 = vadd.f32 %v5379_v63, %v5378_v60  ;;  %v5366_v18 = vadd.f32 %v5365_v32, %v5364_v28  ;;  %v5346_v60 = vld [vmem:[%s9507_s28 + $0x68] sm:$0xff] }
 0x7b2   : >> { %v5394_v53 = vadd.f32 %v5393_v5, %v5392_v4  ;;  %v5408_v0 = vadd.f32 %v5407_v9, %v5406_v56  ;;  %v5421_v41 = vadd.f32 %v5419_v19, %v5416_v49  ;;  %v5347_v56 = vld [vmem:[%s9507_s28 + $0x70] sm:$0xff]  ;;  %v5348_v49 = vld [vmem:[%s9507_s28 + $0x78] sm:$0xff] }
 0x7b3   : >> { %v5422_v14 = vmul.f32 %v5420_v22, %v5341_v48  ;;  %v5431_v55 = vmul.f32 %v5420_v22, %v5309_v16  ;;  %v5381_v33 = vrot.slane %v5380_v7, 1 }
 0x7b4   : >> { %v5395_v10 = vrot.slane %v5394_v53, 2  ;;  %v5409_v11 = vrot.slane %v5408_v0, 4  ;;  %v5423_v43 = vmul.f32 %v5421_v41, %v5342_v25  ;;  %v5432_v34 = vmul.f32 %v5421_v41, %v5310_v57 }
 0x7b5   : >> { %v5436_v12 = vadd.f32 %v5434_v51, %v5431_v55  ;;  %v5382_v50 = vadd.f32 %v5381_v33, %v5380_v7  ;;  %v5594_v33 = vld [vmem:[%s9688_s12 + $0x78] sm:$0xff] (%p5290_p4) }
 0x7b6   : >> { %v5396_v36 = vadd.f32 %v5395_v10, %v5394_v53  ;;  %v5410_v23 = vadd.f32 %v5409_v11, %v5408_v0  ;;  %v5424_v35 = vadd.f32 %v5423_v43, %v5422_v14  ;;  %v5437_v61 = vadd.f32 %v5435_v17, %v5432_v34  ;;  %5595 = vmatpush.msrb.mxu3 (%p5290_p4), %v5594_v33  ;;  %v10609_v33 = vld [vmem:[#allocation22_spill] sm:$0xff] (%p5290_p4) }
 0x7b7   : >> { %v5438_v27 = vmul.f32 %v5436_v12, %v5343_v59  ;;  %v5447_v30 = vmul.f32 %v5436_v12, %v5311_v21  ;;  %v5480_v58 = vsel %vm5479_vm12, %v5366_v18, %v5382_v50 }
 0x7b8   : >> { %v5411_v6 = vrot.slane %v5410_v23, 2  ;;  %v5425_v39 = vrot.slane %v5424_v35, 4  ;;  %v5439_v2 = vmul.f32 %v5437_v61, %v5344_v52  ;;  %v5448_v42 = vmul.f32 %v5437_v61, %v5312_v62 }
 0x7b9   : >> { %v5452_v8 = vadd.f32 %v5450_v31, %v5447_v30  ;;  %v5397_v44 = vrot.slane %v5396_v36, 1  ;;  %v10600_v30 = vld [vmem:[#allocation16_spill] sm:$0xff] (%p5290_p4) }
 0x7ba   : >> { %v5412_v37 = vadd.f32 %v5411_v6, %v5410_v23  ;;  %v5426_v20 = vadd.f32 %v5425_v39, %v5424_v35  ;;  %v5440_v4 = vadd.f32 %v5439_v2, %v5438_v27  ;;  %v5453_v19 = vadd.f32 %v5451_v38, %v5448_v42  ;;  %v5593_v27 = vld [vmem:[%s9688_s12 + $0x70] sm:$0xff] (%p5290_p4) }
 0x7bb   : >> { %v5454_v46 = vmul.f32 %v5452_v8, %v5345_v26  ;;  %v5463_v63 = vmul.f32 %v5452_v8, %v5313_v40  ;;  %v5398_v57 = vadd.f32 %v5397_v44, %v5396_v36  ;;  %v5523_v38 = vsub.f32 (%p5290_p4), 0.0, %v10600_v30  ;;  %v5592_v40 = vld [vmem:[%s9688_s12 + $0x68] sm:$0xff] (%p5290_p4)  ;;  %v10601_v6 = vld [vmem:[#allocation17_spill] sm:$0xff] (%p5290_p4)  ;;  %5596 = vmatpush.msrb.mxu3 (%p5290_p4), %v5593_v27 }
 0x7bc   : >> { %v5427_v54 = vrot.slane %v5426_v20, 2  ;;  %v5441_v16 = vrot.slane %v5440_v4, 4  ;;  %v5413_v48 = vrot.slane %v5412_v37, 1  ;;  %v5455_v5 = vmul.f32 %v5453_v19, %v5346_v60  ;;  %v5589_v42 = vld [vmem:[%s9688_s12 + $0x50] sm:$0xff] (%p5290_p4) }
 0x7bd   : >> { %v5464_v9 = vmul.f32 %v5453_v19, %v5314_v1  ;;  %v5468_v45 = vadd.f32 %v5466_v45, %v5463_v63   ;;  %v5482_v14 = vsel %vm5481_vm13, %v5480_v58, %v5398_v57  ;;  %v5531_v26 = vmul.f32 (%p5290_p4), 1.442695, %v5523_v38  ;;  %5597 = vmatpush.msrb.mxu3 (%p5290_p4), %v5592_v40  ;;  %v10602_v1 = vld [vmem:[#allocation18_spill] sm:$0xff] (%p5290_p4)  ;;  %v5585_v19 = vld [vmem:[%s9688_s12 + $0x30] sm:$0xff] (%p5290_p4)  ;;  %v5584_v63 = vld [vmem:[%s9688_s12 + $0x28] sm:$0xff] (%p5290_p4) }
 0x7be   : >> { %v5428_v25 = vadd.f32 %v5427_v54, %v5426_v20  ;;  %v5442_v28 = vadd.f32 %v5441_v16, %v5440_v4  ;;  %v5456_v22 = vadd.f32 %v5455_v5, %v5454_v46  ;;  %v5414_v0 = vadd.f32 %v5413_v48, %v5412_v37  ;;  %v5587_v37 = vld [vmem:[%s9688_s12 + $0x40] sm:$0xff] (%p5290_p4)  ;;  %v5586_v20 = vld [vmem:[%s9688_s12 + $0x38] sm:$0xff] (%p5290_p4) }
 0x7bf   : >> { %v5469_v2 = vadd.f32 %v5467_v13, %v5464_v9   ;;  %v5470_v51 = vmul.f32 %v5468_v45, %v5347_v56  ;;  %v5524_v39 = vsub.f32 (%p5290_p4), 0.0, %v10601_v6  ;;  %6147 = vpow2.f32 (%p5290_p4), %v5531_v26  ;;  %v5590_v45 = vld [vmem:[%s9688_s12 + $0x58] sm:$0xff] (%p5290_p4)  ;;  %v5588_v13 = vld [vmem:[%s9688_s12 + $0x48] sm:$0xff] (%p5290_p4)  ;;  %v9600_v46 = vld [vmem:[%s9687_s11] ss:$0 sm:$0xff] (%p5290_p4) }
 0x7c0   : >> { %v5429_v3 = vrot.slane %v5428_v25, 1  ;;  %v5443_v53 = vrot.slane %v5442_v28, 2  ;;  %v5457_v41 = vrot.slane %v5456_v22, 4  ;;  %v5484_v11 = vsel %vm5483_vm14, %v5482_v14, %v5414_v0  ;;  %v10603_v56 = vld [vmem:[#allocation19_spill] sm:$0xff] (%p5290_p4)  ;;  %v10605_v0 = vld [vmem:[#allocation20_spill] sm:$0xff] (%p5290_p4) }
 0x7c1   : >> { %v5471_v17 = vmul.f32 %v5469_v2, %v5348_v49  ;;  %v5591_v2 = vld [vmem:[%s9688_s12 + $0x60] sm:$0xff] (%p5290_p4)  ;;  %v5533_v18 = vmul.f32 (%p5290_p4), 1.442695, %v5524_v39  ;;  %v5525_v60 = vsub.f32 (%p5290_p4), 0.0, %v10602_v1  ;;  %v5526_v54 = vsub.f32 (%p5290_p4), 0.0, %v10603_v56 }
 0x7c2   : >> { %v5444_v7 = vadd.f32 %v5443_v53, %v5442_v28  ;;  %v5458_v55 = vadd.f32 %v5457_v41, %v5456_v22  ;;  %v5430_v21 = vadd.f32 %v5429_v3, %v5428_v25  ;;  %5598 = vmatpush.msrb.mxu3 (%p5290_p4), %v5591_v2  ;;  %v5583_v48 = vld [vmem:[%s9688_s12 + $0x20] sm:$0xff] (%p5290_p4)  ;;  %v5582_v25 = vld [vmem:[%s9688_s12 + $0x18] sm:$0xff] (%p5290_p4)  ;;  %v5580_v53 = vld [vmem:[%s9688_s12 + $0x8] sm:$0xff] (%p5290_p4)  ;;  %v5527_v41 = vsub.f32 (%p5290_p4), 0.0, %v10605_v0 }
 0x7c3   : >> { %v5472_v47 = vadd.f32 %v5471_v17, %v5470_v51  ;;  %6149 = vpow2.f32 (%p5290_p4), %v5533_v18  ;;  %v5535_v4 = vmul.f32 (%p5290_p4), 1.442695, %v5525_v60  ;;  %v10604_v5 = vld [vmem:[#allocation23_spill] sm:$0xff] (%p5290_p4)  ;;  %v5537_v28 = vmul.f32 (%p5290_p4), 1.442695, %v5526_v54  ;;  %v5581_v51 = vld [vmem:[%s9688_s12 + $0x10] sm:$0xff] (%p5290_p4) }
 0x7c4   : >> { %v5445_v29 = vrot.slane %v5444_v7, 1  ;;  %v5459_v59 = vrot.slane %v5458_v55, 2  ;;  %v5486_v52 = vsel %vm5485_vm15, %v5484_v11, %v5430_v21  ;;  %5599 = vmatpush.msrb.mxu3 (%p5290_p4), %v5590_v45  ;;  %v5507_v9 = vmul.f32 (%p5290_p4), %v9600_v46, %v10604_v5  ;;  %v10610_v40 = vld [vmem:[#allocation27_spill] sm:$0xff] (%p5290_p4) }
 0x7c5   : >> { %v5473_v10 = vrot.slane %v5472_v47, 4  ;;  %v6148_v8 = vpop.eup (%p5290_p4), %6147  ;;  %v5529_v27 = vsub.f32 (%p5290_p4), 0.0, %v10609_v33  ;;  %v5510_v26 = vmul.f32 (%p5290_p4), %v9600_v46, %v10610_v40  ;;  %v10622_v40 = vld [vmem:[#allocation14_spill] sm:$0xff] (%p5290_p4) }
 0x7c6   : >> { %v5446_v43 = vadd.f32 %v5445_v29, %v5444_v7  ;;  %v5460_v34 = vadd.f32 %v5459_v59, %v5458_v55  ;;  %5600 = vmatpush.msrb.mxu3 (%p5290_p4), %v5589_v42  ;;  %v5547_v44 = vadd.f32 (%p5290_p4), 1.0, %v6148_v8  ;;  %v5579_v7 = vld [vmem:[%s9688_s12] sm:$0xff] (%p5290_p4)  ;;  %v10606_v55 = vld [vmem:[#allocation25_spill] sm:$0xff] (%p5290_p4)  ;;  %v5539_v59 = vmul.f32 (%p5290_p4), 1.442695, %v5527_v41  ;;  %v10611_v8 = vld [vmem:[#allocation24_spill] sm:$0xff] (%p5290_p4) }
 0x7c7   : >> { %v5474_v24 = vadd.f32 %v5473_v10, %v5472_v47  ;;  %v5508_v47 = vmul.f32 (%p5290_p4), %v9600_v46, %v10606_v55  ;;  %v5543_v2 = vmul.f32 (%p5290_p4), 1.442695, %v5529_v27  ;;  %v10621_v27 = vld [vmem:[#allocation13_spill] sm:$0xff] (%p5290_p4) }
 0x7c8   : >> { %v5461_v32 = vrot.slane %v5460_v34, 1  ;;  %v5488_v15 = vsel %vm5487_vm1, %v5486_v52, %v5446_v43  ;;  %5601 = vmatpush.msrb.mxu3 (%p5290_p4), %v5588_v13  ;;  %6151 = vrcp.f32 (%p5290_p4), %v5547_v44  ;;  %v5530_v13 = vsub.f32 (%p5290_p4), 0.0, %v10611_v8  ;;  %v10612_v44 = vld [vmem:[#allocation28_spill] sm:$0xff] (%p5290_p4) }
 0x7c9   : >> { %v5475_v12 = vrot.slane %v5474_v24, 2  ;;  %v6150_v50 = vpop.eup (%p5290_p4), %6149  ;;  %6153 = vpow2.f32 (%p5290_p4), %v5535_v4 }
 0x7ca   : >> { %v5462_v31 = vadd.f32 %v5461_v32, %v5460_v34  ;;  %5602 = vmatpush.msrb.mxu3 (%p5290_p4), %v5587_v37  ;;  %v5548_v16 = vadd.f32 (%p5290_p4), 1.0, %v6150_v50  ;;  %v10607_v34 = vld [vmem:[#allocation21_spill] sm:$0xff] (%p5290_p4)  ;;  %v5511_v37 = vmul.f32 (%p5290_p4), %v9600_v46, %v10612_v44  ;;  %v5545_v50 = vmul.f32 (%p5290_p4), 1.442695, %v5530_v13 }
 0x7cb   : >> { %v5476_v62 = vadd.f32 %v5475_v12, %v5474_v24  ;;  %v5528_v24 = vsub.f32 (%p5290_p4), 0.0, %v10607_v34  ;;  %v10608_v12 = vld [vmem:[#allocation26_spill] sm:$0xff] (%p5290_p4) }
 0x7cc   : >> { %v5490_v23 = vsel %vm5489_vm2, %v5488_v15, %v5462_v31  ;;  %5603 = vmatpush.msrb.mxu3 (%p5290_p4), %v5586_v20  ;;  %6155 = vrcp.f32 (%p5290_p4), %v5548_v16  ;;  %v5509_v31 = vmul.f32 (%p5290_p4), %v9600_v46, %v10608_v12  ;;  %v10618_v12 = vld [vmem:[#allocation10_spill] sm:$0xff] (%p5290_p4) }
 0x7cd   : >> { %v5477_v36 = vrot.slane %v5476_v62, 1  ;;  %6157 = vpow2.f32 (%p5290_p4), %v5537_v28 }
 0x7ce   : > { %5292 = sbr.rel (!%p5290_p4) target bundleno = 1944 (0x798), region = 368  ;;  %5604 = vmatpush.msrb.mxu3 (%p5290_p4), %v5585_v19  ;;  %v6152_v49 = vpop.eup (%p5290_p4), %6151 }
 0x7cf   : >> { %v5478_v35 = vadd.f32 %v5477_v36, %v5476_v62  ;;  %v6154_v22 = vpop.eup (%p5290_p4), %6153  ;;  %v5563_v3 = vmul.f32 (%p5290_p4), %v6152_v49, %v10600_v30  ;;  %v5541_v36 = vmul.f32 (%p5290_p4), 1.442695, %v5528_v24 }
 0x7d0   : > { %5605 = vmatpush.msrb.mxu3 (%p5290_p4), %v5584_v63  ;;  %v5549_v17 = vadd.f32 (%p5290_p4), 1.0, %v6154_v22 }
 0x7d1   : >> { %v5492_v61 = vsel %vm5491_vm3, %v5490_v23, %v5478_v35 }
 0x7d2   : >> { %5494 = vst [vmem:[%s5493_s29] sm:$0xff] %v5492_v61  ;;  %5606 = vmatpush.msrb.mxu3 (%p5290_p4), %v5583_v48  ;;  %v6156_v21 = vpop.eup (%p5290_p4), %6155  ;;  %6159 = vrcp.f32 (%p5290_p4), %v5549_v17  ;;  %v10613_v48 = vld [vmem:[#allocation29_spill] sm:$0xff] (%p5290_p4) }
 0x7d3   : > { %v6158_v10 = vpop.eup %6157  ;;  %v5564_v43 = vmul.f32 %v6156_v21, %v10601_v6  ;;  %6161 = vpow2.f32 %v5539_v59  ;;  %v5512_v5 = vmul.f32 %v9600_v46, %v10613_v48 }
 0x7d4   : > { %5607 = vmatpush.msrb.mxu3 %v5582_v25  ;;  %v5550_v52 = vadd.f32 1.0, %v6158_v10 }
 0x7d6   : > { %5608 = vmatpush.msrb.mxu3 %v5581_v51  ;;  %6163 = vrcp.f32 %v5550_v52  ;;  %v10617_v52 = vld [vmem:[#allocation9_spill] sm:$0xff] }
 0x7d7   : > { %6165 = vpow2.f32 %v5541_v36 }
 0x7d8   : > { %5609 = vmatpush.msrb.mxu3 %v5580_v53  ;;  %v6160_v62 = vpop.eup %6159 }
 0x7d9   : > { %v5495_v57 = vld [vmem:[#allocation7] sm:$0xff]  ;;  %v5496_v29 = vld [vmem:[#allocation7 + $0x8] sm:$0xff]  ;;  %v5497_v15 = vld [vmem:[#allocation7 + $0x10] sm:$0xff]  ;;  %v6162_v23 = vpop.eup %6161  ;;  %v5565_v61 = vmul.f32 %v6160_v62, %v10602_v1 }
 0x7da   : > { %v5515_v58 = vadd.f32 %v5507_v9, %v5495_v57  ;;  %5610 = vmatpush.msrb.mxu3 %v5579_v7  ;;  %v5516_v11 = vadd.f32 %v5508_v47, %v5496_v29  ;;  %v5517_v35 = vadd.f32 %v5509_v31, %v5497_v15  ;;  %v5551_v30 = vadd.f32 1.0, %v6162_v23  ;;  %v5498_v39 = vld [vmem:[#allocation7 + $0x18] sm:$0xff]  ;;  %v5499_v4 = vld [vmem:[#allocation7 + $0x20] sm:$0xff]  ;;  %v5500_v49 = vld [vmem:[#allocation7 + $0x28] sm:$0xff] }
 0x7db   : > { %v5518_v18 = vadd.f32 %v5510_v26, %v5498_v39  ;;  %v5519_v63 = vadd.f32 %v5511_v37, %v5499_v4  ;;  %v5520_v25 = vadd.f32 %v5512_v5, %v5500_v49  ;;  %v5502_v21 = vld [vmem:[#allocation7 + $0x38] sm:$0xff] }
 0x7dc   : > { %v5571_v14 = vmul.f32 %v5563_v3, %v5515_v58  ;;  %v5572_v32 = vmul.f32 %v5564_v43, %v5516_v11  ;;  %v5573_v38 = vmul.f32 %v5565_v61, %v5517_v35  ;;  %v6164_v6 = vpop.eup %6163  ;;  %6167 = vrcp.f32 %v5551_v30  ;;  %v10614_v58 = vld [vmem:[#allocation31_spill] sm:$0xff]  ;;  %v10616_v43 = vld [vmem:[#allocation8_spill] sm:$0xff] }
 0x7dd   : > { %v6166_v45 = vpop.eup %6165  ;;  %v5566_v42 = vmul.f32 %v6164_v6, %v10603_v56  ;;  %6169 = vpow2.f32 %v5543_v2  ;;  %v5513_v3 = vmul.f32 %v9600_v46, %v10614_v58  ;;  %v10619_v15 = vld [vmem:[#allocation11_spill] sm:$0xff]  ;;  %v10620_v35 = vld [vmem:[#allocation12_spill] sm:$0xff] }
 0x7de   : > { %5611 = vmatmul.f32.vlgmr.msrb.gmra.mxu3 %v5571_v14  ;;  %v5552_v1 = vadd.f32 1.0, %v6166_v45  ;;  %v10615_v14 = vld [vmem:[#allocation38_spill] sm:$0xff]  ;;  %v10623_v39 = vld [vmem:[#allocation15_spill] sm:$0xff] }
 0x7df   : > { %v5574_v60 = vmul.f32 %v5566_v42, %v5518_v18  ;;  %v5514_v55 = vmul.f32 %v9600_v46, %v10615_v14 }
 0x7e0   : > { %6171 = vrcp.f32 %v5552_v1 }
 0x7e1   : > { %6173 = vpow2.f32 %v5545_v50  ;;  %v5522_v29 = vadd.f32 %v5514_v55, %v5502_v21 }
 0x7e2   : > { %v6168_v20 = vpop.eup %6167 }
 0x7e3   : > { %v6170_v19 = vpop.eup %6169  ;;  %v5567_v54 = vmul.f32 %v6168_v20, %v10605_v0  ;;  %v5501_v0 = vld [vmem:[#allocation7 + $0x30] sm:$0xff] }
 0x7e4   : > { %v5553_v16 = vadd.f32 1.0, %v6170_v19  ;;  %v5521_v41 = vadd.f32 %v5513_v3, %v5501_v0 }
 0x7e5   : > { %v5575_v56 = vmul.f32 %v5567_v54, %v5519_v63 }
 0x7e6   : > { %5614 = vmatmul.f32.gmra.mxu3 %v5572_v32  ;;  %v6172_v9 = vpop.eup %6171  ;;  %6175 = vrcp.f32 %v5553_v16 }
 0x7e7   : > { %v6174_v57 = vpop.eup %6173  ;;  %v5568_v28 = vmul.f32 %v6172_v9, %v10607_v34 }
 0x7e8   : > { %v5554_v22 = vadd.f32 1.0, %v6174_v57 }
 0x7e9   : > { %v5576_v51 = vmul.f32 %v5568_v28, %v5520_v25 }
 0x7ea   : > { %6177 = vrcp.f32 %v5554_v22 }
 0x7ec   : > { %v6176_v53 = vpop.eup %6175 }
 0x7ed   : > { %v5569_v17 = vmul.f32 %v6176_v53, %v10609_v33 }
 0x7ee   : > { %5617 = vmatmul.f32.gmra.mxu3 %v5573_v38 }
 0x7ef   : > { %v5577_v7 = vmul.f32 %v5569_v17, %v5521_v41 }
 0x7f0   : > { %v6178_v47 = vpop.eup %6177 }
 0x7f1   : > { %v5570_v59 = vmul.f32 %v6178_v47, %v10611_v8 }
 0x7f3   : > { %v5578_v10 = vmul.f32 %v5570_v59, %v5522_v29 }
 0x7f6   : > { %5620 = vmatmul.f32.gmra.mxu3 %v5574_v60 }
 0x7fe   : > { %5623 = vmatmul.f32.gmra.mxu3 %v5575_v56 }
 0x806   : > { %5626 = vmatmul.f32.gmra.mxu3 %v5576_v51 }
 0x80e   : > { %5629 = vmatmul.f32.gmra.mxu3 %v5577_v7 }
 0x816   : > { %5632 = vmatmul.f32.gmra.mxu3 %v5578_v10 }
 0x861   : > { %v5612_v11 = vpop.f32.mrf.mxu3 }
 0x862   : > { %v5613_v34 = vadd.f32 %v5612_v11, %v10616_v43 }
 0x864   : > { %5636 = vst.msk [vmem:[%s6305_s21] sm:$0xff] %vm457_vm0, %v5613_v34 }
 0x869   : > { %v5615_v24 = vpop.f32.mrf.mxu3 }
 0x86a   : > { %v5616_v46 = vadd.f32 %v5615_v24, %v10617_v52 }
 0x86c   : > { %5637 = vst.msk [vmem:[%s6305_s21 + $0x8] sm:$0xff] %vm457_vm0, %v5616_v46 }
 0x871   : > { %v5618_v32 = vpop.f32.mrf.mxu3 }
 0x872   : > { %v5619_v31 = vadd.f32 %v5618_v32, %v10618_v12 }
 0x874   : > { %5638 = vst.msk [vmem:[%s6305_s21 + $0x10] sm:$0xff] %vm457_vm0, %v5619_v31 }
 0x879   : > { %v5621_v62 = vpop.f32.mrf.mxu3 }
 0x87a   : > { %v5622_v36 = vadd.f32 %v5621_v62, %v10619_v15 }
 0x87c   : > { %5639 = vst.msk [vmem:[%s6305_s21 + $0x18] sm:$0xff] %vm457_vm0, %v5622_v36 }
 0x881   : > { %v5624_v23 = vpop.f32.mrf.mxu3 }
 0x882   : > { %v5625_v61 = vadd.f32 %v5624_v23, %v10620_v35 }
 0x884   : > { %5640 = vst.msk [vmem:[%s6305_s21 + $0x20] sm:$0xff] %vm457_vm0, %v5625_v61 }
 0x889   : > { %v5627_v33 = vpop.f32.mrf.mxu3 }
 0x88a   : > { %v5628_v30 = vadd.f32 %v5627_v33, %v10621_v27 }
 0x88c   : > { %5641 = vst.msk [vmem:[%s6305_s21 + $0x28] sm:$0xff] %vm457_vm0, %v5628_v30 }
 0x891   : > { %v5630_v38 = vpop.f32.mrf.mxu3 }
 0x892   : > { %v5631_v26 = vadd.f32 %v5630_v38, %v10622_v40 }
 0x894   : > { %5642 = vst.msk [vmem:[%s6305_s21 + $0x30] sm:$0xff] %vm457_vm0, %v5631_v26 }
 0x899   : > { %v5633_v6 = vpop.f32.mrf.mxu3 }
 0x89a   : > { %v5634_v2 = vadd.f32 %v5633_v6, %v10623_v39 }
 0x89c   : > { %5643 = vst.msk [vmem:[%s6305_s21 + $0x38] sm:$0xff] %vm457_vm0, %v5634_v2 }
 0x89d PF: > { %s23_s25 = sadd.s32 1, %s6197_s25  }
 0x89e   : > { %p20_p5 = scmp.ge.s32.totalorder %s23_s25, 4  }
 0x8a0   :  { %22 = sbr.rel (!%p20_p5) target bundleno = 1 (0x1), region = 379 }

</bundles_post_ra>
